<compile_context>
chip_gen: v7x
topology: tpu7x:2x2x1
jax: 0.10.0
libtpu: 0.0.40
codegen_flags: <defaults>
</compile_context>

<pallas_src>
import functools
import math

import jax
import jax.numpy as jnp
from jax.experimental import pallas as pl
from jax.experimental.pallas import tpu as pltpu


def _round_up(x, m):
    return (x + m - 1) // m * m


def _vmem_capacity_bytes():
    try:
        return int(pltpu.get_tpu_info().vmem_capacity_bytes)
    except Exception:
        return 128 << 20


def _tensorcores_per_chip():
    # v7x exposes 2 TensorCores per chip; v5e/v6e have 1.
    try:
        kind = jax.devices()[0].device_kind.lower()
        return 2 if "v7" in kind else 1
    except Exception:
        return 1


def _layer_vmem_est(tc, Bb, I, H, x_bytes=2, out_bytes=2):
    """Rough per-layer VMEM footprint used to auto-shrink the time chunk."""
    w = (I + H) * 4 * H * 2 + 4 * H * 4                 # single-buffered bf16 W + f32 b
    blk = 2 * tc * Bb * (I * x_bytes + H * out_bytes)   # double-buffered act blocks
    state = 2 * Bb * H * 4                              # h, c
    temps = 6 * Bb * 4 * H * 4                          # in-flight f32 gate temporaries
    return w + blk + state + temps + (4 << 20)


# ----------------------------------------------------------------------------
# Pallas kernel: one LSTM layer (PyTorch gate order i, f, g, o), zero initial
# state, optional fused length-mask on the forward-direction output and fused
# residual add of the layer input.
# ----------------------------------------------------------------------------
def _lstm_layer_kernel(*refs, tc, has_mask, add_input_residual):
    x_ref, wih_hbm, whh_hbm, b_hbm = refs[:4]
    rest = refs[4:]
    if has_mask:
        len_ref, rest = rest[0], rest[1:]
    else:
        len_ref = None
    out_ref, wih_v, whh_v, b_v, h_sc, c_sc = rest

    d = pl.program_id(0)
    t_chunk = pl.program_id(2)
    H = h_sc.shape[1]

    # Start of a (direction, batch-block) time sweep: load the weights ONCE
    # (single-buffered, manual DMA instead of a 2x-buffered BlockSpec copy)
    # and zero the carried state.  Scratch persists across grid steps, and each
    # TensorCore re-executes t==0 for every sweep it owns, so this is safe under
    # megacore sharding of the parallel axes.
    @pl.when(t_chunk == 0)
    def _init():
        pltpu.sync_copy(wih_hbm.at[d], wih_v)
        pltpu.sync_copy(whh_hbm.at[d], whh_v)
        pltpu.sync_copy(b_hbm.at[d], b_v)
        h_sc[...] = jnp.zeros_like(h_sc)
        c_sc[...] = jnp.zeros_like(c_sc)

    wih = wih_v[...]                      # (I, 4H) bf16, resident over time
    whh = whh_v[...]                      # (H, 4H) bf16, resident over time
    b = b_v[...]                          # (1, 4H) f32

    if has_mask:
        lens = len_ref[...]               # (Bb, 1) int32, resident over time
        not_fwd = d != 0                  # mask applies to direction 0 only

    h = h_sc[...]
    c = c_sc[...]
    # Statically unrolled chunk recurrence.  The per-step input projection
    # (x_t @ W_ih) does not depend on the recurrent h chain, so the scheduler
    # overlaps step t+1's projection with step t's gate epilogue, keeping the
    # MXU busy without materializing a (tc, Bb, 4H) gate tensor in VMEM.
    for t in range(tc):
        x_t = x_ref[0, t]                 # (Bb, I) bf16
        xg = jnp.dot(x_t.astype(jnp.bfloat16), wih,
                     preferred_element_type=jnp.float32)
        hg = jnp.dot(h.astype(jnp.bfloat16), whh,
                     preferred_element_type=jnp.float32)
        g = xg + hg + b
        i_g = jax.nn.sigmoid(g[:, 0 * H:1 * H])
        f_g = jax.nn.sigmoid(g[:, 1 * H:2 * H])
        g_g = jnp.tanh(g[:, 2 * H:3 * H])
        o_g = jax.nn.sigmoid(g[:, 3 * H:4 * H])
        c = f_g * c + i_g * g_g
        h = o_g * jnp.tanh(c)
        out = h
        if has_mask:
            # Mask the *output* only; h/c keep evolving over PAD timesteps,
            # matching the emulated-bidirectional reference semantics.
            keep = jnp.logical_or(not_fwd, (t_chunk * tc + t) < lens)
            out = jnp.where(keep, out, 0.0)
        if add_input_residual:
            out = out + x_t.astype(jnp.float32)   # residual == layer input, fused
        out_ref[0, t] = out.astype(out_ref.dtype)
    h_sc[...] = h
    c_sc[...] = c


def lstm_layer(x_stack, wih_stack, whh_stack, b_stack, *, lengths_col=None,
               add_input_residual=False, donate_input=False,
               time_chunk=8, batch_blocks=1, out_dtype=jnp.bfloat16,
               vmem_limit_bytes=None):
    """Run a stack of D independent LSTM layers/directions.

    x_stack:     (D, T, B, I) bf16 (time-major)
    wih_stack:   (D, I, 4H)   bf16  (transposed, PyTorch i,f,g,o gate order)
    whh_stack:   (D, H, 4H)   bf16
    b_stack:     (D, 1, 4H)   f32   (b_ih + b_hh)
    lengths_col: optional (B, 1) int32; masks the direction-0 output only.
    Returns (D, T, B, H) in `out_dtype`.
    """
    D, T, B, I = x_stack.shape
    H = whh_stack.shape[1]
    tc = time_chunk
    assert T % tc == 0, "pad T to a multiple of the time chunk"
    assert B % batch_blocks == 0
    Bb = B // batch_blocks
    assert Bb % 16 == 0 or Bb == B, "batch block must be a multiple of 16 (bf16)"
    if add_input_residual:
        assert I == H
    if donate_input:
        assert I == H and x_stack.dtype == out_dtype
    n_chunks = T // tc

    in_specs = [
        pl.BlockSpec((1, tc, Bb, I), lambda d, nb, t: (d, t, nb, 0)),
        # Weights / bias stay in HBM (pl.ANY) and are copied into VMEM scratch
        # exactly once per (direction, batch-block) sweep -> single-buffered.
        pl.BlockSpec(memory_space=pl.ANY),
        pl.BlockSpec(memory_space=pl.ANY),
        pl.BlockSpec(memory_space=pl.ANY),
    ]
    inputs = [x_stack, wih_stack, whh_stack, b_stack]
    if lengths_col is not None:
        in_specs.append(pl.BlockSpec((Bb, 1), lambda d, nb, t: (nb, 0)))
        inputs.append(lengths_col)

    out_specs = pl.BlockSpec((1, tc, Bb, H), lambda d, nb, t: (d, t, nb, 0))

    if vmem_limit_bytes is None:
        cap = _vmem_capacity_bytes()
        vmem_limit_bytes = int(min(max(cap - (8 << 20), 16 << 20), 100 << 20))

    kernel = functools.partial(_lstm_layer_kernel, tc=tc,
                               has_mask=lengths_col is not None,
                               add_input_residual=add_input_residual)
    return pl.pallas_call(
        kernel,
        grid=(D, batch_blocks, n_chunks),
        in_specs=in_specs,
        out_specs=out_specs,
        out_shape=jax.ShapeDtypeStruct((D, T, B, H), out_dtype),
        scratch_shapes=[
            pltpu.VMEM((I, 4 * H), wih_stack.dtype),   # resident W_ih
            pltpu.VMEM((H, 4 * H), whh_stack.dtype),   # resident W_hh
            pltpu.VMEM((1, 4 * H), jnp.float32),       # resident bias
            pltpu.VMEM((Bb, H), jnp.float32),          # h
            pltpu.VMEM((Bb, H), jnp.float32),          # c
        ],
        input_output_aliases={0: 0} if donate_input else {},
        compiler_params=pltpu.CompilerParams(
            dimension_semantics=("parallel", "parallel", "arbitrary"),
            vmem_limit_bytes=int(vmem_limit_bytes)),
    )(*inputs)


# ----------------------------------------------------------------------------
# Plain-JAX glue (equivalent of C.revert_varlen_tensor / C.set_mask_cpp)
# ----------------------------------------------------------------------------
def revert_varlen(x, lengths):
    """Reverse each sequence in time up to its length; padding stays in place."""
    T = x.shape[0]
    t = jnp.arange(T, dtype=jnp.int32)[:, None]             # (T,1)
    L = lengths[None, :].astype(jnp.int32)                   # (1,B)
    idx = jnp.where(t < L, L - 1 - t, t)                     # (T,B)
    # Gather along time only (per batch column); the index stays (T,B) instead
    # of being broadcast to (T,B,H).
    return jax.vmap(lambda col, i: jnp.take(col, i, axis=0),
                    in_axes=(1, 1), out_axes=1)(x, idx)


def length_mask(T, lengths, dtype):
    t = jnp.arange(T, dtype=jnp.int32)[:, None]
    return (t < lengths[None, :]).astype(dtype)               # (T,B)


# ----------------------------------------------------------------------------
# Parameter construction (PyTorch-style uniform(-1/sqrt(H), 1/sqrt(H)))
# ----------------------------------------------------------------------------
def init_lstm_params(key, input_size, hidden_size):
    k = 1.0 / math.sqrt(hidden_size)
    k0, k1, k2, k3 = jax.random.split(key, 4)
    w_ih = jax.random.uniform(k0, (4 * hidden_size, input_size), jnp.float32, -k, k)
    w_hh = jax.random.uniform(k1, (4 * hidden_size, hidden_size), jnp.float32, -k, k)
    b_ih = jax.random.uniform(k2, (4 * hidden_size,), jnp.float32, -k, k)
    b_hh = jax.random.uniform(k3, (4 * hidden_size,), jnp.float32, -k, k)
    # Kernel consumes transposed bf16 weights and the summed f32 bias.
    return (w_ih.T.astype(jnp.bfloat16),
            w_hh.T.astype(jnp.bfloat16),
            (b_ih + b_hh)[None, :])


def init_encoder_params(key, vocab_size, hidden_size, num_layers):
    k_emb, k_rnn = jax.random.split(key)
    emb = jax.random.normal(k_emb, (vocab_size, hidden_size), jnp.float32)
    emb = emb.at[0].set(0.0)                                  # padding_idx = PAD = 0
    rnn_keys = jax.random.split(k_rnn, num_layers + 1)
    rnn = [init_lstm_params(rnn_keys[0], hidden_size, hidden_size)]      # L0 fwd
    rnn_rev = init_lstm_params(rnn_keys[1], hidden_size, hidden_size)    # L0 bwd
    rnn.append(init_lstm_params(rnn_keys[2], 2 * hidden_size, hidden_size))
    for i in range(num_layers - 2):
        rnn.append(init_lstm_params(rnn_keys[3 + i], hidden_size, hidden_size))
    return {"embedding": emb, "rnn": rnn, "rnn_rev": rnn_rev}


# ----------------------------------------------------------------------------
# Encoder forward
# ----------------------------------------------------------------------------
def residual_recurrent_encoder(tokens, lengths, params, *, time_chunk=8):
    """tokens: (T,B) int32; lengths: (B,) int32. Returns (T,B,H) f32."""
    T0, B0 = tokens.shape
    lengths = lengths.astype(jnp.int32)
    H = params["embedding"].shape[1]

    # ---- Per-generation configuration -------------------------------------
    n_tc = _tensorcores_per_chip()
    uni_bb = n_tc            # unidirectional layers: shard batch across TCs on
                             # v7x, keep the full batch per recurrent matmul on
                             # single-TC chips (v5e/v6e).
    cap = _vmem_capacity_bytes()
    budget = int(min(max(cap - (8 << 20), 16 << 20), 100 << 20))

    B = _round_up(B0, 16 * uni_bb)           # bf16 sublane packing: multiples of 16
    tc = max(1, time_chunk)
    while tc > 1 and max(
            _layer_vmem_est(tc, B, H, H),                 # layer 0 (bidir, bb=1)
            _layer_vmem_est(tc, B // uni_bb, 2 * H, H),   # layer 1 (2H -> H)
    ) > budget:
        tc //= 2
    T = _round_up(T0, tc)

    # Padded columns use PAD token 0 / length 0; padded timesteps come after
    # every real one, so the valid region is unaffected.
    tokens = jnp.pad(tokens, ((0, T - T0), (0, B - B0)))
    lengths_p = jnp.pad(lengths, (0, B - B0))
    lengths_col = lengths_p[:, None]                          # (B,1) int32

    # bf16 inter-layer activations (operands reach the MXU as bf16 anyway).
    x = jnp.take(params["embedding"], tokens, axis=0).astype(jnp.bfloat16)

    # ---- Layer 0: emulated bidirectional LSTM (batch <= 128 path).  Both
    # directions fused into one pallas_call: leading "parallel" grid axis ->
    # one direction per TensorCore on v7x.  Length mask generated in-kernel
    # from the resident lengths block (forward direction only).
    # TODO(synk): revert_varlen is a per-(time,batch)-column gather that a
    # rectangular BlockSpec index_map cannot express; it stays as XLA glue.
    x01 = jnp.stack([x, revert_varlen(x, lengths_p)], axis=0)          # (2,T,B,H)
    wih01 = jnp.stack([params["rnn"][0][0], params["rnn_rev"][0]], 0)
    whh01 = jnp.stack([params["rnn"][0][1], params["rnn_rev"][1]], 0)
    b01 = jnp.stack([params["rnn"][0][2], params["rnn_rev"][2]], 0)
    out01 = lstm_layer(x01, wih01, whh01, b01, lengths_col=lengths_col,
                       time_chunk=tc, batch_blocks=1, vmem_limit_bytes=budget)
    # TODO(synk): the concat could be removed by feeding fwd / reversed-bwd as
    # two inputs to layer 1 with a split W_ih; kept as bf16 XLA glue for now.
    x = jnp.concatenate([out01[0], revert_varlen(out01[1], lengths_p)], axis=2)

    # dropout p = 0 -> identity

    # ---- Layer 1: 2H -> H ----
    x = x[None]                                               # keep (1,T,B,*)
    w, u, b = params["rnn"][1]
    x = lstm_layer(x, w[None], u[None], b[None],
                   time_chunk=tc, batch_blocks=uni_bb, vmem_limit_bytes=budget)

    # ---- Layers 2..N-1: H -> H, residual add fused into the kernel and the
    # input HBM buffer aliased to the output (in-place update).
    for i in range(2, len(params["rnn"])):
        w, u, b = params["rnn"][i]
        x = lstm_layer(x, w[None], u[None], b[None],
                       add_input_residual=True, donate_input=True,
                       time_chunk=tc, batch_blocks=uni_bb,
                       vmem_limit_bytes=budget)

    return x[0, :T0, :B0].astype(jnp.float32)


# ----------------------------------------------------------------------------
# Pure-JAX reference (same bf16 weight/activation precision policy) for
# self-check.
# ----------------------------------------------------------------------------
def _lstm_ref(x, w_ih_t, w_hh_t, b):
    T, B, _ = x.shape
    H = w_hh_t.shape[0]

    def step(carry, xt):
        h, c = carry
        g = (jnp.dot(xt.astype(jnp.bfloat16), w_ih_t,
                     preferred_element_type=jnp.float32) + b
             + jnp.dot(h.astype(jnp.bfloat16), w_hh_t,
                       preferred_element_type=jnp.float32))
        i_g = jax.nn.sigmoid(g[:, :H])
        f_g = jax.nn.sigmoid(g[:, H:2 * H])
        g_g = jnp.tanh(g[:, 2 * H:3 * H])
        o_g = jax.nn.sigmoid(g[:, 3 * H:])
        c = f_g * c + i_g * g_g
        h = o_g * jnp.tanh(c)
        return (h, c), h

    init = (jnp.zeros((B, H), jnp.float32), jnp.zeros((B, H), jnp.float32))
    _, hs = jax.lax.scan(step, init, x)
    return hs


def encoder_reference(tokens, lengths, params):
    T = tokens.shape[0]
    lengths = lengths.astype(jnp.int32)
    x = jnp.take(params["embedding"], tokens, axis=0).astype(jnp.bfloat16)
    mask = length_mask(T, lengths, jnp.float32)[..., None]
    out_fwd = (_lstm_ref(x, *params["rnn"][0]) * mask).astype(jnp.bfloat16)
    out_bwd = revert_varlen(
        _lstm_ref(revert_varlen(x, lengths), *params["rnn_rev"]),
        lengths).astype(jnp.bfloat16)
    x = jnp.concatenate([out_fwd, out_bwd], axis=2)
    x = _lstm_ref(x, *params["rnn"][1]).astype(jnp.bfloat16)
    for i in range(2, len(params["rnn"])):
        x = (_lstm_ref(x, *params["rnn"][i])
             + x.astype(jnp.float32)).astype(jnp.bfloat16)
    return x.astype(jnp.float32)


if __name__ == "__main__":
    vocab_size, hidden_size, num_layers = 50, 32, 4
    T, B = 8, 2

    key = jax.random.PRNGKey(0)
    k_params, k_tok = jax.random.split(key)
    params = init_encoder_params(k_params, vocab_size, hidden_size, num_layers)

    lengths = jnp.array([8, 5], dtype=jnp.int32)              # sorted descending
    tokens = jax.random.randint(k_tok, (T, B), 1, vocab_size, dtype=jnp.int32)
    pad = jnp.arange(T)[:, None] < lengths[None, :]
    tokens = jnp.where(pad, tokens, 0)                        # PAD token = 0

    enc = jax.jit(functools.partial(residual_recurrent_encoder, time_chunk=8))
    out = jax.block_until_ready(enc(tokens, lengths, params))
    assert out.shape == (T, B, hidden_size)
    assert bool(jnp.all(jnp.isfinite(out)))

    ref = jax.block_until_ready(jax.jit(encoder_reference)(tokens, lengths, params))
    max_err = float(jnp.max(jnp.abs(out - ref)))
    assert max_err < 3e-2, f"mismatch vs reference: max abs err = {max_err}"
    print("KERNEL_OK")
</pallas_src>

<mosaic_0001>
module attributes {stable_mosaic.version = 11 : i64} {
  func.func @_lstm_layer_kernel(%arg0: i32, %arg1: i32, %arg2: i32, %arg3: memref<1x8x16x32xbf16, #tpu.memory_space<vmem>>, %arg4: memref<2x32x128xbf16, #tpu.memory_space<any>>, %arg5: memref<2x32x128xbf16, #tpu.memory_space<any>>, %arg6: memref<2x1x128xf32, #tpu.memory_space<any>>, %arg7: memref<16x1xi32, #tpu.memory_space<vmem>>, %arg8: memref<1x8x16x32xbf16, #tpu.memory_space<vmem>>, %arg9: memref<32x128xbf16, #tpu.memory_space<vmem>>, %arg10: memref<32x128xbf16, #tpu.memory_space<vmem>>, %arg11: memref<1x128xf32, #tpu.memory_space<vmem>>, %arg12: memref<16x32xf32, #tpu.memory_space<vmem>>, %arg13: memref<16x32xf32, #tpu.memory_space<vmem>>) attributes {dimension_semantics = [#tpu.dimension_semantics<parallel>, #tpu.dimension_semantics<parallel>, #tpu.dimension_semantics<arbitrary>], iteration_bounds = array<i64: 2, 1, 1>, scalar_prefetch = 0 : i64, scratch_operands = 5 : i64, tpu.core_type = #tpu.core_type<tc>, window_params = [{transform_indices = @transform_0, window_bounds = array<i64: 1, 8, 16, 32>}, {}, {}, {}, {transform_indices = @transform_4, window_bounds = array<i64: 16, 1>}, {transform_indices = @transform_5, window_bounds = array<i64: 1, 8, 16, 32>}]} {
    %c0_i32 = arith.constant 0 : i32
    %0 = arith.cmpi eq, %arg2, %c0_i32 : i32
    %1 = arith.extui %0 : i1 to i32
    %c0_i32_0 = arith.constant 0 : i32
    %2 = arith.cmpi ne, %1, %c0_i32_0 : i32
    scf.if %2 {
      "tpu.region"() ({
        %392 = tpu.sem_alloc : memref<!tpu.dma_semaphore, #tpu.memory_space<semaphore_mem>>
        %c0_i32_135 = arith.constant 0 : i32
        %c0_i32_136 = arith.constant 0 : i32
        %393 = tpu.memref_slice %arg4[%arg0, %c0_i32_135, %c0_i32_136] : memref<2x32x128xbf16, #tpu.memory_space<any>> -> memref<1x32x128xbf16, #tpu.memory_space<any>>
        %394 = tpu.memref_squeeze %393 : memref<1x32x128xbf16, #tpu.memory_space<any>> -> memref<32x128xbf16, #tpu.memory_space<any>>
        tpu.enqueue_dma source(%394 : memref<32x128xbf16, #tpu.memory_space<any>>) target(%arg9 : memref<32x128xbf16, #tpu.memory_space<vmem>>) target_semaphore(%392 : memref<!tpu.dma_semaphore, #tpu.memory_space<semaphore_mem>>)
        %c0_i32_137 = arith.constant 0 : i32
        %c0_i32_138 = arith.constant 0 : i32
        %395 = tpu.memref_slice %arg4[%arg0, %c0_i32_137, %c0_i32_138] : memref<2x32x128xbf16, #tpu.memory_space<any>> -> memref<1x32x128xbf16, #tpu.memory_space<any>>
        %396 = tpu.memref_squeeze %395 : memref<1x32x128xbf16, #tpu.memory_space<any>> -> memref<32x128xbf16, #tpu.memory_space<any>>
        tpu.wait_dma2 semaphore(%392 : memref<!tpu.dma_semaphore, #tpu.memory_space<semaphore_mem>>) src(%396 : memref<32x128xbf16, #tpu.memory_space<any>>) dst(%arg9 : memref<32x128xbf16, #tpu.memory_space<vmem>>)
        tpu.yield
      }) : () -> ()
      "tpu.region"() ({
        %392 = tpu.sem_alloc : memref<!tpu.dma_semaphore, #tpu.memory_space<semaphore_mem>>
        %c0_i32_135 = arith.constant 0 : i32
        %c0_i32_136 = arith.constant 0 : i32
        %393 = tpu.memref_slice %arg5[%arg0, %c0_i32_135, %c0_i32_136] : memref<2x32x128xbf16, #tpu.memory_space<any>> -> memref<1x32x128xbf16, #tpu.memory_space<any>>
        %394 = tpu.memref_squeeze %393 : memref<1x32x128xbf16, #tpu.memory_space<any>> -> memref<32x128xbf16, #tpu.memory_space<any>>
        tpu.enqueue_dma source(%394 : memref<32x128xbf16, #tpu.memory_space<any>>) target(%arg10 : memref<32x128xbf16, #tpu.memory_space<vmem>>) target_semaphore(%392 : memref<!tpu.dma_semaphore, #tpu.memory_space<semaphore_mem>>)
        %c0_i32_137 = arith.constant 0 : i32
        %c0_i32_138 = arith.constant 0 : i32
        %395 = tpu.memref_slice %arg5[%arg0, %c0_i32_137, %c0_i32_138] : memref<2x32x128xbf16, #tpu.memory_space<any>> -> memref<1x32x128xbf16, #tpu.memory_space<any>>
        %396 = tpu.memref_squeeze %395 : memref<1x32x128xbf16, #tpu.memory_space<any>> -> memref<32x128xbf16, #tpu.memory_space<any>>
        tpu.wait_dma2 semaphore(%392 : memref<!tpu.dma_semaphore, #tpu.memory_space<semaphore_mem>>) src(%396 : memref<32x128xbf16, #tpu.memory_space<any>>) dst(%arg10 : memref<32x128xbf16, #tpu.memory_space<vmem>>)
        tpu.yield
      }) : () -> ()
      "tpu.region"() ({
        %392 = tpu.sem_alloc : memref<!tpu.dma_semaphore, #tpu.memory_space<semaphore_mem>>
        %c0_i32_135 = arith.constant 0 : i32
        %c0_i32_136 = arith.constant 0 : i32
        %393 = tpu.memref_slice %arg6[%arg0, %c0_i32_135, %c0_i32_136] : memref<2x1x128xf32, #tpu.memory_space<any>> -> memref<1x1x128xf32, #tpu.memory_space<any>>
        %394 = tpu.memref_squeeze %393 : memref<1x1x128xf32, #tpu.memory_space<any>> -> memref<1x128xf32, #tpu.memory_space<any>>
        tpu.enqueue_dma source(%394 : memref<1x128xf32, #tpu.memory_space<any>>) target(%arg11 : memref<1x128xf32, #tpu.memory_space<vmem>>) target_semaphore(%392 : memref<!tpu.dma_semaphore, #tpu.memory_space<semaphore_mem>>)
        %c0_i32_137 = arith.constant 0 : i32
        %c0_i32_138 = arith.constant 0 : i32
        %395 = tpu.memref_slice %arg6[%arg0, %c0_i32_137, %c0_i32_138] : memref<2x1x128xf32, #tpu.memory_space<any>> -> memref<1x1x128xf32, #tpu.memory_space<any>>
        %396 = tpu.memref_squeeze %395 : memref<1x1x128xf32, #tpu.memory_space<any>> -> memref<1x128xf32, #tpu.memory_space<any>>
        tpu.wait_dma2 semaphore(%392 : memref<!tpu.dma_semaphore, #tpu.memory_space<semaphore_mem>>) src(%396 : memref<1x128xf32, #tpu.memory_space<any>>) dst(%arg11 : memref<1x128xf32, #tpu.memory_space<vmem>>)
        tpu.yield
      }) : () -> ()
      %cst_129 = arith.constant 0.000000e+00 : f32
      %388 = vector.broadcast %cst_129 : f32 to vector<16x32xf32>
      %c0_130 = arith.constant 0 : index
      %c0_131 = arith.constant 0 : index
      %389 = vector.load %arg12[%c0_130, %c0_131] : memref<16x32xf32, #tpu.memory_space<vmem>>, vector<16x32xf32>
      tpu.vector_store %arg12[%c0_130, %c0_131], %388 {strides = array<i32>} : memref<16x32xf32, #tpu.memory_space<vmem>>, vector<16x32xf32>,
      %cst_132 = arith.constant 0.000000e+00 : f32
      %390 = vector.broadcast %cst_132 : f32 to vector<16x32xf32>
      %c0_133 = arith.constant 0 : index
      %c0_134 = arith.constant 0 : index
      %391 = vector.load %arg13[%c0_133, %c0_134] : memref<16x32xf32, #tpu.memory_space<vmem>>, vector<16x32xf32>
      tpu.vector_store %arg13[%c0_133, %c0_134], %390 {strides = array<i32>} : memref<16x32xf32, #tpu.memory_space<vmem>>, vector<16x32xf32>,
    } else {
    }
    %c0 = arith.constant 0 : index
    %c0_1 = arith.constant 0 : index
    %3 = vector.load %arg9[%c0, %c0_1] : memref<32x128xbf16, #tpu.memory_space<vmem>>, vector<32x128xbf16>
    %c0_2 = arith.constant 0 : index
    %c0_3 = arith.constant 0 : index
    %4 = vector.load %arg10[%c0_2, %c0_3] : memref<32x128xbf16, #tpu.memory_space<vmem>>, vector<32x128xbf16>
    %c0_4 = arith.constant 0 : index
    %c0_5 = arith.constant 0 : index
    %5 = vector.load %arg11[%c0_4, %c0_5] : memref<1x128xf32, #tpu.memory_space<vmem>>, vector<1x128xf32>
    %c0_6 = arith.constant 0 : index
    %c0_7 = arith.constant 0 : index
    %6 = vector.load %arg7[%c0_6, %c0_7] : memref<16x1xi32, #tpu.memory_space<vmem>>, vector<16x1xi32>
    %c0_i32_8 = arith.constant 0 : i32
    %7 = arith.cmpi ne, %arg0, %c0_i32_8 : i32
    %c0_9 = arith.constant 0 : index
    %c0_10 = arith.constant 0 : index
    %8 = vector.load %arg12[%c0_9, %c0_10] : memref<16x32xf32, #tpu.memory_space<vmem>>, vector<16x32xf32>
    %c0_11 = arith.constant 0 : index
    %c0_12 = arith.constant 0 : index
    %9 = vector.load %arg13[%c0_11, %c0_12] : memref<16x32xf32, #tpu.memory_space<vmem>>, vector<16x32xf32>
    %c0_13 = arith.constant 0 : index
    %c0_14 = arith.constant 0 : index
    %c0_15 = arith.constant 0 : index
    %c0_16 = arith.constant 0 : index
    %10 = vector.load %arg3[%c0_13, %c0_14, %c0_15, %c0_16] : memref<1x8x16x32xbf16, #tpu.memory_space<vmem>>, vector<1x1x16x32xbf16>
    %11 = vector.shape_cast %10 : vector<1x1x16x32xbf16> to vector<16x32xbf16>
    %cst = arith.constant dense<0.000000e+00> : vector<16x128xf32>
    %12 = tpu.matmul %11, %3, %cst {dimension_numbers = #tpu.dot_dimension_numbers<[1], [0], [0], [1], [0, 0, 1, 1], [], []>} : vector<16x32xbf16>, vector<32x128xbf16>, vector<16x128xf32> -> vector<16x128xf32>
    %13 = arith.truncf %8 : vector<16x32xf32> to vector<16x32xbf16>
    %cst_17 = arith.constant dense<0.000000e+00> : vector<16x128xf32>
    %14 = tpu.matmul %13, %4, %cst_17 {dimension_numbers = #tpu.dot_dimension_numbers<[1], [0], [0], [1], [0, 0, 1, 1], [], []>} : vector<16x32xbf16>, vector<32x128xbf16>, vector<16x128xf32> -> vector<16x128xf32>
    %15 = arith.addf %12, %14 : vector<16x128xf32>
    %16 = vector.broadcast %5 : vector<1x128xf32> to vector<16x128xf32>
    %17 = arith.addf %15, %16 : vector<16x128xf32>
    %18 = vector.extract_strided_slice %17 {offsets = [0, 0], sizes = [16, 32], strides = [1, 1]} : vector<16x128xf32> to vector<16x32xf32>
    %19 = arith.negf %18 : vector<16x32xf32>
    %20 = math.exp %19 : vector<16x32xf32>
    %cst_18 = arith.constant 1.000000e+00 : f32
    %21 = vector.broadcast %cst_18 : f32 to vector<16x32xf32>
    %22 = arith.addf %21, %20 : vector<16x32xf32>
    %23 = arith.divf %21, %22 : vector<16x32xf32>
    %24 = vector.extract_strided_slice %17 {offsets = [0, 32], sizes = [16, 32], strides = [1, 1]} : vector<16x128xf32> to vector<16x32xf32>
    %25 = arith.negf %24 : vector<16x32xf32>
    %26 = math.exp %25 : vector<16x32xf32>
    %cst_19 = arith.constant 1.000000e+00 : f32
    %27 = vector.broadcast %cst_19 : f32 to vector<16x32xf32>
    %28 = arith.addf %27, %26 : vector<16x32xf32>
    %29 = arith.divf %27, %28 : vector<16x32xf32>
    %30 = vector.extract_strided_slice %17 {offsets = [0, 64], sizes = [16, 32], strides = [1, 1]} : vector<16x128xf32> to vector<16x32xf32>
    %31 = math.tanh %30 : vector<16x32xf32>
    %32 = vector.extract_strided_slice %17 {offsets = [0, 96], sizes = [16, 32], strides = [1, 1]} : vector<16x128xf32> to vector<16x32xf32>
    %33 = arith.negf %32 : vector<16x32xf32>
    %34 = math.exp %33 : vector<16x32xf32>
    %cst_20 = arith.constant 1.000000e+00 : f32
    %35 = vector.broadcast %cst_20 : f32 to vector<16x32xf32>
    %36 = arith.addf %35, %34 : vector<16x32xf32>
    %37 = arith.divf %35, %36 : vector<16x32xf32>
    %38 = arith.mulf %29, %9 : vector<16x32xf32>
    %39 = arith.mulf %23, %31 : vector<16x32xf32>
    %40 = arith.addf %38, %39 : vector<16x32xf32>
    %41 = math.tanh %40 : vector<16x32xf32>
    %42 = arith.mulf %37, %41 : vector<16x32xf32>
    %c8_i32 = arith.constant 8 : i32
    %43 = arith.muli %arg2, %c8_i32 : i32
    %c0_i32_21 = arith.constant 0 : i32
    %44 = arith.addi %43, %c0_i32_21 : i32
    %45 = vector.broadcast %44 : i32 to vector<16x1xi32>
    %46 = arith.cmpi slt, %45, %6 : vector<16x1xi32>
    %47 = vector.broadcast %7 : i1 to vector<16x1xi1>
    %48 = arith.ori %47, %46 : vector<16x1xi1>
    %cst_22 = arith.constant 0.000000e+00 : f32
    %49 = vector.shape_cast %48 : vector<16x1xi1> to vector<16x1xi1>
    %50 = vector.broadcast %49 : vector<16x1xi1> to vector<16x32xi1>
    %51 = vector.broadcast %cst_22 : f32 to vector<16x32xf32>
    %52 = arith.select %50, %42, %51 : vector<16x32xi1>, vector<16x32xf32>
    %53 = arith.truncf %52 : vector<16x32xf32> to vector<16x32xbf16>
    %c0_23 = arith.constant 0 : index
    %c0_24 = arith.constant 0 : index
    %c0_25 = arith.constant 0 : index
    %c0_26 = arith.constant 0 : index
    %54 = vector.load %arg8[%c0_23, %c0_24, %c0_25, %c0_26] : memref<1x8x16x32xbf16, #tpu.memory_space<vmem>>, vector<1x1x16x32xbf16>
    %55 = vector.shape_cast %54 : vector<1x1x16x32xbf16> to vector<16x32xbf16>
    %56 = vector.shape_cast %53 : vector<16x32xbf16> to vector<1x1x16x32xbf16>
    tpu.vector_store %arg8[%c0_23, %c0_24, %c0_25, %c0_26], %56 {strides = array<i32>} : memref<1x8x16x32xbf16, #tpu.memory_space<vmem>>, vector<1x1x16x32xbf16>,
    %c0_27 = arith.constant 0 : index
    %c1 = arith.constant 1 : index
    %c0_28 = arith.constant 0 : index
    %c0_29 = arith.constant 0 : index
    %57 = vector.load %arg3[%c0_27, %c1, %c0_28, %c0_29] : memref<1x8x16x32xbf16, #tpu.memory_space<vmem>>, vector<1x1x16x32xbf16>
    %58 = vector.shape_cast %57 : vector<1x1x16x32xbf16> to vector<16x32xbf16>
    %cst_30 = arith.constant dense<0.000000e+00> : vector<16x128xf32>
    %59 = tpu.matmul %58, %3, %cst_30 {dimension_numbers = #tpu.dot_dimension_numbers<[1], [0], [0], [1], [0, 0, 1, 1], [], []>} : vector<16x32xbf16>, vector<32x128xbf16>, vector<16x128xf32> -> vector<16x128xf32>
    %60 = arith.truncf %42 : vector<16x32xf32> to vector<16x32xbf16>
    %cst_31 = arith.constant dense<0.000000e+00> : vector<16x128xf32>
    %61 = tpu.matmul %60, %4, %cst_31 {dimension_numbers = #tpu.dot_dimension_numbers<[1], [0], [0], [1], [0, 0, 1, 1], [], []>} : vector<16x32xbf16>, vector<32x128xbf16>, vector<16x128xf32> -> vector<16x128xf32>
    %62 = arith.addf %59, %61 : vector<16x128xf32>
    %63 = vector.broadcast %5 : vector<1x128xf32> to vector<16x128xf32>
    %64 = arith.addf %62, %63 : vector<16x128xf32>
    %65 = vector.extract_strided_slice %64 {offsets = [0, 0], sizes = [16, 32], strides = [1, 1]} : vector<16x128xf32> to vector<16x32xf32>
    %66 = arith.negf %65 : vector<16x32xf32>
    %67 = math.exp %66 : vector<16x32xf32>
    %cst_32 = arith.constant 1.000000e+00 : f32
    %68 = vector.broadcast %cst_32 : f32 to vector<16x32xf32>
    %69 = arith.addf %68, %67 : vector<16x32xf32>
    %70 = arith.divf %68, %69 : vector<16x32xf32>
    %71 = vector.extract_strided_slice %64 {offsets = [0, 32], sizes = [16, 32], strides = [1, 1]} : vector<16x128xf32> to vector<16x32xf32>
    %72 = arith.negf %71 : vector<16x32xf32>
    %73 = math.exp %72 : vector<16x32xf32>
    %cst_33 = arith.constant 1.000000e+00 : f32
    %74 = vector.broadcast %cst_33 : f32 to vector<16x32xf32>
    %75 = arith.addf %74, %73 : vector<16x32xf32>
    %76 = arith.divf %74, %75 : vector<16x32xf32>
    %77 = vector.extract_strided_slice %64 {offsets = [0, 64], sizes = [16, 32], strides = [1, 1]} : vector<16x128xf32> to vector<16x32xf32>
    %78 = math.tanh %77 : vector<16x32xf32>
    %79 = vector.extract_strided_slice %64 {offsets = [0, 96], sizes = [16, 32], strides = [1, 1]} : vector<16x128xf32> to vector<16x32xf32>
    %80 = arith.negf %79 : vector<16x32xf32>
    %81 = math.exp %80 : vector<16x32xf32>
    %cst_34 = arith.constant 1.000000e+00 : f32
    %82 = vector.broadcast %cst_34 : f32 to vector<16x32xf32>
    %83 = arith.addf %82, %81 : vector<16x32xf32>
    %84 = arith.divf %82, %83 : vector<16x32xf32>
    %85 = arith.mulf %76, %40 : vector<16x32xf32>
    %86 = arith.mulf %70, %78 : vector<16x32xf32>
    %87 = arith.addf %85, %86 : vector<16x32xf32>
    %88 = math.tanh %87 : vector<16x32xf32>
    %89 = arith.mulf %84, %88 : vector<16x32xf32>
    %c8_i32_35 = arith.constant 8 : i32
    %90 = arith.muli %arg2, %c8_i32_35 : i32
    %c1_i32 = arith.constant 1 : i32
    %91 = arith.addi %90, %c1_i32 : i32
    %92 = vector.broadcast %91 : i32 to vector<16x1xi32>
    %93 = arith.cmpi slt, %92, %6 : vector<16x1xi32>
    %94 = vector.broadcast %7 : i1 to vector<16x1xi1>
    %95 = arith.ori %94, %93 : vector<16x1xi1>
    %cst_36 = arith.constant 0.000000e+00 : f32
    %96 = vector.shape_cast %95 : vector<16x1xi1> to vector<16x1xi1>
    %97 = vector.broadcast %96 : vector<16x1xi1> to vector<16x32xi1>
    %98 = vector.broadcast %cst_36 : f32 to vector<16x32xf32>
    %99 = arith.select %97, %89, %98 : vector<16x32xi1>, vector<16x32xf32>
    %100 = arith.truncf %99 : vector<16x32xf32> to vector<16x32xbf16>
    %c0_37 = arith.constant 0 : index
    %c1_38 = arith.constant 1 : index
    %c0_39 = arith.constant 0 : index
    %c0_40 = arith.constant 0 : index
    %101 = vector.load %arg8[%c0_37, %c1_38, %c0_39, %c0_40] : memref<1x8x16x32xbf16, #tpu.memory_space<vmem>>, vector<1x1x16x32xbf16>
    %102 = vector.shape_cast %101 : vector<1x1x16x32xbf16> to vector<16x32xbf16>
    %103 = vector.shape_cast %100 : vector<16x32xbf16> to vector<1x1x16x32xbf16>
    tpu.vector_store %arg8[%c0_37, %c1_38, %c0_39, %c0_40], %103 {strides = array<i32>} : memref<1x8x16x32xbf16, #tpu.memory_space<vmem>>, vector<1x1x16x32xbf16>,
    %c0_41 = arith.constant 0 : index
    %c2 = arith.constant 2 : index
    %c0_42 = arith.constant 0 : index
    %c0_43 = arith.constant 0 : index
    %104 = vector.load %arg3[%c0_41, %c2, %c0_42, %c0_43] : memref<1x8x16x32xbf16, #tpu.memory_space<vmem>>, vector<1x1x16x32xbf16>
    %105 = vector.shape_cast %104 : vector<1x1x16x32xbf16> to vector<16x32xbf16>
    %cst_44 = arith.constant dense<0.000000e+00> : vector<16x128xf32>
    %106 = tpu.matmul %105, %3, %cst_44 {dimension_numbers = #tpu.dot_dimension_numbers<[1], [0], [0], [1], [0, 0, 1, 1], [], []>} : vector<16x32xbf16>, vector<32x128xbf16>, vector<16x128xf32> -> vector<16x128xf32>
    %107 = arith.truncf %89 : vector<16x32xf32> to vector<16x32xbf16>
    %cst_45 = arith.constant dense<0.000000e+00> : vector<16x128xf32>
    %108 = tpu.matmul %107, %4, %cst_45 {dimension_numbers = #tpu.dot_dimension_numbers<[1], [0], [0], [1], [0, 0, 1, 1], [], []>} : vector<16x32xbf16>, vector<32x128xbf16>, vector<16x128xf32> -> vector<16x128xf32>
    %109 = arith.addf %106, %108 : vector<16x128xf32>
    %110 = vector.broadcast %5 : vector<1x128xf32> to vector<16x128xf32>
    %111 = arith.addf %109, %110 : vector<16x128xf32>
    %112 = vector.extract_strided_slice %111 {offsets = [0, 0], sizes = [16, 32], strides = [1, 1]} : vector<16x128xf32> to vector<16x32xf32>
    %113 = arith.negf %112 : vector<16x32xf32>
    %114 = math.exp %113 : vector<16x32xf32>
    %cst_46 = arith.constant 1.000000e+00 : f32
    %115 = vector.broadcast %cst_46 : f32 to vector<16x32xf32>
    %116 = arith.addf %115, %114 : vector<16x32xf32>
    %117 = arith.divf %115, %116 : vector<16x32xf32>
    %118 = vector.extract_strided_slice %111 {offsets = [0, 32], sizes = [16, 32], strides = [1, 1]} : vector<16x128xf32> to vector<16x32xf32>
    %119 = arith.negf %118 : vector<16x32xf32>
    %120 = math.exp %119 : vector<16x32xf32>
    %cst_47 = arith.constant 1.000000e+00 : f32
    %121 = vector.broadcast %cst_47 : f32 to vector<16x32xf32>
    %122 = arith.addf %121, %120 : vector<16x32xf32>
    %123 = arith.divf %121, %122 : vector<16x32xf32>
    %124 = vector.extract_strided_slice %111 {offsets = [0, 64], sizes = [16, 32], strides = [1, 1]} : vector<16x128xf32> to vector<16x32xf32>
    %125 = math.tanh %124 : vector<16x32xf32>
    %126 = vector.extract_strided_slice %111 {offsets = [0, 96], sizes = [16, 32], strides = [1, 1]} : vector<16x128xf32> to vector<16x32xf32>
    %127 = arith.negf %126 : vector<16x32xf32>
    %128 = math.exp %127 : vector<16x32xf32>
    %cst_48 = arith.constant 1.000000e+00 : f32
    %129 = vector.broadcast %cst_48 : f32 to vector<16x32xf32>
    %130 = arith.addf %129, %128 : vector<16x32xf32>
    %131 = arith.divf %129, %130 : vector<16x32xf32>
    %132 = arith.mulf %123, %87 : vector<16x32xf32>
    %133 = arith.mulf %117, %125 : vector<16x32xf32>
    %134 = arith.addf %132, %133 : vector<16x32xf32>
    %135 = math.tanh %134 : vector<16x32xf32>
    %136 = arith.mulf %131, %135 : vector<16x32xf32>
    %c8_i32_49 = arith.constant 8 : i32
    %137 = arith.muli %arg2, %c8_i32_49 : i32
    %c2_i32 = arith.constant 2 : i32
    %138 = arith.addi %137, %c2_i32 : i32
    %139 = vector.broadcast %138 : i32 to vector<16x1xi32>
    %140 = arith.cmpi slt, %139, %6 : vector<16x1xi32>
    %141 = vector.broadcast %7 : i1 to vector<16x1xi1>
    %142 = arith.ori %141, %140 : vector<16x1xi1>
    %cst_50 = arith.constant 0.000000e+00 : f32
    %143 = vector.shape_cast %142 : vector<16x1xi1> to vector<16x1xi1>
    %144 = vector.broadcast %143 : vector<16x1xi1> to vector<16x32xi1>
    %145 = vector.broadcast %cst_50 : f32 to vector<16x32xf32>
    %146 = arith.select %144, %136, %145 : vector<16x32xi1>, vector<16x32xf32>
    %147 = arith.truncf %146 : vector<16x32xf32> to vector<16x32xbf16>
    %c0_51 = arith.constant 0 : index
    %c2_52 = arith.constant 2 : index
    %c0_53 = arith.constant 0 : index
    %c0_54 = arith.constant 0 : index
    %148 = vector.load %arg8[%c0_51, %c2_52, %c0_53, %c0_54] : memref<1x8x16x32xbf16, #tpu.memory_space<vmem>>, vector<1x1x16x32xbf16>
    %149 = vector.shape_cast %148 : vector<1x1x16x32xbf16> to vector<16x32xbf16>
    %150 = vector.shape_cast %147 : vector<16x32xbf16> to vector<1x1x16x32xbf16>
    tpu.vector_store %arg8[%c0_51, %c2_52, %c0_53, %c0_54], %150 {strides = array<i32>} : memref<1x8x16x32xbf16, #tpu.memory_space<vmem>>, vector<1x1x16x32xbf16>,
    %c0_55 = arith.constant 0 : index
    %c3 = arith.constant 3 : index
    %c0_56 = arith.constant 0 : index
    %c0_57 = arith.constant 0 : index
    %151 = vector.load %arg3[%c0_55, %c3, %c0_56, %c0_57] : memref<1x8x16x32xbf16, #tpu.memory_space<vmem>>, vector<1x1x16x32xbf16>
    %152 = vector.shape_cast %151 : vector<1x1x16x32xbf16> to vector<16x32xbf16>
    %cst_58 = arith.constant dense<0.000000e+00> : vector<16x128xf32>
    %153 = tpu.matmul %152, %3, %cst_58 {dimension_numbers = #tpu.dot_dimension_numbers<[1], [0], [0], [1], [0, 0, 1, 1], [], []>} : vector<16x32xbf16>, vector<32x128xbf16>, vector<16x128xf32> -> vector<16x128xf32>
    %154 = arith.truncf %136 : vector<16x32xf32> to vector<16x32xbf16>
    %cst_59 = arith.constant dense<0.000000e+00> : vector<16x128xf32>
    %155 = tpu.matmul %154, %4, %cst_59 {dimension_numbers = #tpu.dot_dimension_numbers<[1], [0], [0], [1], [0, 0, 1, 1], [], []>} : vector<16x32xbf16>, vector<32x128xbf16>, vector<16x128xf32> -> vector<16x128xf32>
    %156 = arith.addf %153, %155 : vector<16x128xf32>
    %157 = vector.broadcast %5 : vector<1x128xf32> to vector<16x128xf32>
    %158 = arith.addf %156, %157 : vector<16x128xf32>
    %159 = vector.extract_strided_slice %158 {offsets = [0, 0], sizes = [16, 32], strides = [1, 1]} : vector<16x128xf32> to vector<16x32xf32>
    %160 = arith.negf %159 : vector<16x32xf32>
    %161 = math.exp %160 : vector<16x32xf32>
    %cst_60 = arith.constant 1.000000e+00 : f32
    %162 = vector.broadcast %cst_60 : f32 to vector<16x32xf32>
    %163 = arith.addf %162, %161 : vector<16x32xf32>
    %164 = arith.divf %162, %163 : vector<16x32xf32>
    %165 = vector.extract_strided_slice %158 {offsets = [0, 32], sizes = [16, 32], strides = [1, 1]} : vector<16x128xf32> to vector<16x32xf32>
    %166 = arith.negf %165 : vector<16x32xf32>
    %167 = math.exp %166 : vector<16x32xf32>
    %cst_61 = arith.constant 1.000000e+00 : f32
    %168 = vector.broadcast %cst_61 : f32 to vector<16x32xf32>
    %169 = arith.addf %168, %167 : vector<16x32xf32>
    %170 = arith.divf %168, %169 : vector<16x32xf32>
    %171 = vector.extract_strided_slice %158 {offsets = [0, 64], sizes = [16, 32], strides = [1, 1]} : vector<16x128xf32> to vector<16x32xf32>
    %172 = math.tanh %171 : vector<16x32xf32>
    %173 = vector.extract_strided_slice %158 {offsets = [0, 96], sizes = [16, 32], strides = [1, 1]} : vector<16x128xf32> to vector<16x32xf32>
    %174 = arith.negf %173 : vector<16x32xf32>
    %175 = math.exp %174 : vector<16x32xf32>
    %cst_62 = arith.constant 1.000000e+00 : f32
    %176 = vector.broadcast %cst_62 : f32 to vector<16x32xf32>
    %177 = arith.addf %176, %175 : vector<16x32xf32>
    %178 = arith.divf %176, %177 : vector<16x32xf32>
    %179 = arith.mulf %170, %134 : vector<16x32xf32>
    %180 = arith.mulf %164, %172 : vector<16x32xf32>
    %181 = arith.addf %179, %180 : vector<16x32xf32>
    %182 = math.tanh %181 : vector<16x32xf32>
    %183 = arith.mulf %178, %182 : vector<16x32xf32>
    %c8_i32_63 = arith.constant 8 : i32
    %184 = arith.muli %arg2, %c8_i32_63 : i32
    %c3_i32 = arith.constant 3 : i32
    %185 = arith.addi %184, %c3_i32 : i32
    %186 = vector.broadcast %185 : i32 to vector<16x1xi32>
    %187 = arith.cmpi slt, %186, %6 : vector<16x1xi32>
    %188 = vector.broadcast %7 : i1 to vector<16x1xi1>
    %189 = arith.ori %188, %187 : vector<16x1xi1>
    %cst_64 = arith.constant 0.000000e+00 : f32
    %190 = vector.shape_cast %189 : vector<16x1xi1> to vector<16x1xi1>
    %191 = vector.broadcast %190 : vector<16x1xi1> to vector<16x32xi1>
    %192 = vector.broadcast %cst_64 : f32 to vector<16x32xf32>
    %193 = arith.select %191, %183, %192 : vector<16x32xi1>, vector<16x32xf32>
    %194 = arith.truncf %193 : vector<16x32xf32> to vector<16x32xbf16>
    %c0_65 = arith.constant 0 : index
    %c3_66 = arith.constant 3 : index
    %c0_67 = arith.constant 0 : index
    %c0_68 = arith.constant 0 : index
    %195 = vector.load %arg8[%c0_65, %c3_66, %c0_67, %c0_68] : memref<1x8x16x32xbf16, #tpu.memory_space<vmem>>, vector<1x1x16x32xbf16>
    %196 = vector.shape_cast %195 : vector<1x1x16x32xbf16> to vector<16x32xbf16>
    %197 = vector.shape_cast %194 : vector<16x32xbf16> to vector<1x1x16x32xbf16>
    tpu.vector_store %arg8[%c0_65, %c3_66, %c0_67, %c0_68], %197 {strides = array<i32>} : memref<1x8x16x32xbf16, #tpu.memory_space<vmem>>, vector<1x1x16x32xbf16>,
    %c0_69 = arith.constant 0 : index
    %c4 = arith.constant 4 : index
    %c0_70 = arith.constant 0 : index
    %c0_71 = arith.constant 0 : index
    %198 = vector.load %arg3[%c0_69, %c4, %c0_70, %c0_71] : memref<1x8x16x32xbf16, #tpu.memory_space<vmem>>, vector<1x1x16x32xbf16>
    %199 = vector.shape_cast %198 : vector<1x1x16x32xbf16> to vector<16x32xbf16>
    %cst_72 = arith.constant dense<0.000000e+00> : vector<16x128xf32>
    %200 = tpu.matmul %199, %3, %cst_72 {dimension_numbers = #tpu.dot_dimension_numbers<[1], [0], [0], [1], [0, 0, 1, 1], [], []>} : vector<16x32xbf16>, vector<32x128xbf16>, vector<16x128xf32> -> vector<16x128xf32>
    %201 = arith.truncf %183 : vector<16x32xf32> to vector<16x32xbf16>
    %cst_73 = arith.constant dense<0.000000e+00> : vector<16x128xf32>
    %202 = tpu.matmul %201, %4, %cst_73 {dimension_numbers = #tpu.dot_dimension_numbers<[1], [0], [0], [1], [0, 0, 1, 1], [], []>} : vector<16x32xbf16>, vector<32x128xbf16>, vector<16x128xf32> -> vector<16x128xf32>
    %203 = arith.addf %200, %202 : vector<16x128xf32>
    %204 = vector.broadcast %5 : vector<1x128xf32> to vector<16x128xf32>
    %205 = arith.addf %203, %204 : vector<16x128xf32>
    %206 = vector.extract_strided_slice %205 {offsets = [0, 0], sizes = [16, 32], strides = [1, 1]} : vector<16x128xf32> to vector<16x32xf32>
    %207 = arith.negf %206 : vector<16x32xf32>
    %208 = math.exp %207 : vector<16x32xf32>
    %cst_74 = arith.constant 1.000000e+00 : f32
    %209 = vector.broadcast %cst_74 : f32 to vector<16x32xf32>
    %210 = arith.addf %209, %208 : vector<16x32xf32>
    %211 = arith.divf %209, %210 : vector<16x32xf32>
    %212 = vector.extract_strided_slice %205 {offsets = [0, 32], sizes = [16, 32], strides = [1, 1]} : vector<16x128xf32> to vector<16x32xf32>
    %213 = arith.negf %212 : vector<16x32xf32>
    %214 = math.exp %213 : vector<16x32xf32>
    %cst_75 = arith.constant 1.000000e+00 : f32
    %215 = vector.broadcast %cst_75 : f32 to vector<16x32xf32>
    %216 = arith.addf %215, %214 : vector<16x32xf32>
    %217 = arith.divf %215, %216 : vector<16x32xf32>
    %218 = vector.extract_strided_slice %205 {offsets = [0, 64], sizes = [16, 32], strides = [1, 1]} : vector<16x128xf32> to vector<16x32xf32>
    %219 = math.tanh %218 : vector<16x32xf32>
    %220 = vector.extract_strided_slice %205 {offsets = [0, 96], sizes = [16, 32], strides = [1, 1]} : vector<16x128xf32> to vector<16x32xf32>
    %221 = arith.negf %220 : vector<16x32xf32>
    %222 = math.exp %221 : vector<16x32xf32>
    %cst_76 = arith.constant 1.000000e+00 : f32
    %223 = vector.broadcast %cst_76 : f32 to vector<16x32xf32>
    %224 = arith.addf %223, %222 : vector<16x32xf32>
    %225 = arith.divf %223, %224 : vector<16x32xf32>
    %226 = arith.mulf %217, %181 : vector<16x32xf32>
    %227 = arith.mulf %211, %219 : vector<16x32xf32>
    %228 = arith.addf %226, %227 : vector<16x32xf32>
    %229 = math.tanh %228 : vector<16x32xf32>
    %230 = arith.mulf %225, %229 : vector<16x32xf32>
    %c8_i32_77 = arith.constant 8 : i32
    %231 = arith.muli %arg2, %c8_i32_77 : i32
    %c4_i32 = arith.constant 4 : i32
    %232 = arith.addi %231, %c4_i32 : i32
    %233 = vector.broadcast %232 : i32 to vector<16x1xi32>
    %234 = arith.cmpi slt, %233, %6 : vector<16x1xi32>
    %235 = vector.broadcast %7 : i1 to vector<16x1xi1>
    %236 = arith.ori %235, %234 : vector<16x1xi1>
    %cst_78 = arith.constant 0.000000e+00 : f32
    %237 = vector.shape_cast %236 : vector<16x1xi1> to vector<16x1xi1>
    %238 = vector.broadcast %237 : vector<16x1xi1> to vector<16x32xi1>
    %239 = vector.broadcast %cst_78 : f32 to vector<16x32xf32>
    %240 = arith.select %238, %230, %239 : vector<16x32xi1>, vector<16x32xf32>
    %241 = arith.truncf %240 : vector<16x32xf32> to vector<16x32xbf16>
    %c0_79 = arith.constant 0 : index
    %c4_80 = arith.constant 4 : index
    %c0_81 = arith.constant 0 : index
    %c0_82 = arith.constant 0 : index
    %242 = vector.load %arg8[%c0_79, %c4_80, %c0_81, %c0_82] : memref<1x8x16x32xbf16, #tpu.memory_space<vmem>>, vector<1x1x16x32xbf16>
    %243 = vector.shape_cast %242 : vector<1x1x16x32xbf16> to vector<16x32xbf16>
    %244 = vector.shape_cast %241 : vector<16x32xbf16> to vector<1x1x16x32xbf16>
    tpu.vector_store %arg8[%c0_79, %c4_80, %c0_81, %c0_82], %244 {strides = array<i32>} : memref<1x8x16x32xbf16, #tpu.memory_space<vmem>>, vector<1x1x16x32xbf16>,
    %c0_83 = arith.constant 0 : index
    %c5 = arith.constant 5 : index
    %c0_84 = arith.constant 0 : index
    %c0_85 = arith.constant 0 : index
    %245 = vector.load %arg3[%c0_83, %c5, %c0_84, %c0_85] : memref<1x8x16x32xbf16, #tpu.memory_space<vmem>>, vector<1x1x16x32xbf16>
    %246 = vector.shape_cast %245 : vector<1x1x16x32xbf16> to vector<16x32xbf16>
    %cst_86 = arith.constant dense<0.000000e+00> : vector<16x128xf32>
    %247 = tpu.matmul %246, %3, %cst_86 {dimension_numbers = #tpu.dot_dimension_numbers<[1], [0], [0], [1], [0, 0, 1, 1], [], []>} : vector<16x32xbf16>, vector<32x128xbf16>, vector<16x128xf32> -> vector<16x128xf32>
    %248 = arith.truncf %230 : vector<16x32xf32> to vector<16x32xbf16>
    %cst_87 = arith.constant dense<0.000000e+00> : vector<16x128xf32>
    %249 = tpu.matmul %248, %4, %cst_87 {dimension_numbers = #tpu.dot_dimension_numbers<[1], [0], [0], [1], [0, 0, 1, 1], [], []>} : vector<16x32xbf16>, vector<32x128xbf16>, vector<16x128xf32> -> vector<16x128xf32>
    %250 = arith.addf %247, %249 : vector<16x128xf32>
    %251 = vector.broadcast %5 : vector<1x128xf32> to vector<16x128xf32>
    %252 = arith.addf %250, %251 : vector<16x128xf32>
    %253 = vector.extract_strided_slice %252 {offsets = [0, 0], sizes = [16, 32], strides = [1, 1]} : vector<16x128xf32> to vector<16x32xf32>
    %254 = arith.negf %253 : vector<16x32xf32>
    %255 = math.exp %254 : vector<16x32xf32>
    %cst_88 = arith.constant 1.000000e+00 : f32
    %256 = vector.broadcast %cst_88 : f32 to vector<16x32xf32>
    %257 = arith.addf %256, %255 : vector<16x32xf32>
    %258 = arith.divf %256, %257 : vector<16x32xf32>
    %259 = vector.extract_strided_slice %252 {offsets = [0, 32], sizes = [16, 32], strides = [1, 1]} : vector<16x128xf32> to vector<16x32xf32>
    %260 = arith.negf %259 : vector<16x32xf32>
    %261 = math.exp %260 : vector<16x32xf32>
    %cst_89 = arith.constant 1.000000e+00 : f32
    %262 = vector.broadcast %cst_89 : f32 to vector<16x32xf32>
    %263 = arith.addf %262, %261 : vector<16x32xf32>
    %264 = arith.divf %262, %263 : vector<16x32xf32>
    %265 = vector.extract_strided_slice %252 {offsets = [0, 64], sizes = [16, 32], strides = [1, 1]} : vector<16x128xf32> to vector<16x32xf32>
    %266 = math.tanh %265 : vector<16x32xf32>
    %267 = vector.extract_strided_slice %252 {offsets = [0, 96], sizes = [16, 32], strides = [1, 1]} : vector<16x128xf32> to vector<16x32xf32>
    %268 = arith.negf %267 : vector<16x32xf32>
    %269 = math.exp %268 : vector<16x32xf32>
    %cst_90 = arith.constant 1.000000e+00 : f32
    %270 = vector.broadcast %cst_90 : f32 to vector<16x32xf32>
    %271 = arith.addf %270, %269 : vector<16x32xf32>
    %272 = arith.divf %270, %271 : vector<16x32xf32>
    %273 = arith.mulf %264, %228 : vector<16x32xf32>
    %274 = arith.mulf %258, %266 : vector<16x32xf32>
    %275 = arith.addf %273, %274 : vector<16x32xf32>
    %276 = math.tanh %275 : vector<16x32xf32>
    %277 = arith.mulf %272, %276 : vector<16x32xf32>
    %c8_i32_91 = arith.constant 8 : i32
    %278 = arith.muli %arg2, %c8_i32_91 : i32
    %c5_i32 = arith.constant 5 : i32
    %279 = arith.addi %278, %c5_i32 : i32
    %280 = vector.broadcast %279 : i32 to vector<16x1xi32>
    %281 = arith.cmpi slt, %280, %6 : vector<16x1xi32>
    %282 = vector.broadcast %7 : i1 to vector<16x1xi1>
    %283 = arith.ori %282, %281 : vector<16x1xi1>
    %cst_92 = arith.constant 0.000000e+00 : f32
    %284 = vector.shape_cast %283 : vector<16x1xi1> to vector<16x1xi1>
    %285 = vector.broadcast %284 : vector<16x1xi1> to vector<16x32xi1>
    %286 = vector.broadcast %cst_92 : f32 to vector<16x32xf32>
    %287 = arith.select %285, %277, %286 : vector<16x32xi1>, vector<16x32xf32>
    %288 = arith.truncf %287 : vector<16x32xf32> to vector<16x32xbf16>
    %c0_93 = arith.constant 0 : index
    %c5_94 = arith.constant 5 : index
    %c0_95 = arith.constant 0 : index
    %c0_96 = arith.constant 0 : index
    %289 = vector.load %arg8[%c0_93, %c5_94, %c0_95, %c0_96] : memref<1x8x16x32xbf16, #tpu.memory_space<vmem>>, vector<1x1x16x32xbf16>
    %290 = vector.shape_cast %289 : vector<1x1x16x32xbf16> to vector<16x32xbf16>
    %291 = vector.shape_cast %288 : vector<16x32xbf16> to vector<1x1x16x32xbf16>
    tpu.vector_store %arg8[%c0_93, %c5_94, %c0_95, %c0_96], %291 {strides = array<i32>} : memref<1x8x16x32xbf16, #tpu.memory_space<vmem>>, vector<1x1x16x32xbf16>,
    %c0_97 = arith.constant 0 : index
    %c6 = arith.constant 6 : index
    %c0_98 = arith.constant 0 : index
    %c0_99 = arith.constant 0 : index
    %292 = vector.load %arg3[%c0_97, %c6, %c0_98, %c0_99] : memref<1x8x16x32xbf16, #tpu.memory_space<vmem>>, vector<1x1x16x32xbf16>
    %293 = vector.shape_cast %292 : vector<1x1x16x32xbf16> to vector<16x32xbf16>
    %cst_100 = arith.constant dense<0.000000e+00> : vector<16x128xf32>
    %294 = tpu.matmul %293, %3, %cst_100 {dimension_numbers = #tpu.dot_dimension_numbers<[1], [0], [0], [1], [0, 0, 1, 1], [], []>} : vector<16x32xbf16>, vector<32x128xbf16>, vector<16x128xf32> -> vector<16x128xf32>
    %295 = arith.truncf %277 : vector<16x32xf32> to vector<16x32xbf16>
    %cst_101 = arith.constant dense<0.000000e+00> : vector<16x128xf32>
    %296 = tpu.matmul %295, %4, %cst_101 {dimension_numbers = #tpu.dot_dimension_numbers<[1], [0], [0], [1], [0, 0, 1, 1], [], []>} : vector<16x32xbf16>, vector<32x128xbf16>, vector<16x128xf32> -> vector<16x128xf32>
    %297 = arith.addf %294, %296 : vector<16x128xf32>
    %298 = vector.broadcast %5 : vector<1x128xf32> to vector<16x128xf32>
    %299 = arith.addf %297, %298 : vector<16x128xf32>
    %300 = vector.extract_strided_slice %299 {offsets = [0, 0], sizes = [16, 32], strides = [1, 1]} : vector<16x128xf32> to vector<16x32xf32>
    %301 = arith.negf %300 : vector<16x32xf32>
    %302 = math.exp %301 : vector<16x32xf32>
    %cst_102 = arith.constant 1.000000e+00 : f32
    %303 = vector.broadcast %cst_102 : f32 to vector<16x32xf32>
    %304 = arith.addf %303, %302 : vector<16x32xf32>
    %305 = arith.divf %303, %304 : vector<16x32xf32>
    %306 = vector.extract_strided_slice %299 {offsets = [0, 32], sizes = [16, 32], strides = [1, 1]} : vector<16x128xf32> to vector<16x32xf32>
    %307 = arith.negf %306 : vector<16x32xf32>
    %308 = math.exp %307 : vector<16x32xf32>
    %cst_103 = arith.constant 1.000000e+00 : f32
    %309 = vector.broadcast %cst_103 : f32 to vector<16x32xf32>
    %310 = arith.addf %309, %308 : vector<16x32xf32>
    %311 = arith.divf %309, %310 : vector<16x32xf32>
    %312 = vector.extract_strided_slice %299 {offsets = [0, 64], sizes = [16, 32], strides = [1, 1]} : vector<16x128xf32> to vector<16x32xf32>
    %313 = math.tanh %312 : vector<16x32xf32>
    %314 = vector.extract_strided_slice %299 {offsets = [0, 96], sizes = [16, 32], strides = [1, 1]} : vector<16x128xf32> to vector<16x32xf32>
    %315 = arith.negf %314 : vector<16x32xf32>
    %316 = math.exp %315 : vector<16x32xf32>
    %cst_104 = arith.constant 1.000000e+00 : f32
    %317 = vector.broadcast %cst_104 : f32 to vector<16x32xf32>
    %318 = arith.addf %317, %316 : vector<16x32xf32>
    %319 = arith.divf %317, %318 : vector<16x32xf32>
    %320 = arith.mulf %311, %275 : vector<16x32xf32>
    %321 = arith.mulf %305, %313 : vector<16x32xf32>
    %322 = arith.addf %320, %321 : vector<16x32xf32>
    %323 = math.tanh %322 : vector<16x32xf32>
    %324 = arith.mulf %319, %323 : vector<16x32xf32>
    %c8_i32_105 = arith.constant 8 : i32
    %325 = arith.muli %arg2, %c8_i32_105 : i32
    %c6_i32 = arith.constant 6 : i32
    %326 = arith.addi %325, %c6_i32 : i32
    %327 = vector.broadcast %326 : i32 to vector<16x1xi32>
    %328 = arith.cmpi slt, %327, %6 : vector<16x1xi32>
    %329 = vector.broadcast %7 : i1 to vector<16x1xi1>
    %330 = arith.ori %329, %328 : vector<16x1xi1>
    %cst_106 = arith.constant 0.000000e+00 : f32
    %331 = vector.shape_cast %330 : vector<16x1xi1> to vector<16x1xi1>
    %332 = vector.broadcast %331 : vector<16x1xi1> to vector<16x32xi1>
    %333 = vector.broadcast %cst_106 : f32 to vector<16x32xf32>
    %334 = arith.select %332, %324, %333 : vector<16x32xi1>, vector<16x32xf32>
    %335 = arith.truncf %334 : vector<16x32xf32> to vector<16x32xbf16>
    %c0_107 = arith.constant 0 : index
    %c6_108 = arith.constant 6 : index
    %c0_109 = arith.constant 0 : index
    %c0_110 = arith.constant 0 : index
    %336 = vector.load %arg8[%c0_107, %c6_108, %c0_109, %c0_110] : memref<1x8x16x32xbf16, #tpu.memory_space<vmem>>, vector<1x1x16x32xbf16>
    %337 = vector.shape_cast %336 : vector<1x1x16x32xbf16> to vector<16x32xbf16>
    %338 = vector.shape_cast %335 : vector<16x32xbf16> to vector<1x1x16x32xbf16>
    tpu.vector_store %arg8[%c0_107, %c6_108, %c0_109, %c0_110], %338 {strides = array<i32>} : memref<1x8x16x32xbf16, #tpu.memory_space<vmem>>, vector<1x1x16x32xbf16>,
    %c0_111 = arith.constant 0 : index
    %c7 = arith.constant 7 : index
    %c0_112 = arith.constant 0 : index
    %c0_113 = arith.constant 0 : index
    %339 = vector.load %arg3[%c0_111, %c7, %c0_112, %c0_113] : memref<1x8x16x32xbf16, #tpu.memory_space<vmem>>, vector<1x1x16x32xbf16>
    %340 = vector.shape_cast %339 : vector<1x1x16x32xbf16> to vector<16x32xbf16>
    %cst_114 = arith.constant dense<0.000000e+00> : vector<16x128xf32>
    %341 = tpu.matmul %340, %3, %cst_114 {dimension_numbers = #tpu.dot_dimension_numbers<[1], [0], [0], [1], [0, 0, 1, 1], [], []>} : vector<16x32xbf16>, vector<32x128xbf16>, vector<16x128xf32> -> vector<16x128xf32>
    %342 = arith.truncf %324 : vector<16x32xf32> to vector<16x32xbf16>
    %cst_115 = arith.constant dense<0.000000e+00> : vector<16x128xf32>
    %343 = tpu.matmul %342, %4, %cst_115 {dimension_numbers = #tpu.dot_dimension_numbers<[1], [0], [0], [1], [0, 0, 1, 1], [], []>} : vector<16x32xbf16>, vector<32x128xbf16>, vector<16x128xf32> -> vector<16x128xf32>
    %344 = arith.addf %341, %343 : vector<16x128xf32>
    %345 = vector.broadcast %5 : vector<1x128xf32> to vector<16x128xf32>
    %346 = arith.addf %344, %345 : vector<16x128xf32>
    %347 = vector.extract_strided_slice %346 {offsets = [0, 0], sizes = [16, 32], strides = [1, 1]} : vector<16x128xf32> to vector<16x32xf32>
    %348 = arith.negf %347 : vector<16x32xf32>
    %349 = math.exp %348 : vector<16x32xf32>
    %cst_116 = arith.constant 1.000000e+00 : f32
    %350 = vector.broadcast %cst_116 : f32 to vector<16x32xf32>
    %351 = arith.addf %350, %349 : vector<16x32xf32>
    %352 = arith.divf %350, %351 : vector<16x32xf32>
    %353 = vector.extract_strided_slice %346 {offsets = [0, 32], sizes = [16, 32], strides = [1, 1]} : vector<16x128xf32> to vector<16x32xf32>
    %354 = arith.negf %353 : vector<16x32xf32>
    %355 = math.exp %354 : vector<16x32xf32>
    %cst_117 = arith.constant 1.000000e+00 : f32
    %356 = vector.broadcast %cst_117 : f32 to vector<16x32xf32>
    %357 = arith.addf %356, %355 : vector<16x32xf32>
    %358 = arith.divf %356, %357 : vector<16x32xf32>
    %359 = vector.extract_strided_slice %346 {offsets = [0, 64], sizes = [16, 32], strides = [1, 1]} : vector<16x128xf32> to vector<16x32xf32>
    %360 = math.tanh %359 : vector<16x32xf32>
    %361 = vector.extract_strided_slice %346 {offsets = [0, 96], sizes = [16, 32], strides = [1, 1]} : vector<16x128xf32> to vector<16x32xf32>
    %362 = arith.negf %361 : vector<16x32xf32>
    %363 = math.exp %362 : vector<16x32xf32>
    %cst_118 = arith.constant 1.000000e+00 : f32
    %364 = vector.broadcast %cst_118 : f32 to vector<16x32xf32>
    %365 = arith.addf %364, %363 : vector<16x32xf32>
    %366 = arith.divf %364, %365 : vector<16x32xf32>
    %367 = arith.mulf %358, %322 : vector<16x32xf32>
    %368 = arith.mulf %352, %360 : vector<16x32xf32>
    %369 = arith.addf %367, %368 : vector<16x32xf32>
    %370 = math.tanh %369 : vector<16x32xf32>
    %371 = arith.mulf %366, %370 : vector<16x32xf32>
    %c8_i32_119 = arith.constant 8 : i32
    %372 = arith.muli %arg2, %c8_i32_119 : i32
    %c7_i32 = arith.constant 7 : i32
    %373 = arith.addi %372, %c7_i32 : i32
    %374 = vector.broadcast %373 : i32 to vector<16x1xi32>
    %375 = arith.cmpi slt, %374, %6 : vector<16x1xi32>
    %376 = vector.broadcast %7 : i1 to vector<16x1xi1>
    %377 = arith.ori %376, %375 : vector<16x1xi1>
    %cst_120 = arith.constant 0.000000e+00 : f32
    %378 = vector.shape_cast %377 : vector<16x1xi1> to vector<16x1xi1>
    %379 = vector.broadcast %378 : vector<16x1xi1> to vector<16x32xi1>
    %380 = vector.broadcast %cst_120 : f32 to vector<16x32xf32>
    %381 = arith.select %379, %371, %380 : vector<16x32xi1>, vector<16x32xf32>
    %382 = arith.truncf %381 : vector<16x32xf32> to vector<16x32xbf16>
    %c0_121 = arith.constant 0 : index
    %c7_122 = arith.constant 7 : index
    %c0_123 = arith.constant 0 : index
    %c0_124 = arith.constant 0 : index
    %383 = vector.load %arg8[%c0_121, %c7_122, %c0_123, %c0_124] : memref<1x8x16x32xbf16, #tpu.memory_space<vmem>>, vector<1x1x16x32xbf16>
    %384 = vector.shape_cast %383 : vector<1x1x16x32xbf16> to vector<16x32xbf16>
    %385 = vector.shape_cast %382 : vector<16x32xbf16> to vector<1x1x16x32xbf16>
    tpu.vector_store %arg8[%c0_121, %c7_122, %c0_123, %c0_124], %385 {strides = array<i32>} : memref<1x8x16x32xbf16, #tpu.memory_space<vmem>>, vector<1x1x16x32xbf16>,
    %c0_125 = arith.constant 0 : index
    %c0_126 = arith.constant 0 : index
    %386 = vector.load %arg12[%c0_125, %c0_126] : memref<16x32xf32, #tpu.memory_space<vmem>>, vector<16x32xf32>
    tpu.vector_store %arg12[%c0_125, %c0_126], %371 {strides = array<i32>} : memref<16x32xf32, #tpu.memory_space<vmem>>, vector<16x32xf32>,
    %c0_127 = arith.constant 0 : index
    %c0_128 = arith.constant 0 : index
    %387 = vector.load %arg13[%c0_127, %c0_128] : memref<16x32xf32, #tpu.memory_space<vmem>>, vector<16x32xf32>
    tpu.vector_store %arg13[%c0_127, %c0_128], %369 {strides = array<i32>} : memref<16x32xf32, #tpu.memory_space<vmem>>, vector<16x32xf32>,
    return
  }
  func.func @transform_0(%arg0: i32, %arg1: i32, %arg2: i32) -> (i32, i32, i32, i32) {
    %c0_i32 = arith.constant 0 : i32
    %c0_i32_0 = arith.constant 0 : i32
    return %arg0, %arg2, %arg1, %c0_i32 : i32, i32, i32, i32
  }
  func.func @transform_4(%arg0: i32, %arg1: i32, %arg2: i32) -> (i32, i32) {
    %c0_i32 = arith.constant 0 : i32
    %c0_i32_0 = arith.constant 0 : i32
    return %arg1, %c0_i32 : i32, i32
  }
  func.func @transform_5(%arg0: i32, %arg1: i32, %arg2: i32) -> (i32, i32, i32, i32) {
    %c0_i32 = arith.constant 0 : i32
    %c0_i32_0 = arith.constant 0 : i32
    return %arg0, %arg2, %arg1, %c0_i32 : i32, i32, i32, i32
  }
}

module attributes {stable_mosaic.version = 11 : i64} {
  func.func @_lstm_layer_kernel(%arg0: i32, %arg1: i32, %arg2: i32, %arg3: memref<1x8x16x64xbf16, #tpu.memory_space<vmem>>, %arg4: memref<1x64x128xbf16, #tpu.memory_space<any>>, %arg5: memref<1x32x128xbf16, #tpu.memory_space<any>>, %arg6: memref<1x1x128xf32, #tpu.memory_space<any>>, %arg7: memref<1x8x16x32xbf16, #tpu.memory_space<vmem>>, %arg8: memref<64x128xbf16, #tpu.memory_space<vmem>>, %arg9: memref<32x128xbf16, #tpu.memory_space<vmem>>, %arg10: memref<1x128xf32, #tpu.memory_space<vmem>>, %arg11: memref<16x32xf32, #tpu.memory_space<vmem>>, %arg12: memref<16x32xf32, #tpu.memory_space<vmem>>) attributes {dimension_semantics = [#tpu.dimension_semantics<parallel>, #tpu.dimension_semantics<parallel>, #tpu.dimension_semantics<arbitrary>], iteration_bounds = array<i64: 1, 1, 1>, scalar_prefetch = 0 : i64, scratch_operands = 5 : i64, tpu.core_type = #tpu.core_type<tc>, window_params = [{transform_indices = @transform_0, window_bounds = array<i64: 1, 8, 16, 64>}, {}, {}, {}, {transform_indices = @transform_4, window_bounds = array<i64: 1, 8, 16, 32>}]} {
    %c0_i32 = arith.constant 0 : i32
    %0 = arith.cmpi eq, %arg2, %c0_i32 : i32
    %1 = arith.extui %0 : i1 to i32
    %c0_i32_0 = arith.constant 0 : i32
    %2 = arith.cmpi ne, %1, %c0_i32_0 : i32
    scf.if %2 {
      "tpu.region"() ({
        %310 = tpu.sem_alloc : memref<!tpu.dma_semaphore, #tpu.memory_space<semaphore_mem>>
        %c0_i32_116 = arith.constant 0 : i32
        %c0_i32_117 = arith.constant 0 : i32
        %311 = tpu.memref_slice %arg4[%arg0, %c0_i32_116, %c0_i32_117] : memref<1x64x128xbf16, #tpu.memory_space<any>> -> memref<1x64x128xbf16, #tpu.memory_space<any>>
        %312 = tpu.memref_squeeze %311 : memref<1x64x128xbf16, #tpu.memory_space<any>> -> memref<64x128xbf16, #tpu.memory_space<any>>
        tpu.enqueue_dma source(%312 : memref<64x128xbf16, #tpu.memory_space<any>>) target(%arg8 : memref<64x128xbf16, #tpu.memory_space<vmem>>) target_semaphore(%310 : memref<!tpu.dma_semaphore, #tpu.memory_space<semaphore_mem>>)
        %c0_i32_118 = arith.constant 0 : i32
        %c0_i32_119 = arith.constant 0 : i32
        %313 = tpu.memref_slice %arg4[%arg0, %c0_i32_118, %c0_i32_119] : memref<1x64x128xbf16, #tpu.memory_space<any>> -> memref<1x64x128xbf16, #tpu.memory_space<any>>
        %314 = tpu.memref_squeeze %313 : memref<1x64x128xbf16, #tpu.memory_space<any>> -> memref<64x128xbf16, #tpu.memory_space<any>>
        tpu.wait_dma2 semaphore(%310 : memref<!tpu.dma_semaphore, #tpu.memory_space<semaphore_mem>>) src(%314 : memref<64x128xbf16, #tpu.memory_space<any>>) dst(%arg8 : memref<64x128xbf16, #tpu.memory_space<vmem>>)
        tpu.yield
      }) : () -> ()
      "tpu.region"() ({
        %310 = tpu.sem_alloc : memref<!tpu.dma_semaphore, #tpu.memory_space<semaphore_mem>>
        %c0_i32_116 = arith.constant 0 : i32
        %c0_i32_117 = arith.constant 0 : i32
        %311 = tpu.memref_slice %arg5[%arg0, %c0_i32_116, %c0_i32_117] : memref<1x32x128xbf16, #tpu.memory_space<any>> -> memref<1x32x128xbf16, #tpu.memory_space<any>>
        %312 = tpu.memref_squeeze %311 : memref<1x32x128xbf16, #tpu.memory_space<any>> -> memref<32x128xbf16, #tpu.memory_space<any>>
        tpu.enqueue_dma source(%312 : memref<32x128xbf16, #tpu.memory_space<any>>) target(%arg9 : memref<32x128xbf16, #tpu.memory_space<vmem>>) target_semaphore(%310 : memref<!tpu.dma_semaphore, #tpu.memory_space<semaphore_mem>>)
        %c0_i32_118 = arith.constant 0 : i32
        %c0_i32_119 = arith.constant 0 : i32
        %313 = tpu.memref_slice %arg5[%arg0, %c0_i32_118, %c0_i32_119] : memref<1x32x128xbf16, #tpu.memory_space<any>> -> memref<1x32x128xbf16, #tpu.memory_space<any>>
        %314 = tpu.memref_squeeze %313 : memref<1x32x128xbf16, #tpu.memory_space<any>> -> memref<32x128xbf16, #tpu.memory_space<any>>
        tpu.wait_dma2 semaphore(%310 : memref<!tpu.dma_semaphore, #tpu.memory_space<semaphore_mem>>) src(%314 : memref<32x128xbf16, #tpu.memory_space<any>>) dst(%arg9 : memref<32x128xbf16, #tpu.memory_space<vmem>>)
        tpu.yield
      }) : () -> ()
      "tpu.region"() ({
        %310 = tpu.sem_alloc : memref<!tpu.dma_semaphore, #tpu.memory_space<semaphore_mem>>
        %c0_i32_116 = arith.constant 0 : i32
        %c0_i32_117 = arith.constant 0 : i32
        %311 = tpu.memref_slice %arg6[%arg0, %c0_i32_116, %c0_i32_117] : memref<1x1x128xf32, #tpu.memory_space<any>> -> memref<1x1x128xf32, #tpu.memory_space<any>>
        %312 = tpu.memref_squeeze %311 : memref<1x1x128xf32, #tpu.memory_space<any>> -> memref<1x128xf32, #tpu.memory_space<any>>
        tpu.enqueue_dma source(%312 : memref<1x128xf32, #tpu.memory_space<any>>) target(%arg10 : memref<1x128xf32, #tpu.memory_space<vmem>>) target_semaphore(%310 : memref<!tpu.dma_semaphore, #tpu.memory_space<semaphore_mem>>)
        %c0_i32_118 = arith.constant 0 : i32
        %c0_i32_119 = arith.constant 0 : i32
        %313 = tpu.memref_slice %arg6[%arg0, %c0_i32_118, %c0_i32_119] : memref<1x1x128xf32, #tpu.memory_space<any>> -> memref<1x1x128xf32, #tpu.memory_space<any>>
        %314 = tpu.memref_squeeze %313 : memref<1x1x128xf32, #tpu.memory_space<any>> -> memref<1x128xf32, #tpu.memory_space<any>>
        tpu.wait_dma2 semaphore(%310 : memref<!tpu.dma_semaphore, #tpu.memory_space<semaphore_mem>>) src(%314 : memref<1x128xf32, #tpu.memory_space<any>>) dst(%arg10 : memref<1x128xf32, #tpu.memory_space<vmem>>)
        tpu.yield
      }) : () -> ()
      %cst_110 = arith.constant 0.000000e+00 : f32
      %306 = vector.broadcast %cst_110 : f32 to vector<16x32xf32>
      %c0_111 = arith.constant 0 : index
      %c0_112 = arith.constant 0 : index
      %307 = vector.load %arg11[%c0_111, %c0_112] : memref<16x32xf32, #tpu.memory_space<vmem>>, vector<16x32xf32>
      tpu.vector_store %arg11[%c0_111, %c0_112], %306 {strides = array<i32>} : memref<16x32xf32, #tpu.memory_space<vmem>>, vector<16x32xf32>,
      %cst_113 = arith.constant 0.000000e+00 : f32
      %308 = vector.broadcast %cst_113 : f32 to vector<16x32xf32>
      %c0_114 = arith.constant 0 : index
      %c0_115 = arith.constant 0 : index
      %309 = vector.load %arg12[%c0_114, %c0_115] : memref<16x32xf32, #tpu.memory_space<vmem>>, vector<16x32xf32>
      tpu.vector_store %arg12[%c0_114, %c0_115], %308 {strides = array<i32>} : memref<16x32xf32, #tpu.memory_space<vmem>>, vector<16x32xf32>,
    } else {
    }
    %c0 = arith.constant 0 : index
    %c0_1 = arith.constant 0 : index
    %3 = vector.load %arg8[%c0, %c0_1] : memref<64x128xbf16, #tpu.memory_space<vmem>>, vector<64x128xbf16>
    %c0_2 = arith.constant 0 : index
    %c0_3 = arith.constant 0 : index
    %4 = vector.load %arg9[%c0_2, %c0_3] : memref<32x128xbf16, #tpu.memory_space<vmem>>, vector<32x128xbf16>
    %c0_4 = arith.constant 0 : index
    %c0_5 = arith.constant 0 : index
    %5 = vector.load %arg10[%c0_4, %c0_5] : memref<1x128xf32, #tpu.memory_space<vmem>>, vector<1x128xf32>
    %c0_6 = arith.constant 0 : index
    %c0_7 = arith.constant 0 : index
    %6 = vector.load %arg11[%c0_6, %c0_7] : memref<16x32xf32, #tpu.memory_space<vmem>>, vector<16x32xf32>
    %c0_8 = arith.constant 0 : index
    %c0_9 = arith.constant 0 : index
    %7 = vector.load %arg12[%c0_8, %c0_9] : memref<16x32xf32, #tpu.memory_space<vmem>>, vector<16x32xf32>
    %c0_10 = arith.constant 0 : index
    %c0_11 = arith.constant 0 : index
    %c0_12 = arith.constant 0 : index
    %c0_13 = arith.constant 0 : index
    %8 = vector.load %arg3[%c0_10, %c0_11, %c0_12, %c0_13] : memref<1x8x16x64xbf16, #tpu.memory_space<vmem>>, vector<1x1x16x64xbf16>
    %9 = vector.shape_cast %8 : vector<1x1x16x64xbf16> to vector<16x64xbf16>
    %cst = arith.constant dense<0.000000e+00> : vector<16x128xf32>
    %10 = tpu.matmul %9, %3, %cst {dimension_numbers = #tpu.dot_dimension_numbers<[1], [0], [0], [1], [0, 0, 1, 1], [], []>} : vector<16x64xbf16>, vector<64x128xbf16>, vector<16x128xf32> -> vector<16x128xf32>
    %11 = arith.truncf %6 : vector<16x32xf32> to vector<16x32xbf16>
    %cst_14 = arith.constant dense<0.000000e+00> : vector<16x128xf32>
    %12 = tpu.matmul %11, %4, %cst_14 {dimension_numbers = #tpu.dot_dimension_numbers<[1], [0], [0], [1], [0, 0, 1, 1], [], []>} : vector<16x32xbf16>, vector<32x128xbf16>, vector<16x128xf32> -> vector<16x128xf32>
    %13 = arith.addf %10, %12 : vector<16x128xf32>
    %14 = vector.broadcast %5 : vector<1x128xf32> to vector<16x128xf32>
    %15 = arith.addf %13, %14 : vector<16x128xf32>
    %16 = vector.extract_strided_slice %15 {offsets = [0, 0], sizes = [16, 32], strides = [1, 1]} : vector<16x128xf32> to vector<16x32xf32>
    %17 = arith.negf %16 : vector<16x32xf32>
    %18 = math.exp %17 : vector<16x32xf32>
    %cst_15 = arith.constant 1.000000e+00 : f32
    %19 = vector.broadcast %cst_15 : f32 to vector<16x32xf32>
    %20 = arith.addf %19, %18 : vector<16x32xf32>
    %21 = arith.divf %19, %20 : vector<16x32xf32>
    %22 = vector.extract_strided_slice %15 {offsets = [0, 32], sizes = [16, 32], strides = [1, 1]} : vector<16x128xf32> to vector<16x32xf32>
    %23 = arith.negf %22 : vector<16x32xf32>
    %24 = math.exp %23 : vector<16x32xf32>
    %cst_16 = arith.constant 1.000000e+00 : f32
    %25 = vector.broadcast %cst_16 : f32 to vector<16x32xf32>
    %26 = arith.addf %25, %24 : vector<16x32xf32>
    %27 = arith.divf %25, %26 : vector<16x32xf32>
    %28 = vector.extract_strided_slice %15 {offsets = [0, 64], sizes = [16, 32], strides = [1, 1]} : vector<16x128xf32> to vector<16x32xf32>
    %29 = math.tanh %28 : vector<16x32xf32>
    %30 = vector.extract_strided_slice %15 {offsets = [0, 96], sizes = [16, 32], strides = [1, 1]} : vector<16x128xf32> to vector<16x32xf32>
    %31 = arith.negf %30 : vector<16x32xf32>
    %32 = math.exp %31 : vector<16x32xf32>
    %cst_17 = arith.constant 1.000000e+00 : f32
    %33 = vector.broadcast %cst_17 : f32 to vector<16x32xf32>
    %34 = arith.addf %33, %32 : vector<16x32xf32>
    %35 = arith.divf %33, %34 : vector<16x32xf32>
    %36 = arith.mulf %27, %7 : vector<16x32xf32>
    %37 = arith.mulf %21, %29 : vector<16x32xf32>
    %38 = arith.addf %36, %37 : vector<16x32xf32>
    %39 = math.tanh %38 : vector<16x32xf32>
    %40 = arith.mulf %35, %39 : vector<16x32xf32>
    %41 = arith.truncf %40 : vector<16x32xf32> to vector<16x32xbf16>
    %c0_18 = arith.constant 0 : index
    %c0_19 = arith.constant 0 : index
    %c0_20 = arith.constant 0 : index
    %c0_21 = arith.constant 0 : index
    %42 = vector.load %arg7[%c0_18, %c0_19, %c0_20, %c0_21] : memref<1x8x16x32xbf16, #tpu.memory_space<vmem>>, vector<1x1x16x32xbf16>
    %43 = vector.shape_cast %42 : vector<1x1x16x32xbf16> to vector<16x32xbf16>
    %44 = vector.shape_cast %41 : vector<16x32xbf16> to vector<1x1x16x32xbf16>
    tpu.vector_store %arg7[%c0_18, %c0_19, %c0_20, %c0_21], %44 {strides = array<i32>} : memref<1x8x16x32xbf16, #tpu.memory_space<vmem>>, vector<1x1x16x32xbf16>,
    %c0_22 = arith.constant 0 : index
    %c1 = arith.constant 1 : index
    %c0_23 = arith.constant 0 : index
    %c0_24 = arith.constant 0 : index
    %45 = vector.load %arg3[%c0_22, %c1, %c0_23, %c0_24] : memref<1x8x16x64xbf16, #tpu.memory_space<vmem>>, vector<1x1x16x64xbf16>
    %46 = vector.shape_cast %45 : vector<1x1x16x64xbf16> to vector<16x64xbf16>
    %cst_25 = arith.constant dense<0.000000e+00> : vector<16x128xf32>
    %47 = tpu.matmul %46, %3, %cst_25 {dimension_numbers = #tpu.dot_dimension_numbers<[1], [0], [0], [1], [0, 0, 1, 1], [], []>} : vector<16x64xbf16>, vector<64x128xbf16>, vector<16x128xf32> -> vector<16x128xf32>
    %48 = arith.truncf %40 : vector<16x32xf32> to vector<16x32xbf16>
    %cst_26 = arith.constant dense<0.000000e+00> : vector<16x128xf32>
    %49 = tpu.matmul %48, %4, %cst_26 {dimension_numbers = #tpu.dot_dimension_numbers<[1], [0], [0], [1], [0, 0, 1, 1], [], []>} : vector<16x32xbf16>, vector<32x128xbf16>, vector<16x128xf32> -> vector<16x128xf32>
    %50 = arith.addf %47, %49 : vector<16x128xf32>
    %51 = vector.broadcast %5 : vector<1x128xf32> to vector<16x128xf32>
    %52 = arith.addf %50, %51 : vector<16x128xf32>
    %53 = vector.extract_strided_slice %52 {offsets = [0, 0], sizes = [16, 32], strides = [1, 1]} : vector<16x128xf32> to vector<16x32xf32>
    %54 = arith.negf %53 : vector<16x32xf32>
    %55 = math.exp %54 : vector<16x32xf32>
    %cst_27 = arith.constant 1.000000e+00 : f32
    %56 = vector.broadcast %cst_27 : f32 to vector<16x32xf32>
    %57 = arith.addf %56, %55 : vector<16x32xf32>
    %58 = arith.divf %56, %57 : vector<16x32xf32>
    %59 = vector.extract_strided_slice %52 {offsets = [0, 32], sizes = [16, 32], strides = [1, 1]} : vector<16x128xf32> to vector<16x32xf32>
    %60 = arith.negf %59 : vector<16x32xf32>
    %61 = math.exp %60 : vector<16x32xf32>
    %cst_28 = arith.constant 1.000000e+00 : f32
    %62 = vector.broadcast %cst_28 : f32 to vector<16x32xf32>
    %63 = arith.addf %62, %61 : vector<16x32xf32>
    %64 = arith.divf %62, %63 : vector<16x32xf32>
    %65 = vector.extract_strided_slice %52 {offsets = [0, 64], sizes = [16, 32], strides = [1, 1]} : vector<16x128xf32> to vector<16x32xf32>
    %66 = math.tanh %65 : vector<16x32xf32>
    %67 = vector.extract_strided_slice %52 {offsets = [0, 96], sizes = [16, 32], strides = [1, 1]} : vector<16x128xf32> to vector<16x32xf32>
    %68 = arith.negf %67 : vector<16x32xf32>
    %69 = math.exp %68 : vector<16x32xf32>
    %cst_29 = arith.constant 1.000000e+00 : f32
    %70 = vector.broadcast %cst_29 : f32 to vector<16x32xf32>
    %71 = arith.addf %70, %69 : vector<16x32xf32>
    %72 = arith.divf %70, %71 : vector<16x32xf32>
    %73 = arith.mulf %64, %38 : vector<16x32xf32>
    %74 = arith.mulf %58, %66 : vector<16x32xf32>
    %75 = arith.addf %73, %74 : vector<16x32xf32>
    %76 = math.tanh %75 : vector<16x32xf32>
    %77 = arith.mulf %72, %76 : vector<16x32xf32>
    %78 = arith.truncf %77 : vector<16x32xf32> to vector<16x32xbf16>
    %c0_30 = arith.constant 0 : index
    %c1_31 = arith.constant 1 : index
    %c0_32 = arith.constant 0 : index
    %c0_33 = arith.constant 0 : index
    %79 = vector.load %arg7[%c0_30, %c1_31, %c0_32, %c0_33] : memref<1x8x16x32xbf16, #tpu.memory_space<vmem>>, vector<1x1x16x32xbf16>
    %80 = vector.shape_cast %79 : vector<1x1x16x32xbf16> to vector<16x32xbf16>
    %81 = vector.shape_cast %78 : vector<16x32xbf16> to vector<1x1x16x32xbf16>
    tpu.vector_store %arg7[%c0_30, %c1_31, %c0_32, %c0_33], %81 {strides = array<i32>} : memref<1x8x16x32xbf16, #tpu.memory_space<vmem>>, vector<1x1x16x32xbf16>,
    %c0_34 = arith.constant 0 : index
    %c2 = arith.constant 2 : index
    %c0_35 = arith.constant 0 : index
    %c0_36 = arith.constant 0 : index
    %82 = vector.load %arg3[%c0_34, %c2, %c0_35, %c0_36] : memref<1x8x16x64xbf16, #tpu.memory_space<vmem>>, vector<1x1x16x64xbf16>
    %83 = vector.shape_cast %82 : vector<1x1x16x64xbf16> to vector<16x64xbf16>
    %cst_37 = arith.constant dense<0.000000e+00> : vector<16x128xf32>
    %84 = tpu.matmul %83, %3, %cst_37 {dimension_numbers = #tpu.dot_dimension_numbers<[1], [0], [0], [1], [0, 0, 1, 1], [], []>} : vector<16x64xbf16>, vector<64x128xbf16>, vector<16x128xf32> -> vector<16x128xf32>
    %85 = arith.truncf %77 : vector<16x32xf32> to vector<16x32xbf16>
    %cst_38 = arith.constant dense<0.000000e+00> : vector<16x128xf32>
    %86 = tpu.matmul %85, %4, %cst_38 {dimension_numbers = #tpu.dot_dimension_numbers<[1], [0], [0], [1], [0, 0, 1, 1], [], []>} : vector<16x32xbf16>, vector<32x128xbf16>, vector<16x128xf32> -> vector<16x128xf32>
    %87 = arith.addf %84, %86 : vector<16x128xf32>
    %88 = vector.broadcast %5 : vector<1x128xf32> to vector<16x128xf32>
    %89 = arith.addf %87, %88 : vector<16x128xf32>
    %90 = vector.extract_strided_slice %89 {offsets = [0, 0], sizes = [16, 32], strides = [1, 1]} : vector<16x128xf32> to vector<16x32xf32>
    %91 = arith.negf %90 : vector<16x32xf32>
    %92 = math.exp %91 : vector<16x32xf32>
    %cst_39 = arith.constant 1.000000e+00 : f32
    %93 = vector.broadcast %cst_39 : f32 to vector<16x32xf32>
    %94 = arith.addf %93, %92 : vector<16x32xf32>
    %95 = arith.divf %93, %94 : vector<16x32xf32>
    %96 = vector.extract_strided_slice %89 {offsets = [0, 32], sizes = [16, 32], strides = [1, 1]} : vector<16x128xf32> to vector<16x32xf32>
    %97 = arith.negf %96 : vector<16x32xf32>
    %98 = math.exp %97 : vector<16x32xf32>
    %cst_40 = arith.constant 1.000000e+00 : f32
    %99 = vector.broadcast %cst_40 : f32 to vector<16x32xf32>
    %100 = arith.addf %99, %98 : vector<16x32xf32>
    %101 = arith.divf %99, %100 : vector<16x32xf32>
    %102 = vector.extract_strided_slice %89 {offsets = [0, 64], sizes = [16, 32], strides = [1, 1]} : vector<16x128xf32> to vector<16x32xf32>
    %103 = math.tanh %102 : vector<16x32xf32>
    %104 = vector.extract_strided_slice %89 {offsets = [0, 96], sizes = [16, 32], strides = [1, 1]} : vector<16x128xf32> to vector<16x32xf32>
    %105 = arith.negf %104 : vector<16x32xf32>
    %106 = math.exp %105 : vector<16x32xf32>
    %cst_41 = arith.constant 1.000000e+00 : f32
    %107 = vector.broadcast %cst_41 : f32 to vector<16x32xf32>
    %108 = arith.addf %107, %106 : vector<16x32xf32>
    %109 = arith.divf %107, %108 : vector<16x32xf32>
    %110 = arith.mulf %101, %75 : vector<16x32xf32>
    %111 = arith.mulf %95, %103 : vector<16x32xf32>
    %112 = arith.addf %110, %111 : vector<16x32xf32>
    %113 = math.tanh %112 : vector<16x32xf32>
    %114 = arith.mulf %109, %113 : vector<16x32xf32>
    %115 = arith.truncf %114 : vector<16x32xf32> to vector<16x32xbf16>
    %c0_42 = arith.constant 0 : index
    %c2_43 = arith.constant 2 : index
    %c0_44 = arith.constant 0 : index
    %c0_45 = arith.constant 0 : index
    %116 = vector.load %arg7[%c0_42, %c2_43, %c0_44, %c0_45] : memref<1x8x16x32xbf16, #tpu.memory_space<vmem>>, vector<1x1x16x32xbf16>
    %117 = vector.shape_cast %116 : vector<1x1x16x32xbf16> to vector<16x32xbf16>
    %118 = vector.shape_cast %115 : vector<16x32xbf16> to vector<1x1x16x32xbf16>
    tpu.vector_store %arg7[%c0_42, %c2_43, %c0_44, %c0_45], %118 {strides = array<i32>} : memref<1x8x16x32xbf16, #tpu.memory_space<vmem>>, vector<1x1x16x32xbf16>,
    %c0_46 = arith.constant 0 : index
    %c3 = arith.constant 3 : index
    %c0_47 = arith.constant 0 : index
    %c0_48 = arith.constant 0 : index
    %119 = vector.load %arg3[%c0_46, %c3, %c0_47, %c0_48] : memref<1x8x16x64xbf16, #tpu.memory_space<vmem>>, vector<1x1x16x64xbf16>
    %120 = vector.shape_cast %119 : vector<1x1x16x64xbf16> to vector<16x64xbf16>
    %cst_49 = arith.constant dense<0.000000e+00> : vector<16x128xf32>
    %121 = tpu.matmul %120, %3, %cst_49 {dimension_numbers = #tpu.dot_dimension_numbers<[1], [0], [0], [1], [0, 0, 1, 1], [], []>} : vector<16x64xbf16>, vector<64x128xbf16>, vector<16x128xf32> -> vector<16x128xf32>
    %122 = arith.truncf %114 : vector<16x32xf32> to vector<16x32xbf16>
    %cst_50 = arith.constant dense<0.000000e+00> : vector<16x128xf32>
    %123 = tpu.matmul %122, %4, %cst_50 {dimension_numbers = #tpu.dot_dimension_numbers<[1], [0], [0], [1], [0, 0, 1, 1], [], []>} : vector<16x32xbf16>, vector<32x128xbf16>, vector<16x128xf32> -> vector<16x128xf32>
    %124 = arith.addf %121, %123 : vector<16x128xf32>
    %125 = vector.broadcast %5 : vector<1x128xf32> to vector<16x128xf32>
    %126 = arith.addf %124, %125 : vector<16x128xf32>
    %127 = vector.extract_strided_slice %126 {offsets = [0, 0], sizes = [16, 32], strides = [1, 1]} : vector<16x128xf32> to vector<16x32xf32>
    %128 = arith.negf %127 : vector<16x32xf32>
    %129 = math.exp %128 : vector<16x32xf32>
    %cst_51 = arith.constant 1.000000e+00 : f32
    %130 = vector.broadcast %cst_51 : f32 to vector<16x32xf32>
    %131 = arith.addf %130, %129 : vector<16x32xf32>
    %132 = arith.divf %130, %131 : vector<16x32xf32>
    %133 = vector.extract_strided_slice %126 {offsets = [0, 32], sizes = [16, 32], strides = [1, 1]} : vector<16x128xf32> to vector<16x32xf32>
    %134 = arith.negf %133 : vector<16x32xf32>
    %135 = math.exp %134 : vector<16x32xf32>
    %cst_52 = arith.constant 1.000000e+00 : f32
    %136 = vector.broadcast %cst_52 : f32 to vector<16x32xf32>
    %137 = arith.addf %136, %135 : vector<16x32xf32>
    %138 = arith.divf %136, %137 : vector<16x32xf32>
    %139 = vector.extract_strided_slice %126 {offsets = [0, 64], sizes = [16, 32], strides = [1, 1]} : vector<16x128xf32> to vector<16x32xf32>
    %140 = math.tanh %139 : vector<16x32xf32>
    %141 = vector.extract_strided_slice %126 {offsets = [0, 96], sizes = [16, 32], strides = [1, 1]} : vector<16x128xf32> to vector<16x32xf32>
    %142 = arith.negf %141 : vector<16x32xf32>
    %143 = math.exp %142 : vector<16x32xf32>
    %cst_53 = arith.constant 1.000000e+00 : f32
    %144 = vector.broadcast %cst_53 : f32 to vector<16x32xf32>
    %145 = arith.addf %144, %143 : vector<16x32xf32>
    %146 = arith.divf %144, %145 : vector<16x32xf32>
    %147 = arith.mulf %138, %112 : vector<16x32xf32>
    %148 = arith.mulf %132, %140 : vector<16x32xf32>
    %149 = arith.addf %147, %148 : vector<16x32xf32>
    %150 = math.tanh %149 : vector<16x32xf32>
    %151 = arith.mulf %146, %150 : vector<16x32xf32>
    %152 = arith.truncf %151 : vector<16x32xf32> to vector<16x32xbf16>
    %c0_54 = arith.constant 0 : index
    %c3_55 = arith.constant 3 : index
    %c0_56 = arith.constant 0 : index
    %c0_57 = arith.constant 0 : index
    %153 = vector.load %arg7[%c0_54, %c3_55, %c0_56, %c0_57] : memref<1x8x16x32xbf16, #tpu.memory_space<vmem>>, vector<1x1x16x32xbf16>
    %154 = vector.shape_cast %153 : vector<1x1x16x32xbf16> to vector<16x32xbf16>
    %155 = vector.shape_cast %152 : vector<16x32xbf16> to vector<1x1x16x32xbf16>
    tpu.vector_store %arg7[%c0_54, %c3_55, %c0_56, %c0_57], %155 {strides = array<i32>} : memref<1x8x16x32xbf16, #tpu.memory_space<vmem>>, vector<1x1x16x32xbf16>,
    %c0_58 = arith.constant 0 : index
    %c4 = arith.constant 4 : index
    %c0_59 = arith.constant 0 : index
    %c0_60 = arith.constant 0 : index
    %156 = vector.load %arg3[%c0_58, %c4, %c0_59, %c0_60] : memref<1x8x16x64xbf16, #tpu.memory_space<vmem>>, vector<1x1x16x64xbf16>
    %157 = vector.shape_cast %156 : vector<1x1x16x64xbf16> to vector<16x64xbf16>
    %cst_61 = arith.constant dense<0.000000e+00> : vector<16x128xf32>
    %158 = tpu.matmul %157, %3, %cst_61 {dimension_numbers = #tpu.dot_dimension_numbers<[1], [0], [0], [1], [0, 0, 1, 1], [], []>} : vector<16x64xbf16>, vector<64x128xbf16>, vector<16x128xf32> -> vector<16x128xf32>
    %159 = arith.truncf %151 : vector<16x32xf32> to vector<16x32xbf16>
    %cst_62 = arith.constant dense<0.000000e+00> : vector<16x128xf32>
    %160 = tpu.matmul %159, %4, %cst_62 {dimension_numbers = #tpu.dot_dimension_numbers<[1], [0], [0], [1], [0, 0, 1, 1], [], []>} : vector<16x32xbf16>, vector<32x128xbf16>, vector<16x128xf32> -> vector<16x128xf32>
    %161 = arith.addf %158, %160 : vector<16x128xf32>
    %162 = vector.broadcast %5 : vector<1x128xf32> to vector<16x128xf32>
    %163 = arith.addf %161, %162 : vector<16x128xf32>
    %164 = vector.extract_strided_slice %163 {offsets = [0, 0], sizes = [16, 32], strides = [1, 1]} : vector<16x128xf32> to vector<16x32xf32>
    %165 = arith.negf %164 : vector<16x32xf32>
    %166 = math.exp %165 : vector<16x32xf32>
    %cst_63 = arith.constant 1.000000e+00 : f32
    %167 = vector.broadcast %cst_63 : f32 to vector<16x32xf32>
    %168 = arith.addf %167, %166 : vector<16x32xf32>
    %169 = arith.divf %167, %168 : vector<16x32xf32>
    %170 = vector.extract_strided_slice %163 {offsets = [0, 32], sizes = [16, 32], strides = [1, 1]} : vector<16x128xf32> to vector<16x32xf32>
    %171 = arith.negf %170 : vector<16x32xf32>
    %172 = math.exp %171 : vector<16x32xf32>
    %cst_64 = arith.constant 1.000000e+00 : f32
    %173 = vector.broadcast %cst_64 : f32 to vector<16x32xf32>
    %174 = arith.addf %173, %172 : vector<16x32xf32>
    %175 = arith.divf %173, %174 : vector<16x32xf32>
    %176 = vector.extract_strided_slice %163 {offsets = [0, 64], sizes = [16, 32], strides = [1, 1]} : vector<16x128xf32> to vector<16x32xf32>
    %177 = math.tanh %176 : vector<16x32xf32>
    %178 = vector.extract_strided_slice %163 {offsets = [0, 96], sizes = [16, 32], strides = [1, 1]} : vector<16x128xf32> to vector<16x32xf32>
    %179 = arith.negf %178 : vector<16x32xf32>
    %180 = math.exp %179 : vector<16x32xf32>
    %cst_65 = arith.constant 1.000000e+00 : f32
    %181 = vector.broadcast %cst_65 : f32 to vector<16x32xf32>
    %182 = arith.addf %181, %180 : vector<16x32xf32>
    %183 = arith.divf %181, %182 : vector<16x32xf32>
    %184 = arith.mulf %175, %149 : vector<16x32xf32>
    %185 = arith.mulf %169, %177 : vector<16x32xf32>
    %186 = arith.addf %184, %185 : vector<16x32xf32>
    %187 = math.tanh %186 : vector<16x32xf32>
    %188 = arith.mulf %183, %187 : vector<16x32xf32>
    %189 = arith.truncf %188 : vector<16x32xf32> to vector<16x32xbf16>
    %c0_66 = arith.constant 0 : index
    %c4_67 = arith.constant 4 : index
    %c0_68 = arith.constant 0 : index
    %c0_69 = arith.constant 0 : index
    %190 = vector.load %arg7[%c0_66, %c4_67, %c0_68, %c0_69] : memref<1x8x16x32xbf16, #tpu.memory_space<vmem>>, vector<1x1x16x32xbf16>
    %191 = vector.shape_cast %190 : vector<1x1x16x32xbf16> to vector<16x32xbf16>
    %192 = vector.shape_cast %189 : vector<16x32xbf16> to vector<1x1x16x32xbf16>
    tpu.vector_store %arg7[%c0_66, %c4_67, %c0_68, %c0_69], %192 {strides = array<i32>} : memref<1x8x16x32xbf16, #tpu.memory_space<vmem>>, vector<1x1x16x32xbf16>,
    %c0_70 = arith.constant 0 : index
    %c5 = arith.constant 5 : index
    %c0_71 = arith.constant 0 : index
    %c0_72 = arith.constant 0 : index
    %193 = vector.load %arg3[%c0_70, %c5, %c0_71, %c0_72] : memref<1x8x16x64xbf16, #tpu.memory_space<vmem>>, vector<1x1x16x64xbf16>
    %194 = vector.shape_cast %193 : vector<1x1x16x64xbf16> to vector<16x64xbf16>
    %cst_73 = arith.constant dense<0.000000e+00> : vector<16x128xf32>
    %195 = tpu.matmul %194, %3, %cst_73 {dimension_numbers = #tpu.dot_dimension_numbers<[1], [0], [0], [1], [0, 0, 1, 1], [], []>} : vector<16x64xbf16>, vector<64x128xbf16>, vector<16x128xf32> -> vector<16x128xf32>
    %196 = arith.truncf %188 : vector<16x32xf32> to vector<16x32xbf16>
    %cst_74 = arith.constant dense<0.000000e+00> : vector<16x128xf32>
    %197 = tpu.matmul %196, %4, %cst_74 {dimension_numbers = #tpu.dot_dimension_numbers<[1], [0], [0], [1], [0, 0, 1, 1], [], []>} : vector<16x32xbf16>, vector<32x128xbf16>, vector<16x128xf32> -> vector<16x128xf32>
    %198 = arith.addf %195, %197 : vector<16x128xf32>
    %199 = vector.broadcast %5 : vector<1x128xf32> to vector<16x128xf32>
    %200 = arith.addf %198, %199 : vector<16x128xf32>
    %201 = vector.extract_strided_slice %200 {offsets = [0, 0], sizes = [16, 32], strides = [1, 1]} : vector<16x128xf32> to vector<16x32xf32>
    %202 = arith.negf %201 : vector<16x32xf32>
    %203 = math.exp %202 : vector<16x32xf32>
    %cst_75 = arith.constant 1.000000e+00 : f32
    %204 = vector.broadcast %cst_75 : f32 to vector<16x32xf32>
    %205 = arith.addf %204, %203 : vector<16x32xf32>
    %206 = arith.divf %204, %205 : vector<16x32xf32>
    %207 = vector.extract_strided_slice %200 {offsets = [0, 32], sizes = [16, 32], strides = [1, 1]} : vector<16x128xf32> to vector<16x32xf32>
    %208 = arith.negf %207 : vector<16x32xf32>
    %209 = math.exp %208 : vector<16x32xf32>
    %cst_76 = arith.constant 1.000000e+00 : f32
    %210 = vector.broadcast %cst_76 : f32 to vector<16x32xf32>
    %211 = arith.addf %210, %209 : vector<16x32xf32>
    %212 = arith.divf %210, %211 : vector<16x32xf32>
    %213 = vector.extract_strided_slice %200 {offsets = [0, 64], sizes = [16, 32], strides = [1, 1]} : vector<16x128xf32> to vector<16x32xf32>
    %214 = math.tanh %213 : vector<16x32xf32>
    %215 = vector.extract_strided_slice %200 {offsets = [0, 96], sizes = [16, 32], strides = [1, 1]} : vector<16x128xf32> to vector<16x32xf32>
    %216 = arith.negf %215 : vector<16x32xf32>
    %217 = math.exp %216 : vector<16x32xf32>
    %cst_77 = arith.constant 1.000000e+00 : f32
    %218 = vector.broadcast %cst_77 : f32 to vector<16x32xf32>
    %219 = arith.addf %218, %217 : vector<16x32xf32>
    %220 = arith.divf %218, %219 : vector<16x32xf32>
    %221 = arith.mulf %212, %186 : vector<16x32xf32>
    %222 = arith.mulf %206, %214 : vector<16x32xf32>
    %223 = arith.addf %221, %222 : vector<16x32xf32>
    %224 = math.tanh %223 : vector<16x32xf32>
    %225 = arith.mulf %220, %224 : vector<16x32xf32>
    %226 = arith.truncf %225 : vector<16x32xf32> to vector<16x32xbf16>
    %c0_78 = arith.constant 0 : index
    %c5_79 = arith.constant 5 : index
    %c0_80 = arith.constant 0 : index
    %c0_81 = arith.constant 0 : index
    %227 = vector.load %arg7[%c0_78, %c5_79, %c0_80, %c0_81] : memref<1x8x16x32xbf16, #tpu.memory_space<vmem>>, vector<1x1x16x32xbf16>
    %228 = vector.shape_cast %227 : vector<1x1x16x32xbf16> to vector<16x32xbf16>
    %229 = vector.shape_cast %226 : vector<16x32xbf16> to vector<1x1x16x32xbf16>
    tpu.vector_store %arg7[%c0_78, %c5_79, %c0_80, %c0_81], %229 {strides = array<i32>} : memref<1x8x16x32xbf16, #tpu.memory_space<vmem>>, vector<1x1x16x32xbf16>,
    %c0_82 = arith.constant 0 : index
    %c6 = arith.constant 6 : index
    %c0_83 = arith.constant 0 : index
    %c0_84 = arith.constant 0 : index
    %230 = vector.load %arg3[%c0_82, %c6, %c0_83, %c0_84] : memref<1x8x16x64xbf16, #tpu.memory_space<vmem>>, vector<1x1x16x64xbf16>
    %231 = vector.shape_cast %230 : vector<1x1x16x64xbf16> to vector<16x64xbf16>
    %cst_85 = arith.constant dense<0.000000e+00> : vector<16x128xf32>
    %232 = tpu.matmul %231, %3, %cst_85 {dimension_numbers = #tpu.dot_dimension_numbers<[1], [0], [0], [1], [0, 0, 1, 1], [], []>} : vector<16x64xbf16>, vector<64x128xbf16>, vector<16x128xf32> -> vector<16x128xf32>
    %233 = arith.truncf %225 : vector<16x32xf32> to vector<16x32xbf16>
    %cst_86 = arith.constant dense<0.000000e+00> : vector<16x128xf32>
    %234 = tpu.matmul %233, %4, %cst_86 {dimension_numbers = #tpu.dot_dimension_numbers<[1], [0], [0], [1], [0, 0, 1, 1], [], []>} : vector<16x32xbf16>, vector<32x128xbf16>, vector<16x128xf32> -> vector<16x128xf32>
    %235 = arith.addf %232, %234 : vector<16x128xf32>
    %236 = vector.broadcast %5 : vector<1x128xf32> to vector<16x128xf32>
    %237 = arith.addf %235, %236 : vector<16x128xf32>
    %238 = vector.extract_strided_slice %237 {offsets = [0, 0], sizes = [16, 32], strides = [1, 1]} : vector<16x128xf32> to vector<16x32xf32>
    %239 = arith.negf %238 : vector<16x32xf32>
    %240 = math.exp %239 : vector<16x32xf32>
    %cst_87 = arith.constant 1.000000e+00 : f32
    %241 = vector.broadcast %cst_87 : f32 to vector<16x32xf32>
    %242 = arith.addf %241, %240 : vector<16x32xf32>
    %243 = arith.divf %241, %242 : vector<16x32xf32>
    %244 = vector.extract_strided_slice %237 {offsets = [0, 32], sizes = [16, 32], strides = [1, 1]} : vector<16x128xf32> to vector<16x32xf32>
    %245 = arith.negf %244 : vector<16x32xf32>
    %246 = math.exp %245 : vector<16x32xf32>
    %cst_88 = arith.constant 1.000000e+00 : f32
    %247 = vector.broadcast %cst_88 : f32 to vector<16x32xf32>
    %248 = arith.addf %247, %246 : vector<16x32xf32>
    %249 = arith.divf %247, %248 : vector<16x32xf32>
    %250 = vector.extract_strided_slice %237 {offsets = [0, 64], sizes = [16, 32], strides = [1, 1]} : vector<16x128xf32> to vector<16x32xf32>
    %251 = math.tanh %250 : vector<16x32xf32>
    %252 = vector.extract_strided_slice %237 {offsets = [0, 96], sizes = [16, 32], strides = [1, 1]} : vector<16x128xf32> to vector<16x32xf32>
    %253 = arith.negf %252 : vector<16x32xf32>
    %254 = math.exp %253 : vector<16x32xf32>
    %cst_89 = arith.constant 1.000000e+00 : f32
    %255 = vector.broadcast %cst_89 : f32 to vector<16x32xf32>
    %256 = arith.addf %255, %254 : vector<16x32xf32>
    %257 = arith.divf %255, %256 : vector<16x32xf32>
    %258 = arith.mulf %249, %223 : vector<16x32xf32>
    %259 = arith.mulf %243, %251 : vector<16x32xf32>
    %260 = arith.addf %258, %259 : vector<16x32xf32>
    %261 = math.tanh %260 : vector<16x32xf32>
    %262 = arith.mulf %257, %261 : vector<16x32xf32>
    %263 = arith.truncf %262 : vector<16x32xf32> to vector<16x32xbf16>
    %c0_90 = arith.constant 0 : index
    %c6_91 = arith.constant 6 : index
    %c0_92 = arith.constant 0 : index
    %c0_93 = arith.constant 0 : index
    %264 = vector.load %arg7[%c0_90, %c6_91, %c0_92, %c0_93] : memref<1x8x16x32xbf16, #tpu.memory_space<vmem>>, vector<1x1x16x32xbf16>
    %265 = vector.shape_cast %264 : vector<1x1x16x32xbf16> to vector<16x32xbf16>
    %266 = vector.shape_cast %263 : vector<16x32xbf16> to vector<1x1x16x32xbf16>
    tpu.vector_store %arg7[%c0_90, %c6_91, %c0_92, %c0_93], %266 {strides = array<i32>} : memref<1x8x16x32xbf16, #tpu.memory_space<vmem>>, vector<1x1x16x32xbf16>,
    %c0_94 = arith.constant 0 : index
    %c7 = arith.constant 7 : index
    %c0_95 = arith.constant 0 : index
    %c0_96 = arith.constant 0 : index
    %267 = vector.load %arg3[%c0_94, %c7, %c0_95, %c0_96] : memref<1x8x16x64xbf16, #tpu.memory_space<vmem>>, vector<1x1x16x64xbf16>
    %268 = vector.shape_cast %267 : vector<1x1x16x64xbf16> to vector<16x64xbf16>
    %cst_97 = arith.constant dense<0.000000e+00> : vector<16x128xf32>
    %269 = tpu.matmul %268, %3, %cst_97 {dimension_numbers = #tpu.dot_dimension_numbers<[1], [0], [0], [1], [0, 0, 1, 1], [], []>} : vector<16x64xbf16>, vector<64x128xbf16>, vector<16x128xf32> -> vector<16x128xf32>
    %270 = arith.truncf %262 : vector<16x32xf32> to vector<16x32xbf16>
    %cst_98 = arith.constant dense<0.000000e+00> : vector<16x128xf32>
    %271 = tpu.matmul %270, %4, %cst_98 {dimension_numbers = #tpu.dot_dimension_numbers<[1], [0], [0], [1], [0, 0, 1, 1], [], []>} : vector<16x32xbf16>, vector<32x128xbf16>, vector<16x128xf32> -> vector<16x128xf32>
    %272 = arith.addf %269, %271 : vector<16x128xf32>
    %273 = vector.broadcast %5 : vector<1x128xf32> to vector<16x128xf32>
    %274 = arith.addf %272, %273 : vector<16x128xf32>
    %275 = vector.extract_strided_slice %274 {offsets = [0, 0], sizes = [16, 32], strides = [1, 1]} : vector<16x128xf32> to vector<16x32xf32>
    %276 = arith.negf %275 : vector<16x32xf32>
    %277 = math.exp %276 : vector<16x32xf32>
    %cst_99 = arith.constant 1.000000e+00 : f32
    %278 = vector.broadcast %cst_99 : f32 to vector<16x32xf32>
    %279 = arith.addf %278, %277 : vector<16x32xf32>
    %280 = arith.divf %278, %279 : vector<16x32xf32>
    %281 = vector.extract_strided_slice %274 {offsets = [0, 32], sizes = [16, 32], strides = [1, 1]} : vector<16x128xf32> to vector<16x32xf32>
    %282 = arith.negf %281 : vector<16x32xf32>
    %283 = math.exp %282 : vector<16x32xf32>
    %cst_100 = arith.constant 1.000000e+00 : f32
    %284 = vector.broadcast %cst_100 : f32 to vector<16x32xf32>
    %285 = arith.addf %284, %283 : vector<16x32xf32>
    %286 = arith.divf %284, %285 : vector<16x32xf32>
    %287 = vector.extract_strided_slice %274 {offsets = [0, 64], sizes = [16, 32], strides = [1, 1]} : vector<16x128xf32> to vector<16x32xf32>
    %288 = math.tanh %287 : vector<16x32xf32>
    %289 = vector.extract_strided_slice %274 {offsets = [0, 96], sizes = [16, 32], strides = [1, 1]} : vector<16x128xf32> to vector<16x32xf32>
    %290 = arith.negf %289 : vector<16x32xf32>
    %291 = math.exp %290 : vector<16x32xf32>
    %cst_101 = arith.constant 1.000000e+00 : f32
    %292 = vector.broadcast %cst_101 : f32 to vector<16x32xf32>
    %293 = arith.addf %292, %291 : vector<16x32xf32>
    %294 = arith.divf %292, %293 : vector<16x32xf32>
    %295 = arith.mulf %286, %260 : vector<16x32xf32>
    %296 = arith.mulf %280, %288 : vector<16x32xf32>
    %297 = arith.addf %295, %296 : vector<16x32xf32>
    %298 = math.tanh %297 : vector<16x32xf32>
    %299 = arith.mulf %294, %298 : vector<16x32xf32>
    %300 = arith.truncf %299 : vector<16x32xf32> to vector<16x32xbf16>
    %c0_102 = arith.constant 0 : index
    %c7_103 = arith.constant 7 : index
    %c0_104 = arith.constant 0 : index
    %c0_105 = arith.constant 0 : index
    %301 = vector.load %arg7[%c0_102, %c7_103, %c0_104, %c0_105] : memref<1x8x16x32xbf16, #tpu.memory_space<vmem>>, vector<1x1x16x32xbf16>
    %302 = vector.shape_cast %301 : vector<1x1x16x32xbf16> to vector<16x32xbf16>
    %303 = vector.shape_cast %300 : vector<16x32xbf16> to vector<1x1x16x32xbf16>
    tpu.vector_store %arg7[%c0_102, %c7_103, %c0_104, %c0_105], %303 {strides = array<i32>} : memref<1x8x16x32xbf16, #tpu.memory_space<vmem>>, vector<1x1x16x32xbf16>,
    %c0_106 = arith.constant 0 : index
    %c0_107 = arith.constant 0 : index
    %304 = vector.load %arg11[%c0_106, %c0_107] : memref<16x32xf32, #tpu.memory_space<vmem>>, vector<16x32xf32>
    tpu.vector_store %arg11[%c0_106, %c0_107], %299 {strides = array<i32>} : memref<16x32xf32, #tpu.memory_space<vmem>>, vector<16x32xf32>,
    %c0_108 = arith.constant 0 : index
    %c0_109 = arith.constant 0 : index
    %305 = vector.load %arg12[%c0_108, %c0_109] : memref<16x32xf32, #tpu.memory_space<vmem>>, vector<16x32xf32>
    tpu.vector_store %arg12[%c0_108, %c0_109], %297 {strides = array<i32>} : memref<16x32xf32, #tpu.memory_space<vmem>>, vector<16x32xf32>,
    return
  }
  func.func @transform_0(%arg0: i32, %arg1: i32, %arg2: i32) -> (i32, i32, i32, i32) {
    %c0_i32 = arith.constant 0 : i32
    %c0_i32_0 = arith.constant 0 : i32
    return %arg0, %arg2, %arg1, %c0_i32 : i32, i32, i32, i32
  }
  func.func @transform_4(%arg0: i32, %arg1: i32, %arg2: i32) -> (i32, i32, i32, i32) {
    %c0_i32 = arith.constant 0 : i32
    %c0_i32_0 = arith.constant 0 : i32
    return %arg0, %arg2, %arg1, %c0_i32 : i32, i32, i32, i32
  }
}

module attributes {stable_mosaic.version = 11 : i64} {
  func.func @_lstm_layer_kernel(%arg0: i32, %arg1: i32, %arg2: i32, %arg3: memref<1x8x16x32xbf16, #tpu.memory_space<vmem>>, %arg4: memref<1x32x128xbf16, #tpu.memory_space<any>>, %arg5: memref<1x32x128xbf16, #tpu.memory_space<any>>, %arg6: memref<1x1x128xf32, #tpu.memory_space<any>>, %arg7: memref<1x8x16x32xbf16, #tpu.memory_space<vmem>>, %arg8: memref<32x128xbf16, #tpu.memory_space<vmem>>, %arg9: memref<32x128xbf16, #tpu.memory_space<vmem>>, %arg10: memref<1x128xf32, #tpu.memory_space<vmem>>, %arg11: memref<16x32xf32, #tpu.memory_space<vmem>>, %arg12: memref<16x32xf32, #tpu.memory_space<vmem>>) attributes {dimension_semantics = [#tpu.dimension_semantics<parallel>, #tpu.dimension_semantics<parallel>, #tpu.dimension_semantics<arbitrary>], iteration_bounds = array<i64: 1, 1, 1>, scalar_prefetch = 0 : i64, scratch_operands = 5 : i64, tpu.core_type = #tpu.core_type<tc>, window_params = [{transform_indices = @transform_0, window_bounds = array<i64: 1, 8, 16, 32>}, {}, {}, {}, {transform_indices = @transform_4, window_bounds = array<i64: 1, 8, 16, 32>}]} {
    %c0_i32 = arith.constant 0 : i32
    %0 = arith.cmpi eq, %arg2, %c0_i32 : i32
    %1 = arith.extui %0 : i1 to i32
    %c0_i32_0 = arith.constant 0 : i32
    %2 = arith.cmpi ne, %1, %c0_i32_0 : i32
    scf.if %2 {
      "tpu.region"() ({
        %326 = tpu.sem_alloc : memref<!tpu.dma_semaphore, #tpu.memory_space<semaphore_mem>>
        %c0_i32_116 = arith.constant 0 : i32
        %c0_i32_117 = arith.constant 0 : i32
        %327 = tpu.memref_slice %arg4[%arg0, %c0_i32_116, %c0_i32_117] : memref<1x32x128xbf16, #tpu.memory_space<any>> -> memref<1x32x128xbf16, #tpu.memory_space<any>>
        %328 = tpu.memref_squeeze %327 : memref<1x32x128xbf16, #tpu.memory_space<any>> -> memref<32x128xbf16, #tpu.memory_space<any>>
        tpu.enqueue_dma source(%328 : memref<32x128xbf16, #tpu.memory_space<any>>) target(%arg8 : memref<32x128xbf16, #tpu.memory_space<vmem>>) target_semaphore(%326 : memref<!tpu.dma_semaphore, #tpu.memory_space<semaphore_mem>>)
        %c0_i32_118 = arith.constant 0 : i32
        %c0_i32_119 = arith.constant 0 : i32
        %329 = tpu.memref_slice %arg4[%arg0, %c0_i32_118, %c0_i32_119] : memref<1x32x128xbf16, #tpu.memory_space<any>> -> memref<1x32x128xbf16, #tpu.memory_space<any>>
        %330 = tpu.memref_squeeze %329 : memref<1x32x128xbf16, #tpu.memory_space<any>> -> memref<32x128xbf16, #tpu.memory_space<any>>
        tpu.wait_dma2 semaphore(%326 : memref<!tpu.dma_semaphore, #tpu.memory_space<semaphore_mem>>) src(%330 : memref<32x128xbf16, #tpu.memory_space<any>>) dst(%arg8 : memref<32x128xbf16, #tpu.memory_space<vmem>>)
        tpu.yield
      }) : () -> ()
      "tpu.region"() ({
        %326 = tpu.sem_alloc : memref<!tpu.dma_semaphore, #tpu.memory_space<semaphore_mem>>
        %c0_i32_116 = arith.constant 0 : i32
        %c0_i32_117 = arith.constant 0 : i32
        %327 = tpu.memref_slice %arg5[%arg0, %c0_i32_116, %c0_i32_117] : memref<1x32x128xbf16, #tpu.memory_space<any>> -> memref<1x32x128xbf16, #tpu.memory_space<any>>
        %328 = tpu.memref_squeeze %327 : memref<1x32x128xbf16, #tpu.memory_space<any>> -> memref<32x128xbf16, #tpu.memory_space<any>>
        tpu.enqueue_dma source(%328 : memref<32x128xbf16, #tpu.memory_space<any>>) target(%arg9 : memref<32x128xbf16, #tpu.memory_space<vmem>>) target_semaphore(%326 : memref<!tpu.dma_semaphore, #tpu.memory_space<semaphore_mem>>)
        %c0_i32_118 = arith.constant 0 : i32
        %c0_i32_119 = arith.constant 0 : i32
        %329 = tpu.memref_slice %arg5[%arg0, %c0_i32_118, %c0_i32_119] : memref<1x32x128xbf16, #tpu.memory_space<any>> -> memref<1x32x128xbf16, #tpu.memory_space<any>>
        %330 = tpu.memref_squeeze %329 : memref<1x32x128xbf16, #tpu.memory_space<any>> -> memref<32x128xbf16, #tpu.memory_space<any>>
        tpu.wait_dma2 semaphore(%326 : memref<!tpu.dma_semaphore, #tpu.memory_space<semaphore_mem>>) src(%330 : memref<32x128xbf16, #tpu.memory_space<any>>) dst(%arg9 : memref<32x128xbf16, #tpu.memory_space<vmem>>)
        tpu.yield
      }) : () -> ()
      "tpu.region"() ({
        %326 = tpu.sem_alloc : memref<!tpu.dma_semaphore, #tpu.memory_space<semaphore_mem>>
        %c0_i32_116 = arith.constant 0 : i32
        %c0_i32_117 = arith.constant 0 : i32
        %327 = tpu.memref_slice %arg6[%arg0, %c0_i32_116, %c0_i32_117] : memref<1x1x128xf32, #tpu.memory_space<any>> -> memref<1x1x128xf32, #tpu.memory_space<any>>
        %328 = tpu.memref_squeeze %327 : memref<1x1x128xf32, #tpu.memory_space<any>> -> memref<1x128xf32, #tpu.memory_space<any>>
        tpu.enqueue_dma source(%328 : memref<1x128xf32, #tpu.memory_space<any>>) target(%arg10 : memref<1x128xf32, #tpu.memory_space<vmem>>) target_semaphore(%326 : memref<!tpu.dma_semaphore, #tpu.memory_space<semaphore_mem>>)
        %c0_i32_118 = arith.constant 0 : i32
        %c0_i32_119 = arith.constant 0 : i32
        %329 = tpu.memref_slice %arg6[%arg0, %c0_i32_118, %c0_i32_119] : memref<1x1x128xf32, #tpu.memory_space<any>> -> memref<1x1x128xf32, #tpu.memory_space<any>>
        %330 = tpu.memref_squeeze %329 : memref<1x1x128xf32, #tpu.memory_space<any>> -> memref<1x128xf32, #tpu.memory_space<any>>
        tpu.wait_dma2 semaphore(%326 : memref<!tpu.dma_semaphore, #tpu.memory_space<semaphore_mem>>) src(%330 : memref<1x128xf32, #tpu.memory_space<any>>) dst(%arg10 : memref<1x128xf32, #tpu.memory_space<vmem>>)
        tpu.yield
      }) : () -> ()
      %cst_110 = arith.constant 0.000000e+00 : f32
      %322 = vector.broadcast %cst_110 : f32 to vector<16x32xf32>
      %c0_111 = arith.constant 0 : index
      %c0_112 = arith.constant 0 : index
      %323 = vector.load %arg11[%c0_111, %c0_112] : memref<16x32xf32, #tpu.memory_space<vmem>>, vector<16x32xf32>
      tpu.vector_store %arg11[%c0_111, %c0_112], %322 {strides = array<i32>} : memref<16x32xf32, #tpu.memory_space<vmem>>, vector<16x32xf32>,
      %cst_113 = arith.constant 0.000000e+00 : f32
      %324 = vector.broadcast %cst_113 : f32 to vector<16x32xf32>
      %c0_114 = arith.constant 0 : index
      %c0_115 = arith.constant 0 : index
      %325 = vector.load %arg12[%c0_114, %c0_115] : memref<16x32xf32, #tpu.memory_space<vmem>>, vector<16x32xf32>
      tpu.vector_store %arg12[%c0_114, %c0_115], %324 {strides = array<i32>} : memref<16x32xf32, #tpu.memory_space<vmem>>, vector<16x32xf32>,
    } else {
    }
    %c0 = arith.constant 0 : index
    %c0_1 = arith.constant 0 : index
    %3 = vector.load %arg8[%c0, %c0_1] : memref<32x128xbf16, #tpu.memory_space<vmem>>, vector<32x128xbf16>
    %c0_2 = arith.constant 0 : index
    %c0_3 = arith.constant 0 : index
    %4 = vector.load %arg9[%c0_2, %c0_3] : memref<32x128xbf16, #tpu.memory_space<vmem>>, vector<32x128xbf16>
    %c0_4 = arith.constant 0 : index
    %c0_5 = arith.constant 0 : index
    %5 = vector.load %arg10[%c0_4, %c0_5] : memref<1x128xf32, #tpu.memory_space<vmem>>, vector<1x128xf32>
    %c0_6 = arith.constant 0 : index
    %c0_7 = arith.constant 0 : index
    %6 = vector.load %arg11[%c0_6, %c0_7] : memref<16x32xf32, #tpu.memory_space<vmem>>, vector<16x32xf32>
    %c0_8 = arith.constant 0 : index
    %c0_9 = arith.constant 0 : index
    %7 = vector.load %arg12[%c0_8, %c0_9] : memref<16x32xf32, #tpu.memory_space<vmem>>, vector<16x32xf32>
    %c0_10 = arith.constant 0 : index
    %c0_11 = arith.constant 0 : index
    %c0_12 = arith.constant 0 : index
    %c0_13 = arith.constant 0 : index
    %8 = vector.load %arg3[%c0_10, %c0_11, %c0_12, %c0_13] : memref<1x8x16x32xbf16, #tpu.memory_space<vmem>>, vector<1x1x16x32xbf16>
    %9 = vector.shape_cast %8 : vector<1x1x16x32xbf16> to vector<16x32xbf16>
    %cst = arith.constant dense<0.000000e+00> : vector<16x128xf32>
    %10 = tpu.matmul %9, %3, %cst {dimension_numbers = #tpu.dot_dimension_numbers<[1], [0], [0], [1], [0, 0, 1, 1], [], []>} : vector<16x32xbf16>, vector<32x128xbf16>, vector<16x128xf32> -> vector<16x128xf32>
    %11 = arith.truncf %6 : vector<16x32xf32> to vector<16x32xbf16>
    %cst_14 = arith.constant dense<0.000000e+00> : vector<16x128xf32>
    %12 = tpu.matmul %11, %4, %cst_14 {dimension_numbers = #tpu.dot_dimension_numbers<[1], [0], [0], [1], [0, 0, 1, 1], [], []>} : vector<16x32xbf16>, vector<32x128xbf16>, vector<16x128xf32> -> vector<16x128xf32>
    %13 = arith.addf %10, %12 : vector<16x128xf32>
    %14 = vector.broadcast %5 : vector<1x128xf32> to vector<16x128xf32>
    %15 = arith.addf %13, %14 : vector<16x128xf32>
    %16 = vector.extract_strided_slice %15 {offsets = [0, 0], sizes = [16, 32], strides = [1, 1]} : vector<16x128xf32> to vector<16x32xf32>
    %17 = arith.negf %16 : vector<16x32xf32>
    %18 = math.exp %17 : vector<16x32xf32>
    %cst_15 = arith.constant 1.000000e+00 : f32
    %19 = vector.broadcast %cst_15 : f32 to vector<16x32xf32>
    %20 = arith.addf %19, %18 : vector<16x32xf32>
    %21 = arith.divf %19, %20 : vector<16x32xf32>
    %22 = vector.extract_strided_slice %15 {offsets = [0, 32], sizes = [16, 32], strides = [1, 1]} : vector<16x128xf32> to vector<16x32xf32>
    %23 = arith.negf %22 : vector<16x32xf32>
    %24 = math.exp %23 : vector<16x32xf32>
    %cst_16 = arith.constant 1.000000e+00 : f32
    %25 = vector.broadcast %cst_16 : f32 to vector<16x32xf32>
    %26 = arith.addf %25, %24 : vector<16x32xf32>
    %27 = arith.divf %25, %26 : vector<16x32xf32>
    %28 = vector.extract_strided_slice %15 {offsets = [0, 64], sizes = [16, 32], strides = [1, 1]} : vector<16x128xf32> to vector<16x32xf32>
    %29 = math.tanh %28 : vector<16x32xf32>
    %30 = vector.extract_strided_slice %15 {offsets = [0, 96], sizes = [16, 32], strides = [1, 1]} : vector<16x128xf32> to vector<16x32xf32>
    %31 = arith.negf %30 : vector<16x32xf32>
    %32 = math.exp %31 : vector<16x32xf32>
    %cst_17 = arith.constant 1.000000e+00 : f32
    %33 = vector.broadcast %cst_17 : f32 to vector<16x32xf32>
    %34 = arith.addf %33, %32 : vector<16x32xf32>
    %35 = arith.divf %33, %34 : vector<16x32xf32>
    %36 = arith.mulf %27, %7 : vector<16x32xf32>
    %37 = arith.mulf %21, %29 : vector<16x32xf32>
    %38 = arith.addf %36, %37 : vector<16x32xf32>
    %39 = math.tanh %38 : vector<16x32xf32>
    %40 = arith.mulf %35, %39 : vector<16x32xf32>
    %41 = arith.extf %9 : vector<16x32xbf16> to vector<16x32xf32>
    %42 = arith.addf %40, %41 : vector<16x32xf32>
    %43 = arith.truncf %42 : vector<16x32xf32> to vector<16x32xbf16>
    %c0_18 = arith.constant 0 : index
    %c0_19 = arith.constant 0 : index
    %c0_20 = arith.constant 0 : index
    %c0_21 = arith.constant 0 : index
    %44 = vector.load %arg7[%c0_18, %c0_19, %c0_20, %c0_21] : memref<1x8x16x32xbf16, #tpu.memory_space<vmem>>, vector<1x1x16x32xbf16>
    %45 = vector.shape_cast %44 : vector<1x1x16x32xbf16> to vector<16x32xbf16>
    %46 = vector.shape_cast %43 : vector<16x32xbf16> to vector<1x1x16x32xbf16>
    tpu.vector_store %arg7[%c0_18, %c0_19, %c0_20, %c0_21], %46 {strides = array<i32>} : memref<1x8x16x32xbf16, #tpu.memory_space<vmem>>, vector<1x1x16x32xbf16>,
    %c0_22 = arith.constant 0 : index
    %c1 = arith.constant 1 : index
    %c0_23 = arith.constant 0 : index
    %c0_24 = arith.constant 0 : index
    %47 = vector.load %arg3[%c0_22, %c1, %c0_23, %c0_24] : memref<1x8x16x32xbf16, #tpu.memory_space<vmem>>, vector<1x1x16x32xbf16>
    %48 = vector.shape_cast %47 : vector<1x1x16x32xbf16> to vector<16x32xbf16>
    %cst_25 = arith.constant dense<0.000000e+00> : vector<16x128xf32>
    %49 = tpu.matmul %48, %3, %cst_25 {dimension_numbers = #tpu.dot_dimension_numbers<[1], [0], [0], [1], [0, 0, 1, 1], [], []>} : vector<16x32xbf16>, vector<32x128xbf16>, vector<16x128xf32> -> vector<16x128xf32>
    %50 = arith.truncf %40 : vector<16x32xf32> to vector<16x32xbf16>
    %cst_26 = arith.constant dense<0.000000e+00> : vector<16x128xf32>
    %51 = tpu.matmul %50, %4, %cst_26 {dimension_numbers = #tpu.dot_dimension_numbers<[1], [0], [0], [1], [0, 0, 1, 1], [], []>} : vector<16x32xbf16>, vector<32x128xbf16>, vector<16x128xf32> -> vector<16x128xf32>
    %52 = arith.addf %49, %51 : vector<16x128xf32>
    %53 = vector.broadcast %5 : vector<1x128xf32> to vector<16x128xf32>
    %54 = arith.addf %52, %53 : vector<16x128xf32>
    %55 = vector.extract_strided_slice %54 {offsets = [0, 0], sizes = [16, 32], strides = [1, 1]} : vector<16x128xf32> to vector<16x32xf32>
    %56 = arith.negf %55 : vector<16x32xf32>
    %57 = math.exp %56 : vector<16x32xf32>
    %cst_27 = arith.constant 1.000000e+00 : f32
    %58 = vector.broadcast %cst_27 : f32 to vector<16x32xf32>
    %59 = arith.addf %58, %57 : vector<16x32xf32>
    %60 = arith.divf %58, %59 : vector<16x32xf32>
    %61 = vector.extract_strided_slice %54 {offsets = [0, 32], sizes = [16, 32], strides = [1, 1]} : vector<16x128xf32> to vector<16x32xf32>
    %62 = arith.negf %61 : vector<16x32xf32>
    %63 = math.exp %62 : vector<16x32xf32>
    %cst_28 = arith.constant 1.000000e+00 : f32
    %64 = vector.broadcast %cst_28 : f32 to vector<16x32xf32>
    %65 = arith.addf %64, %63 : vector<16x32xf32>
    %66 = arith.divf %64, %65 : vector<16x32xf32>
    %67 = vector.extract_strided_slice %54 {offsets = [0, 64], sizes = [16, 32], strides = [1, 1]} : vector<16x128xf32> to vector<16x32xf32>
    %68 = math.tanh %67 : vector<16x32xf32>
    %69 = vector.extract_strided_slice %54 {offsets = [0, 96], sizes = [16, 32], strides = [1, 1]} : vector<16x128xf32> to vector<16x32xf32>
    %70 = arith.negf %69 : vector<16x32xf32>
    %71 = math.exp %70 : vector<16x32xf32>
    %cst_29 = arith.constant 1.000000e+00 : f32
    %72 = vector.broadcast %cst_29 : f32 to vector<16x32xf32>
    %73 = arith.addf %72, %71 : vector<16x32xf32>
    %74 = arith.divf %72, %73 : vector<16x32xf32>
    %75 = arith.mulf %66, %38 : vector<16x32xf32>
    %76 = arith.mulf %60, %68 : vector<16x32xf32>
    %77 = arith.addf %75, %76 : vector<16x32xf32>
    %78 = math.tanh %77 : vector<16x32xf32>
    %79 = arith.mulf %74, %78 : vector<16x32xf32>
    %80 = arith.extf %48 : vector<16x32xbf16> to vector<16x32xf32>
    %81 = arith.addf %79, %80 : vector<16x32xf32>
    %82 = arith.truncf %81 : vector<16x32xf32> to vector<16x32xbf16>
    %c0_30 = arith.constant 0 : index
    %c1_31 = arith.constant 1 : index
    %c0_32 = arith.constant 0 : index
    %c0_33 = arith.constant 0 : index
    %83 = vector.load %arg7[%c0_30, %c1_31, %c0_32, %c0_33] : memref<1x8x16x32xbf16, #tpu.memory_space<vmem>>, vector<1x1x16x32xbf16>
    %84 = vector.shape_cast %83 : vector<1x1x16x32xbf16> to vector<16x32xbf16>
    %85 = vector.shape_cast %82 : vector<16x32xbf16> to vector<1x1x16x32xbf16>
    tpu.vector_store %arg7[%c0_30, %c1_31, %c0_32, %c0_33], %85 {strides = array<i32>} : memref<1x8x16x32xbf16, #tpu.memory_space<vmem>>, vector<1x1x16x32xbf16>,
    %c0_34 = arith.constant 0 : index
    %c2 = arith.constant 2 : index
    %c0_35 = arith.constant 0 : index
    %c0_36 = arith.constant 0 : index
    %86 = vector.load %arg3[%c0_34, %c2, %c0_35, %c0_36] : memref<1x8x16x32xbf16, #tpu.memory_space<vmem>>, vector<1x1x16x32xbf16>
    %87 = vector.shape_cast %86 : vector<1x1x16x32xbf16> to vector<16x32xbf16>
    %cst_37 = arith.constant dense<0.000000e+00> : vector<16x128xf32>
    %88 = tpu.matmul %87, %3, %cst_37 {dimension_numbers = #tpu.dot_dimension_numbers<[1], [0], [0], [1], [0, 0, 1, 1], [], []>} : vector<16x32xbf16>, vector<32x128xbf16>, vector<16x128xf32> -> vector<16x128xf32>
    %89 = arith.truncf %79 : vector<16x32xf32> to vector<16x32xbf16>
    %cst_38 = arith.constant dense<0.000000e+00> : vector<16x128xf32>
    %90 = tpu.matmul %89, %4, %cst_38 {dimension_numbers = #tpu.dot_dimension_numbers<[1], [0], [0], [1], [0, 0, 1, 1], [], []>} : vector<16x32xbf16>, vector<32x128xbf16>, vector<16x128xf32> -> vector<16x128xf32>
    %91 = arith.addf %88, %90 : vector<16x128xf32>
    %92 = vector.broadcast %5 : vector<1x128xf32> to vector<16x128xf32>
    %93 = arith.addf %91, %92 : vector<16x128xf32>
    %94 = vector.extract_strided_slice %93 {offsets = [0, 0], sizes = [16, 32], strides = [1, 1]} : vector<16x128xf32> to vector<16x32xf32>
    %95 = arith.negf %94 : vector<16x32xf32>
    %96 = math.exp %95 : vector<16x32xf32>
    %cst_39 = arith.constant 1.000000e+00 : f32
    %97 = vector.broadcast %cst_39 : f32 to vector<16x32xf32>
    %98 = arith.addf %97, %96 : vector<16x32xf32>
    %99 = arith.divf %97, %98 : vector<16x32xf32>
    %100 = vector.extract_strided_slice %93 {offsets = [0, 32], sizes = [16, 32], strides = [1, 1]} : vector<16x128xf32> to vector<16x32xf32>
    %101 = arith.negf %100 : vector<16x32xf32>
    %102 = math.exp %101 : vector<16x32xf32>
    %cst_40 = arith.constant 1.000000e+00 : f32
    %103 = vector.broadcast %cst_40 : f32 to vector<16x32xf32>
    %104 = arith.addf %103, %102 : vector<16x32xf32>
    %105 = arith.divf %103, %104 : vector<16x32xf32>
    %106 = vector.extract_strided_slice %93 {offsets = [0, 64], sizes = [16, 32], strides = [1, 1]} : vector<16x128xf32> to vector<16x32xf32>
    %107 = math.tanh %106 : vector<16x32xf32>
    %108 = vector.extract_strided_slice %93 {offsets = [0, 96], sizes = [16, 32], strides = [1, 1]} : vector<16x128xf32> to vector<16x32xf32>
    %109 = arith.negf %108 : vector<16x32xf32>
    %110 = math.exp %109 : vector<16x32xf32>
    %cst_41 = arith.constant 1.000000e+00 : f32
    %111 = vector.broadcast %cst_41 : f32 to vector<16x32xf32>
    %112 = arith.addf %111, %110 : vector<16x32xf32>
    %113 = arith.divf %111, %112 : vector<16x32xf32>
    %114 = arith.mulf %105, %77 : vector<16x32xf32>
    %115 = arith.mulf %99, %107 : vector<16x32xf32>
    %116 = arith.addf %114, %115 : vector<16x32xf32>
    %117 = math.tanh %116 : vector<16x32xf32>
    %118 = arith.mulf %113, %117 : vector<16x32xf32>
    %119 = arith.extf %87 : vector<16x32xbf16> to vector<16x32xf32>
    %120 = arith.addf %118, %119 : vector<16x32xf32>
    %121 = arith.truncf %120 : vector<16x32xf32> to vector<16x32xbf16>
    %c0_42 = arith.constant 0 : index
    %c2_43 = arith.constant 2 : index
    %c0_44 = arith.constant 0 : index
    %c0_45 = arith.constant 0 : index
    %122 = vector.load %arg7[%c0_42, %c2_43, %c0_44, %c0_45] : memref<1x8x16x32xbf16, #tpu.memory_space<vmem>>, vector<1x1x16x32xbf16>
    %123 = vector.shape_cast %122 : vector<1x1x16x32xbf16> to vector<16x32xbf16>
    %124 = vector.shape_cast %121 : vector<16x32xbf16> to vector<1x1x16x32xbf16>
    tpu.vector_store %arg7[%c0_42, %c2_43, %c0_44, %c0_45], %124 {strides = array<i32>} : memref<1x8x16x32xbf16, #tpu.memory_space<vmem>>, vector<1x1x16x32xbf16>,
    %c0_46 = arith.constant 0 : index
    %c3 = arith.constant 3 : index
    %c0_47 = arith.constant 0 : index
    %c0_48 = arith.constant 0 : index
    %125 = vector.load %arg3[%c0_46, %c3, %c0_47, %c0_48] : memref<1x8x16x32xbf16, #tpu.memory_space<vmem>>, vector<1x1x16x32xbf16>
    %126 = vector.shape_cast %125 : vector<1x1x16x32xbf16> to vector<16x32xbf16>
    %cst_49 = arith.constant dense<0.000000e+00> : vector<16x128xf32>
    %127 = tpu.matmul %126, %3, %cst_49 {dimension_numbers = #tpu.dot_dimension_numbers<[1], [0], [0], [1], [0, 0, 1, 1], [], []>} : vector<16x32xbf16>, vector<32x128xbf16>, vector<16x128xf32> -> vector<16x128xf32>
    %128 = arith.truncf %118 : vector<16x32xf32> to vector<16x32xbf16>
    %cst_50 = arith.constant dense<0.000000e+00> : vector<16x128xf32>
    %129 = tpu.matmul %128, %4, %cst_50 {dimension_numbers = #tpu.dot_dimension_numbers<[1], [0], [0], [1], [0, 0, 1, 1], [], []>} : vector<16x32xbf16>, vector<32x128xbf16>, vector<16x128xf32> -> vector<16x128xf32>
    %130 = arith.addf %127, %129 : vector<16x128xf32>
    %131 = vector.broadcast %5 : vector<1x128xf32> to vector<16x128xf32>
    %132 = arith.addf %130, %131 : vector<16x128xf32>
    %133 = vector.extract_strided_slice %132 {offsets = [0, 0], sizes = [16, 32], strides = [1, 1]} : vector<16x128xf32> to vector<16x32xf32>
    %134 = arith.negf %133 : vector<16x32xf32>
    %135 = math.exp %134 : vector<16x32xf32>
    %cst_51 = arith.constant 1.000000e+00 : f32
    %136 = vector.broadcast %cst_51 : f32 to vector<16x32xf32>
    %137 = arith.addf %136, %135 : vector<16x32xf32>
    %138 = arith.divf %136, %137 : vector<16x32xf32>
    %139 = vector.extract_strided_slice %132 {offsets = [0, 32], sizes = [16, 32], strides = [1, 1]} : vector<16x128xf32> to vector<16x32xf32>
    %140 = arith.negf %139 : vector<16x32xf32>
    %141 = math.exp %140 : vector<16x32xf32>
    %cst_52 = arith.constant 1.000000e+00 : f32
    %142 = vector.broadcast %cst_52 : f32 to vector<16x32xf32>
    %143 = arith.addf %142, %141 : vector<16x32xf32>
    %144 = arith.divf %142, %143 : vector<16x32xf32>
    %145 = vector.extract_strided_slice %132 {offsets = [0, 64], sizes = [16, 32], strides = [1, 1]} : vector<16x128xf32> to vector<16x32xf32>
    %146 = math.tanh %145 : vector<16x32xf32>
    %147 = vector.extract_strided_slice %132 {offsets = [0, 96], sizes = [16, 32], strides = [1, 1]} : vector<16x128xf32> to vector<16x32xf32>
    %148 = arith.negf %147 : vector<16x32xf32>
    %149 = math.exp %148 : vector<16x32xf32>
    %cst_53 = arith.constant 1.000000e+00 : f32
    %150 = vector.broadcast %cst_53 : f32 to vector<16x32xf32>
    %151 = arith.addf %150, %149 : vector<16x32xf32>
    %152 = arith.divf %150, %151 : vector<16x32xf32>
    %153 = arith.mulf %144, %116 : vector<16x32xf32>
    %154 = arith.mulf %138, %146 : vector<16x32xf32>
    %155 = arith.addf %153, %154 : vector<16x32xf32>
    %156 = math.tanh %155 : vector<16x32xf32>
    %157 = arith.mulf %152, %156 : vector<16x32xf32>
    %158 = arith.extf %126 : vector<16x32xbf16> to vector<16x32xf32>
    %159 = arith.addf %157, %158 : vector<16x32xf32>
    %160 = arith.truncf %159 : vector<16x32xf32> to vector<16x32xbf16>
    %c0_54 = arith.constant 0 : index
    %c3_55 = arith.constant 3 : index
    %c0_56 = arith.constant 0 : index
    %c0_57 = arith.constant 0 : index
    %161 = vector.load %arg7[%c0_54, %c3_55, %c0_56, %c0_57] : memref<1x8x16x32xbf16, #tpu.memory_space<vmem>>, vector<1x1x16x32xbf16>
    %162 = vector.shape_cast %161 : vector<1x1x16x32xbf16> to vector<16x32xbf16>
    %163 = vector.shape_cast %160 : vector<16x32xbf16> to vector<1x1x16x32xbf16>
    tpu.vector_store %arg7[%c0_54, %c3_55, %c0_56, %c0_57], %163 {strides = array<i32>} : memref<1x8x16x32xbf16, #tpu.memory_space<vmem>>, vector<1x1x16x32xbf16>,
    %c0_58 = arith.constant 0 : index
    %c4 = arith.constant 4 : index
    %c0_59 = arith.constant 0 : index
    %c0_60 = arith.constant 0 : index
    %164 = vector.load %arg3[%c0_58, %c4, %c0_59, %c0_60] : memref<1x8x16x32xbf16, #tpu.memory_space<vmem>>, vector<1x1x16x32xbf16>
    %165 = vector.shape_cast %164 : vector<1x1x16x32xbf16> to vector<16x32xbf16>
    %cst_61 = arith.constant dense<0.000000e+00> : vector<16x128xf32>
    %166 = tpu.matmul %165, %3, %cst_61 {dimension_numbers = #tpu.dot_dimension_numbers<[1], [0], [0], [1], [0, 0, 1, 1], [], []>} : vector<16x32xbf16>, vector<32x128xbf16>, vector<16x128xf32> -> vector<16x128xf32>
    %167 = arith.truncf %157 : vector<16x32xf32> to vector<16x32xbf16>
    %cst_62 = arith.constant dense<0.000000e+00> : vector<16x128xf32>
    %168 = tpu.matmul %167, %4, %cst_62 {dimension_numbers = #tpu.dot_dimension_numbers<[1], [0], [0], [1], [0, 0, 1, 1], [], []>} : vector<16x32xbf16>, vector<32x128xbf16>, vector<16x128xf32> -> vector<16x128xf32>
    %169 = arith.addf %166, %168 : vector<16x128xf32>
    %170 = vector.broadcast %5 : vector<1x128xf32> to vector<16x128xf32>
    %171 = arith.addf %169, %170 : vector<16x128xf32>
    %172 = vector.extract_strided_slice %171 {offsets = [0, 0], sizes = [16, 32], strides = [1, 1]} : vector<16x128xf32> to vector<16x32xf32>
    %173 = arith.negf %172 : vector<16x32xf32>
    %174 = math.exp %173 : vector<16x32xf32>
    %cst_63 = arith.constant 1.000000e+00 : f32
    %175 = vector.broadcast %cst_63 : f32 to vector<16x32xf32>
    %176 = arith.addf %175, %174 : vector<16x32xf32>
    %177 = arith.divf %175, %176 : vector<16x32xf32>
    %178 = vector.extract_strided_slice %171 {offsets = [0, 32], sizes = [16, 32], strides = [1, 1]} : vector<16x128xf32> to vector<16x32xf32>
    %179 = arith.negf %178 : vector<16x32xf32>
    %180 = math.exp %179 : vector<16x32xf32>
    %cst_64 = arith.constant 1.000000e+00 : f32
    %181 = vector.broadcast %cst_64 : f32 to vector<16x32xf32>
    %182 = arith.addf %181, %180 : vector<16x32xf32>
    %183 = arith.divf %181, %182 : vector<16x32xf32>
    %184 = vector.extract_strided_slice %171 {offsets = [0, 64], sizes = [16, 32], strides = [1, 1]} : vector<16x128xf32> to vector<16x32xf32>
    %185 = math.tanh %184 : vector<16x32xf32>
    %186 = vector.extract_strided_slice %171 {offsets = [0, 96], sizes = [16, 32], strides = [1, 1]} : vector<16x128xf32> to vector<16x32xf32>
    %187 = arith.negf %186 : vector<16x32xf32>
    %188 = math.exp %187 : vector<16x32xf32>
    %cst_65 = arith.constant 1.000000e+00 : f32
    %189 = vector.broadcast %cst_65 : f32 to vector<16x32xf32>
    %190 = arith.addf %189, %188 : vector<16x32xf32>
    %191 = arith.divf %189, %190 : vector<16x32xf32>
    %192 = arith.mulf %183, %155 : vector<16x32xf32>
    %193 = arith.mulf %177, %185 : vector<16x32xf32>
    %194 = arith.addf %192, %193 : vector<16x32xf32>
    %195 = math.tanh %194 : vector<16x32xf32>
    %196 = arith.mulf %191, %195 : vector<16x32xf32>
    %197 = arith.extf %165 : vector<16x32xbf16> to vector<16x32xf32>
    %198 = arith.addf %196, %197 : vector<16x32xf32>
    %199 = arith.truncf %198 : vector<16x32xf32> to vector<16x32xbf16>
    %c0_66 = arith.constant 0 : index
    %c4_67 = arith.constant 4 : index
    %c0_68 = arith.constant 0 : index
    %c0_69 = arith.constant 0 : index
    %200 = vector.load %arg7[%c0_66, %c4_67, %c0_68, %c0_69] : memref<1x8x16x32xbf16, #tpu.memory_space<vmem>>, vector<1x1x16x32xbf16>
    %201 = vector.shape_cast %200 : vector<1x1x16x32xbf16> to vector<16x32xbf16>
    %202 = vector.shape_cast %199 : vector<16x32xbf16> to vector<1x1x16x32xbf16>
    tpu.vector_store %arg7[%c0_66, %c4_67, %c0_68, %c0_69], %202 {strides = array<i32>} : memref<1x8x16x32xbf16, #tpu.memory_space<vmem>>, vector<1x1x16x32xbf16>,
    %c0_70 = arith.constant 0 : index
    %c5 = arith.constant 5 : index
    %c0_71 = arith.constant 0 : index
    %c0_72 = arith.constant 0 : index
    %203 = vector.load %arg3[%c0_70, %c5, %c0_71, %c0_72] : memref<1x8x16x32xbf16, #tpu.memory_space<vmem>>, vector<1x1x16x32xbf16>
    %204 = vector.shape_cast %203 : vector<1x1x16x32xbf16> to vector<16x32xbf16>
    %cst_73 = arith.constant dense<0.000000e+00> : vector<16x128xf32>
    %205 = tpu.matmul %204, %3, %cst_73 {dimension_numbers = #tpu.dot_dimension_numbers<[1], [0], [0], [1], [0, 0, 1, 1], [], []>} : vector<16x32xbf16>, vector<32x128xbf16>, vector<16x128xf32> -> vector<16x128xf32>
    %206 = arith.truncf %196 : vector<16x32xf32> to vector<16x32xbf16>
    %cst_74 = arith.constant dense<0.000000e+00> : vector<16x128xf32>
    %207 = tpu.matmul %206, %4, %cst_74 {dimension_numbers = #tpu.dot_dimension_numbers<[1], [0], [0], [1], [0, 0, 1, 1], [], []>} : vector<16x32xbf16>, vector<32x128xbf16>, vector<16x128xf32> -> vector<16x128xf32>
    %208 = arith.addf %205, %207 : vector<16x128xf32>
    %209 = vector.broadcast %5 : vector<1x128xf32> to vector<16x128xf32>
    %210 = arith.addf %208, %209 : vector<16x128xf32>
    %211 = vector.extract_strided_slice %210 {offsets = [0, 0], sizes = [16, 32], strides = [1, 1]} : vector<16x128xf32> to vector<16x32xf32>
    %212 = arith.negf %211 : vector<16x32xf32>
    %213 = math.exp %212 : vector<16x32xf32>
    %cst_75 = arith.constant 1.000000e+00 : f32
    %214 = vector.broadcast %cst_75 : f32 to vector<16x32xf32>
    %215 = arith.addf %214, %213 : vector<16x32xf32>
    %216 = arith.divf %214, %215 : vector<16x32xf32>
    %217 = vector.extract_strided_slice %210 {offsets = [0, 32], sizes = [16, 32], strides = [1, 1]} : vector<16x128xf32> to vector<16x32xf32>
    %218 = arith.negf %217 : vector<16x32xf32>
    %219 = math.exp %218 : vector<16x32xf32>
    %cst_76 = arith.constant 1.000000e+00 : f32
    %220 = vector.broadcast %cst_76 : f32 to vector<16x32xf32>
    %221 = arith.addf %220, %219 : vector<16x32xf32>
    %222 = arith.divf %220, %221 : vector<16x32xf32>
    %223 = vector.extract_strided_slice %210 {offsets = [0, 64], sizes = [16, 32], strides = [1, 1]} : vector<16x128xf32> to vector<16x32xf32>
    %224 = math.tanh %223 : vector<16x32xf32>
    %225 = vector.extract_strided_slice %210 {offsets = [0, 96], sizes = [16, 32], strides = [1, 1]} : vector<16x128xf32> to vector<16x32xf32>
    %226 = arith.negf %225 : vector<16x32xf32>
    %227 = math.exp %226 : vector<16x32xf32>
    %cst_77 = arith.constant 1.000000e+00 : f32
    %228 = vector.broadcast %cst_77 : f32 to vector<16x32xf32>
    %229 = arith.addf %228, %227 : vector<16x32xf32>
    %230 = arith.divf %228, %229 : vector<16x32xf32>
    %231 = arith.mulf %222, %194 : vector<16x32xf32>
    %232 = arith.mulf %216, %224 : vector<16x32xf32>
    %233 = arith.addf %231, %232 : vector<16x32xf32>
    %234 = math.tanh %233 : vector<16x32xf32>
    %235 = arith.mulf %230, %234 : vector<16x32xf32>
    %236 = arith.extf %204 : vector<16x32xbf16> to vector<16x32xf32>
    %237 = arith.addf %235, %236 : vector<16x32xf32>
    %238 = arith.truncf %237 : vector<16x32xf32> to vector<16x32xbf16>
    %c0_78 = arith.constant 0 : index
    %c5_79 = arith.constant 5 : index
    %c0_80 = arith.constant 0 : index
    %c0_81 = arith.constant 0 : index
    %239 = vector.load %arg7[%c0_78, %c5_79, %c0_80, %c0_81] : memref<1x8x16x32xbf16, #tpu.memory_space<vmem>>, vector<1x1x16x32xbf16>
    %240 = vector.shape_cast %239 : vector<1x1x16x32xbf16> to vector<16x32xbf16>
    %241 = vector.shape_cast %238 : vector<16x32xbf16> to vector<1x1x16x32xbf16>
    tpu.vector_store %arg7[%c0_78, %c5_79, %c0_80, %c0_81], %241 {strides = array<i32>} : memref<1x8x16x32xbf16, #tpu.memory_space<vmem>>, vector<1x1x16x32xbf16>,
    %c0_82 = arith.constant 0 : index
    %c6 = arith.constant 6 : index
    %c0_83 = arith.constant 0 : index
    %c0_84 = arith.constant 0 : index
    %242 = vector.load %arg3[%c0_82, %c6, %c0_83, %c0_84] : memref<1x8x16x32xbf16, #tpu.memory_space<vmem>>, vector<1x1x16x32xbf16>
    %243 = vector.shape_cast %242 : vector<1x1x16x32xbf16> to vector<16x32xbf16>
    %cst_85 = arith.constant dense<0.000000e+00> : vector<16x128xf32>
    %244 = tpu.matmul %243, %3, %cst_85 {dimension_numbers = #tpu.dot_dimension_numbers<[1], [0], [0], [1], [0, 0, 1, 1], [], []>} : vector<16x32xbf16>, vector<32x128xbf16>, vector<16x128xf32> -> vector<16x128xf32>
    %245 = arith.truncf %235 : vector<16x32xf32> to vector<16x32xbf16>
    %cst_86 = arith.constant dense<0.000000e+00> : vector<16x128xf32>
    %246 = tpu.matmul %245, %4, %cst_86 {dimension_numbers = #tpu.dot_dimension_numbers<[1], [0], [0], [1], [0, 0, 1, 1], [], []>} : vector<16x32xbf16>, vector<32x128xbf16>, vector<16x128xf32> -> vector<16x128xf32>
    %247 = arith.addf %244, %246 : vector<16x128xf32>
    %248 = vector.broadcast %5 : vector<1x128xf32> to vector<16x128xf32>
    %249 = arith.addf %247, %248 : vector<16x128xf32>
    %250 = vector.extract_strided_slice %249 {offsets = [0, 0], sizes = [16, 32], strides = [1, 1]} : vector<16x128xf32> to vector<16x32xf32>
    %251 = arith.negf %250 : vector<16x32xf32>
    %252 = math.exp %251 : vector<16x32xf32>
    %cst_87 = arith.constant 1.000000e+00 : f32
    %253 = vector.broadcast %cst_87 : f32 to vector<16x32xf32>
    %254 = arith.addf %253, %252 : vector<16x32xf32>
    %255 = arith.divf %253, %254 : vector<16x32xf32>
    %256 = vector.extract_strided_slice %249 {offsets = [0, 32], sizes = [16, 32], strides = [1, 1]} : vector<16x128xf32> to vector<16x32xf32>
    %257 = arith.negf %256 : vector<16x32xf32>
    %258 = math.exp %257 : vector<16x32xf32>
    %cst_88 = arith.constant 1.000000e+00 : f32
    %259 = vector.broadcast %cst_88 : f32 to vector<16x32xf32>
    %260 = arith.addf %259, %258 : vector<16x32xf32>
    %261 = arith.divf %259, %260 : vector<16x32xf32>
    %262 = vector.extract_strided_slice %249 {offsets = [0, 64], sizes = [16, 32], strides = [1, 1]} : vector<16x128xf32> to vector<16x32xf32>
    %263 = math.tanh %262 : vector<16x32xf32>
    %264 = vector.extract_strided_slice %249 {offsets = [0, 96], sizes = [16, 32], strides = [1, 1]} : vector<16x128xf32> to vector<16x32xf32>
    %265 = arith.negf %264 : vector<16x32xf32>
    %266 = math.exp %265 : vector<16x32xf32>
    %cst_89 = arith.constant 1.000000e+00 : f32
    %267 = vector.broadcast %cst_89 : f32 to vector<16x32xf32>
    %268 = arith.addf %267, %266 : vector<16x32xf32>
    %269 = arith.divf %267, %268 : vector<16x32xf32>
    %270 = arith.mulf %261, %233 : vector<16x32xf32>
    %271 = arith.mulf %255, %263 : vector<16x32xf32>
    %272 = arith.addf %270, %271 : vector<16x32xf32>
    %273 = math.tanh %272 : vector<16x32xf32>
    %274 = arith.mulf %269, %273 : vector<16x32xf32>
    %275 = arith.extf %243 : vector<16x32xbf16> to vector<16x32xf32>
    %276 = arith.addf %274, %275 : vector<16x32xf32>
    %277 = arith.truncf %276 : vector<16x32xf32> to vector<16x32xbf16>
    %c0_90 = arith.constant 0 : index
    %c6_91 = arith.constant 6 : index
    %c0_92 = arith.constant 0 : index
    %c0_93 = arith.constant 0 : index
    %278 = vector.load %arg7[%c0_90, %c6_91, %c0_92, %c0_93] : memref<1x8x16x32xbf16, #tpu.memory_space<vmem>>, vector<1x1x16x32xbf16>
    %279 = vector.shape_cast %278 : vector<1x1x16x32xbf16> to vector<16x32xbf16>
    %280 = vector.shape_cast %277 : vector<16x32xbf16> to vector<1x1x16x32xbf16>
    tpu.vector_store %arg7[%c0_90, %c6_91, %c0_92, %c0_93], %280 {strides = array<i32>} : memref<1x8x16x32xbf16, #tpu.memory_space<vmem>>, vector<1x1x16x32xbf16>,
    %c0_94 = arith.constant 0 : index
    %c7 = arith.constant 7 : index
    %c0_95 = arith.constant 0 : index
    %c0_96 = arith.constant 0 : index
    %281 = vector.load %arg3[%c0_94, %c7, %c0_95, %c0_96] : memref<1x8x16x32xbf16, #tpu.memory_space<vmem>>, vector<1x1x16x32xbf16>
    %282 = vector.shape_cast %281 : vector<1x1x16x32xbf16> to vector<16x32xbf16>
    %cst_97 = arith.constant dense<0.000000e+00> : vector<16x128xf32>
    %283 = tpu.matmul %282, %3, %cst_97 {dimension_numbers = #tpu.dot_dimension_numbers<[1], [0], [0], [1], [0, 0, 1, 1], [], []>} : vector<16x32xbf16>, vector<32x128xbf16>, vector<16x128xf32> -> vector<16x128xf32>
    %284 = arith.truncf %274 : vector<16x32xf32> to vector<16x32xbf16>
    %cst_98 = arith.constant dense<0.000000e+00> : vector<16x128xf32>
    %285 = tpu.matmul %284, %4, %cst_98 {dimension_numbers = #tpu.dot_dimension_numbers<[1], [0], [0], [1], [0, 0, 1, 1], [], []>} : vector<16x32xbf16>, vector<32x128xbf16>, vector<16x128xf32> -> vector<16x128xf32>
    %286 = arith.addf %283, %285 : vector<16x128xf32>
    %287 = vector.broadcast %5 : vector<1x128xf32> to vector<16x128xf32>
    %288 = arith.addf %286, %287 : vector<16x128xf32>
    %289 = vector.extract_strided_slice %288 {offsets = [0, 0], sizes = [16, 32], strides = [1, 1]} : vector<16x128xf32> to vector<16x32xf32>
    %290 = arith.negf %289 : vector<16x32xf32>
    %291 = math.exp %290 : vector<16x32xf32>
    %cst_99 = arith.constant 1.000000e+00 : f32
    %292 = vector.broadcast %cst_99 : f32 to vector<16x32xf32>
    %293 = arith.addf %292, %291 : vector<16x32xf32>
    %294 = arith.divf %292, %293 : vector<16x32xf32>
    %295 = vector.extract_strided_slice %288 {offsets = [0, 32], sizes = [16, 32], strides = [1, 1]} : vector<16x128xf32> to vector<16x32xf32>
    %296 = arith.negf %295 : vector<16x32xf32>
    %297 = math.exp %296 : vector<16x32xf32>
    %cst_100 = arith.constant 1.000000e+00 : f32
    %298 = vector.broadcast %cst_100 : f32 to vector<16x32xf32>
    %299 = arith.addf %298, %297 : vector<16x32xf32>
    %300 = arith.divf %298, %299 : vector<16x32xf32>
    %301 = vector.extract_strided_slice %288 {offsets = [0, 64], sizes = [16, 32], strides = [1, 1]} : vector<16x128xf32> to vector<16x32xf32>
    %302 = math.tanh %301 : vector<16x32xf32>
    %303 = vector.extract_strided_slice %288 {offsets = [0, 96], sizes = [16, 32], strides = [1, 1]} : vector<16x128xf32> to vector<16x32xf32>
    %304 = arith.negf %303 : vector<16x32xf32>
    %305 = math.exp %304 : vector<16x32xf32>
    %cst_101 = arith.constant 1.000000e+00 : f32
    %306 = vector.broadcast %cst_101 : f32 to vector<16x32xf32>
    %307 = arith.addf %306, %305 : vector<16x32xf32>
    %308 = arith.divf %306, %307 : vector<16x32xf32>
    %309 = arith.mulf %300, %272 : vector<16x32xf32>
    %310 = arith.mulf %294, %302 : vector<16x32xf32>
    %311 = arith.addf %309, %310 : vector<16x32xf32>
    %312 = math.tanh %311 : vector<16x32xf32>
    %313 = arith.mulf %308, %312 : vector<16x32xf32>
    %314 = arith.extf %282 : vector<16x32xbf16> to vector<16x32xf32>
    %315 = arith.addf %313, %314 : vector<16x32xf32>
    %316 = arith.truncf %315 : vector<16x32xf32> to vector<16x32xbf16>
    %c0_102 = arith.constant 0 : index
    %c7_103 = arith.constant 7 : index
    %c0_104 = arith.constant 0 : index
    %c0_105 = arith.constant 0 : index
    %317 = vector.load %arg7[%c0_102, %c7_103, %c0_104, %c0_105] : memref<1x8x16x32xbf16, #tpu.memory_space<vmem>>, vector<1x1x16x32xbf16>
    %318 = vector.shape_cast %317 : vector<1x1x16x32xbf16> to vector<16x32xbf16>
    %319 = vector.shape_cast %316 : vector<16x32xbf16> to vector<1x1x16x32xbf16>
    tpu.vector_store %arg7[%c0_102, %c7_103, %c0_104, %c0_105], %319 {strides = array<i32>} : memref<1x8x16x32xbf16, #tpu.memory_space<vmem>>, vector<1x1x16x32xbf16>,
    %c0_106 = arith.constant 0 : index
    %c0_107 = arith.constant 0 : index
    %320 = vector.load %arg11[%c0_106, %c0_107] : memref<16x32xf32, #tpu.memory_space<vmem>>, vector<16x32xf32>
    tpu.vector_store %arg11[%c0_106, %c0_107], %313 {strides = array<i32>} : memref<16x32xf32, #tpu.memory_space<vmem>>, vector<16x32xf32>,
    %c0_108 = arith.constant 0 : index
    %c0_109 = arith.constant 0 : index
    %321 = vector.load %arg12[%c0_108, %c0_109] : memref<16x32xf32, #tpu.memory_space<vmem>>, vector<16x32xf32>
    tpu.vector_store %arg12[%c0_108, %c0_109], %311 {strides = array<i32>} : memref<16x32xf32, #tpu.memory_space<vmem>>, vector<16x32xf32>,
    return
  }
  func.func @transform_0(%arg0: i32, %arg1: i32, %arg2: i32) -> (i32, i32, i32, i32) {
    %c0_i32 = arith.constant 0 : i32
    %c0_i32_0 = arith.constant 0 : i32
    return %arg0, %arg2, %arg1, %c0_i32 : i32, i32, i32, i32
  }
  func.func @transform_4(%arg0: i32, %arg1: i32, %arg2: i32) -> (i32, i32, i32, i32) {
    %c0_i32 = arith.constant 0 : i32
    %c0_i32_0 = arith.constant 0 : i32
    return %arg0, %arg2, %arg1, %c0_i32 : i32, i32, i32, i32
  }
}

</mosaic_0001>

<bundles_post_ra>
// kernel: residual_recurrent_encoder.5
= control target key start
LH: loop header
LB: loop body
LE: loop exit
PB: predicated region body
PF: predicated region fallthrough
CT: control target
= control target key end

     0   :  { %9 = vsyncpa [#allocation8], 0  ;;  %s2521_s0 = inlined_call_operand.hbm [shape: bf16[1,8,16,64], index: 0, kind: input, shape index: {}]   ;;  %s2522_s1 = inlined_call_operand.hbm [shape: bf16[1,64,128], index: 1, kind: input, shape index: {}]   ;;  %s2523_s2 = inlined_call_operand.hbm [shape: bf16[1,32,128], index: 2, kind: input, shape index: {}]   ;;  %s2524_s3 = inlined_call_operand.hbm [shape: f32[1,1,128], index: 3, kind: input, shape index: {}]   ;;  %s2525_s4 = inlined_call_operand.hbm [shape: bf16[1,8,16,32], index: 4, kind: output, shape index: {}]  }
   0x1   :  { %10 = vsyncpa [#allocation9], 0  ;;  %s2016_s15 = smov [#allocation7]   ;;  %s1896_s19 = scalar_lea.hbm %s2521_s0, 1024 }
   0x2   :  { %s16_s16 = sshll.u32 %s2016_s15, 4  ;;  %p1897_p0 = scmp.ne.s32.totalorder %s2521_s0, %s1896_s19  ;;  %s17_s16 = int_to_ptr.vmem [resolvable:$true] %s16_s16 }
   0x3   :  { %p1900_p1 = scmp.lt.u32.totalorder %s1896_s19, %s2521_s0 }
   0x5   :  { %p1902_p2 = pnand %p1900_p1, %p1897_p0 }
   0x7   :  { %1905 = shalt.err (!%p1902_p2)
}
   0x8   :  { %s1906_s24 = scalar_lea.vmem %s17_s16, 1024  ;;  %p1911_p4 = scmp.lt.s32.totalorder %s17_s16, %s17_s16 }
   0x9   :  { %p1907_p3 = scmp.ne.s32.totalorder %s17_s16, %s1906_s24  ;;  %p1912_p5 = scmp.lt.s32.totalorder %s1906_s24, %s1906_s24 }
   0xb   :  { %p1913_p6 = por %p1912_p5, %p1911_p4 }
   0xd   :  { %p1914_p7 = pnand %p1913_p6, %p1907_p3 }
   0xf   :  { %1917 = shalt.err (!%p1914_p7)
}
  0x10   :  { %s2017_s25 = smov 64   ;;  %s2018_s26 = smov 4  }
  0x11   :  { %22 = dma.hbm_to_vmem [thread:$0]  %s2521_s0, 1024, %s17_s16, [#allocation8], %s2017_s25, %s2017_s25, %s2018_s26  }
  0x12   :  { %2006 = dma.done.wait [#allocation8], 1024  }
  0x13   :  { %2007 = vsyncadd [#allocation8], 4294966272 }
  0x14   :  { %s2019_s29 = smov [#allocation2]   ;;  %s1918_s7 = scalar_lea.hbm %s2522_s1, 512 }
  0x15   :  { %s41_s30 = sshll.u32 %s2019_s29, 4  ;;  %p1919_p8 = scmp.ne.s32.totalorder %s2522_s1, %s1918_s7  ;;  %s42_s30 = int_to_ptr.vmem [resolvable:$true] %s41_s30 }
  0x16   :  { %p1922_p9 = scmp.lt.u32.totalorder %s1918_s7, %s2522_s1 }
  0x18   :  { %p1924_p10 = pnand %p1922_p9, %p1919_p8 }
  0x1a   :  { %1927 = shalt.err (!%p1924_p10)  }
  0x1b   :  { %s1928_s0 = scalar_lea.vmem %s42_s30, 512  ;;  %p1933_p12 = scmp.lt.s32.totalorder %s42_s30, %s42_s30 }
  0x1c   :  { %p1929_p11 = scmp.ne.s32.totalorder %s42_s30, %s1928_s0  ;;  %p1934_p13 = scmp.lt.s32.totalorder %s1928_s0, %s1928_s0 }
  0x1e   :  { %p1935_p0 = por %p1934_p13, %p1933_p12 }
  0x20   :  { %p1936_p1 = pnand %p1935_p0, %p1929_p11 }
  0x22   :  { %1939 = shalt.err (!%p1936_p1)  }
  0x23   :  { %44 = dma.hbm_to_vmem [thread:$0]  %s2522_s1, 512, %s42_s30, [#allocation11] }
  0x24   :  { %2008 = dma.done.wait [#allocation11], 512 }
  0x25   :  { %2009 = vsyncadd [#allocation11], 4294966784 }
  0x26   :  { %s2020_s14 = smov [#allocation3]   ;;  %s1940_s18 = scalar_lea.hbm %s2523_s2, 256 }
  0x27   :  { %s59_s15 = sshll.u32 %s2020_s14, 4  ;;  %p1941_p2 = scmp.ne.s32.totalorder %s2523_s2, %s1940_s18  ;;  %s60_s15 = int_to_ptr.vmem [resolvable:$true] %s59_s15 }
  0x28   :  { %p1944_p3 = scmp.lt.u32.totalorder %s1940_s18, %s2523_s2 }
  0x2a   :  { %p1946_p4 = pnand %p1944_p3, %p1941_p2 }
  0x2c   :  { %1949 = shalt.err (!%p1946_p4)  }
  0x2d   :  { %s1950_s1 = scalar_lea.vmem %s60_s15, 256  ;;  %p1955_p6 = scmp.lt.s32.totalorder %s60_s15, %s60_s15 }
  0x2e   :  { %p1951_p5 = scmp.ne.s32.totalorder %s60_s15, %s1950_s1  ;;  %p1956_p7 = scmp.lt.s32.totalorder %s1950_s1, %s1950_s1 }
  0x30   :  { %p1957_p8 = por %p1956_p7, %p1955_p6 }
  0x32   :  { %p1958_p9 = pnand %p1957_p8, %p1951_p5 }
  0x34   :  { %1961 = shalt.err (!%p1958_p9)  }
  0x35   :  { %62 = dma.hbm_to_vmem [thread:$0]  %s2523_s2, 256, %s60_s15, [#allocation16] }
  0x36   :  { %2010 = dma.done.wait [#allocation16], 256 }
  0x37   :  { %2011 = vsyncadd [#allocation16], 4294967040 }
  0x38   :  { %s2021_s27 = smov [#allocation4]   ;;  %s1962_s5 = scalar_lea.hbm %s2524_s3, 16 }
  0x39   :  { %s74_s28 = sshll.u32 %s2021_s27, 4  ;;  %p1963_p10 = scmp.ne.s32.totalorder %s2524_s3, %s1962_s5  ;;  %s75_s28 = int_to_ptr.vmem [resolvable:$true] %s74_s28 }
  0x3a   :  { %p1966_p11 = scmp.lt.u32.totalorder %s1962_s5, %s2524_s3 }
  0x3c   :  { %p1968_p12 = pnand %p1966_p11, %p1963_p10 }
  0x3e   :  { %1971 = shalt.err (!%p1968_p12)  }
  0x3f   :  { %s1972_s2 = scalar_lea.vmem %s75_s28, 16  ;;  %p1977_p0 = scmp.lt.s32.totalorder %s75_s28, %s75_s28 }
  0x40   :  { %p1973_p13 = scmp.ne.s32.totalorder %s75_s28, %s1972_s2  ;;  %p1978_p1 = scmp.lt.s32.totalorder %s1972_s2, %s1972_s2 }
  0x42   :  { %p1979_p2 = por %p1978_p1, %p1977_p0 }
  0x44   :  { %p1980_p3 = pnand %p1979_p2, %p1973_p13 }
  0x46   :  { %1983 = shalt.err (!%p1980_p3)  }
  0x47   :  { %77 = dma.hbm_to_vmem [thread:$0]  %s2524_s3, 16, %s75_s28, [#allocation19] }
  0x48   :  { %2012 = dma.done.wait [#allocation19], 16 }
  0x49   :  { %2013 = vsyncadd [#allocation19], 4294967280  ;;  %v2103_v0 = vld [vmem:[#allocation3] sm:$0xff]  ;;  %vm81_vm0 = vcmask 261120   ;;  %v2022_v1 = vmov 0.0   ;;  %vm2023_vm1 = vmmov 0  }
  0x4a   :  { %1589 = vmatprep.subr.bf16.mxu1 %v2022_v1  ;;  %1593 = vmatprep.mubr.msk.bf16.mxu1 %vm2023_vm1, %v2022_v1  ;;  %82 = vst.msk [vmem:[#allocation5] sm:$0xff] %vm81_vm0, %v2022_v1  ;;  %83 = vst.msk [vmem:[#allocation5 + $0x8] sm:$0xff] %vm81_vm0, %v2022_v1  ;;  %v2117_v2 = vld [vmem:[#allocation3 + $0x8] sm:$0xff]  ;;  %v2129_v7 = vld [vmem:[#allocation2] sm:$0xff]  ;;  %s2024_s3 = smov 32   ;;  %vm150_vm2 = vcmask 523264  }
  0x4b   :  { %84 = vst.msk [vmem:[#allocation6] sm:$0xff] %vm81_vm0, %v2022_v1  ;;  %85 = vst.msk [vmem:[#allocation6 + $0x8] sm:$0xff] %vm81_vm0, %v2022_v1  ;;  %1590 = vmatpush3.bf16.msra.mxu1 %v2103_v0  ;;  %1609 = vmatprep.subr.bf16.mxu0 %v2022_v1  ;;  %v2137_v9 = vld [vmem:[#allocation2 + $0x8] sm:$0xff]  ;;  %v2142_v10 = vld [vmem:[#allocation2 + $0x10] sm:$0xff]  ;;  %vm271_vm3 = vcmask 257024   ;;  %s2025_s0 = smov 96  }
  0x4c   :  { %1591 = vmatprep.subr.bf16.mxu1 %v2022_v1  ;;  %1610 = vmatpush3.bf16.msra.mxu0 %v2103_v0  ;;  %v2146_v11 = vld [vmem:[#allocation2 + $0x18] sm:$0xff]  ;;  %v2157_v17 = vld [vmem:[#allocation4] ss:$0 sm:$0xff]  ;;  %s2026_s12 = smov [#allocation10]  }
  0x4d   :  { %1611 = vmatprep.subr.bf16.mxu0 %v2022_v1  ;;  %1613 = vmatprep.mubr.msk.bf16.mxu0 %vm2023_vm1, %v2022_v1  ;;  %v1760_v12 = vld [vmem:[#allocation7] sm:$0xff]   ;;  %v1761_v56 = vld [vmem:[#allocation7 + $0x8] sm:$0xff]   ;;  %s1440_s13 = sshll.u32 %s2026_s12, 4  ;;  %s1441_s13 = int_to_ptr.vmem [resolvable:$true] %s1440_s13 }
  0x4e   :  { %s1984_s14 = scalar_lea.vmem %s1441_s13, 1024  ;;  %p1989_p5 = scmp.lt.s32.totalorder %s1441_s13, %s1441_s13 }
  0x4f   :  { %1592 = vmatpush3.bf16.msra.mxu1 %v2117_v2  ;;  %p1985_p4 = scmp.ne.s32.totalorder %s1441_s13, %s1984_s14  ;;  %p1990_p6 = scmp.lt.s32.totalorder %s1984_s14, %s1984_s14 }
  0x50   :  { %1597 = vmatprep.subr.bf16.mxu1 %v2022_v1  ;;  %1612 = vmatpush3.bf16.msra.mxu0 %v2117_v2 }
  0x51   :  { %v93_v3 = vld [vmem:[#allocation5] sm:$0xff]  ;;  %v94_v4 = vld [vmem:[#allocation5 + $0x8] sm:$0xff]  ;;  %1617 = vmatprep.subr.bf16.mxu0 %v2022_v1  ;;  %p1991_p7 = por %p1990_p6, %p1989_p5 }
  0x52   :  { %v95_v5 = vld [vmem:[#allocation6] sm:$0xff]  ;;  %v99_v6 = vpack.c.bf16 %v94_v4, %v93_v3  ;;  %v96_v8 = vld [vmem:[#allocation6 + $0x8] sm:$0xff] }
  0x53   :  { %219 = vrot.lane.b32.xlu1 %v95_v5, %s2024_s3  ;;  %p1992_p8 = pnand %p1991_p7, %p1985_p4 }
  0x54   :  { %1594 = vmatmul.mubr.msk.bf16.vlgmr.msra.gmra.mrb[0].mxu1 %vm81_vm0, %v99_v6 }
  0x55   :  { %1598 = vmatpush3.bf16.msra.mxu1 %v2129_v7  ;;  %1605 = vmatprep.mubr.msk.bf16.mxu1 %vm2023_vm1, %v2022_v1 }
  0x56   :  { %1599 = vmatprep.subr.bf16.mxu1 %v2022_v1 }
  0x57   :  { %221 = vrot.lane.b32.xlu1 %v96_v8, %s2024_s3 }
  0x59   :  { %1600 = vmatpush3.bf16.msra.mxu1 %v2137_v9 }
  0x5a   :  { %1601 = vmatprep.subr.bf16.mxu1 %v2022_v1 }
  0x5d   :  { %1602 = vmatpush3.bf16.msra.mxu1 %v2142_v10 }
  0x5e   :  { %1603 = vmatprep.subr.bf16.mxu1 %v2022_v1 }
  0x61   :  { %1604 = vmatpush3.bf16.msra.mxu1 %v2146_v11 }
  0x62   :  { %1629 = vmatprep.subr.bf16.mxu1 %v2022_v1 }
  0x64   :  { %1606 = vmatmul.mubr.msk.bf16.vlgmr.msra.gmra.mrb[4].mxu1 %vm150_vm2, %v1760_v12 }
  0x65   :  { %1630 = vmatpush3.bf16.msra.mxu1 %v2103_v0  ;;  %1633 = vmatprep.mubr.msk.bf16.mxu1 %vm2023_vm1, %v2022_v1 }
  0x66   :  { %1631 = vmatprep.subr.bf16.mxu1 %v2022_v1 }
  0x69   :  { %1632 = vmatpush3.bf16.msra.mxu1 %v2117_v2 }
  0x6a   :  { %1637 = vmatprep.subr.bf16.mxu1 %v2022_v1 }
  0xc5   :  { %v220_v40 = vpop.permute.xlu1 %219 }
  0xc9   :  { %v222_v42 = vpop.permute.xlu1 %221 }
 0x127   :  { %v138_v13 = vpop.f32.mrb[0].mxu1 }
 0x128   :  { %v1595_v14 = vpop.f32.mrb[1].mxu1 }
 0x129   :  { %v141_v15 = vpop.f32.mrb[2].mxu1 }
 0x12a   :  { %v1596_v16 = vpop.f32.mrb[3].mxu1 }
 0x137   :  { %v188_v18 = vpop.f32.mrb[4].mxu1 }
 0x138   :  { %v189_v19 = vadd.f32 %v188_v18, %v138_v13  ;;  %v1607_v20 = vpop.f32.mrb[5].mxu1 }
 0x139   :  { %v191_v21 = vpop.f32.mrb[6].mxu1 }
 0x13a   :  { %v201_v22 = vadd.f32 %v2157_v17, %v189_v19  ;;  %v192_v23 = vadd.f32 %v191_v21, %v141_v15  ;;  %v1608_v24 = vpop.f32.mrb[7].mxu1 }
 0x13c   :  { %v202_v25 = vadd.f32 %v2157_v17, %v192_v23  ;;  %1768 = vtanh.f32 %v201_v22  ;;  %v1456_v28 = vmul.f32 -1.442695, %v201_v22 }
 0x13e   :  { %1770 = vtanh.f32 %v202_v25  ;;  %v1457_v29 = vmul.f32 -1.442695, %v202_v25 }
 0x13f   :  { %1772 = vpow2.f32 %v1456_v28 }
 0x140   :  { %1774 = vpow2.f32 %v1457_v29 }
 0x146   :  { %v1769_v26 = vpop.eup %1768 }
 0x147   :  { %229 = vrot.lane.b32.xlu0 %v1769_v26, %s2017_s25 }
 0x148   :  { %v1771_v27 = vpop.eup %1770 }
 0x149   :  { %v1773_v30 = vpop.eup %1772 }
 0x14a   :  { %v209_v31 = vadd.f32 1.0, %v1773_v30  ;;  %v1775_v32 = vpop.eup %1774 }
 0x14b   :  { %231 = vrot.lane.b32.xlu0 %v1771_v27, %s2017_s25  ;;  %v210_v33 = vadd.f32 1.0, %v1775_v32 }
 0x14c   :  { %1776 = vrcp.f32 %v209_v31 }
 0x14d   :  { %1778 = vrcp.f32 %v210_v33 }
 0x156   :  { %v1777_v34 = vpop.eup %1776 }
 0x157   :  { %v1779_v37 = vpop.eup %1778  ;;  %v225_v41 = vmul.f32 %v1777_v34, %v220_v40 }
 0x158   :  { %v226_v45 = vmul.f32 %v1779_v37, %v222_v42 }
 0x1b9   :  { %v230_v35 = vpop.permute.xlu0 %229 }
 0x1ba   :  { %v235_v36 = vmul.f32 %v1777_v34, %v230_v35 }
 0x1bc   :  { %239 = vrot.lane.b32.xlu0 %v235_v36, %s2024_s3 }
 0x1bd   :  { %v232_v38 = vpop.permute.xlu0 %231 }
 0x1be   :  { %v236_v39 = vmul.f32 %v1779_v37, %v232_v38 }
 0x1c0   :  { %241 = vrot.lane.b32.xlu1 %v236_v39, %s2024_s3 }
 0x22e   :  { %v240_v43 = vpop.permute.xlu0 %239 }
 0x22f   :  { %v2165_v44 = vadd.f32 %v240_v43, %v225_v41  ;;  %v1762_v41 = vld [vmem:[#allocation7 + $0x10] sm:$0xff]  }
 0x231   :  { %1780 = vtanh.f32 %v2165_v44 }
 0x232   :  { %v242_v46 = vpop.permute.xlu1 %241 }
 0x233   :  { %v2168_v47 = vadd.f32 %v242_v46, %v226_v45 }
 0x235   :  { %1782 = vtanh.f32 %v2168_v47 }
 0x23b   :  { %v1781_v48 = vpop.eup %1780 }
 0x23c   :  { %251 = vrot.lane.b32.xlu0 %v1781_v48, %s2017_s25 }
 0x23f   :  { %v1783_v49 = vpop.eup %1782 }
 0x240   :  { %253 = vrot.lane.b32.xlu1 %v1783_v49, %s2017_s25 }
 0x2ae   :  { %v252_v50 = vpop.permute.xlu0 %251 }
 0x2af   :  { %v2173_v52 = vmul.f32 %v1777_v34, %v252_v50 }
 0x2b2   :  { %v254_v51 = vpop.permute.xlu1 %253 }
 0x2b3   :  { %v2175_v53 = vmul.f32 %v1779_v37, %v254_v51 }
 0x2b5   :  { %v259_v54 = vpack.c.bf16 %v2175_v53, %v2173_v52 }
 0x2b7   :  { %277 = vrot.lane.b32.xlu0 %v259_v54, %s2024_s3 }
 0x329   :  { %v278_v55 = vpop.permute.xlu0 %277 }
 0x32a   :  { %1614 = vmatmul.mubr.msk.bf16.vlgmr.msra.gmra.mrb[0].mxu0 %vm81_vm0, %v278_v55 }
 0x32b   :  { %1618 = vmatpush3.bf16.msra.mxu0 %v2129_v7  ;;  %1625 = vmatprep.mubr.msk.bf16.mxu0 %vm2023_vm1, %v2022_v1 }
 0x32c   :  { %1619 = vmatprep.subr.bf16.mxu0 %v2022_v1 }
 0x32f   :  { %1620 = vmatpush3.bf16.msra.mxu0 %v2137_v9 }
 0x330   :  { %1621 = vmatprep.subr.bf16.mxu0 %v2022_v1 }
 0x333   :  { %1622 = vmatpush3.bf16.msra.mxu0 %v2142_v10 }
 0x334   :  { %1623 = vmatprep.subr.bf16.mxu0 %v2022_v1 }
 0x337   :  { %1624 = vmatpush3.bf16.msra.mxu0 %v2146_v11 }
 0x338   :  { %1649 = vmatprep.subr.bf16.mxu0 %v2022_v1 }
 0x33a   :  { %1626 = vmatmul.mubr.msk.bf16.vlgmr.msra.gmra.mrb[4].mxu0 %vm150_vm2, %v1761_v56 }
 0x33b   :  { %1650 = vmatpush3.bf16.msra.mxu0 %v2103_v0  ;;  %1653 = vmatprep.mubr.msk.bf16.mxu0 %vm2023_vm1, %v2022_v1 }
 0x33c   :  { %1651 = vmatprep.subr.bf16.mxu0 %v2022_v1 }
 0x33f   :  { %1652 = vmatpush3.bf16.msra.mxu0 %v2117_v2 }
 0x340   :  { %1657 = vmatprep.subr.bf16.mxu0 %v2022_v1 }
 0x3fd   :  { %v316_v57 = vpop.f32.mrb[0].mxu0 }
 0x3fe   :  { %v1615_v58 = vpop.f32.mrb[1].mxu0 }
 0x3ff   :  { %v319_v59 = vpop.f32.mrb[2].mxu0 }
 0x400   :  { %v1616_v60 = vpop.f32.mrb[3].mxu0 }
 0x40d   :  { %v365_v61 = vpop.f32.mrb[4].mxu0 }
 0x40e   :  { %v366_v62 = vadd.f32 %v365_v61, %v316_v57  ;;  %v1627_v63 = vpop.f32.mrb[5].mxu0 }
 0x40f   :  { %v368_v3 = vpop.f32.mrb[6].mxu0 }
 0x410   :  { %v372_v4 = vadd.f32 %v2157_v17, %v366_v62  ;;  %v369_v5 = vadd.f32 %v368_v3, %v319_v59  ;;  %v1628_v6 = vpop.f32.mrb[7].mxu0 }
 0x412   :  { %1784 = vtanh.f32 %v372_v4  ;;  %v373_v8 = vadd.f32 %v2157_v17, %v369_v5  ;;  %v1463_v14 = vmul.f32 -1.442695, %v372_v4 }
 0x414   :  { %1786 = vtanh.f32 %v373_v8  ;;  %v1464_v15 = vmul.f32 -1.442695, %v373_v8 }
 0x415   :  { %1788 = vpow2.f32 %v1463_v14 }
 0x416   :  { %1790 = vpow2.f32 %v1464_v15 }
 0x41c   :  { %v1785_v12 = vpop.eup %1784 }
 0x41d   :  { %392 = vrot.lane.b32.xlu1 %v1785_v12, %s2017_s25 }
 0x41e   :  { %v1787_v13 = vpop.eup %1786 }
 0x41f   :  { %394 = vrot.lane.b32.xlu0 %v1787_v13, %s2017_s25  ;;  %v1789_v16 = vpop.eup %1788 }
 0x420   :  { %v1791_v18 = vpop.eup %1790  ;;  %v380_v19 = vadd.f32 1.0, %v1789_v16 }
 0x421   :  { %v381_v20 = vadd.f32 1.0, %v1791_v18 }
 0x422   :  { %1792 = vrcp.f32 %v380_v19 }
 0x423   :  { %1794 = vrcp.f32 %v381_v20 }
 0x42c   :  { %v1793_v21 = vpop.eup %1792 }
 0x42d   :  { %v1795_v24 = vpop.eup %1794  ;;  %v388_v27 = vmul.f32 %v1793_v21, %v2165_v44 }
 0x42e   :  { %v389_v30 = vmul.f32 %v1795_v24, %v2168_v47 }
 0x48f   :  { %v393_v22 = vpop.permute.xlu1 %392 }
 0x490   :  { %v398_v23 = vmul.f32 %v1793_v21, %v393_v22 }
 0x491   :  { %v395_v25 = vpop.permute.xlu0 %394 }
 0x492   :  { %402 = vrot.lane.b32.xlu1 %v398_v23, %s2024_s3  ;;  %v399_v26 = vmul.f32 %v1795_v24, %v395_v25 }
 0x494   :  { %404 = vrot.lane.b32.xlu0 %v399_v26, %s2024_s3 }
 0x504   :  { %v403_v28 = vpop.permute.xlu1 %402 }
 0x505   :  { %v2205_v29 = vadd.f32 %v403_v28, %v388_v27  ;;  %v1763_v28 = vld [vmem:[#allocation7 + $0x18] sm:$0xff]  }
 0x506   :  { %v405_v31 = vpop.permute.xlu0 %404 }
 0x507   :  { %1796 = vtanh.f32 %v2205_v29  ;;  %v2209_v32 = vadd.f32 %v405_v31, %v389_v30 }
 0x509   :  { %1798 = vtanh.f32 %v2209_v32 }
 0x511   :  { %v1797_v33 = vpop.eup %1796 }
 0x512   :  { %414 = vrot.lane.b32.xlu1 %v1797_v33, %s2017_s25 }
 0x513   :  { %v1799_v34 = vpop.eup %1798 }
 0x514   :  { %416 = vrot.lane.b32.xlu0 %v1799_v34, %s2017_s25 }
 0x584   :  { %v415_v35 = vpop.permute.xlu1 %414 }
 0x585   :  { %v2214_v37 = vmul.f32 %v1793_v21, %v415_v35 }
 0x586   :  { %v417_v36 = vpop.permute.xlu0 %416 }
 0x587   :  { %v2216_v38 = vmul.f32 %v1795_v24, %v417_v36 }
 0x589   :  { %v422_v39 = vpack.c.bf16 %v2216_v38, %v2214_v37 }
 0x58b   :  { %440 = vrot.lane.b32.xlu1 %v422_v39, %s2024_s3 }
 0x5fd   :  { %v441_v40 = vpop.permute.xlu1 %440 }
 0x5fe   :  { %1634 = vmatmul.mubr.msk.bf16.vlgmr.msra.gmra.mrb[8].mxu1 %vm81_vm0, %v441_v40 }
 0x5ff   :  { %1638 = vmatpush3.bf16.msra.mxu1 %v2129_v7  ;;  %1645 = vmatprep.mubr.msk.bf16.mxu1 %vm2023_vm1, %v2022_v1 }
 0x600   :  { %1639 = vmatprep.subr.bf16.mxu1 %v2022_v1 }
 0x603   :  { %1640 = vmatpush3.bf16.msra.mxu1 %v2137_v9 }
 0x604   :  { %1641 = vmatprep.subr.bf16.mxu1 %v2022_v1 }
 0x607   :  { %1642 = vmatpush3.bf16.msra.mxu1 %v2142_v10 }
 0x608   :  { %1643 = vmatprep.subr.bf16.mxu1 %v2022_v1 }
 0x60b   :  { %1644 = vmatpush3.bf16.msra.mxu1 %v2146_v11 }
 0x60c   :  { %1669 = vmatprep.subr.bf16.mxu1 %v2022_v1 }
 0x60e   :  { %1646 = vmatmul.mubr.msk.bf16.vlgmr.msra.gmra.mrb[12].mxu1 %vm150_vm2, %v1762_v41 }
 0x60f   :  { %1670 = vmatpush3.bf16.msra.mxu1 %v2103_v0  ;;  %1673 = vmatprep.mubr.msk.bf16.mxu1 %vm2023_vm1, %v2022_v1 }
 0x610   :  { %1671 = vmatprep.subr.bf16.mxu1 %v2022_v1 }
 0x613   :  { %1672 = vmatpush3.bf16.msra.mxu1 %v2117_v2 }
 0x614   :  { %1677 = vmatprep.subr.bf16.mxu1 %v2022_v1 }
 0x6d1   :  { %v479_v42 = vpop.f32.mrb[8].mxu1 }
 0x6d2   :  { %v1635_v43 = vpop.f32.mrb[9].mxu1 }
 0x6d3   :  { %v482_v44 = vpop.f32.mrb[10].mxu1 }
 0x6d4   :  { %v1636_v45 = vpop.f32.mrb[11].mxu1 }
 0x6e1   :  { %v528_v46 = vpop.f32.mrb[12].mxu1 }
 0x6e2   :  { %v529_v47 = vadd.f32 %v528_v46, %v479_v42  ;;  %v1647_v48 = vpop.f32.mrb[13].mxu1 }
 0x6e3   :  { %v531_v49 = vpop.f32.mrb[14].mxu1 }
 0x6e4   :  { %v535_v50 = vadd.f32 %v2157_v17, %v529_v47  ;;  %v532_v51 = vadd.f32 %v531_v49, %v482_v44  ;;  %v1648_v54 = vpop.f32.mrb[15].mxu1 }
 0x6e6   :  { %1800 = vtanh.f32 %v535_v50  ;;  %v536_v55 = vadd.f32 %v2157_v17, %v532_v51  ;;  %v1470_v58 = vmul.f32 -1.442695, %v535_v50 }
 0x6e8   :  { %1802 = vtanh.f32 %v536_v55  ;;  %v1471_v59 = vmul.f32 -1.442695, %v536_v55 }
 0x6e9   :  { %1804 = vpow2.f32 %v1470_v58 }
 0x6ea   :  { %1806 = vpow2.f32 %v1471_v59 }
 0x6f0   :  { %v1801_v56 = vpop.eup %1800 }
 0x6f1   :  { %555 = vrot.lane.b32.xlu0 %v1801_v56, %s2017_s25 }
 0x6f2   :  { %v1803_v57 = vpop.eup %1802 }
 0x6f3   :  { %557 = vrot.lane.b32.xlu1 %v1803_v57, %s2017_s25  ;;  %v1805_v60 = vpop.eup %1804 }
 0x6f4   :  { %v1807_v61 = vpop.eup %1806  ;;  %v543_v62 = vadd.f32 1.0, %v1805_v60 }
 0x6f5   :  { %v544_v63 = vadd.f32 1.0, %v1807_v61 }
 0x6f6   :  { %1808 = vrcp.f32 %v543_v62 }
 0x6f7   :  { %1810 = vrcp.f32 %v544_v63 }
 0x700   :  { %v1809_v3 = vpop.eup %1808 }
 0x701   :  { %v1811_v6 = vpop.eup %1810  ;;  %v551_v13 = vmul.f32 %v1809_v3, %v2205_v29 }
 0x702   :  { %v552_v16 = vmul.f32 %v1811_v6, %v2209_v32 }
 0x763   :  { %v556_v4 = vpop.permute.xlu0 %555 }
 0x764   :  { %v561_v5 = vmul.f32 %v1809_v3, %v556_v4 }
 0x765   :  { %v558_v8 = vpop.permute.xlu1 %557 }
 0x766   :  { %565 = vrot.lane.b32.xlu0 %v561_v5, %s2024_s3  ;;  %v562_v12 = vmul.f32 %v1811_v6, %v558_v8 }
 0x768   :  { %567 = vrot.lane.b32.xlu1 %v562_v12, %s2024_s3 }
 0x7d8   :  { %v566_v14 = vpop.permute.xlu0 %565 }
 0x7d9   :  { %v2246_v15 = vadd.f32 %v566_v14, %v551_v13 }
 0x7da   :  { %v568_v18 = vpop.permute.xlu1 %567 }
 0x7db   :  { %1812 = vtanh.f32 %v2246_v15  ;;  %v2250_v19 = vadd.f32 %v568_v18, %v552_v16  ;;  %v1764_v16 = vld [vmem:[#allocation7 + $0x20] sm:$0xff]  }
 0x7dd   :  { %1814 = vtanh.f32 %v2250_v19 }
 0x7e5   :  { %v1813_v20 = vpop.eup %1812 }
 0x7e6   :  { %577 = vrot.lane.b32.xlu0 %v1813_v20, %s2017_s25 }
 0x7e7   :  { %v1815_v21 = vpop.eup %1814 }
 0x7e8   :  { %579 = vrot.lane.b32.xlu1 %v1815_v21, %s2017_s25 }
 0x858   :  { %v578_v22 = vpop.permute.xlu0 %577 }
 0x859   :  { %v2255_v24 = vmul.f32 %v1809_v3, %v578_v22 }
 0x85a   :  { %v580_v23 = vpop.permute.xlu1 %579 }
 0x85b   :  { %v2257_v25 = vmul.f32 %v1811_v6, %v580_v23 }
 0x85d   :  { %v585_v26 = vpack.c.bf16 %v2257_v25, %v2255_v24 }
 0x85f   :  { %603 = vrot.lane.b32.xlu0 %v585_v26, %s2024_s3 }
 0x8d1   :  { %v604_v27 = vpop.permute.xlu0 %603 }
 0x8d2   :  { %1654 = vmatmul.mubr.msk.bf16.vlgmr.msra.gmra.mrb[8].mxu0 %vm81_vm0, %v604_v27 }
 0x8d3   :  { %1658 = vmatpush3.bf16.msra.mxu0 %v2129_v7  ;;  %1665 = vmatprep.mubr.msk.bf16.mxu0 %vm2023_vm1, %v2022_v1 }
 0x8d4   :  { %1659 = vmatprep.subr.bf16.mxu0 %v2022_v1 }
 0x8d7   :  { %1660 = vmatpush3.bf16.msra.mxu0 %v2137_v9 }
 0x8d8   :  { %1661 = vmatprep.subr.bf16.mxu0 %v2022_v1 }
 0x8db   :  { %1662 = vmatpush3.bf16.msra.mxu0 %v2142_v10 }
 0x8dc   :  { %1663 = vmatprep.subr.bf16.mxu0 %v2022_v1 }
 0x8df   :  { %1664 = vmatpush3.bf16.msra.mxu0 %v2146_v11 }
 0x8e0   :  { %1689 = vmatprep.subr.bf16.mxu0 %v2022_v1 }
 0x8e2   :  { %1666 = vmatmul.mubr.msk.bf16.vlgmr.msra.gmra.mrb[12].mxu0 %vm150_vm2, %v1763_v28 }
 0x8e3   :  { %1690 = vmatpush3.bf16.msra.mxu0 %v2103_v0  ;;  %1693 = vmatprep.mubr.msk.bf16.mxu0 %vm2023_vm1, %v2022_v1 }
 0x8e4   :  { %1691 = vmatprep.subr.bf16.mxu0 %v2022_v1 }
 0x8e7   :  { %1692 = vmatpush3.bf16.msra.mxu0 %v2117_v2 }
 0x8e8   :  { %1697 = vmatprep.subr.bf16.mxu0 %v2022_v1 }
 0x9a5   :  { %v642_v29 = vpop.f32.mrb[8].mxu0 }
 0x9a6   :  { %v1655_v30 = vpop.f32.mrb[9].mxu0 }
 0x9a7   :  { %v645_v31 = vpop.f32.mrb[10].mxu0 }
 0x9a8   :  { %v1656_v32 = vpop.f32.mrb[11].mxu0 }
 0x9b5   :  { %v691_v33 = vpop.f32.mrb[12].mxu0 }
 0x9b6   :  { %v692_v34 = vadd.f32 %v691_v33, %v642_v29  ;;  %v1667_v35 = vpop.f32.mrb[13].mxu0 }
 0x9b7   :  { %v694_v36 = vpop.f32.mrb[14].mxu0 }
 0x9b8   :  { %v698_v39 = vadd.f32 %v2157_v17, %v692_v34  ;;  %v695_v40 = vadd.f32 %v694_v36, %v645_v31  ;;  %v1668_v41 = vpop.f32.mrb[15].mxu0 }
 0x9ba   :  { %1816 = vtanh.f32 %v698_v39  ;;  %v699_v42 = vadd.f32 %v2157_v17, %v695_v40  ;;  %v1477_v45 = vmul.f32 -1.442695, %v698_v39 }
 0x9bc   :  { %1818 = vtanh.f32 %v699_v42  ;;  %v1478_v46 = vmul.f32 -1.442695, %v699_v42 }
 0x9bd   :  { %1820 = vpow2.f32 %v1477_v45 }
 0x9be   :  { %1822 = vpow2.f32 %v1478_v46 }
 0x9c4   :  { %v1817_v43 = vpop.eup %1816 }
 0x9c5   :  { %718 = vrot.lane.b32.xlu1 %v1817_v43, %s2017_s25 }
 0x9c6   :  { %v1819_v44 = vpop.eup %1818 }
 0x9c7   :  { %720 = vrot.lane.b32.xlu0 %v1819_v44, %s2017_s25  ;;  %v1821_v47 = vpop.eup %1820 }
 0x9c8   :  { %v1823_v48 = vpop.eup %1822  ;;  %v706_v49 = vadd.f32 1.0, %v1821_v47 }
 0x9c9   :  { %v707_v50 = vadd.f32 1.0, %v1823_v48 }
 0x9ca   :  { %1824 = vrcp.f32 %v706_v49 }
 0x9cb   :  { %1826 = vrcp.f32 %v707_v50 }
 0x9d4   :  { %v1825_v51 = vpop.eup %1824 }
 0x9d5   :  { %v1827_v56 = vpop.eup %1826  ;;  %v714_v59 = vmul.f32 %v1825_v51, %v2246_v15 }
 0x9d6   :  { %v715_v62 = vmul.f32 %v1827_v56, %v2250_v19 }
 0xa37   :  { %v719_v54 = vpop.permute.xlu1 %718 }
 0xa38   :  { %v724_v55 = vmul.f32 %v1825_v51, %v719_v54 }
 0xa39   :  { %v721_v57 = vpop.permute.xlu0 %720 }
 0xa3a   :  { %728 = vrot.lane.b32.xlu1 %v724_v55, %s2024_s3  ;;  %v725_v58 = vmul.f32 %v1827_v56, %v721_v57 }
 0xa3c   :  { %730 = vrot.lane.b32.xlu0 %v725_v58, %s2024_s3 }
 0xaac   :  { %v729_v60 = vpop.permute.xlu1 %728 }
 0xaad   :  { %v2287_v61 = vadd.f32 %v729_v60, %v714_v59 }
 0xaae   :  { %v731_v63 = vpop.permute.xlu0 %730 }
 0xaaf   :  { %1828 = vtanh.f32 %v2287_v61  ;;  %v2291_v3 = vadd.f32 %v731_v63, %v715_v62 }
 0xab1   :  { %1830 = vtanh.f32 %v2291_v3 }
 0xab9   :  { %v1829_v4 = vpop.eup %1828 }
 0xaba   :  { %740 = vrot.lane.b32.xlu1 %v1829_v4, %s2017_s25 }
 0xabb   :  { %v1831_v5 = vpop.eup %1830 }
 0xabc   :  { %742 = vrot.lane.b32.xlu0 %v1831_v5, %s2017_s25 }
 0xb2c   :  { %v741_v6 = vpop.permute.xlu1 %740 }
 0xb2d   :  { %v2296_v12 = vmul.f32 %v1825_v51, %v741_v6 }
 0xb2e   :  { %v743_v8 = vpop.permute.xlu0 %742 }
 0xb2f   :  { %v2298_v13 = vmul.f32 %v1827_v56, %v743_v8 }
 0xb31   :  { %v748_v14 = vpack.c.bf16 %v2298_v13, %v2296_v12 }
 0xb33   :  { %766 = vrot.lane.b32.xlu1 %v748_v14, %s2024_s3 }
 0xba5   :  { %v767_v15 = vpop.permute.xlu1 %766 }
 0xba6   :  { %1674 = vmatmul.mubr.msk.bf16.vlgmr.msra.gmra.mrb[16].mxu1 %vm81_vm0, %v767_v15 }
 0xba7   :  { %1678 = vmatpush3.bf16.msra.mxu1 %v2129_v7  ;;  %1685 = vmatprep.mubr.msk.bf16.mxu1 %vm2023_vm1, %v2022_v1 }
 0xba8   :  { %1679 = vmatprep.subr.bf16.mxu1 %v2022_v1 }
 0xbab   :  { %1680 = vmatpush3.bf16.msra.mxu1 %v2137_v9 }
 0xbac   :  { %1681 = vmatprep.subr.bf16.mxu1 %v2022_v1 }
 0xbaf   :  { %1682 = vmatpush3.bf16.msra.mxu1 %v2142_v10 }
 0xbb0   :  { %1683 = vmatprep.subr.bf16.mxu1 %v2022_v1 }
 0xbb3   :  { %1684 = vmatpush3.bf16.msra.mxu1 %v2146_v11 }
 0xbb4   :  { %1709 = vmatprep.subr.bf16.mxu1 %v2022_v1 }
 0xbb6   :  { %1686 = vmatmul.mubr.msk.bf16.vlgmr.msra.gmra.mrb[20].mxu1 %vm150_vm2, %v1764_v16 }
 0xbb7   :  { %1710 = vmatpush3.bf16.msra.mxu1 %v2103_v0  ;;  %1713 = vmatprep.mubr.msk.bf16.mxu1 %vm2023_vm1, %v2022_v1 }
 0xbb8   :  { %1711 = vmatprep.subr.bf16.mxu1 %v2022_v1 }
 0xbbb   :  { %1712 = vmatpush3.bf16.msra.mxu1 %v2117_v2 }
 0xbbc   :  { %1717 = vmatprep.subr.bf16.mxu1 %v2022_v1 }
 0xc79   :  { %v805_v18 = vpop.f32.mrb[16].mxu1 }
 0xc7a   :  { %v1675_v19 = vpop.f32.mrb[17].mxu1 }
 0xc7b   :  { %v808_v20 = vpop.f32.mrb[18].mxu1 }
 0xc7c   :  { %v1676_v21 = vpop.f32.mrb[19].mxu1 }
 0xc89   :  { %v854_v22 = vpop.f32.mrb[20].mxu1 }
 0xc8a   :  { %v855_v23 = vadd.f32 %v854_v22, %v805_v18  ;;  %v1687_v26 = vpop.f32.mrb[21].mxu1 }
 0xc8b   :  { %v857_v27 = vpop.f32.mrb[22].mxu1 }
 0xc8c   :  { %v861_v28 = vadd.f32 %v2157_v17, %v855_v23  ;;  %v858_v29 = vadd.f32 %v857_v27, %v808_v20  ;;  %v1688_v30 = vpop.f32.mrb[23].mxu1 }
 0xc8e   :  { %1832 = vtanh.f32 %v861_v28  ;;  %v862_v31 = vadd.f32 %v2157_v17, %v858_v29  ;;  %v1484_v34 = vmul.f32 -1.442695, %v861_v28 }
 0xc90   :  { %1834 = vtanh.f32 %v862_v31  ;;  %v1485_v35 = vmul.f32 -1.442695, %v862_v31 }
 0xc91   :  { %1836 = vpow2.f32 %v1484_v34 }
 0xc92   :  { %1838 = vpow2.f32 %v1485_v35 }
 0xc98   :  { %v1833_v32 = vpop.eup %1832 }
 0xc99   :  { %881 = vrot.lane.b32.xlu0 %v1833_v32, %s2017_s25 }
 0xc9a   :  { %v1835_v33 = vpop.eup %1834 }
 0xc9b   :  { %883 = vrot.lane.b32.xlu1 %v1835_v33, %s2017_s25  ;;  %v1837_v36 = vpop.eup %1836 }
 0xc9c   :  { %v1839_v39 = vpop.eup %1838  ;;  %v869_v40 = vadd.f32 1.0, %v1837_v36 }
 0xc9d   :  { %v870_v41 = vadd.f32 1.0, %v1839_v39 }
 0xc9e   :  { %1840 = vrcp.f32 %v869_v40 }
 0xc9f   :  { %1842 = vrcp.f32 %v870_v41 }
 0xca8   :  { %v1841_v42 = vpop.eup %1840 }
 0xca9   :  { %v1843_v45 = vpop.eup %1842  ;;  %v877_v48 = vmul.f32 %v1841_v42, %v2287_v61 }
 0xcaa   :  { %v878_v51 = vmul.f32 %v1843_v45, %v2291_v3  ;;  %v1765_v3 = vld [vmem:[#allocation7 + $0x28] sm:$0xff]  }
 0xd0b   :  { %v882_v43 = vpop.permute.xlu0 %881 }
 0xd0c   :  { %v887_v44 = vmul.f32 %v1841_v42, %v882_v43 }
 0xd0d   :  { %v884_v46 = vpop.permute.xlu1 %883 }
 0xd0e   :  { %891 = vrot.lane.b32.xlu0 %v887_v44, %s2024_s3  ;;  %v888_v47 = vmul.f32 %v1843_v45, %v884_v46 }
 0xd10   :  { %893 = vrot.lane.b32.xlu1 %v888_v47, %s2024_s3 }
 0xd80   :  { %v892_v49 = vpop.permute.xlu0 %891 }
 0xd81   :  { %v2328_v50 = vadd.f32 %v892_v49, %v877_v48 }
 0xd82   :  { %v894_v54 = vpop.permute.xlu1 %893 }
 0xd83   :  { %1844 = vtanh.f32 %v2328_v50  ;;  %v2332_v55 = vadd.f32 %v894_v54, %v878_v51 }
 0xd85   :  { %1846 = vtanh.f32 %v2332_v55 }
 0xd8d   :  { %v1845_v56 = vpop.eup %1844 }
 0xd8e   :  { %903 = vrot.lane.b32.xlu0 %v1845_v56, %s2017_s25 }
 0xd8f   :  { %v1847_v57 = vpop.eup %1846 }
 0xd90   :  { %905 = vrot.lane.b32.xlu1 %v1847_v57, %s2017_s25 }
 0xe00   :  { %v904_v58 = vpop.permute.xlu0 %903 }
 0xe01   :  { %v2337_v60 = vmul.f32 %v1841_v42, %v904_v58 }
 0xe02   :  { %v906_v59 = vpop.permute.xlu1 %905 }
 0xe03   :  { %v2339_v61 = vmul.f32 %v1843_v45, %v906_v59 }
 0xe05   :  { %v911_v62 = vpack.c.bf16 %v2339_v61, %v2337_v60 }
 0xe07   :  { %929 = vrot.lane.b32.xlu0 %v911_v62, %s2024_s3 }
 0xe79   :  { %v930_v63 = vpop.permute.xlu0 %929 }
 0xe7a   :  { %1694 = vmatmul.mubr.msk.bf16.vlgmr.msra.gmra.mrb[16].mxu0 %vm81_vm0, %v930_v63 }
 0xe7b   :  { %1698 = vmatpush3.bf16.msra.mxu0 %v2129_v7  ;;  %1705 = vmatprep.mubr.msk.bf16.mxu0 %vm2023_vm1, %v2022_v1 }
 0xe7c   :  { %1699 = vmatprep.subr.bf16.mxu0 %v2022_v1 }
 0xe7f   :  { %1700 = vmatpush3.bf16.msra.mxu0 %v2137_v9 }
 0xe80   :  { %1701 = vmatprep.subr.bf16.mxu0 %v2022_v1 }
 0xe83   :  { %1702 = vmatpush3.bf16.msra.mxu0 %v2142_v10 }
 0xe84   :  { %1703 = vmatprep.subr.bf16.mxu0 %v2022_v1 }
 0xe87   :  { %1704 = vmatpush3.bf16.msra.mxu0 %v2146_v11 }
 0xe88   :  { %1729 = vmatprep.subr.bf16.mxu0 %v2022_v1 }
 0xe8a   :  { %1706 = vmatmul.mubr.msk.bf16.vlgmr.msra.gmra.mrb[20].mxu0 %vm150_vm2, %v1765_v3 }
 0xe8b   :  { %1730 = vmatpush3.bf16.msra.mxu0 %v2103_v0  ;;  %1733 = vmatprep.mubr.msk.bf16.mxu0 %vm2023_vm1, %v2022_v1 }
 0xe8c   :  { %1731 = vmatprep.subr.bf16.mxu0 %v2022_v1 }
 0xe8f   :  { %1732 = vmatpush3.bf16.msra.mxu0 %v2117_v2 }
 0xe90   :  { %1737 = vmatprep.subr.bf16.mxu0 %v2022_v1 }
 0xf4d   :  { %v968_v4 = vpop.f32.mrb[16].mxu0 }
 0xf4e   :  { %v1695_v5 = vpop.f32.mrb[17].mxu0 }
 0xf4f   :  { %v971_v6 = vpop.f32.mrb[18].mxu0 }
 0xf50   :  { %v1696_v8 = vpop.f32.mrb[19].mxu0 }
 0xf5d   :  { %v1017_v14 = vpop.f32.mrb[20].mxu0 }
 0xf5e   :  { %v1018_v15 = vadd.f32 %v1017_v14, %v968_v4  ;;  %v1707_v16 = vpop.f32.mrb[21].mxu0 }
 0xf5f   :  { %v1020_v18 = vpop.f32.mrb[22].mxu0 }
 0xf60   :  { %v1024_v19 = vadd.f32 %v2157_v17, %v1018_v15  ;;  %v1021_v0 = vadd.f32 %v1020_v18, %v971_v6  ;;  %v1708_v20 = vpop.f32.mrb[23].mxu0 }
 0xf62   :  { %1848 = vtanh.f32 %v1024_v19  ;;  %v1025_v21 = vadd.f32 %v2157_v17, %v1021_v0  ;;  %v1491_v23 = vmul.f32 -1.442695, %v1024_v19 }
 0xf64   :  { %1850 = vtanh.f32 %v1025_v21  ;;  %v1492_v26 = vmul.f32 -1.442695, %v1025_v21 }
 0xf65   :  { %1852 = vpow2.f32 %v1491_v23 }
 0xf66   :  { %1854 = vpow2.f32 %v1492_v26 }
 0xf6c   :  { %v1849_v22 = vpop.eup %1848 }
 0xf6d   :  { %1044 = vrot.lane.b32.xlu1 %v1849_v22, %s2017_s25 }
 0xf6e   :  { %v1851_v2 = vpop.eup %1850 }
 0xf6f   :  { %1046 = vrot.lane.b32.xlu0 %v1851_v2, %s2017_s25  ;;  %v1853_v27 = vpop.eup %1852 }
 0xf70   :  { %v1855_v28 = vpop.eup %1854  ;;  %v1032_v29 = vadd.f32 1.0, %v1853_v27 }
 0xf71   :  { %v1033_v30 = vadd.f32 1.0, %v1855_v28 }
 0xf72   :  { %1856 = vrcp.f32 %v1032_v29 }
 0xf73   :  { %1858 = vrcp.f32 %v1033_v30 }
 0xf7c   :  { %v1857_v31 = vpop.eup %1856 }
 0xf7d   :  { %v1859_v34 = vpop.eup %1858  ;;  %v1040_v39 = vmul.f32 %v1857_v31, %v2328_v50 }
 0xf7e   :  { %v1041_v42 = vmul.f32 %v1859_v34, %v2332_v55  ;;  %v1766_v55 = vld [vmem:[#allocation7 + $0x30] sm:$0xff]  }
 0xfdf   :  { %v1045_v32 = vpop.permute.xlu1 %1044 }
 0xfe0   :  { %v1050_v33 = vmul.f32 %v1857_v31, %v1045_v32 }
 0xfe1   :  { %v1047_v35 = vpop.permute.xlu0 %1046 }
 0xfe2   :  { %1054 = vrot.lane.b32.xlu1 %v1050_v33, %s2024_s3  ;;  %v1051_v36 = vmul.f32 %v1859_v34, %v1047_v35 }
 0xfe4   :  { %1056 = vrot.lane.b32.xlu0 %v1051_v36, %s2024_s3 }
0x1054   :  { %v1055_v40 = vpop.permute.xlu1 %1054 }
0x1055   :  { %v2369_v41 = vadd.f32 %v1055_v40, %v1040_v39 }
0x1056   :  { %v1057_v43 = vpop.permute.xlu0 %1056 }
0x1057   :  { %1860 = vtanh.f32 %v2369_v41  ;;  %v2373_v44 = vadd.f32 %v1057_v43, %v1041_v42 }
0x1059   :  { %1862 = vtanh.f32 %v2373_v44 }
0x1061   :  { %v1861_v45 = vpop.eup %1860 }
0x1062   :  { %1066 = vrot.lane.b32.xlu1 %v1861_v45, %s2017_s25 }
0x1063   :  { %v1863_v46 = vpop.eup %1862 }
0x1064   :  { %1068 = vrot.lane.b32.xlu0 %v1863_v46, %s2017_s25  ;;  %v1767_v46 = vld [vmem:[#allocation7 + $0x38] sm:$0xff]  }
0x10d4   :  { %v1067_v47 = vpop.permute.xlu1 %1066 }
0x10d5   :  { %v2378_v49 = vmul.f32 %v1857_v31, %v1067_v47 }
0x10d6   :  { %v1069_v48 = vpop.permute.xlu0 %1068 }
0x10d7   :  { %v2380_v50 = vmul.f32 %v1859_v34, %v1069_v48 }
0x10d9   :  { %v1074_v51 = vpack.c.bf16 %v2380_v50, %v2378_v49 }
0x10db   :  { %1092 = vrot.lane.b32.xlu1 %v1074_v51, %s2024_s3 }
0x114d   :  { %v1093_v54 = vpop.permute.xlu1 %1092 }
0x114e   :  { %1714 = vmatmul.mubr.msk.bf16.vlgmr.msra.gmra.mrb[24].mxu1 %vm81_vm0, %v1093_v54 }
0x114f   :  { %1718 = vmatpush3.bf16.msra.mxu1 %v2129_v7  ;;  %1725 = vmatprep.mubr.msk.bf16.mxu1 %vm2023_vm1, %v2022_v1 }
0x1150   :  { %1719 = vmatprep.subr.bf16.mxu1 %v2022_v1 }
0x1153   :  { %1720 = vmatpush3.bf16.msra.mxu1 %v2137_v9 }
0x1154   :  { %1721 = vmatprep.subr.bf16.mxu1 %v2022_v1 }
0x1157   :  { %1722 = vmatpush3.bf16.msra.mxu1 %v2142_v10 }
0x1158   :  { %1723 = vmatprep.subr.bf16.mxu1 %v2022_v1 }
0x115b   :  { %1724 = vmatpush3.bf16.msra.mxu1 %v2146_v11 }
0x115e   :  { %1726 = vmatmul.mubr.msk.bf16.vlgmr.msra.gmra.mrb[28].mxu1 %vm150_vm2, %v1766_v55 }
0x1221   :  { %v1131_v56 = vpop.f32.mrb[24].mxu1 }
0x1222   :  { %v1715_v57 = vpop.f32.mrb[25].mxu1 }
0x1223   :  { %v1134_v58 = vpop.f32.mrb[26].mxu1 }
0x1224   :  { %v1716_v59 = vpop.f32.mrb[27].mxu1 }
0x1231   :  { %v1180_v62 = vpop.f32.mrb[28].mxu1 }
0x1232   :  { %v1181_v63 = vadd.f32 %v1180_v62, %v1131_v56  ;;  %v1727_v3 = vpop.f32.mrb[29].mxu1 }
0x1233   :  { %v1183_v4 = vpop.f32.mrb[30].mxu1 }
0x1234   :  { %v1187_v5 = vadd.f32 %v2157_v17, %v1181_v63  ;;  %v1184_v6 = vadd.f32 %v1183_v4, %v1134_v58  ;;  %v1728_v8 = vpop.f32.mrb[31].mxu1 }
0x1236   :  { %1864 = vtanh.f32 %v1187_v5  ;;  %v1188_v14 = vadd.f32 %v2157_v17, %v1184_v6  ;;  %v1498_v18 = vmul.f32 -1.442695, %v1187_v5 }
0x1238   :  { %1866 = vtanh.f32 %v1188_v14  ;;  %v1499_v19 = vmul.f32 -1.442695, %v1188_v14 }
0x1239   :  { %1868 = vpow2.f32 %v1498_v18 }
0x123a   :  { %1870 = vpow2.f32 %v1499_v19 }
0x1240   :  { %v1865_v15 = vpop.eup %1864 }
0x1241   :  { %1207 = vrot.lane.b32.xlu0 %v1865_v15, %s2017_s25 }
0x1242   :  { %v1867_v16 = vpop.eup %1866 }
0x1243   :  { %1209 = vrot.lane.b32.xlu1 %v1867_v16, %s2017_s25  ;;  %v1869_v0 = vpop.eup %1868 }
0x1244   :  { %v1871_v20 = vpop.eup %1870  ;;  %v1195_v21 = vadd.f32 1.0, %v1869_v0 }
0x1245   :  { %v1196_v22 = vadd.f32 1.0, %v1871_v20 }
0x1246   :  { %1872 = vrcp.f32 %v1195_v21 }
0x1247   :  { %1874 = vrcp.f32 %v1196_v22 }
0x1250   :  { %v1873_v2 = vpop.eup %1872 }
0x1251   :  { %v1875_v27 = vpop.eup %1874  ;;  %v1203_v30 = vmul.f32 %v1873_v2, %v2369_v41 }
0x1252   :  { %v1204_v33 = vmul.f32 %v1875_v27, %v2373_v44 }
0x12b3   :  { %v1208_v23 = vpop.permute.xlu0 %1207 }
0x12b4   :  { %v1213_v26 = vmul.f32 %v1873_v2, %v1208_v23 }
0x12b5   :  { %v1210_v28 = vpop.permute.xlu1 %1209 }
0x12b6   :  { %1217 = vrot.lane.b32.xlu0 %v1213_v26, %s2024_s3  ;;  %v1214_v29 = vmul.f32 %v1875_v27, %v1210_v28  ;;  %v1510_v28 = vpack.c.bf16 %v2175_v53, %v2175_v53  ;;  %v1514_v53 = vpack.c.bf16 %v2257_v25, %v2257_v25  ;;  %v1518_v25 = vpack.c.bf16 %v2339_v61, %v2339_v61 }
0x12b8   :  { %1219 = vrot.lane.b32.xlu1 %v1214_v29, %s2024_s3  ;;  %v1511_v29 = vpack.c.bf16 %v2214_v37, %v2214_v37  ;;  %v1515_v37 = vpack.c.bf16 %v2296_v12, %v2296_v12  ;;  %v1519_v12 = vpack.c.bf16 %v2378_v49, %v2378_v49 }
0x1328   :  { %v1218_v31 = vpop.permute.xlu0 %1217 }
0x1329   :  { %v2403_v32 = vadd.f32 %v1218_v31, %v1203_v30  ;;  %v1512_v30 = vpack.c.bf16 %v2216_v38, %v2216_v38  ;;  %v1516_v38 = vpack.c.bf16 %v2298_v13, %v2298_v13  ;;  %v1520_v13 = vpack.c.bf16 %v2380_v50, %v2380_v50 }
0x132a   :  { %v1220_v34 = vpop.permute.xlu1 %1219 }
0x132b   :  { %1876 = vtanh.f32 %v2403_v32  ;;  %v2407_v35 = vadd.f32 %v1220_v34, %v1204_v33 }
0x132d   :  { %1878 = vtanh.f32 %v2407_v35 }
0x1335   :  { %v1877_v36 = vpop.eup %1876 }
0x1336   :  { %1229 = vrot.lane.b32.xlu0 %v1877_v36, %s2017_s25 }
0x1337   :  { %v1879_v39 = vpop.eup %1878 }
0x1338   :  { %1231 = vrot.lane.b32.xlu1 %v1879_v39, %s2017_s25 }
0x13a8   :  { %v1230_v40 = vpop.permute.xlu0 %1229 }
0x13a9   :  { %v2412_v42 = vmul.f32 %v1873_v2, %v1230_v40 }
0x13aa   :  { %v1232_v41 = vpop.permute.xlu1 %1231 }
0x13ab   :  { %v2414_v43 = vmul.f32 %v1875_v27, %v1232_v41  ;;  %v1509_v27 = vpack.c.bf16 %v2173_v52, %v2173_v52  ;;  %v1513_v52 = vpack.c.bf16 %v2255_v24, %v2255_v24  ;;  %v1517_v24 = vpack.c.bf16 %v2337_v60, %v2337_v60 }
0x13ac   :  { %v1521_v60 = vpack.c.bf16 %v2412_v42, %v2412_v42 }
0x13ad   :  { %v1237_v44 = vpack.c.bf16 %v2414_v43, %v2412_v42  ;;  %v1522_v61 = vpack.c.bf16 %v2414_v43, %v2414_v43 }
0x13af   :  { %1255 = vrot.lane.b32.xlu0 %v1237_v44, %s2024_s3 }
0x1421   :  { %v1256_v45 = vpop.permute.xlu0 %1255 }
0x1422   :  { %1734 = vmatmul.mubr.msk.bf16.vlgmr.msra.gmra.mrb[24].mxu0 %vm81_vm0, %v1256_v45 }
0x1423   :  { %1738 = vmatpush3.bf16.msra.mxu0 %v2129_v7  ;;  %1745 = vmatprep.mubr.msk.bf16.mxu0 %vm2023_vm1, %v2022_v1 }
0x1424   :  { %1739 = vmatprep.subr.bf16.mxu0 %v2022_v1 }
0x1427   :  { %1740 = vmatpush3.bf16.msra.mxu0 %v2137_v9 }
0x1428   :  { %1741 = vmatprep.subr.bf16.mxu0 %v2022_v1 }
0x142b   :  { %1742 = vmatpush3.bf16.msra.mxu0 %v2142_v10 }
0x142c   :  { %1743 = vmatprep.subr.bf16.mxu0 %v2022_v1 }
0x142f   :  { %1744 = vmatpush3.bf16.msra.mxu0 %v2146_v11 }
0x1432   :  { %1746 = vmatmul.mubr.msk.bf16.vlgmr.msra.gmra.mrb[28].mxu0 %vm150_vm2, %v1767_v46 }
0x14f5   :  { %v1294_v47 = vpop.f32.mrb[24].mxu0 }
0x14f6   :  { %v1735_v7 = vpop.f32.mrb[25].mxu0 }
0x14f7   :  { %v1297_v48 = vpop.f32.mrb[26].mxu0 }
0x14f8   :  { %v1736_v51 = vpop.f32.mrb[27].mxu0 }
0x1505   :  { %v1343_v54 = vpop.f32.mrb[28].mxu0 }
0x1506   :  { %v1344_v55 = vadd.f32 %v1343_v54, %v1294_v47  ;;  %v1747_v56 = vpop.f32.mrb[29].mxu0 }
0x1507   :  { %v1346_v57 = vpop.f32.mrb[30].mxu0 }
0x1508   :  { %v1350_v9 = vadd.f32 %v2157_v17, %v1344_v55  ;;  %v1347_v58 = vadd.f32 %v1346_v57, %v1297_v48  ;;  %v1748_v59 = vpop.f32.mrb[31].mxu0 }
0x150a   :  { %1880 = vtanh.f32 %v1350_v9  ;;  %v1351_v1 = vadd.f32 %v2157_v17, %v1347_v58  ;;  %v1505_v62 = vmul.f32 -1.442695, %v1350_v9 }
0x150c   :  { %1882 = vtanh.f32 %v1351_v1  ;;  %v1506_v63 = vmul.f32 -1.442695, %v1351_v1 }
0x150d   :  { %1884 = vpow2.f32 %v1505_v62 }
0x150e   :  { %1886 = vpow2.f32 %v1506_v63 }
0x1514   :  { %v1881_v10 = vpop.eup %1880 }
0x1515   :  { %1370 = vrot.lane.b32.xlu1 %v1881_v10, %s2017_s25 }
0x1516   :  { %v1883_v11 = vpop.eup %1882 }
0x1517   :  { %1372 = vrot.lane.b32.xlu0 %v1883_v11, %s2017_s25  ;;  %v1885_v3 = vpop.eup %1884 }
0x1518   :  { %v1887_v4 = vpop.eup %1886  ;;  %v1358_v5 = vadd.f32 1.0, %v1885_v3 }
0x1519   :  { %v1359_v6 = vadd.f32 1.0, %v1887_v4 }
0x151a   :  { %1888 = vrcp.f32 %v1358_v5 }
0x151b   :  { %1890 = vrcp.f32 %v1359_v6 }
0x1524   :  { %v1889_v8 = vpop.eup %1888 }
0x1525   :  { %v1891_v15 = vpop.eup %1890  ;;  %v1366_v19 = vmul.f32 %v1889_v8, %v2403_v32 }
0x1526   :  { %v1367_v21 = vmul.f32 %v1891_v15, %v2407_v35 }
0x1587   :  { %v1371_v14 = vpop.permute.xlu1 %1370 }
0x1588   :  { %v1376_v17 = vmul.f32 %v1889_v8, %v1371_v14 }
0x1589   :  { %v1373_v16 = vpop.permute.xlu0 %1372 }
0x158a   :  { %1380 = vrot.lane.b32.xlu1 %v1376_v17, %s2024_s3  ;;  %v1377_v18 = vmul.f32 %v1891_v15, %v1373_v16 }
0x158c   :  { %1382 = vrot.lane.b32.xlu0 %v1377_v18, %s2024_s3 }
0x15fc   :  { %v1381_v0 = vpop.permute.xlu1 %1380 }
0x15fd   :  { %v1386_v20 = vadd.f32 %v1381_v0, %v1366_v19 }
0x15fe   :  { %v1383_v22 = vpop.permute.xlu0 %1382 }
0x15ff   :  { %1892 = vtanh.f32 %v1386_v20  ;;  %v1387_v2 = vadd.f32 %v1383_v22, %v1367_v21 }
0x1601   :  { %1894 = vtanh.f32 %v1387_v2 }
0x1609   :  { %v1893_v23 = vpop.eup %1892 }
0x160a   :  { %1392 = vrot.lane.b32.xlu1 %v1893_v23, %s2017_s25 }
0x160b   :  { %v1895_v26 = vpop.eup %1894 }
0x160c   :  { %1394 = vrot.lane.b32.xlu0 %v1895_v26, %s2017_s25 }
0x160e   :  { %265 = vrot.lane.b32.xlu1 %v1509_v27, %s2024_s3 }
0x1610   :  { %267 = vrot.lane.b32.xlu0 %v1510_v28, %s2024_s3 }
0x1612   :  { %428 = vrot.lane.b32.xlu1 %v1511_v29, %s2024_s3 }
0x1614   :  { %430 = vrot.lane.b32.xlu0 %v1512_v30, %s2024_s3 }
0x1616   :  { %591 = vrot.lane.b32.xlu1 %v1513_v52, %s2024_s3 }
0x1618   :  { %593 = vrot.lane.b32.xlu0 %v1514_v53, %s2024_s3 }
0x161a   :  { %754 = vrot.lane.b32.xlu1 %v1515_v37, %s2024_s3 }
0x161c   :  { %756 = vrot.lane.b32.xlu0 %v1516_v38, %s2024_s3 }
0x161e   :  { %917 = vrot.lane.b32.xlu1 %v1517_v24, %s2024_s3 }
0x1620   :  { %919 = vrot.lane.b32.xlu0 %v1518_v25, %s2024_s3 }
0x1622   :  { %1080 = vrot.lane.b32.xlu1 %v1519_v12, %s2024_s3 }
0x1624   :  { %1082 = vrot.lane.b32.xlu0 %v1520_v13, %s2024_s3 }
0x1626   :  { %1243 = vrot.lane.b32.xlu1 %v1521_v60, %s2024_s3 }
0x1628   :  { %1245 = vrot.lane.b32.xlu0 %v1522_v61, %s2024_s3 }
0x167c   :  { %v1393_v49 = vpop.permute.xlu1 %1392 }
0x167d   :  { %v1398_v31 = vmul.f32 %v1889_v8, %v1393_v49 }
0x167e   :  { %v1395_v32 = vpop.permute.xlu0 %1394 }
0x167f   :  { %1417 = vrot.lane.b32.xlu1 %v1398_v31, %s2024_s3  ;;  %v1399_v33 = vmul.f32 %v1891_v15, %v1395_v32  ;;  %v1523_v34 = vpack.c.bf16 %v1398_v31, %v1398_v31 }
0x1680   :  { %v266_v50 = vpop.permute.xlu1 %265 }
0x1681   :  { %272 = vst.msk [vmem:[#allocation10] sm:$0xf] %vm271_vm3, %v266_v50  ;;  %1419 = vrot.lane.b32.xlu0 %v1399_v33, %s2024_s3  ;;  %v1524_v36 = vpack.c.bf16 %v1399_v33, %v1399_v33 }
0x1682   :  { %v268_v35 = vpop.permute.xlu0 %267 }
0x1683   :  { %1406 = vrot.lane.b32.xlu1 %v1523_v34, %s2024_s3  ;;  %273 = vst.msk [vmem:[#allocation10 + $0x4] sm:$0xf] %vm271_vm3, %v268_v35 }
0x1684   :  { %v429_v39 = vpop.permute.xlu1 %428 }
0x1685   :  { %435 = vst.msk [vmem:[#allocation10 + $0x8] sm:$0xf] %vm271_vm3, %v429_v39  ;;  %1408 = vrot.lane.b32.xlu0 %v1524_v36, %s2024_s3 }
0x1686   :  { %v431_v40 = vpop.permute.xlu0 %430 }
0x1687   :  { %1427 = vrot.lane.b32.xlu1 %v1386_v20, %s2025_s0  ;;  %436 = vst.msk [vmem:[#allocation10 + $0xc] sm:$0xf] %vm271_vm3, %v431_v40 }
0x1688   :  { %v592_v41 = vpop.permute.xlu1 %591 }
0x1689   :  { %598 = vst.msk [vmem:[#allocation10 + $0x10] sm:$0xf] %vm271_vm3, %v592_v41  ;;  %1429 = vrot.lane.b32.xlu0 %v1387_v2, %s2025_s0 }
0x168a   :  { %v594_v42 = vpop.permute.xlu0 %593 }
0x168b   :  { %599 = vst.msk [vmem:[#allocation10 + $0x14] sm:$0xf] %vm271_vm3, %v594_v42 }
0x168c   :  { %v755_v43 = vpop.permute.xlu1 %754 }
0x168d   :  { %761 = vst.msk [vmem:[#allocation10 + $0x18] sm:$0xf] %vm271_vm3, %v755_v43 }
0x168e   :  { %v757_v44 = vpop.permute.xlu0 %756 }
0x168f   :  { %762 = vst.msk [vmem:[#allocation10 + $0x1c] sm:$0xf] %vm271_vm3, %v757_v44 }
0x1690   :  { %v918_v45 = vpop.permute.xlu1 %917 }
0x1691   :  { %924 = vst.msk [vmem:[#allocation10 + $0x20] sm:$0xf] %vm271_vm3, %v918_v45 }
0x1692   :  { %v920_v46 = vpop.permute.xlu0 %919 }
0x1693   :  { %925 = vst.msk [vmem:[#allocation10 + $0x24] sm:$0xf] %vm271_vm3, %v920_v46 }
0x1694   :  { %v1081_v47 = vpop.permute.xlu1 %1080 }
0x1695   :  { %1087 = vst.msk [vmem:[#allocation10 + $0x28] sm:$0xf] %vm271_vm3, %v1081_v47 }
0x1696   :  { %v1083_v7 = vpop.permute.xlu0 %1082 }
0x1697   :  { %1088 = vst.msk [vmem:[#allocation10 + $0x2c] sm:$0xf] %vm271_vm3, %v1083_v7 }
0x1698   :  { %v1244_v48 = vpop.permute.xlu1 %1243 }
0x1699   :  { %1250 = vst.msk [vmem:[#allocation10 + $0x30] sm:$0xf] %vm271_vm3, %v1244_v48 }
0x169a   :  { %v1246_v51 = vpop.permute.xlu0 %1245 }
0x169b   :  { %1251 = vst.msk [vmem:[#allocation10 + $0x34] sm:$0xf] %vm271_vm3, %v1246_v51 }
0x16f1   :  { %v1418_v54 = vpop.permute.xlu1 %1417 }
0x16f2   :  { %1423 = vst.msk [vmem:[#allocation5] sm:$0xff] %vm81_vm0, %v1418_v54 }
0x16f3   :  { %v1420_v55 = vpop.permute.xlu0 %1419 }
0x16f4   :  { %1424 = vst.msk [vmem:[#allocation5 + $0x8] sm:$0xff] %vm81_vm0, %v1420_v55 }
0x16f5   :  { %v1407_v56 = vpop.permute.xlu1 %1406 }
0x16f6   :  { %1413 = vst.msk [vmem:[#allocation10 + $0x38] sm:$0xf] %vm271_vm3, %v1407_v56 }
0x16f7   :  { %v1409_v57 = vpop.permute.xlu0 %1408 }
0x16f8   :  { %1414 = vst.msk [vmem:[#allocation10 + $0x3c] sm:$0xf] %vm271_vm3, %v1409_v57 }
0x16f9   :  { %v1428_v9 = vpop.permute.xlu1 %1427 }
0x16fa   :  { %1433 = vst.msk [vmem:[#allocation6] sm:$0xff] %vm81_vm0, %v1428_v9 }
0x16fb   :  { %1995 = shalt.err (!%p1992_p8)
}
0x16fc   :  { %s1996_s17 = scalar_lea.hbm %s2525_s4, 1024 }
0x16fd   :  { %p1997_p9 = scmp.ne.s32.totalorder %s2525_s4, %s1996_s17  ;;  %p2000_p10 = scmp.lt.u32.totalorder %s1996_s17, %s2525_s4 }
0x16ff   :  { %p2002_p11 = pnand %p2000_p10, %p1997_p9 }
0x1701   :  { %2005 = shalt.err (!%p2002_p11)
}
0x1702   :  { %1446 = dma.vmem_to_hbm [thread:$0]  %s1441_s13, 1024, %s2525_s4, [#allocation9], %s2017_s25, %s2017_s25, %s2018_s26   ;;  %v1430_v58 = vpop.permute.xlu0 %1429 }
0x1703   :  { %1434 = vst.msk [vmem:[#allocation6 + $0x8] sm:$0xff] %vm81_vm0, %v1430_v58 }
0x1704   :  { %2014 = dma.done.wait [#allocation9], 1024  }
0x1705   :  { %2015 = vsyncadd [#allocation9], 4294966272 }
0x1706   :  { %1450 = vsyncpa [#allocation8], 1 }
0x1707   :  { %1451 = vsyncpa [#allocation9], 1 }

// kernel: residual_recurrent_encoder.6
= control target key start
LH: loop header
LB: loop body
LE: loop exit
PB: predicated region body
PF: predicated region fallthrough
CT: control target
= control target key end

     0   :  { %9 = vsyncpa [#allocation8], 0  ;;  %s2658_s0 = inlined_call_operand.hbm [shape: bf16[1,8,16,32], index: 0, kind: input, shape index: {}, may-alias: {0,4}]   ;;  %s2659_s1 = inlined_call_operand.hbm [shape: bf16[1,32,128], index: 1, kind: input, shape index: {}]   ;;  %s2660_s2 = inlined_call_operand.hbm [shape: bf16[1,32,128], index: 2, kind: input, shape index: {}]   ;;  %s2661_s3 = inlined_call_operand.hbm [shape: f32[1,1,128], index: 3, kind: input, shape index: {}]   ;;  %s2662_s4 = inlined_call_operand.hbm [shape: bf16[1,8,16,32], index: 4, kind: output, shape index: {}, may-alias: {0,4}]  }
   0x1   :  { %10 = vsyncpa [#allocation9], 0  ;;  %s2140_s15 = smov [#allocation7]   ;;  %s2020_s19 = scalar_lea.hbm %s2658_s0, 1024 }
   0x2   :  { %s16_s16 = sshll.u32 %s2140_s15, 4  ;;  %p2021_p0 = scmp.ne.s32.totalorder %s2658_s0, %s2020_s19  ;;  %s17_s16 = int_to_ptr.vmem [resolvable:$true] %s16_s16 }
   0x3   :  { %p2024_p1 = scmp.lt.u32.totalorder %s2020_s19, %s2658_s0 }
   0x5   :  { %p2026_p2 = pnand %p2024_p1, %p2021_p0 }
   0x7   :  { %2029 = shalt.err (!%p2026_p2)
}
   0x8   :  { %s2030_s24 = scalar_lea.vmem %s17_s16, 1024  ;;  %p2035_p4 = scmp.lt.s32.totalorder %s17_s16, %s17_s16 }
   0x9   :  { %p2031_p3 = scmp.ne.s32.totalorder %s17_s16, %s2030_s24  ;;  %p2036_p5 = scmp.lt.s32.totalorder %s2030_s24, %s2030_s24 }
   0xb   :  { %p2037_p6 = por %p2036_p5, %p2035_p4 }
   0xd   :  { %p2038_p7 = pnand %p2037_p6, %p2031_p3 }
   0xf   :  { %2041 = shalt.err (!%p2038_p7)
}
  0x10   :  { %s2141_s25 = smov 64   ;;  %s2142_s26 = smov 4  }
  0x11   :  { %22 = dma.hbm_to_vmem [thread:$0]  %s2658_s0, 1024, %s17_s16, [#allocation8], %s2141_s25, %s2141_s25, %s2142_s26  }
  0x12   :  { %2130 = dma.done.wait [#allocation8], 1024  }
  0x13   :  { %2131 = vsyncadd [#allocation8], 4294966272 }
  0x14   :  { %s2143_s29 = smov [#allocation2]   ;;  %s2042_s7 = scalar_lea.hbm %s2659_s1, 256 }
  0x15   :  { %s41_s30 = sshll.u32 %s2143_s29, 4  ;;  %p2043_p8 = scmp.ne.s32.totalorder %s2659_s1, %s2042_s7  ;;  %s42_s30 = int_to_ptr.vmem [resolvable:$true] %s41_s30 }
  0x16   :  { %p2046_p9 = scmp.lt.u32.totalorder %s2042_s7, %s2659_s1 }
  0x18   :  { %p2048_p10 = pnand %p2046_p9, %p2043_p8 }
  0x1a   :  { %2051 = shalt.err (!%p2048_p10)  }
  0x1b   :  { %s2052_s0 = scalar_lea.vmem %s42_s30, 256  ;;  %p2057_p12 = scmp.lt.s32.totalorder %s42_s30, %s42_s30 }
  0x1c   :  { %p2053_p11 = scmp.ne.s32.totalorder %s42_s30, %s2052_s0  ;;  %p2058_p13 = scmp.lt.s32.totalorder %s2052_s0, %s2052_s0 }
  0x1e   :  { %p2059_p0 = por %p2058_p13, %p2057_p12 }
  0x20   :  { %p2060_p1 = pnand %p2059_p0, %p2053_p11 }
  0x22   :  { %2063 = shalt.err (!%p2060_p1)  }
  0x23   :  { %44 = dma.hbm_to_vmem [thread:$0]  %s2659_s1, 256, %s42_s30, [#allocation11] }
  0x24   :  { %2132 = dma.done.wait [#allocation11], 256 }
  0x25   :  { %2133 = vsyncadd [#allocation11], 4294967040 }
  0x26   :  { %s2144_s14 = smov [#allocation3]   ;;  %s2064_s18 = scalar_lea.hbm %s2660_s2, 256 }
  0x27   :  { %s59_s15 = sshll.u32 %s2144_s14, 4  ;;  %p2065_p2 = scmp.ne.s32.totalorder %s2660_s2, %s2064_s18  ;;  %s60_s15 = int_to_ptr.vmem [resolvable:$true] %s59_s15 }
  0x28   :  { %p2068_p3 = scmp.lt.u32.totalorder %s2064_s18, %s2660_s2 }
  0x2a   :  { %p2070_p4 = pnand %p2068_p3, %p2065_p2 }
  0x2c   :  { %2073 = shalt.err (!%p2070_p4)  }
  0x2d   :  { %s2074_s1 = scalar_lea.vmem %s60_s15, 256  ;;  %p2079_p6 = scmp.lt.s32.totalorder %s60_s15, %s60_s15 }
  0x2e   :  { %p2075_p5 = scmp.ne.s32.totalorder %s60_s15, %s2074_s1  ;;  %p2080_p7 = scmp.lt.s32.totalorder %s2074_s1, %s2074_s1 }
  0x30   :  { %p2081_p8 = por %p2080_p7, %p2079_p6 }
  0x32   :  { %p2082_p9 = pnand %p2081_p8, %p2075_p5 }
  0x34   :  { %2085 = shalt.err (!%p2082_p9)  }
  0x35   :  { %62 = dma.hbm_to_vmem [thread:$0]  %s2660_s2, 256, %s60_s15, [#allocation16] }
  0x36   :  { %2134 = dma.done.wait [#allocation16], 256 }
  0x37   :  { %2135 = vsyncadd [#allocation16], 4294967040 }
  0x38   :  { %s2145_s27 = smov [#allocation4]   ;;  %s2086_s5 = scalar_lea.hbm %s2661_s3, 16 }
  0x39   :  { %s74_s28 = sshll.u32 %s2145_s27, 4  ;;  %p2087_p10 = scmp.ne.s32.totalorder %s2661_s3, %s2086_s5  ;;  %s75_s28 = int_to_ptr.vmem [resolvable:$true] %s74_s28 }
  0x3a   :  { %p2090_p11 = scmp.lt.u32.totalorder %s2086_s5, %s2661_s3 }
  0x3c   :  { %p2092_p12 = pnand %p2090_p11, %p2087_p10 }
  0x3e   :  { %2095 = shalt.err (!%p2092_p12)  }
  0x3f   :  { %s2096_s2 = scalar_lea.vmem %s75_s28, 16  ;;  %p2101_p0 = scmp.lt.s32.totalorder %s75_s28, %s75_s28 }
  0x40   :  { %p2097_p13 = scmp.ne.s32.totalorder %s75_s28, %s2096_s2  ;;  %p2102_p1 = scmp.lt.s32.totalorder %s2096_s2, %s2096_s2 }
  0x42   :  { %p2103_p2 = por %p2102_p1, %p2101_p0 }
  0x44   :  { %p2104_p3 = pnand %p2103_p2, %p2097_p13 }
  0x46   :  { %2107 = shalt.err (!%p2104_p3)  }
  0x47   :  { %77 = dma.hbm_to_vmem [thread:$0]  %s2661_s3, 16, %s75_s28, [#allocation19] }
  0x48   :  { %2136 = dma.done.wait [#allocation19], 16 }
  0x49   :  { %2137 = vsyncadd [#allocation19], 4294967280  ;;  %v2227_v0 = vld [vmem:[#allocation2] sm:$0xff]  ;;  %v2229_v1 = vld [vmem:[#allocation3] sm:$0xff]  ;;  %vm81_vm0 = vcmask 261120   ;;  %v2146_v2 = vmov 0.0  }
  0x4a   :  { %1688 = vmatprep.subr.bf16.mxu1 %v2146_v2  ;;  %1680 = vmatprep.subr.bf16.mxu0 %v2146_v2  ;;  %82 = vst.msk [vmem:[#allocation5] sm:$0xff] %vm81_vm0, %v2146_v2  ;;  %83 = vst.msk [vmem:[#allocation5 + $0x8] sm:$0xff] %vm81_vm0, %v2146_v2  ;;  %v95_v3 = vld [vmem:[#allocation7] sm:$0xff]   ;;  %v2247_v5 = vld [vmem:[#allocation3 + $0x8] sm:$0xff]  ;;  %vm2147_vm1 = vmmov 0   ;;  %s2148_s3 = smov 32  }
  0x4b   :  { %84 = vst.msk [vmem:[#allocation6] sm:$0xff] %vm81_vm0, %v2146_v2  ;;  %85 = vst.msk [vmem:[#allocation6 + $0x8] sm:$0xff] %vm81_vm0, %v2146_v2  ;;  %1689 = vmatpush3.bf16.msra.mxu1 %v2227_v0  ;;  %1681 = vmatpush3.bf16.msra.mxu0 %v2229_v1  ;;  %v2244_v4 = vld [vmem:[#allocation2 + $0x8] sm:$0xff]  ;;  %v2273_v13 = vld [vmem:[#allocation4] ss:$0 sm:$0xff]  ;;  %s2149_s0 = smov 96  }
  0x4c   :  { %1690 = vmatprep.subr.bf16.mxu1 %v2146_v2  ;;  %1682 = vmatprep.subr.bf16.mxu0 %v2146_v2  ;;  %v2287_v46 = vld [vmem:[#allocation7 + $0x8] sm:$0xff]   ;;  %vm280_vm2 = vcmask 257024   ;;  %s2150_s12 = smov [#allocation10]  }
  0x4d   :  { %1692 = vmatprep.mubr.msk.bf16.mxu1 %vm2147_vm1, %v2146_v2  ;;  %1684 = vmatprep.mubr.msk.bf16.mxu0 %vm2147_vm1, %v2146_v2  ;;  %s1547_s13 = sshll.u32 %s2150_s12, 4  ;;  %s1548_s13 = int_to_ptr.vmem [resolvable:$true] %s1547_s13 }
  0x4e   :  { %s2108_s14 = scalar_lea.vmem %s1548_s13, 1024  ;;  %p2113_p5 = scmp.lt.s32.totalorder %s1548_s13, %s1548_s13 }
  0x4f   :  { %1691 = vmatpush3.bf16.msra.mxu1 %v2244_v4  ;;  %1683 = vmatpush3.bf16.msra.mxu0 %v2247_v5  ;;  %p2109_p4 = scmp.ne.s32.totalorder %s1548_s13, %s2108_s14  ;;  %p2114_p6 = scmp.lt.s32.totalorder %s2108_s14, %s2108_s14 }
  0x50   :  { %1704 = vmatprep.subr.bf16.mxu1 %v2146_v2  ;;  %1696 = vmatprep.subr.bf16.mxu0 %v2146_v2 }
  0x51   :  { %v91_v6 = vld [vmem:[#allocation5] sm:$0xff]  ;;  %v92_v7 = vld [vmem:[#allocation5 + $0x8] sm:$0xff]  ;;  %p2115_p7 = por %p2114_p6, %p2113_p5 }
  0x52   :  { %v93_v8 = vld [vmem:[#allocation6] sm:$0xff]  ;;  %1693 = vmatmul.mubr.msk.bf16.vlgmr.msra.gmra.mrb[0].mxu1 %vm81_vm0, %v95_v3  ;;  %v97_v9 = vpack.c.bf16 %v92_v7, %v91_v6  ;;  %v94_v10 = vld [vmem:[#allocation6 + $0x8] sm:$0xff] }
  0x53   :  { %216 = vrot.lane.b32.xlu1 %v93_v8, %s2148_s3  ;;  %1705 = vmatpush3.bf16.msra.mxu1 %v2227_v0  ;;  %p2116_p8 = pnand %p2115_p7, %p2109_p4 }
  0x54   :  { %1708 = vmatprep.mubr.msk.bf16.mxu1 %vm2147_vm1, %v2146_v2  ;;  %1685 = vmatmul.mubr.msk.bf16.vlgmr.msra.gmra.mrb[0].mxu0 %vm81_vm0, %v97_v9 }
  0x55   :  { %1706 = vmatprep.subr.bf16.mxu1 %v2146_v2  ;;  %1697 = vmatpush3.bf16.msra.mxu0 %v2229_v1 }
  0x56   :  { %1700 = vmatprep.mubr.msk.bf16.mxu0 %vm2147_vm1, %v2146_v2  ;;  %1698 = vmatprep.subr.bf16.mxu0 %v2146_v2 }
  0x57   :  { %218 = vrot.lane.b32.xlu1 %v94_v10, %s2148_s3  ;;  %1707 = vmatpush3.bf16.msra.mxu1 %v2244_v4 }
  0x58   :  { %1720 = vmatprep.subr.bf16.mxu1 %v2146_v2 }
  0x59   :  { %1699 = vmatpush3.bf16.msra.mxu0 %v2247_v5 }
  0x5a   :  { %1712 = vmatprep.subr.bf16.mxu0 %v2146_v2  ;;  %1709 = vmatmul.mubr.msk.bf16.vlgmr.msra.gmra.mrb[4].mxu1 %vm81_vm0, %v2287_v46 }
  0x5b   :  { %1721 = vmatpush3.bf16.msra.mxu1 %v2227_v0  ;;  %1724 = vmatprep.mubr.msk.bf16.mxu1 %vm2147_vm1, %v2146_v2 }
  0x5c   :  { %1722 = vmatprep.subr.bf16.mxu1 %v2146_v2 }
  0x5f   :  { %1723 = vmatpush3.bf16.msra.mxu1 %v2244_v4 }
  0x60   :  { %1736 = vmatprep.subr.bf16.mxu1 %v2146_v2 }
  0xc5   :  { %v217_v38 = vpop.permute.xlu1 %216 }
  0xc9   :  { %v219_v40 = vpop.permute.xlu1 %218 }
 0x125   :  { %v185_v11 = vpop.f32.mrb[0].mxu1 }
 0x126   :  { %v1694_v12 = vpop.f32.mrb[1].mxu1 }
 0x127   :  { %v136_v14 = vpop.f32.mrb[0].mxu0  ;;  %v188_v15 = vpop.f32.mrb[2].mxu1 }
 0x128   :  { %v186_v16 = vadd.f32 %v185_v11, %v136_v14  ;;  %v1686_v17 = vpop.f32.mrb[1].mxu0  ;;  %v1695_v18 = vpop.f32.mrb[3].mxu1 }
 0x129   :  { %v139_v19 = vpop.f32.mrb[2].mxu0 }
 0x12a   :  { %v198_v20 = vadd.f32 %v2273_v13, %v186_v16  ;;  %v189_v21 = vadd.f32 %v188_v15, %v139_v19  ;;  %v1687_v22 = vpop.f32.mrb[3].mxu0 }
 0x12c   :  { %v199_v23 = vadd.f32 %v2273_v13, %v189_v21  ;;  %1875 = vtanh.f32 %v198_v20  ;;  %v1563_v26 = vmul.f32 -1.442695, %v198_v20 }
 0x12d   :  { %v376_v54 = vpop.f32.mrb[4].mxu1 }
 0x12e   :  { %1877 = vtanh.f32 %v199_v23  ;;  %v1564_v27 = vmul.f32 -1.442695, %v199_v23  ;;  %v1710_v55 = vpop.f32.mrb[5].mxu1 }
 0x12f   :  { %1879 = vpow2.f32 %v1563_v26  ;;  %v379_v56 = vpop.f32.mrb[6].mxu1 }
 0x130   :  { %1881 = vpow2.f32 %v1564_v27  ;;  %v1711_v57 = vpop.f32.mrb[7].mxu1 }
 0x136   :  { %v1876_v24 = vpop.eup %1875 }
 0x137   :  { %226 = vrot.lane.b32.xlu0 %v1876_v24, %s2141_s25 }
 0x138   :  { %v1878_v25 = vpop.eup %1877 }
 0x139   :  { %v1880_v28 = vpop.eup %1879 }
 0x13a   :  { %v206_v29 = vadd.f32 1.0, %v1880_v28  ;;  %v1882_v30 = vpop.eup %1881 }
 0x13b   :  { %228 = vrot.lane.b32.xlu0 %v1878_v25, %s2141_s25  ;;  %v207_v31 = vadd.f32 1.0, %v1882_v30 }
 0x13c   :  { %1883 = vrcp.f32 %v206_v29  ;;  %v2327_v29 = vld [vmem:[#allocation7 + $0x10] sm:$0xff]  }
 0x13d   :  { %1885 = vrcp.f32 %v207_v31  ;;  %1725 = vmatmul.mubr.msk.bf16.vlgmr.msra.gmra.mrb[8].mxu1 %vm81_vm0, %v2327_v29 }
 0x13e   :  { %1737 = vmatpush3.bf16.msra.mxu1 %v2227_v0  ;;  %1740 = vmatprep.mubr.msk.bf16.mxu1 %vm2147_vm1, %v2146_v2 }
 0x13f   :  { %1738 = vmatprep.subr.bf16.mxu1 %v2146_v2 }
 0x142   :  { %1739 = vmatpush3.bf16.msra.mxu1 %v2244_v4 }
 0x143   :  { %1752 = vmatprep.subr.bf16.mxu1 %v2146_v2 }
 0x146   :  { %v1884_v32 = vpop.eup %1883 }
 0x147   :  { %v1886_v35 = vpop.eup %1885  ;;  %v222_v39 = vmul.f32 %v1884_v32, %v217_v38 }
 0x148   :  { %v223_v43 = vmul.f32 %v1886_v35, %v219_v40 }
 0x1a9   :  { %v227_v33 = vpop.permute.xlu0 %226 }
 0x1aa   :  { %v232_v34 = vmul.f32 %v1884_v32, %v227_v33 }
 0x1ac   :  { %236 = vrot.lane.b32.xlu0 %v232_v34, %s2148_s3 }
 0x1ad   :  { %v229_v36 = vpop.permute.xlu0 %228 }
 0x1ae   :  { %v233_v37 = vmul.f32 %v1886_v35, %v229_v36 }
 0x1b0   :  { %238 = vrot.lane.b32.xlu1 %v233_v37, %s2148_s3 }
 0x210   :  { %v553_v37 = vpop.f32.mrb[8].mxu1 }
 0x211   :  { %v1726_v38 = vpop.f32.mrb[9].mxu1 }
 0x21e   :  { %v237_v41 = vpop.permute.xlu0 %236 }
 0x21f   :  { %v2281_v42 = vadd.f32 %v237_v41, %v222_v39  ;;  %v556_v39 = vpop.f32.mrb[10].mxu1 }
 0x220   :  { %v1727_v40 = vpop.f32.mrb[11].mxu1 }
 0x221   :  { %1887 = vtanh.f32 %v2281_v42 }
 0x222   :  { %v239_v44 = vpop.permute.xlu1 %238 }
 0x223   :  { %v2284_v45 = vadd.f32 %v239_v44, %v223_v43 }
 0x225   :  { %1889 = vtanh.f32 %v2284_v45 }
 0x22b   :  { %v1888_v47 = vpop.eup %1887 }
 0x22c   :  { %248 = vrot.lane.b32.xlu0 %v1888_v47, %s2141_s25 }
 0x22f   :  { %v1890_v48 = vpop.eup %1889 }
 0x230   :  { %250 = vrot.lane.b32.xlu1 %v1890_v48, %s2141_s25 }
 0x29e   :  { %v249_v49 = vpop.permute.xlu0 %248 }
 0x29f   :  { %v2299_v51 = vmul.f32 %v1884_v32, %v249_v49 }
 0x2a2   :  { %v251_v50 = vpop.permute.xlu1 %250 }
 0x2a3   :  { %v2301_v52 = vmul.f32 %v1886_v35, %v251_v50 }
 0x2a5   :  { %v286_v53 = vpack.c.bf16 %v2301_v52, %v2299_v51 }
 0x2a7   :  { %288 = vrot.lane.b32.xlu0 %v286_v53, %s2148_s3 }
 0x319   :  { %v289_v58 = vpop.permute.xlu0 %288 }
 0x31a   :  { %1701 = vmatmul.mubr.msk.bf16.vlgmr.msra.gmra.mrb[4].mxu0 %vm81_vm0, %v289_v58 }
 0x31b   :  { %1713 = vmatpush3.bf16.msra.mxu0 %v2229_v1  ;;  %1716 = vmatprep.mubr.msk.bf16.mxu0 %vm2147_vm1, %v2146_v2 }
 0x31c   :  { %1714 = vmatprep.subr.bf16.mxu0 %v2146_v2 }
 0x31f   :  { %1715 = vmatpush3.bf16.msra.mxu0 %v2247_v5 }
 0x320   :  { %1728 = vmatprep.subr.bf16.mxu0 %v2146_v2 }
 0x3ed   :  { %v327_v59 = vpop.f32.mrb[4].mxu0 }
 0x3ee   :  { %v377_v60 = vadd.f32 %v376_v54, %v327_v59  ;;  %v1702_v61 = vpop.f32.mrb[5].mxu0 }
 0x3ef   :  { %v330_v62 = vpop.f32.mrb[6].mxu0 }
 0x3f0   :  { %v383_v63 = vadd.f32 %v2273_v13, %v377_v60  ;;  %v380_v3 = vadd.f32 %v379_v56, %v330_v62  ;;  %v1703_v6 = vpop.f32.mrb[7].mxu0 }
 0x3f2   :  { %1891 = vtanh.f32 %v383_v63  ;;  %v384_v7 = vadd.f32 %v2273_v13, %v380_v3  ;;  %v1570_v10 = vmul.f32 -1.442695, %v383_v63 }
 0x3f4   :  { %1893 = vtanh.f32 %v384_v7  ;;  %v1571_v11 = vmul.f32 -1.442695, %v384_v7 }
 0x3f5   :  { %1895 = vpow2.f32 %v1570_v10 }
 0x3f6   :  { %1897 = vpow2.f32 %v1571_v11 }
 0x3fc   :  { %v1892_v8 = vpop.eup %1891 }
 0x3fd   :  { %403 = vrot.lane.b32.xlu1 %v1892_v8, %s2141_s25 }
 0x3fe   :  { %v1894_v9 = vpop.eup %1893 }
 0x3ff   :  { %405 = vrot.lane.b32.xlu0 %v1894_v9, %s2141_s25  ;;  %v1896_v12 = vpop.eup %1895 }
 0x400   :  { %v1898_v14 = vpop.eup %1897  ;;  %v391_v15 = vadd.f32 1.0, %v1896_v12 }
 0x401   :  { %v392_v16 = vadd.f32 1.0, %v1898_v14 }
 0x402   :  { %1899 = vrcp.f32 %v391_v15  ;;  %v2367_v15 = vld [vmem:[#allocation7 + $0x18] sm:$0xff]  }
 0x403   :  { %1901 = vrcp.f32 %v392_v16  ;;  %1741 = vmatmul.mubr.msk.bf16.vlgmr.msra.gmra.mrb[12].mxu1 %vm81_vm0, %v2367_v15 }
 0x404   :  { %1753 = vmatpush3.bf16.msra.mxu1 %v2227_v0  ;;  %1756 = vmatprep.mubr.msk.bf16.mxu1 %vm2147_vm1, %v2146_v2 }
 0x405   :  { %1754 = vmatprep.subr.bf16.mxu1 %v2146_v2 }
 0x408   :  { %1755 = vmatpush3.bf16.msra.mxu1 %v2244_v4 }
 0x409   :  { %1768 = vmatprep.subr.bf16.mxu1 %v2146_v2 }
 0x40c   :  { %v1900_v17 = vpop.eup %1899 }
 0x40d   :  { %v1902_v20 = vpop.eup %1901  ;;  %v399_v23 = vmul.f32 %v1900_v17, %v2281_v42 }
 0x40e   :  { %v400_v26 = vmul.f32 %v1902_v20, %v2284_v45 }
 0x46f   :  { %v404_v18 = vpop.permute.xlu1 %403 }
 0x470   :  { %v409_v19 = vmul.f32 %v1900_v17, %v404_v18 }
 0x471   :  { %v406_v21 = vpop.permute.xlu0 %405 }
 0x472   :  { %413 = vrot.lane.b32.xlu1 %v409_v19, %s2148_s3  ;;  %v410_v22 = vmul.f32 %v1902_v20, %v406_v21 }
 0x474   :  { %415 = vrot.lane.b32.xlu0 %v410_v22, %s2148_s3 }
 0x4e4   :  { %v414_v24 = vpop.permute.xlu1 %413 }
 0x4e5   :  { %v2320_v25 = vadd.f32 %v414_v24, %v399_v23  ;;  %v730_v23 = vpop.f32.mrb[12].mxu1 }
 0x4e6   :  { %v416_v27 = vpop.permute.xlu0 %415  ;;  %v1742_v24 = vpop.f32.mrb[13].mxu1 }
 0x4e7   :  { %1903 = vtanh.f32 %v2320_v25  ;;  %v2324_v28 = vadd.f32 %v416_v27, %v400_v26 }
 0x4e9   :  { %1905 = vtanh.f32 %v2324_v28 }
 0x4f1   :  { %v1904_v30 = vpop.eup %1903 }
 0x4f2   :  { %425 = vrot.lane.b32.xlu1 %v1904_v30, %s2141_s25 }
 0x4f3   :  { %v1906_v31 = vpop.eup %1905 }
 0x4f4   :  { %427 = vrot.lane.b32.xlu0 %v1906_v31, %s2141_s25 }
 0x564   :  { %v426_v32 = vpop.permute.xlu1 %425 }
 0x565   :  { %v2339_v34 = vmul.f32 %v1900_v17, %v426_v32 }
 0x566   :  { %v428_v33 = vpop.permute.xlu0 %427 }
 0x567   :  { %v2341_v35 = vmul.f32 %v1902_v20, %v428_v33 }
 0x569   :  { %v463_v36 = vpack.c.bf16 %v2341_v35, %v2339_v34 }
 0x56b   :  { %465 = vrot.lane.b32.xlu1 %v463_v36, %s2148_s3 }
 0x5dd   :  { %v466_v41 = vpop.permute.xlu1 %465 }
 0x5de   :  { %1717 = vmatmul.mubr.msk.bf16.vlgmr.msra.gmra.mrb[8].mxu0 %vm81_vm0, %v466_v41 }
 0x5df   :  { %1729 = vmatpush3.bf16.msra.mxu0 %v2229_v1  ;;  %1732 = vmatprep.mubr.msk.bf16.mxu0 %vm2147_vm1, %v2146_v2 }
 0x5e0   :  { %1730 = vmatprep.subr.bf16.mxu0 %v2146_v2 }
 0x5e3   :  { %1731 = vmatpush3.bf16.msra.mxu0 %v2247_v5 }
 0x5e4   :  { %1744 = vmatprep.subr.bf16.mxu0 %v2146_v2 }
 0x6b1   :  { %v504_v42 = vpop.f32.mrb[8].mxu0 }
 0x6b2   :  { %v554_v43 = vadd.f32 %v553_v37, %v504_v42  ;;  %v1718_v44 = vpop.f32.mrb[9].mxu0 }
 0x6b3   :  { %v507_v45 = vpop.f32.mrb[10].mxu0 }
 0x6b4   :  { %v560_v47 = vadd.f32 %v2273_v13, %v554_v43  ;;  %v557_v48 = vadd.f32 %v556_v39, %v507_v45  ;;  %v1719_v49 = vpop.f32.mrb[11].mxu0 }
 0x6b6   :  { %1907 = vtanh.f32 %v560_v47  ;;  %v561_v50 = vadd.f32 %v2273_v13, %v557_v48  ;;  %v1577_v55 = vmul.f32 -1.442695, %v560_v47 }
 0x6b8   :  { %1909 = vtanh.f32 %v561_v50  ;;  %v1578_v56 = vmul.f32 -1.442695, %v561_v50 }
 0x6b9   :  { %1911 = vpow2.f32 %v1577_v55 }
 0x6ba   :  { %1913 = vpow2.f32 %v1578_v56 }
 0x6c0   :  { %v1908_v53 = vpop.eup %1907 }
 0x6c1   :  { %580 = vrot.lane.b32.xlu0 %v1908_v53, %s2141_s25 }
 0x6c2   :  { %v1910_v54 = vpop.eup %1909 }
 0x6c3   :  { %582 = vrot.lane.b32.xlu1 %v1910_v54, %s2141_s25  ;;  %v1912_v57 = vpop.eup %1911 }
 0x6c4   :  { %v1914_v58 = vpop.eup %1913  ;;  %v568_v59 = vadd.f32 1.0, %v1912_v57 }
 0x6c5   :  { %v569_v60 = vadd.f32 1.0, %v1914_v58 }
 0x6c6   :  { %1915 = vrcp.f32 %v568_v59 }
 0x6c7   :  { %1917 = vrcp.f32 %v569_v60 }
 0x6d0   :  { %v1916_v61 = vpop.eup %1915 }
 0x6d1   :  { %v1918_v3 = vpop.eup %1917  ;;  %v576_v8 = vmul.f32 %v1916_v61, %v2320_v25  ;;  %v733_v25 = vpop.f32.mrb[14].mxu1 }
 0x6d2   :  { %v577_v11 = vmul.f32 %v1918_v3, %v2324_v28  ;;  %v1743_v26 = vpop.f32.mrb[15].mxu1 }
 0x733   :  { %v581_v62 = vpop.permute.xlu0 %580 }
 0x734   :  { %v586_v63 = vmul.f32 %v1916_v61, %v581_v62  ;;  %v2407_v62 = vld [vmem:[#allocation7 + $0x20] sm:$0xff]  }
 0x735   :  { %v583_v6 = vpop.permute.xlu1 %582  ;;  %1757 = vmatmul.mubr.msk.bf16.vlgmr.msra.gmra.mrb[16].mxu1 %vm81_vm0, %v2407_v62 }
 0x736   :  { %590 = vrot.lane.b32.xlu0 %v586_v63, %s2148_s3  ;;  %v587_v7 = vmul.f32 %v1918_v3, %v583_v6  ;;  %1769 = vmatpush3.bf16.msra.mxu1 %v2227_v0 }
 0x737   :  { %1772 = vmatprep.mubr.msk.bf16.mxu1 %vm2147_vm1, %v2146_v2  ;;  %1770 = vmatprep.subr.bf16.mxu1 %v2146_v2 }
 0x738   :  { %592 = vrot.lane.b32.xlu1 %v587_v7, %s2148_s3 }
 0x73a   :  { %1771 = vmatpush3.bf16.msra.mxu1 %v2244_v4 }
 0x73b   :  { %1784 = vmatprep.subr.bf16.mxu1 %v2146_v2 }
 0x7a8   :  { %v591_v9 = vpop.permute.xlu0 %590 }
 0x7a9   :  { %v2360_v10 = vadd.f32 %v591_v9, %v576_v8 }
 0x7aa   :  { %v593_v12 = vpop.permute.xlu1 %592 }
 0x7ab   :  { %1919 = vtanh.f32 %v2360_v10  ;;  %v2364_v14 = vadd.f32 %v593_v12, %v577_v11 }
 0x7ad   :  { %1921 = vtanh.f32 %v2364_v14 }
 0x7b5   :  { %v1920_v16 = vpop.eup %1919 }
 0x7b6   :  { %602 = vrot.lane.b32.xlu0 %v1920_v16, %s2141_s25 }
 0x7b7   :  { %v1922_v17 = vpop.eup %1921 }
 0x7b8   :  { %604 = vrot.lane.b32.xlu1 %v1922_v17, %s2141_s25 }
 0x808   :  { %v907_v11 = vpop.f32.mrb[16].mxu1 }
 0x809   :  { %v1758_v12 = vpop.f32.mrb[17].mxu1 }
 0x828   :  { %v603_v18 = vpop.permute.xlu0 %602 }
 0x829   :  { %v2379_v20 = vmul.f32 %v1916_v61, %v603_v18 }
 0x82a   :  { %v605_v19 = vpop.permute.xlu1 %604 }
 0x82b   :  { %v2381_v21 = vmul.f32 %v1918_v3, %v605_v19 }
 0x82d   :  { %v640_v22 = vpack.c.bf16 %v2381_v21, %v2379_v20 }
 0x82f   :  { %642 = vrot.lane.b32.xlu0 %v640_v22, %s2148_s3 }
 0x8a1   :  { %v643_v27 = vpop.permute.xlu0 %642 }
 0x8a2   :  { %1733 = vmatmul.mubr.msk.bf16.vlgmr.msra.gmra.mrb[12].mxu0 %vm81_vm0, %v643_v27 }
 0x8a3   :  { %1745 = vmatpush3.bf16.msra.mxu0 %v2229_v1  ;;  %1748 = vmatprep.mubr.msk.bf16.mxu0 %vm2147_vm1, %v2146_v2 }
 0x8a4   :  { %1746 = vmatprep.subr.bf16.mxu0 %v2146_v2 }
 0x8a7   :  { %1747 = vmatpush3.bf16.msra.mxu0 %v2247_v5 }
 0x8a8   :  { %1760 = vmatprep.subr.bf16.mxu0 %v2146_v2 }
 0x975   :  { %v681_v28 = vpop.f32.mrb[12].mxu0 }
 0x976   :  { %v731_v30 = vadd.f32 %v730_v23, %v681_v28  ;;  %v1734_v31 = vpop.f32.mrb[13].mxu0 }
 0x977   :  { %v684_v32 = vpop.f32.mrb[14].mxu0 }
 0x978   :  { %v737_v33 = vadd.f32 %v2273_v13, %v731_v30  ;;  %v734_v36 = vadd.f32 %v733_v25, %v684_v32  ;;  %v1735_v37 = vpop.f32.mrb[15].mxu0 }
 0x97a   :  { %1923 = vtanh.f32 %v737_v33  ;;  %v738_v38 = vadd.f32 %v2273_v13, %v734_v36  ;;  %v1584_v41 = vmul.f32 -1.442695, %v737_v33 }
 0x97c   :  { %1925 = vtanh.f32 %v738_v38  ;;  %v1585_v42 = vmul.f32 -1.442695, %v738_v38 }
 0x97d   :  { %1927 = vpow2.f32 %v1584_v41 }
 0x97e   :  { %1929 = vpow2.f32 %v1585_v42 }
 0x984   :  { %v1924_v39 = vpop.eup %1923 }
 0x985   :  { %757 = vrot.lane.b32.xlu1 %v1924_v39, %s2141_s25 }
 0x986   :  { %v1926_v40 = vpop.eup %1925 }
 0x987   :  { %759 = vrot.lane.b32.xlu0 %v1926_v40, %s2141_s25  ;;  %v1928_v43 = vpop.eup %1927 }
 0x988   :  { %v1930_v44 = vpop.eup %1929  ;;  %v745_v45 = vadd.f32 1.0, %v1928_v43 }
 0x989   :  { %v746_v47 = vadd.f32 1.0, %v1930_v44 }
 0x98a   :  { %1931 = vrcp.f32 %v745_v45 }
 0x98b   :  { %1933 = vrcp.f32 %v746_v47 }
 0x994   :  { %v1932_v48 = vpop.eup %1931 }
 0x995   :  { %v1934_v53 = vpop.eup %1933  ;;  %v753_v56 = vmul.f32 %v1932_v48, %v2360_v10 }
 0x996   :  { %v754_v59 = vmul.f32 %v1934_v53, %v2364_v14  ;;  %v910_v14 = vpop.f32.mrb[18].mxu1 }
 0x997   :  { %v1759_v16 = vpop.f32.mrb[19].mxu1 }
 0x9f7   :  { %v758_v49 = vpop.permute.xlu1 %757 }
 0x9f8   :  { %v763_v50 = vmul.f32 %v1932_v48, %v758_v49 }
 0x9f9   :  { %v760_v54 = vpop.permute.xlu0 %759 }
 0x9fa   :  { %767 = vrot.lane.b32.xlu1 %v763_v50, %s2148_s3  ;;  %v764_v55 = vmul.f32 %v1934_v53, %v760_v54  ;;  %v2447_v54 = vld [vmem:[#allocation7 + $0x28] sm:$0xff]  }
 0x9fb   :  { %1773 = vmatmul.mubr.msk.bf16.vlgmr.msra.gmra.mrb[20].mxu1 %vm81_vm0, %v2447_v54 }
 0x9fc   :  { %769 = vrot.lane.b32.xlu0 %v764_v55, %s2148_s3  ;;  %1785 = vmatpush3.bf16.msra.mxu1 %v2227_v0 }
 0x9fd   :  { %1788 = vmatprep.mubr.msk.bf16.mxu1 %vm2147_vm1, %v2146_v2  ;;  %1786 = vmatprep.subr.bf16.mxu1 %v2146_v2 }
 0xa00   :  { %1787 = vmatpush3.bf16.msra.mxu1 %v2244_v4 }
 0xa01   :  { %1800 = vmatprep.subr.bf16.mxu1 %v2146_v2 }
 0xa6c   :  { %v768_v57 = vpop.permute.xlu1 %767 }
 0xa6d   :  { %v2400_v58 = vadd.f32 %v768_v57, %v753_v56 }
 0xa6e   :  { %v770_v60 = vpop.permute.xlu0 %769 }
 0xa6f   :  { %1935 = vtanh.f32 %v2400_v58  ;;  %v2404_v61 = vadd.f32 %v770_v60, %v754_v59 }
 0xa71   :  { %1937 = vtanh.f32 %v2404_v61 }
 0xa79   :  { %v1936_v63 = vpop.eup %1935 }
 0xa7a   :  { %779 = vrot.lane.b32.xlu1 %v1936_v63, %s2141_s25 }
 0xa7b   :  { %v1938_v3 = vpop.eup %1937 }
 0xa7c   :  { %781 = vrot.lane.b32.xlu0 %v1938_v3, %s2141_s25 }
 0xace   :  { %v1084_v63 = vpop.f32.mrb[20].mxu1 }
 0xacf   :  { %v1774_v3 = vpop.f32.mrb[21].mxu1 }
 0xaec   :  { %v780_v6 = vpop.permute.xlu1 %779 }
 0xaed   :  { %v2419_v8 = vmul.f32 %v1932_v48, %v780_v6  ;;  %v1087_v6 = vpop.f32.mrb[22].mxu1 }
 0xaee   :  { %v782_v7 = vpop.permute.xlu0 %781 }
 0xaef   :  { %v2421_v9 = vmul.f32 %v1934_v53, %v782_v7  ;;  %v1775_v7 = vpop.f32.mrb[23].mxu1 }
 0xaf1   :  { %v817_v10 = vpack.c.bf16 %v2421_v9, %v2419_v8 }
 0xaf3   :  { %819 = vrot.lane.b32.xlu1 %v817_v10, %s2148_s3 }
 0xb65   :  { %v820_v17 = vpop.permute.xlu1 %819 }
 0xb66   :  { %1749 = vmatmul.mubr.msk.bf16.vlgmr.msra.gmra.mrb[16].mxu0 %vm81_vm0, %v820_v17 }
 0xb67   :  { %1761 = vmatpush3.bf16.msra.mxu0 %v2229_v1  ;;  %1764 = vmatprep.mubr.msk.bf16.mxu0 %vm2147_vm1, %v2146_v2 }
 0xb68   :  { %1762 = vmatprep.subr.bf16.mxu0 %v2146_v2 }
 0xb6b   :  { %1763 = vmatpush3.bf16.msra.mxu0 %v2247_v5 }
 0xb6c   :  { %1776 = vmatprep.subr.bf16.mxu0 %v2146_v2 }
 0xc39   :  { %v858_v18 = vpop.f32.mrb[16].mxu0 }
 0xc3a   :  { %v908_v19 = vadd.f32 %v907_v11, %v858_v18  ;;  %v1750_v22 = vpop.f32.mrb[17].mxu0 }
 0xc3b   :  { %v861_v23 = vpop.f32.mrb[18].mxu0 }
 0xc3c   :  { %v914_v24 = vadd.f32 %v2273_v13, %v908_v19  ;;  %v911_v25 = vadd.f32 %v910_v14, %v861_v23  ;;  %v1751_v26 = vpop.f32.mrb[19].mxu0 }
 0xc3e   :  { %1939 = vtanh.f32 %v914_v24  ;;  %v915_v27 = vadd.f32 %v2273_v13, %v911_v25  ;;  %v1591_v31 = vmul.f32 -1.442695, %v914_v24 }
 0xc40   :  { %1941 = vtanh.f32 %v915_v27  ;;  %v1592_v32 = vmul.f32 -1.442695, %v915_v27 }
 0xc41   :  { %1943 = vpow2.f32 %v1591_v31 }
 0xc42   :  { %1945 = vpow2.f32 %v1592_v32 }
 0xc48   :  { %v1940_v28 = vpop.eup %1939 }
 0xc49   :  { %934 = vrot.lane.b32.xlu0 %v1940_v28, %s2141_s25 }
 0xc4a   :  { %v1942_v30 = vpop.eup %1941 }
 0xc4b   :  { %936 = vrot.lane.b32.xlu1 %v1942_v30, %s2141_s25  ;;  %v1944_v33 = vpop.eup %1943 }
 0xc4c   :  { %v1946_v36 = vpop.eup %1945  ;;  %v922_v37 = vadd.f32 1.0, %v1944_v33 }
 0xc4d   :  { %v923_v38 = vadd.f32 1.0, %v1946_v36 }
 0xc4e   :  { %1947 = vrcp.f32 %v922_v37 }
 0xc4f   :  { %1949 = vrcp.f32 %v923_v38 }
 0xc58   :  { %v1948_v39 = vpop.eup %1947 }
 0xc59   :  { %v1950_v42 = vpop.eup %1949  ;;  %v930_v45 = vmul.f32 %v1948_v39, %v2400_v58 }
 0xc5a   :  { %v931_v49 = vmul.f32 %v1950_v42, %v2404_v61 }
 0xcbb   :  { %v935_v40 = vpop.permute.xlu0 %934 }
 0xcbc   :  { %v940_v41 = vmul.f32 %v1948_v39, %v935_v40 }
 0xcbd   :  { %v937_v43 = vpop.permute.xlu1 %936 }
 0xcbe   :  { %944 = vrot.lane.b32.xlu0 %v940_v41, %s2148_s3  ;;  %v941_v44 = vmul.f32 %v1950_v42, %v937_v43 }
 0xcc0   :  { %946 = vrot.lane.b32.xlu1 %v941_v44, %s2148_s3 }
 0xd30   :  { %v945_v47 = vpop.permute.xlu0 %944 }
 0xd31   :  { %v2440_v48 = vadd.f32 %v945_v47, %v930_v45  ;;  %v2487_v47 = vld [vmem:[#allocation7 + $0x30] sm:$0xff]  }
 0xd32   :  { %v947_v50 = vpop.permute.xlu1 %946  ;;  %1789 = vmatmul.mubr.msk.bf16.vlgmr.msra.gmra.mrb[24].mxu1 %vm81_vm0, %v2487_v47 }
 0xd33   :  { %1951 = vtanh.f32 %v2440_v48  ;;  %v2444_v53 = vadd.f32 %v947_v50, %v931_v49  ;;  %1801 = vmatpush3.bf16.msra.mxu1 %v2227_v0  ;;  %1804 = vmatprep.mubr.msk.bf16.mxu1 %vm2147_vm1, %v2146_v2 }
 0xd34   :  { %1802 = vmatprep.subr.bf16.mxu1 %v2146_v2 }
 0xd35   :  { %1953 = vtanh.f32 %v2444_v53 }
 0xd37   :  { %1803 = vmatpush3.bf16.msra.mxu1 %v2244_v4 }
 0xd3d   :  { %v1952_v55 = vpop.eup %1951 }
 0xd3e   :  { %956 = vrot.lane.b32.xlu0 %v1952_v55, %s2141_s25 }
 0xd3f   :  { %v1954_v56 = vpop.eup %1953 }
 0xd40   :  { %958 = vrot.lane.b32.xlu1 %v1954_v56, %s2141_s25 }
 0xdb0   :  { %v957_v57 = vpop.permute.xlu0 %956 }
 0xdb1   :  { %v2459_v59 = vmul.f32 %v1948_v39, %v957_v57 }
 0xdb2   :  { %v959_v58 = vpop.permute.xlu1 %958 }
 0xdb3   :  { %v2461_v60 = vmul.f32 %v1950_v42, %v959_v58 }
 0xdb5   :  { %v994_v61 = vpack.c.bf16 %v2461_v60, %v2459_v59 }
 0xdb7   :  { %996 = vrot.lane.b32.xlu0 %v994_v61, %s2148_s3 }
 0xe05   :  { %v1261_v57 = vpop.f32.mrb[24].mxu1 }
 0xe06   :  { %v1790_v58 = vpop.f32.mrb[25].mxu1 }
 0xe07   :  { %v1264_v61 = vpop.f32.mrb[26].mxu1 }
 0xe29   :  { %v997_v10 = vpop.permute.xlu0 %996 }
 0xe2a   :  { %1765 = vmatmul.mubr.msk.bf16.vlgmr.msra.gmra.mrb[20].mxu0 %vm81_vm0, %v997_v10 }
 0xe2b   :  { %1777 = vmatpush3.bf16.msra.mxu0 %v2229_v1  ;;  %1780 = vmatprep.mubr.msk.bf16.mxu0 %vm2147_vm1, %v2146_v2 }
 0xe2c   :  { %1778 = vmatprep.subr.bf16.mxu0 %v2146_v2 }
 0xe2f   :  { %1779 = vmatpush3.bf16.msra.mxu0 %v2247_v5 }
 0xe30   :  { %1792 = vmatprep.subr.bf16.mxu0 %v2146_v2 }
 0xefd   :  { %v1035_v11 = vpop.f32.mrb[20].mxu0 }
 0xefe   :  { %v1085_v12 = vadd.f32 %v1084_v63, %v1035_v11  ;;  %v1766_v14 = vpop.f32.mrb[21].mxu0  ;;  %v1791_v63 = vpop.f32.mrb[27].mxu1 }
 0xeff   :  { %v1038_v16 = vpop.f32.mrb[22].mxu0 }
 0xf00   :  { %v1091_v17 = vadd.f32 %v2273_v13, %v1085_v12  ;;  %v1088_v18 = vadd.f32 %v1087_v6, %v1038_v16  ;;  %v1767_v19 = vpop.f32.mrb[23].mxu0 }
 0xf02   :  { %1955 = vtanh.f32 %v1091_v17  ;;  %v1092_v22 = vadd.f32 %v2273_v13, %v1088_v18  ;;  %v1598_v25 = vmul.f32 -1.442695, %v1091_v17 }
 0xf04   :  { %1957 = vtanh.f32 %v1092_v22  ;;  %v1599_v26 = vmul.f32 -1.442695, %v1092_v22 }
 0xf05   :  { %1959 = vpow2.f32 %v1598_v25 }
 0xf06   :  { %1961 = vpow2.f32 %v1599_v26 }
 0xf0c   :  { %v1956_v23 = vpop.eup %1955 }
 0xf0d   :  { %1111 = vrot.lane.b32.xlu1 %v1956_v23, %s2141_s25 }
 0xf0e   :  { %v1958_v24 = vpop.eup %1957 }
 0xf0f   :  { %1113 = vrot.lane.b32.xlu0 %v1958_v24, %s2141_s25  ;;  %v1960_v27 = vpop.eup %1959 }
 0xf10   :  { %v1962_v28 = vpop.eup %1961  ;;  %v1099_v30 = vadd.f32 1.0, %v1960_v27 }
 0xf11   :  { %v1100_v31 = vadd.f32 1.0, %v1962_v28 }
 0xf12   :  { %1963 = vrcp.f32 %v1099_v30 }
 0xf13   :  { %1965 = vrcp.f32 %v1100_v31 }
 0xf1c   :  { %v1964_v32 = vpop.eup %1963 }
 0xf1d   :  { %v1966_v37 = vpop.eup %1965  ;;  %v1107_v40 = vmul.f32 %v1964_v32, %v2440_v48 }
 0xf1e   :  { %v1108_v43 = vmul.f32 %v1966_v37, %v2444_v53 }
 0xf7f   :  { %v1112_v33 = vpop.permute.xlu1 %1111 }
 0xf80   :  { %v1117_v36 = vmul.f32 %v1964_v32, %v1112_v33 }
 0xf81   :  { %v1114_v38 = vpop.permute.xlu0 %1113 }
 0xf82   :  { %1121 = vrot.lane.b32.xlu1 %v1117_v36, %s2148_s3  ;;  %v1118_v39 = vmul.f32 %v1966_v37, %v1114_v38 }
 0xf84   :  { %1123 = vrot.lane.b32.xlu0 %v1118_v39, %s2148_s3  ;;  %v2525_v39 = vld [vmem:[#allocation7 + $0x38] sm:$0xff]  }
 0xf85   :  { %1805 = vmatmul.mubr.msk.bf16.vlgmr.msra.gmra.mrb[28].mxu1 %vm81_vm0, %v2525_v39 }
 0xff4   :  { %v1122_v41 = vpop.permute.xlu1 %1121 }
 0xff5   :  { %v2480_v42 = vadd.f32 %v1122_v41, %v1107_v40 }
 0xff6   :  { %v1124_v44 = vpop.permute.xlu0 %1123 }
 0xff7   :  { %1967 = vtanh.f32 %v2480_v42  ;;  %v2484_v45 = vadd.f32 %v1124_v44, %v1108_v43 }
 0xff9   :  { %1969 = vtanh.f32 %v2484_v45 }
0x1001   :  { %v1968_v48 = vpop.eup %1967 }
0x1002   :  { %1133 = vrot.lane.b32.xlu1 %v1968_v48, %s2141_s25 }
0x1003   :  { %v1970_v49 = vpop.eup %1969 }
0x1004   :  { %1135 = vrot.lane.b32.xlu0 %v1970_v49, %s2141_s25 }
0x1058   :  { %v1438_v49 = vpop.f32.mrb[28].mxu1 }
0x1074   :  { %v1134_v50 = vpop.permute.xlu1 %1133 }
0x1075   :  { %v2498_v55 = vmul.f32 %v1964_v32, %v1134_v50  ;;  %v1806_v50 = vpop.f32.mrb[29].mxu1 }
0x1076   :  { %v1136_v53 = vpop.permute.xlu0 %1135 }
0x1077   :  { %v2500_v56 = vmul.f32 %v1966_v37, %v1136_v53  ;;  %v1441_v53 = vpop.f32.mrb[30].mxu1 }
0x1079   :  { %v1171_v0 = vpack.c.bf16 %v2500_v56, %v2498_v55 }
0x107b   :  { %1173 = vrot.lane.b32.xlu1 %v1171_v0, %s2148_s3  ;;  %v1807_v0 = vpop.f32.mrb[31].mxu1 }
0x10ed   :  { %v1174_v3 = vpop.permute.xlu1 %1173 }
0x10ee   :  { %1781 = vmatmul.mubr.msk.bf16.vlgmr.msra.gmra.mrb[24].mxu0 %vm81_vm0, %v1174_v3 }
0x10ef   :  { %1793 = vmatpush3.bf16.msra.mxu0 %v2229_v1  ;;  %1796 = vmatprep.mubr.msk.bf16.mxu0 %vm2147_vm1, %v2146_v2 }
0x10f0   :  { %1794 = vmatprep.subr.bf16.mxu0 %v2146_v2 }
0x10f3   :  { %1795 = vmatpush3.bf16.msra.mxu0 %v2247_v5 }
0x11c1   :  { %v1212_v4 = vpop.f32.mrb[24].mxu0 }
0x11c2   :  { %v1262_v6 = vadd.f32 %v1261_v57, %v1212_v4  ;;  %v1782_v7 = vpop.f32.mrb[25].mxu0 }
0x11c3   :  { %v1215_v10 = vpop.f32.mrb[26].mxu0 }
0x11c4   :  { %v1268_v11 = vadd.f32 %v2273_v13, %v1262_v6  ;;  %v1265_v12 = vadd.f32 %v1264_v61, %v1215_v10  ;;  %v1783_v14 = vpop.f32.mrb[27].mxu0 }
0x11c6   :  { %1971 = vtanh.f32 %v1268_v11  ;;  %v1269_v16 = vadd.f32 %v2273_v13, %v1265_v12  ;;  %v1605_v2 = vmul.f32 -1.442695, %v1268_v11 }
0x11c8   :  { %1973 = vtanh.f32 %v1269_v16  ;;  %v1606_v5 = vmul.f32 -1.442695, %v1269_v16 }
0x11c9   :  { %1975 = vpow2.f32 %v1605_v2 }
0x11ca   :  { %1977 = vpow2.f32 %v1606_v5 }
0x11d0   :  { %v1972_v1 = vpop.eup %1971 }
0x11d1   :  { %1288 = vrot.lane.b32.xlu0 %v1972_v1, %s2141_s25 }
0x11d2   :  { %v1974_v17 = vpop.eup %1973 }
0x11d3   :  { %1290 = vrot.lane.b32.xlu1 %v1974_v17, %s2141_s25  ;;  %v1976_v18 = vpop.eup %1975 }
0x11d4   :  { %v1978_v19 = vpop.eup %1977  ;;  %v1276_v22 = vadd.f32 1.0, %v1976_v18  ;;  %v2003_v18 = vld [vmem:[#allocation7] sm:$0xff]  }
0x11d5   :  { %v1277_v23 = vadd.f32 1.0, %v1978_v19  ;;  %v256_v19 = vunpack.c.l.bf16 %v2003_v18 }
0x11d6   :  { %1979 = vrcp.f32 %v1276_v22 }
0x11d7   :  { %1981 = vrcp.f32 %v1277_v23 }
0x11e0   :  { %v1980_v24 = vpop.eup %1979 }
0x11e1   :  { %v1982_v27 = vpop.eup %1981  ;;  %v1284_v31 = vmul.f32 %v1980_v24, %v2480_v42 }
0x11e2   :  { %v1285_v36 = vmul.f32 %v1982_v27, %v2484_v45 }
0x1243   :  { %v1289_v25 = vpop.permute.xlu0 %1288 }
0x1244   :  { %v1294_v26 = vmul.f32 %v1980_v24, %v1289_v25  ;;  %v433_v25 = vunpack.c.l.bf16 %v2287_v46 }
0x1245   :  { %v1291_v28 = vpop.permute.xlu1 %1290 }
0x1246   :  { %1298 = vrot.lane.b32.xlu0 %v1294_v26, %s2148_s3  ;;  %v1295_v30 = vmul.f32 %v1982_v27, %v1291_v28  ;;  %v434_v26 = vunpack.c.h.bf16 %v2287_v46 }
0x1248   :  { %1300 = vrot.lane.b32.xlu1 %v1295_v30, %s2148_s3 }
0x12b8   :  { %v1299_v32 = vpop.permute.xlu0 %1298 }
0x12b9   :  { %v2518_v33 = vadd.f32 %v1299_v32, %v1284_v31  ;;  %v610_v31 = vunpack.c.l.bf16 %v2327_v29  ;;  %v611_v32 = vunpack.c.h.bf16 %v2327_v29 }
0x12ba   :  { %v1301_v37 = vpop.permute.xlu1 %1300 }
0x12bb   :  { %1983 = vtanh.f32 %v2518_v33  ;;  %v2522_v38 = vadd.f32 %v1301_v37, %v1285_v36  ;;  %v1824_v37 = vpack.i.bf16 %v434_v26, %v433_v25  ;;  %v1829_v46 = vpack.i.bf16 %v611_v32, %v610_v31 }
0x12bd   :  { %1985 = vtanh.f32 %v2522_v38 }
0x12c5   :  { %v1984_v40 = vpop.eup %1983 }
0x12c6   :  { %1310 = vrot.lane.b32.xlu0 %v1984_v40, %s2141_s25  ;;  %v787_v40 = vunpack.c.l.bf16 %v2367_v15 }
0x12c7   :  { %v1986_v41 = vpop.eup %1985 }
0x12c8   :  { %1312 = vrot.lane.b32.xlu1 %v1986_v41, %s2141_s25  ;;  %v788_v41 = vunpack.c.h.bf16 %v2367_v15 }
0x12ca   :  { %v1834_v29 = vpack.i.bf16 %v788_v41, %v787_v40 }
0x1338   :  { %v1311_v42 = vpop.permute.xlu0 %1310 }
0x1339   :  { %v2531_v44 = vmul.f32 %v1980_v24, %v1311_v42  ;;  %v964_v42 = vunpack.c.l.bf16 %v2407_v62 }
0x133a   :  { %v1313_v43 = vpop.permute.xlu1 %1312 }
0x133b   :  { %v2533_v45 = vmul.f32 %v1982_v27, %v1313_v43  ;;  %v965_v43 = vunpack.c.h.bf16 %v2407_v62 }
0x133d   :  { %v1348_v48 = vpack.c.bf16 %v2533_v45, %v2531_v44  ;;  %v1839_v50 = vpack.i.bf16 %v965_v43, %v964_v42 }
0x133f   :  { %1350 = vrot.lane.b32.xlu0 %v1348_v48, %s2148_s3  ;;  %v1141_v48 = vunpack.c.l.bf16 %v2447_v54 }
0x13b1   :  { %v1351_v57 = vpop.permute.xlu0 %1350 }
0x13b2   :  { %1797 = vmatmul.mubr.msk.bf16.vlgmr.msra.gmra.mrb[28].mxu0 %vm81_vm0, %v1351_v57 }
0x1485   :  { %v1389_v58 = vpop.f32.mrb[28].mxu0 }
0x1486   :  { %v1439_v61 = vadd.f32 %v1438_v49, %v1389_v58  ;;  %v1798_v63 = vpop.f32.mrb[29].mxu0  ;;  %v1142_v49 = vunpack.c.h.bf16 %v2447_v54 }
0x1487   :  { %v1392_v3 = vpop.f32.mrb[30].mxu0  ;;  %v1318_v63 = vunpack.c.l.bf16 %v2487_v47 }
0x1488   :  { %v1445_v4 = vadd.f32 %v2273_v13, %v1439_v61  ;;  %v1442_v6 = vadd.f32 %v1441_v53, %v1392_v3  ;;  %v1799_v7 = vpop.f32.mrb[31].mxu0  ;;  %v1844_v15 = vpack.i.bf16 %v1142_v49, %v1141_v48  ;;  %v1319_v3 = vunpack.c.h.bf16 %v2487_v47 }
0x1489   :  { %v1496_v7 = vunpack.c.h.bf16 %v2525_v39 }
0x148a   :  { %1987 = vtanh.f32 %v1445_v4  ;;  %v1446_v10 = vadd.f32 %v2273_v13, %v1442_v6  ;;  %v1612_v14 = vmul.f32 -1.442695, %v1445_v4  ;;  %v257_v13 = vunpack.c.h.bf16 %v2003_v18 }
0x148b   :  { %v1495_v6 = vunpack.c.l.bf16 %v2525_v39 }
0x148c   :  { %1989 = vtanh.f32 %v1446_v10  ;;  %v1613_v16 = vmul.f32 -1.442695, %v1446_v10  ;;  %v1819_v30 = vpack.i.bf16 %v257_v13, %v256_v19 }
0x148d   :  { %1991 = vpow2.f32 %v1612_v14  ;;  %v1854_v14 = vpack.i.bf16 %v1496_v7, %v1495_v6 }
0x148e   :  { %1993 = vpow2.f32 %v1613_v16 }
0x1494   :  { %v1988_v11 = vpop.eup %1987 }
0x1495   :  { %1465 = vrot.lane.b32.xlu1 %v1988_v11, %s2141_s25 }
0x1496   :  { %v1990_v12 = vpop.eup %1989 }
0x1497   :  { %1467 = vrot.lane.b32.xlu0 %v1990_v12, %s2141_s25  ;;  %v1992_v1 = vpop.eup %1991 }
0x1498   :  { %v1994_v17 = vpop.eup %1993  ;;  %v1453_v2 = vadd.f32 1.0, %v1992_v1 }
0x1499   :  { %v1454_v5 = vadd.f32 1.0, %v1994_v17 }
0x149a   :  { %1995 = vrcp.f32 %v1453_v2 }
0x149b   :  { %1997 = vrcp.f32 %v1454_v5 }
0x14a4   :  { %v2543_v22 = vpop.eup %1995 }
0x14a5   :  { %v2548_v27 = vpop.eup %1997  ;;  %v1461_v62 = vmul.f32 %v2543_v22, %v2518_v33 }
0x14a6   :  { %v1462_v57 = vmul.f32 %v2548_v27, %v2522_v38  ;;  %v1849_v38 = vpack.i.bf16 %v1319_v3, %v1318_v63 }
0x1507   :  { %v1466_v23 = vpop.permute.xlu1 %1465 }
0x1508   :  { %v1471_v24 = vmul.f32 %v2543_v22, %v1466_v23 }
0x1509   :  { %v1468_v28 = vpop.permute.xlu0 %1467 }
0x150a   :  { %1475 = vrot.lane.b32.xlu1 %v1471_v24, %s2148_s3  ;;  %v1472_v36 = vmul.f32 %v2548_v27, %v1468_v28 }
0x150c   :  { %1477 = vrot.lane.b32.xlu0 %v1472_v36, %s2148_s3 }
0x150e   :  { %1820 = vrot.lane.b32.xlu1 %v1819_v30, %s2149_s0 }
0x1510   :  { %1825 = vrot.lane.b32.xlu0 %v1824_v37, %s2149_s0 }
0x1512   :  { %1830 = vrot.lane.b32.xlu1 %v1829_v46, %s2149_s0 }
0x1514   :  { %1835 = vrot.lane.b32.xlu0 %v1834_v29, %s2149_s0 }
0x1516   :  { %1840 = vrot.lane.b32.xlu1 %v1839_v50, %s2149_s0 }
0x1518   :  { %1845 = vrot.lane.b32.xlu0 %v1844_v15, %s2149_s0 }
0x157c   :  { %v1476_v53 = vpop.permute.xlu1 %1475 }
0x157d   :  { %v2569_v0 = vadd.f32 %v1476_v53, %v1461_v62 }
0x157e   :  { %v1478_v54 = vpop.permute.xlu0 %1477 }
0x157f   :  { %1999 = vtanh.f32 %v2569_v0  ;;  %v2574_v58 = vadd.f32 %v1478_v54, %v1462_v57 }
0x1580   :  { %v1821_v61 = vpop.permute.xlu1 %1820 }
0x1581   :  { %2001 = vtanh.f32 %v2574_v58  ;;  %v2004_v11 = vadd.low.f32.bf16 %v2299_v51, %v1821_v61  ;;  %v2005_v47 = vadd.high.f32.bf16 %v2301_v52, %v1821_v61 }
0x1582   :  { %v1826_v33 = vpop.permute.xlu0 %1825 }
0x1583   :  { %v2006_v16 = vadd.low.f32.bf16 %v2339_v34, %v1826_v33  ;;  %v1616_v1 = vpack.c.bf16 %v2004_v11, %v2004_v11  ;;  %v2007_v39 = vadd.high.f32.bf16 %v2341_v35, %v1826_v33  ;;  %v1617_v2 = vpack.c.bf16 %v2005_v47, %v2005_v47 }
0x1584   :  { %v1831_v12 = vpop.permute.xlu1 %1830 }
0x1585   :  { %v2008_v51 = vadd.low.f32.bf16 %v2379_v20, %v1831_v12  ;;  %v1618_v5 = vpack.c.bf16 %v2006_v16, %v2006_v16  ;;  %v2009_v52 = vadd.high.f32.bf16 %v2381_v21, %v1831_v12  ;;  %v1619_v34 = vpack.c.bf16 %v2007_v39, %v2007_v39 }
0x1586   :  { %v1836_v17 = vpop.permute.xlu0 %1835 }
0x1587   :  { %v2010_v19 = vadd.low.f32.bf16 %v2419_v8, %v1836_v17  ;;  %v1620_v13 = vpack.c.bf16 %v2008_v51, %v2008_v51  ;;  %v2011_v35 = vadd.high.f32.bf16 %v2421_v9, %v1836_v17  ;;  %v1621_v20 = vpack.c.bf16 %v2009_v52, %v2009_v52 }
0x1588   :  { %v1841_v18 = vpop.permute.xlu1 %1840 }
0x1589   :  { %v2000_v4 = vpop.eup %1999  ;;  %v2012_v24 = vadd.low.f32.bf16 %v2459_v59, %v1841_v18  ;;  %v1622_v25 = vpack.c.bf16 %v2010_v19, %v2010_v19  ;;  %v2013_v21 = vadd.high.f32.bf16 %v2461_v60, %v1841_v18  ;;  %v1623_v26 = vpack.c.bf16 %v2011_v35, %v2011_v35 }
0x158a   :  { %1487 = vrot.lane.b32.xlu1 %v2000_v4, %s2141_s25  ;;  %v1846_v23 = vpop.permute.xlu0 %1845 }
0x158b   :  { %v2002_v10 = vpop.eup %2001  ;;  %v2014_v8 = vadd.low.f32.bf16 %v2498_v55, %v1846_v23  ;;  %v1624_v28 = vpack.c.bf16 %v2012_v24, %v2012_v24  ;;  %v2015_v9 = vadd.high.f32.bf16 %v2500_v56, %v1846_v23  ;;  %v1625_v30 = vpack.c.bf16 %v2013_v21, %v2013_v21 }
0x158c   :  { %1489 = vrot.lane.b32.xlu0 %v2002_v10, %s2141_s25 }
0x158d   :  { %v1626_v31 = vpack.c.bf16 %v2014_v8, %v2014_v8  ;;  %v1627_v59 = vpack.c.bf16 %v2015_v9, %v2015_v9 }
0x158e   :  { %1850 = vrot.lane.b32.xlu1 %v1849_v38, %s2149_s0 }
0x1590   :  { %1855 = vrot.lane.b32.xlu0 %v1854_v14, %s2149_s0 }
0x1592   :  { %274 = vrot.lane.b32.xlu1 %v1616_v1, %s2148_s3 }
0x1594   :  { %276 = vrot.lane.b32.xlu0 %v1617_v2, %s2148_s3 }
0x1596   :  { %451 = vrot.lane.b32.xlu1 %v1618_v5, %s2148_s3 }
0x1598   :  { %453 = vrot.lane.b32.xlu0 %v1619_v34, %s2148_s3 }
0x159a   :  { %628 = vrot.lane.b32.xlu1 %v1620_v13, %s2148_s3 }
0x159c   :  { %630 = vrot.lane.b32.xlu0 %v1621_v20, %s2148_s3 }
0x159e   :  { %805 = vrot.lane.b32.xlu1 %v1622_v25, %s2148_s3 }
0x15a0   :  { %807 = vrot.lane.b32.xlu0 %v1623_v26, %s2148_s3 }
0x15a2   :  { %982 = vrot.lane.b32.xlu1 %v1624_v28, %s2148_s3 }
0x15a4   :  { %984 = vrot.lane.b32.xlu0 %v1625_v30, %s2148_s3 }
0x15a6   :  { %1159 = vrot.lane.b32.xlu1 %v1626_v31, %s2148_s3 }
0x15a8   :  { %1161 = vrot.lane.b32.xlu0 %v1627_v59, %s2148_s3 }
0x15fc   :  { %v1488_v60 = vpop.permute.xlu1 %1487 }
0x15fd   :  { %v1493_v42 = vmul.f32 %v2543_v22, %v1488_v60 }
0x15fe   :  { %v1490_v32 = vpop.permute.xlu0 %1489 }
0x15ff   :  { %v1494_v43 = vmul.f32 %v2548_v27, %v1490_v32 }
0x1600   :  { %v1851_v36 = vpop.permute.xlu1 %1850 }
0x1601   :  { %v2016_v55 = vadd.high.f32.bf16 %v2533_v45, %v1851_v36  ;;  %v2017_v37 = vadd.low.f32.bf16 %v2531_v44, %v1851_v36 }
0x1602   :  { %v1856_v40 = vpop.permute.xlu0 %1855 }
0x1603   :  { %v1628_v56 = vpack.c.bf16 %v2017_v37, %v2017_v37  ;;  %v1629_v46 = vpack.c.bf16 %v2016_v55, %v2016_v55  ;;  %v2018_v48 = vadd.high.f32.bf16 %v1494_v43, %v1856_v40  ;;  %v2019_v44 = vadd.low.f32.bf16 %v1493_v42, %v1856_v40 }
0x1604   :  { %v275_v41 = vpop.permute.xlu1 %274 }
0x1605   :  { %281 = vst.msk [vmem:[#allocation10] sm:$0xf] %vm280_vm2, %v275_v41  ;;  %1336 = vrot.lane.b32.xlu1 %v1628_v56, %s2148_s3  ;;  %1338 = vrot.lane.b32.xlu0 %v1629_v46, %s2148_s3  ;;  %v1631_v27 = vpack.c.bf16 %v2018_v48, %v2018_v48  ;;  %v1630_v50 = vpack.c.bf16 %v2019_v44, %v2019_v44 }
0x1606   :  { %v277_v29 = vpop.permute.xlu0 %276 }
0x1607   :  { %282 = vst.msk [vmem:[#allocation10 + $0x4] sm:$0xf] %vm280_vm2, %v277_v29 }
0x1608   :  { %v452_v45 = vpop.permute.xlu1 %451 }
0x1609   :  { %458 = vst.msk [vmem:[#allocation10 + $0x8] sm:$0xf] %vm280_vm2, %v452_v45  ;;  %1524 = vrot.lane.b32.xlu1 %v1493_v42, %s2148_s3  ;;  %1526 = vrot.lane.b32.xlu0 %v1494_v43, %s2148_s3 }
0x160a   :  { %v454_v49 = vpop.permute.xlu0 %453 }
0x160b   :  { %459 = vst.msk [vmem:[#allocation10 + $0xc] sm:$0xf] %vm280_vm2, %v454_v49 }
0x160c   :  { %v629_v22 = vpop.permute.xlu1 %628 }
0x160d   :  { %635 = vst.msk [vmem:[#allocation10 + $0x10] sm:$0xf] %vm280_vm2, %v629_v22  ;;  %1515 = vrot.lane.b32.xlu0 %v1631_v27, %s2148_s3  ;;  %1513 = vrot.lane.b32.xlu1 %v1630_v50, %s2148_s3 }
0x160e   :  { %v631_v15 = vpop.permute.xlu0 %630 }
0x160f   :  { %636 = vst.msk [vmem:[#allocation10 + $0x14] sm:$0xf] %vm280_vm2, %v631_v15 }
0x1610   :  { %v806_v62 = vpop.permute.xlu1 %805 }
0x1611   :  { %812 = vst.msk [vmem:[#allocation10 + $0x18] sm:$0xf] %vm280_vm2, %v806_v62  ;;  %1536 = vrot.lane.b32.xlu0 %v2574_v58, %s2149_s0  ;;  %1534 = vrot.lane.b32.xlu1 %v2569_v0, %s2149_s0 }
0x1612   :  { %v808_v53 = vpop.permute.xlu0 %807 }
0x1613   :  { %813 = vst.msk [vmem:[#allocation10 + $0x1c] sm:$0xf] %vm280_vm2, %v808_v53 }
0x1614   :  { %v983_v57 = vpop.permute.xlu1 %982 }
0x1615   :  { %989 = vst.msk [vmem:[#allocation10 + $0x20] sm:$0xf] %vm280_vm2, %v983_v57 }
0x1616   :  { %v985_v54 = vpop.permute.xlu0 %984 }
0x1617   :  { %990 = vst.msk [vmem:[#allocation10 + $0x24] sm:$0xf] %vm280_vm2, %v985_v54 }
0x1618   :  { %v1160_v61 = vpop.permute.xlu1 %1159 }
0x1619   :  { %1166 = vst.msk [vmem:[#allocation10 + $0x28] sm:$0xf] %vm280_vm2, %v1160_v61 }
0x161a   :  { %v1162_v63 = vpop.permute.xlu0 %1161 }
0x161b   :  { %1167 = vst.msk [vmem:[#allocation10 + $0x2c] sm:$0xf] %vm280_vm2, %v1162_v63 }
0x1677   :  { %v1337_v3 = vpop.permute.xlu1 %1336  ;;  %v1339_v4 = vpop.permute.xlu0 %1338 }
0x1678   :  { %1343 = vst.msk [vmem:[#allocation10 + $0x30] sm:$0xf] %vm280_vm2, %v1337_v3  ;;  %1344 = vst.msk [vmem:[#allocation10 + $0x34] sm:$0xf] %vm280_vm2, %v1339_v4 }
0x167b   :  { %v1525_v0 = vpop.permute.xlu1 %1524  ;;  %v1527_v58 = vpop.permute.xlu0 %1526 }
0x167c   :  { %1530 = vst.msk [vmem:[#allocation5] sm:$0xff] %vm81_vm0, %v1525_v0  ;;  %1531 = vst.msk [vmem:[#allocation5 + $0x8] sm:$0xff] %vm81_vm0, %v1527_v58 }
0x167f   :  { %v1516_v33 = vpop.permute.xlu0 %1515  ;;  %v1514_v6 = vpop.permute.xlu1 %1513 }
0x1680   :  { %1521 = vst.msk [vmem:[#allocation10 + $0x3c] sm:$0xf] %vm280_vm2, %v1516_v33  ;;  %1520 = vst.msk [vmem:[#allocation10 + $0x38] sm:$0xf] %vm280_vm2, %v1514_v6 }
0x1681   :  { %2119 = shalt.err (!%p2116_p8)
}
0x1682   :  { %s2120_s17 = scalar_lea.hbm %s2662_s4, 1024 }
0x1683   :  { %p2121_p9 = scmp.ne.s32.totalorder %s2662_s4, %s2120_s17  ;;  %p2124_p10 = scmp.lt.u32.totalorder %s2120_s17, %s2662_s4 }
0x1685   :  { %p2126_p11 = pnand %p2124_p10, %p2121_p9 }
0x1687   :  { %2129 = shalt.err (!%p2126_p11)
}
0x1688   :  { %1553 = dma.vmem_to_hbm [thread:$0]  %s1548_s13, 1024, %s2662_s4, [#allocation9], %s2141_s25, %s2141_s25, %s2142_s26   ;;  %v1537_v7 = vpop.permute.xlu0 %1536  ;;  %v1535_v38 = vpop.permute.xlu1 %1534 }
0x1689   :  { %1541 = vst.msk [vmem:[#allocation6 + $0x8] sm:$0xff] %vm81_vm0, %v1537_v7  ;;  %1540 = vst.msk [vmem:[#allocation6] sm:$0xff] %vm81_vm0, %v1535_v38 }
0x168a   :  { %2138 = dma.done.wait [#allocation9], 1024  }
0x168b   :  { %2139 = vsyncadd [#allocation9], 4294966272 }
0x168c   :  { %1557 = vsyncpa [#allocation8], 1 }
0x168d   :  { %1558 = vsyncpa [#allocation9], 1 }

// kernel: residual_recurrent_encoder.4
= control target key start
LH: loop header
LB: loop body
LE: loop exit
PB: predicated region body
PF: predicated region fallthrough
CT: control target
= control target key end

     0   :  { %s3468_s0 = inlined_call_operand.hbm [shape: bf16[2,8,16,32], index: 0, kind: input, shape index: {}]   ;;  %s3469_s1 = inlined_call_operand.hbm [shape: bf16[2,32,128], index: 1, kind: input, shape index: {}]   ;;  %s3470_s2 = inlined_call_operand.hbm [shape: bf16[2,32,128], index: 2, kind: input, shape index: {}]   ;;  %s3471_s3 = inlined_call_operand.hbm [shape: f32[2,1,128], index: 3, kind: input, shape index: {}]   ;;  %s3472_s4 = inlined_call_operand.hbm [shape: s32[16,1], index: 4, kind: input, shape index: {}]   ;;  %s3473_s5 = inlined_call_operand.hbm [shape: bf16[2,8,16,32], index: 5, kind: output, shape index: {}]  }
   0x1   :  { %3478 = sst [smem:[#allocation30_spill]] %s3468_s0 }
   0x2   :  { %3479 = sst [smem:[#allocation31_spill]] %s3469_s1 }
   0x3   :  { %10 = vsyncpa [#allocation8], 0 }
   0x4   :  { %12 = vsyncpa [#allocation8 + $0x1], 0 }
   0x5   :  { %13 = vsyncpa [#allocation11], 0 }
   0x6   :  { %14 = vsyncpa [#allocation9], 0 }
   0x7   :  { %16 = vsyncpa [#allocation9 + $0x1], 0  ;;  %s2743_s18 = smov 0   ;;  %s2745_s19 = smov 0  }
   0x8   :  { %s2747_s20 = smov 0   ;;  %s2749_s21 = smov 0  }
   0x9   :  { %s2751_s22 = smov 0   ;;  %s2753_s23 = smov 0  }
   0xa LB: > { %s1928_s24 = sadd.s32 4294967295, %s2694_s23   ;;  %s1929_s25 = sadd.s32 4294967294, %s2694_s23   ;;  %s2694_s23 = sphi %s2753_s23, %s22_s23   ;;  %s2690_s22 = sphi %s2751_s22, %s3503_s22   ;;  %s2686_s21 = sphi %s2749_s21, %s3502_s21   ;;  %s2682_s20 = sphi %s2747_s20, %s3501_s20   ;;  %s2678_s19 = sphi %s2745_s19, %s3500_s19   ;;  %s2674_s18 = sphi %s2743_s18, %s3499_s18  }
   0xb   : > { %p65_p0 = scmp.ne.s32.totalorder %s2678_s19, %s2674_s18  ;;  %p2777_p1 = scmp.eq.s32.totalorder %s1928_s24, 0 }
   0xc   : > { %p2781_p2 = scmp.eq.s32.totalorder %s1928_s24, 1  ;;  %p125_p3 = scmp.eq.s32.totalorder %s1929_s25, 1 }
   0xd   : > { %s3480_s26 = scalar_select %p2777_p1, 1, 0 }
   0xe   : > { %s3481_s27 = scalar_select %p2781_p2, 1, 0 }
   0xf   : > { %p2787_p4 = por %p2777_p1, %p65_p0  ;;  %p1930_p5 = scmp.ge.s32.totalorder %s2694_s23, 1 }
  0x10   : > { %p2792_p6 = por %p125_p3, %p65_p0  ;;  %p132_p7 = scmp.lt.s32.totalorder %s2694_s23, 3 }
  0x11   : > { %s3482_s28 = scalar_select %p2787_p4, 1, 0 }
  0x12   : > { %s3483_s29 = scalar_select %p2792_p6, 1, 0 }
  0x13   : > { %p2797_p8 = pnand %p1930_p5, %p132_p7  ;;  %s2696_s6 = smov [#allocation10]  }
  0x14   : > { %s147_s7 = sshll.u32 %s2696_s6, 4  ;;  %s41_s9 = sadd.s32 1, %s2690_s22  ;;  %s148_s7 = int_to_ptr.vmem [resolvable:$true] %s147_s7 }
  0x15   : > { %s3484_s30 = scalar_select %p2797_p8, 1, 0 }
  0x16   : > { %p2255_p9 = pneg %p2797_p8  ;;  %s2472_s12 = scalar_lea.hbm %s3472_s4, 256 }
  0x17   : > { %p2473_p12 = scmp.ne.s32.totalorder %s3472_s4, %s2472_s12  ;;  %p2479_p5 = scmp.lt.u32.totalorder %s2472_s12, %s3472_s4 }
  0x18   : > { %p2806_p11 = pnand %p2255_p9, %p2777_p1 }
  0x1a   : > { %p2474_p13 = pneg %p2806_p11 }
  0x1c   : > { %p2475_p0 = pnand %p2474_p13, %p2473_p12 }
  0x1e   : > { %p2476_p3 = pneg %p2475_p0 }
  0x20   : > { %p2481_p7 = pnand %p2479_p5, %p2476_p3 }
  0x22   : > { %2484 = shalt.err (!%p2481_p7)
}
  0x23   : > { %s2485_s17 = scalar_lea.vmem %s148_s7, 256  ;;  %p2493_p1 = scmp.lt.s32.totalorder %s148_s7, %s148_s7 }
  0x24   : > { %p2486_p9 = scmp.ne.s32.totalorder %s148_s7, %s2485_s17  ;;  %p2494_p4 = scmp.lt.s32.totalorder %s2485_s17, %s2485_s17 }
  0x26   : > { %p2488_p10 = pnand %p2486_p9, %p2474_p13  ;;  %p2495_p8 = por %p2494_p4, %p2493_p1 }
  0x28   : > { %p2489_p6 = pneg %p2488_p10 }
  0x2a   : > { %p2496_p2 = pnand %p2495_p8, %p2489_p6 }
  0x2c   : > { %2499 = shalt.err (!%p2496_p2)
}
  0x2d   : > { %s2697_s24 = smov 128   ;;  %s2698_s25 = smov 8  }
  0x2e   : > { %2258 = dma.hbm_to_vmem [thread:$0]  (!%p2806_p11), %s3472_s4, 256, %s148_s7, [#allocation11], %s2697_s24, %s2697_s24, %s2698_s25  }
  0x2f   : > { %p43_p1 = scmp.ge.s32.totalorder %s41_s9, 2  ;;  %s52_s11 = sadd.s32 1, %s2682_s20 }
  0x30   : > { %p59_p2 = scmp.ne.s32.totalorder %s2682_s20, %s2678_s19  ;;  %p60_p4 = scmp.eq.s32.totalorder %s2694_s23, 0 }
  0x31   : > { %s3505_s9 = smov (%p43_p1, %s41_s9), 0  ;;  %p3487_p8 = scmp.ne.s32.totalorder %s3481_s27, 0 }
  0x32   : > { %p2833_p6 = por %p60_p4, %p59_p2  ;;  %s45_s8 = ssub.s32 %s2690_s22, %s3505_s9 }
  0x33   : > { %p2839_p10 = por %p3487_p8, %p59_p2  ;;  %p2268_p12 = scmp.lt.s32.totalorder %s2694_s23, 2 }
  0x34   : > { %p50_p11 = scmp.eq.s32.totalorder %s45_s8, 0  ;;  %s161_s7 = sand.u32 1, %s2682_s20  }
  0x35   : > { %s1933_s14 = sshll.u32 %s161_s7, 6  ;;  %s2051_s16 = sshll.u32 %s2690_s22, 10 }
  0x36   : > { %s2848_s15 = scalar_select %p50_p11, %s2682_s20, %s52_s11  }
  0x37   : > { %s3489_s0 = sld [smem:[#allocation30_spill]]  ;;  %s165_s27 = scalar_lea.vmem [#allocation7], %s1933_s14 }
  0x38   : > { %s177_s6 = sshll.u32 %s165_s27, 4  ;;  %p2860_p13 = pnand %p2268_p12, %p2833_p6  ;;  %s2856_s6 = int_to_ptr.vmem [resolvable:$true] %s177_s6 }
  0x39   : > { %s2864_s11 = scalar_lea.sflag [#allocation8], %s161_s7 }
  0x3a   : > { %p2502_p3 = pneg %p2860_p13 }
  0x3d   : > { %s2854_s25 = scalar_lea.hbm %s3489_s0, %s2051_s16  ;;  %s2505_s12 = scalar_lea.hbm %s3489_s0, 2048 }
  0x3e   : > { %s2500_s8 = scalar_lea.hbm %s2854_s25, 1024  ;;  %p2506_p9 = scmp.lt.u32.totalorder %s2854_s25, %s3489_s0 }
  0x3f   : > { %p2501_p0 = scmp.ne.s32.totalorder %s2854_s25, %s2500_s8  ;;  %p2507_p1 = scmp.lt.u32.totalorder %s2505_s12, %s2500_s8 }
  0x40   : > { %p2509_p4 = scmp.lt.u32.totalorder %s2500_s8, %s2854_s25 }
  0x41   : > { %p2503_p5 = pnand %p2502_p3, %p2501_p0  ;;  %p2508_p2 = por %p2507_p1, %p2506_p9 }
  0x43   : > { %p2504_p7 = pneg %p2503_p5  ;;  %p2510_p6 = por %p2509_p4, %p2508_p2 }
  0x45   : > { %p2511_p8 = pnand %p2510_p6, %p2504_p7 }
  0x47   : > { %2514 = shalt.err (!%p2511_p8)
}
  0x48   : > { %s2515_s7 = scalar_lea.vmem %s2856_s6, 1024  ;;  %s2699_s27 = smov [#allocation7]  }
  0x49   : > { %p2516_p12 = scmp.ne.s32.totalorder %s2856_s6, %s2515_s7  ;;  %s2520_s14 = sshll.u32 %s2699_s27, 4  ;;  %s2521_s14 = int_to_ptr.vmem [resolvable:$false] %s2520_s14 }
  0x4a   : > { %s2522_s16 = scalar_lea.vmem %s2521_s14, 2048  ;;  %p2523_p5 = scmp.lt.s32.totalorder %s2856_s6, %s2521_s14 }
  0x4b   : > { %p2518_p11 = pnand %p2516_p12, %p2502_p3  ;;  %p2524_p9 = scmp.lt.s32.totalorder %s2522_s16, %s2515_s7 }
  0x4d   : > { %p2519_p0 = pneg %p2518_p11  ;;  %p2525_p1 = por %p2524_p9, %p2523_p5 }
  0x4f   : > { %p2526_p2 = pnand %p2525_p1, %p2519_p0 }
  0x51   : > { %2529 = shalt.err (!%p2526_p2)
}
  0x52   : > { %s2700_s8 = smov 64   ;;  %s2701_s12 = smov 4  }
  0x53   : > { %2262 = dma.hbm_to_vmem [thread:$0]  (!%p2860_p13), %s2854_s25, 1024, %s2856_s6, %s2864_s11, %s2700_s8, %s2700_s8, %s2701_s12  }
  0x54   : > { %p3491_p3 = scmp.ne.s32.totalorder %s3484_s30, 0 }
  0x55   : > { %s2895_s17 = sand.u32 (!%p3491_p3), 1, %s2678_s19   ;;  %p3492_p7 = scmp.ne.s32.totalorder (!%p3491_p3), %s3482_s28, 0 }
  0x56   : > { %189 = sbr.rel (%p3491_p3) target bundleno = 5868 (0x16ec), region = 28  ;;  %s1937_s24 = sshll.u32 (!%p3491_p3), %s2895_s17, 6 }
  0x57   : > { %s192_s7 = scalar_lea.sflag (!%p3491_p3), [#allocation8], %s2895_s17  ;;  %s2899_s27 = scalar_lea.vmem (!%p3491_p3), [#allocation7], %s1937_s24 }
  0x5d   : > { %2655 = dma.done.wait (%p3492_p7), %s192_s7, 1024  }
  0x5e   : > { %2657 = vsyncadd (%p3492_p7), %s192_s7, 4294966272  ;;  %p3493_p13 = scmp.ne.s32.totalorder %s3480_s26, 0 }
  0x60   : > { %2659 = dma.done.wait (%p3493_p13), [#allocation11], 256  }
  0x61   : > { %2661 = vsyncadd (%p3493_p13), [#allocation11], 4294967040  ;;  %s2909_s30 = scalar_lea.vmem [#allocation12], %s1937_s24 }
  0x62   : > { %s2052_s25 = sshll.u32 %s2686_s21, 8  ;;  %s3494_s1 = sld [smem:[#allocation31_spill]] }
  0x63   : > { %s2702_s14 = smov [#allocation2]  }
  0x64   : > { %s240_s16 = sshll.u32 %s2702_s14, 4  ;;  %s241_s16 = int_to_ptr.vmem [resolvable:$true] %s240_s16 }
  0x68   : > { %s232_s11 = scalar_lea.hbm %s3494_s1, %s2052_s25  ;;  %s2532_s7 = scalar_lea.hbm %s3494_s1, 512 }
  0x69   : > { %s2530_s8 = scalar_lea.hbm %s232_s11, 256  ;;  %p2533_p6 = scmp.lt.u32.totalorder %s232_s11, %s3494_s1 }
  0x6a   : > { %p2531_p4 = scmp.ne.s32.totalorder %s232_s11, %s2530_s8  ;;  %p2534_p8 = scmp.lt.u32.totalorder %s2532_s7, %s2530_s8 }
  0x6b   : > { %p2536_p11 = scmp.lt.u32.totalorder %s2530_s8, %s232_s11 }
  0x6c   : > { %p2535_p12 = por %p2534_p8, %p2533_p6 }
  0x6e   : > { %p2537_p0 = por %p2536_p11, %p2535_p12 }
  0x70   : > { %p2538_p5 = pnand %p2537_p0, %p2531_p4 }
  0x72   : > { %2541 = shalt.err (!%p2538_p5)  }
  0x73   : > { %s2542_s24 = scalar_lea.vmem %s241_s16, 256  ;;  %p2547_p1 = scmp.lt.s32.totalorder %s241_s16, %s241_s16 }
  0x74   : > { %p2543_p9 = scmp.ne.s32.totalorder %s241_s16, %s2542_s24  ;;  %p2548_p2 = scmp.lt.s32.totalorder %s2542_s24, %s2542_s24 }
  0x76   : > { %p2549_p3 = por %p2548_p2, %p2547_p1 }
  0x78   : > { %p2550_p7 = pnand %p2549_p3, %p2543_p9 }
  0x7a   : > { %2553 = shalt.err (!%p2550_p7)  }
  0x7b   : > { %243 = dma.hbm_to_vmem [thread:$0]  %s232_s11, 256, %s241_s16, [#allocation13] }
  0x7c   : > { %2662 = dma.done.wait [#allocation13], 256 }
  0x7d   : > { %2663 = vsyncadd [#allocation13], 4294967040 }
  0x7e   : > { %s250_s0 = scalar_lea.hbm %s3470_s2, %s2052_s25  ;;  %s2703_s14 = smov [#allocation3]  }
  0x7f   : > { %s258_s28 = sshll.u32 %s2703_s14, 4  ;;  %s2554_s8 = scalar_lea.hbm %s250_s0, 256  ;;  %s259_s28 = int_to_ptr.vmem [resolvable:$true] %s258_s28 }
  0x80   : > { %p2555_p13 = scmp.ne.s32.totalorder %s250_s0, %s2554_s8  ;;  %s2556_s26 = scalar_lea.hbm %s3470_s2, 512 }
  0x81   : > { %p2557_p4 = scmp.lt.u32.totalorder %s250_s0, %s3470_s2  ;;  %p2558_p6 = scmp.lt.u32.totalorder %s2556_s26, %s2554_s8 }
  0x82   : > { %p2560_p12 = scmp.lt.u32.totalorder %s2554_s8, %s250_s0 }
  0x83   : > { %p2559_p8 = por %p2558_p6, %p2557_p4 }
  0x85   : > { %p2561_p11 = por %p2560_p12, %p2559_p8 }
  0x87   : > { %p2562_p0 = pnand %p2561_p11, %p2555_p13 }
  0x89   : > { %2565 = shalt.err (!%p2562_p0)  }
  0x8a   : > { %s2566_s25 = scalar_lea.vmem %s259_s28, 256  ;;  %p2571_p9 = scmp.lt.s32.totalorder %s259_s28, %s259_s28 }
  0x8b   : > { %p2567_p5 = scmp.ne.s32.totalorder %s259_s28, %s2566_s25  ;;  %p2572_p1 = scmp.lt.s32.totalorder %s2566_s25, %s2566_s25 }
  0x8d   : > { %p2573_p2 = por %p2572_p1, %p2571_p9 }
  0x8f   : > { %p2574_p3 = pnand %p2573_p2, %p2567_p5 }
  0x91   : > { %2577 = shalt.err (!%p2574_p3)  }
  0x92   : > { %261 = dma.hbm_to_vmem [thread:$0]  %s250_s0, 256, %s259_s28, [#allocation18] }
  0x93   : > { %2664 = dma.done.wait [#allocation18], 256 }
  0x94   : > { %2665 = vsyncadd [#allocation18], 4294967040 }
  0x95   : > { %s1944_s11 = sshll.u32 %s2686_s21, 4  ;;  %s2704_s10 = smov [#allocation4]  }
  0x96   : > { %s267_s6 = scalar_lea.hbm %s3471_s3, %s1944_s11  ;;  %s275_s14 = sshll.u32 %s2704_s10, 4  ;;  %s276_s14 = int_to_ptr.vmem [resolvable:$true] %s275_s14 }
  0x97   : > { %s2578_s8 = scalar_lea.hbm %s267_s6, 16  ;;  %s2580_s26 = scalar_lea.hbm %s3471_s3, 32 }
  0x98   : > { %p2579_p7 = scmp.ne.s32.totalorder %s267_s6, %s2578_s8  ;;  %p2581_p13 = scmp.lt.u32.totalorder %s267_s6, %s3471_s3 }
  0x99   : > { %p2582_p4 = scmp.lt.u32.totalorder %s2580_s26, %s2578_s8  ;;  %p2584_p8 = scmp.lt.u32.totalorder %s2578_s8, %s267_s6 }
  0x9b   : > { %p2583_p6 = por %p2582_p4, %p2581_p13 }
  0x9d   : > { %p2585_p12 = por %p2584_p8, %p2583_p6 }
  0x9f   : > { %p2586_p11 = pnand %p2585_p12, %p2579_p7 }
  0xa1   : > { %2589 = shalt.err (!%p2586_p11)  }
  0xa2   : > { %s2590_s0 = scalar_lea.vmem %s276_s14, 16  ;;  %p2595_p5 = scmp.lt.s32.totalorder %s276_s14, %s276_s14 }
  0xa3   : > { %p2591_p0 = scmp.ne.s32.totalorder %s276_s14, %s2590_s0  ;;  %p2596_p9 = scmp.lt.s32.totalorder %s2590_s0, %s2590_s0 }
  0xa5   : > { %p2597_p1 = por %p2596_p9, %p2595_p5 }
  0xa7   : > { %p2598_p2 = pnand %p2597_p1, %p2591_p0 }
  0xa9   : > { %2601 = shalt.err (!%p2598_p2)  }
  0xaa   : > { %278 = dma.hbm_to_vmem [thread:$0]  %s267_s6, 16, %s276_s14, [#allocation21] }
  0xab   : > { %2666 = dma.done.wait [#allocation21], 16 }
  0xac   : > { %2667 = vsyncadd [#allocation21], 4294967280  ;;  %v2940_v0 = vld [vmem:[#allocation2] sm:$0xff]  ;;  %v2942_v1 = vld [vmem:[#allocation3] sm:$0xff]  ;;  %vm282_vm0 = vcmask 261120   ;;  %v2705_v2 = vmov 0.0  }
  0xad   : > { %2127 = vmatprep.subr.bf16.mxu1 %v2705_v2  ;;  %2119 = vmatprep.subr.bf16.mxu0 %v2705_v2  ;;  %v2946_v3 = vld [vmem:[#allocation2 + $0x8] sm:$0xff]  ;;  %283 = vst.msk [vmem:[#allocation5] sm:$0xff] %vm282_vm0, %v2705_v2  ;;  %284 = vst.msk [vmem:[#allocation5 + $0x8] sm:$0xff] %vm282_vm0, %v2705_v2  ;;  %v2958_v4 = vld [vmem:[#allocation3 + $0x8] sm:$0xff]  ;;  %vm2706_vm1 = vmmov 0   ;;  %s2707_s28 = smov 32  }
  0xae   : > { %285 = vst.msk [vmem:[#allocation6] sm:$0xff] %vm282_vm0, %v2705_v2  ;;  %286 = vst.msk [vmem:[#allocation6 + $0x8] sm:$0xff] %vm282_vm0, %v2705_v2  ;;  %2128 = vmatpush3.bf16.msra.mxu1 %v2940_v0  ;;  %2120 = vmatpush3.bf16.msra.mxu0 %v2942_v1  ;;  %v2336_v5 = vld [vmem:[%s2899_s27] sm:$0xff]   ;;  %v2987_v13 = vld [vmem:[#allocation4] ss:$0 sm:$0xff]  ;;  %s2708_s11 = smov 64  }
  0xaf   : > { %2129 = vmatprep.subr.bf16.mxu1 %v2705_v2  ;;  %2121 = vmatprep.subr.bf16.mxu0 %v2705_v2  ;;  %v2337_v46 = vld [vmem:[%s2899_s27 + $0x8] sm:$0xff]   ;;  %p294_p3 = scmp.ne.s32.totalorder %s2686_s21, 0  ;;  %s2710_s1 = smov 96  }
  0xb0   : > { %2131 = vmatprep.mubr.msk.bf16.mxu1 %vm2706_vm1, %v2705_v2  ;;  %2123 = vmatprep.mubr.msk.bf16.mxu0 %vm2706_vm1, %v2705_v2  ;;  %s2070_s16 = sshll.u32 %s2686_s21, 10  ;;  %s1816_s6 = sshll.u32 %s2909_s30, 4  ;;  %s3413_s6 = int_to_ptr.vmem [resolvable:$true] %s1816_s6 }
  0xb1   : > { %s3411_s8 = scalar_lea.hbm %s3473_s5, %s2070_s16  ;;  %s1798_s21 = scalar_lea.sflag [#allocation9], %s2895_s17 }
  0xb2   : > { %2130 = vmatpush3.bf16.msra.mxu1 %v2946_v3  ;;  %2122 = vmatpush3.bf16.msra.mxu0 %v2958_v4  ;;  %s2602_s12 = scalar_lea.vmem %s3413_s6, 1024  ;;  %s2711_s7 = smov [#allocation12]  }
  0xb3   : > { %2143 = vmatprep.subr.bf16.mxu1 %v2705_v2  ;;  %2135 = vmatprep.subr.bf16.mxu0 %v2705_v2  ;;  %p2603_p7 = scmp.ne.s32.totalorder %s3413_s6, %s2602_s12  ;;  %s2606_s26 = sshll.u32 %s2711_s7, 4  ;;  %s2607_s26 = int_to_ptr.vmem [resolvable:$false] %s2606_s26 }
  0xb4   : > { %v295_v6 = vld [vmem:[#allocation5] sm:$0xff]  ;;  %v296_v7 = vld [vmem:[#allocation5 + $0x8] sm:$0xff]  ;;  %s2608_s24 = scalar_lea.vmem %s2607_s26, 2048  ;;  %p2609_p6 = scmp.lt.s32.totalorder %s3413_s6, %s2607_s26 }
  0xb5   : > { %v297_v8 = vld [vmem:[#allocation6] sm:$0xff]  ;;  %2132 = vmatmul.mubr.msk.bf16.vlgmr.msra.gmra.mrb[0].mxu1 %vm282_vm0, %v2336_v5  ;;  %v301_v9 = vpack.c.bf16 %v296_v7, %v295_v6  ;;  %v298_v10 = vld [vmem:[#allocation6 + $0x8] sm:$0xff]  ;;  %p2604_p13 = pnand %p2603_p7, %p2839_p10  ;;  %p2610_p8 = scmp.lt.s32.totalorder %s2608_s24, %s2602_s12 }
  0xb6   : > { %420 = vrot.lane.b32.xlu1 %v297_v8, %s2707_s28  ;;  %2144 = vmatpush3.bf16.msra.mxu1 %v2940_v0 }
  0xb7   : > { %2147 = vmatprep.mubr.msk.bf16.mxu1 %vm2706_vm1, %v2705_v2  ;;  %2124 = vmatmul.mubr.msk.bf16.vlgmr.msra.gmra.mrb[0].mxu0 %vm282_vm0, %v301_v9  ;;  %p2605_p4 = pneg %p2604_p13  ;;  %p2611_p12 = por %p2610_p8, %p2609_p6 }
  0xb8   : > { %2145 = vmatprep.subr.bf16.mxu1 %v2705_v2  ;;  %2136 = vmatpush3.bf16.msra.mxu0 %v2942_v1 }
  0xb9   : > { %2139 = vmatprep.mubr.msk.bf16.mxu0 %vm2706_vm1, %v2705_v2  ;;  %2137 = vmatprep.subr.bf16.mxu0 %v2705_v2  ;;  %p2612_p11 = pnand %p2611_p12, %p2605_p4 }
  0xba   : > { %422 = vrot.lane.b32.xlu1 %v298_v10, %s2707_s28  ;;  %2146 = vmatpush3.bf16.msra.mxu1 %v2946_v3 }
  0xbb   : > { %2159 = vmatprep.subr.bf16.mxu1 %v2705_v2 }
  0xbc   : > { %2138 = vmatpush3.bf16.msra.mxu0 %v2958_v4 }
  0xbd   : > { %2151 = vmatprep.subr.bf16.mxu0 %v2705_v2  ;;  %2148 = vmatmul.mubr.msk.bf16.vlgmr.msra.gmra.mrb[4].mxu1 %vm282_vm0, %v2337_v46 }
  0xbe   : > { %2160 = vmatpush3.bf16.msra.mxu1 %v2940_v0  ;;  %2163 = vmatprep.mubr.msk.bf16.mxu1 %vm2706_vm1, %v2705_v2 }
  0xbf   : > { %2161 = vmatprep.subr.bf16.mxu1 %v2705_v2 }
  0xc2   : > { %2162 = vmatpush3.bf16.msra.mxu1 %v2946_v3 }
  0xc3   : > { %2175 = vmatprep.subr.bf16.mxu1 %v2705_v2 }
 0x128   : > { %v421_v38 = vpop.permute.xlu1 %420 }
 0x12c   : > { %v423_v40 = vpop.permute.xlu1 %422 }
 0x188   : > { %v389_v11 = vpop.f32.mrb[0].mxu1 }
 0x189   : > { %v2133_v12 = vpop.f32.mrb[1].mxu1 }
 0x18a   : > { %v340_v14 = vpop.f32.mrb[0].mxu0  ;;  %v392_v15 = vpop.f32.mrb[2].mxu1 }
 0x18b   : > { %v390_v16 = vadd.f32 %v389_v11, %v340_v14  ;;  %v2125_v17 = vpop.f32.mrb[1].mxu0  ;;  %v2134_v18 = vpop.f32.mrb[3].mxu1 }
 0x18c   : > { %v343_v19 = vpop.f32.mrb[2].mxu0 }
 0x18d   : > { %v402_v20 = vadd.f32 %v2987_v13, %v390_v16  ;;  %v393_v21 = vadd.f32 %v392_v15, %v343_v19  ;;  %v2126_v22 = vpop.f32.mrb[3].mxu0 }
 0x18f   : > { %2344 = vtanh.f32 %v402_v20  ;;  %v403_v23 = vadd.f32 %v2987_v13, %v393_v21  ;;  %v1949_v26 = vmul.f32 -1.442695, %v402_v20 }
 0x190   : > { %v589_v54 = vpop.f32.mrb[4].mxu1 }
 0x191   : > { %2346 = vtanh.f32 %v403_v23  ;;  %v1950_v27 = vmul.f32 -1.442695, %v403_v23  ;;  %v2149_v55 = vpop.f32.mrb[5].mxu1 }
 0x192   : > { %2348 = vpow2.f32 %v1949_v26  ;;  %v592_v56 = vpop.f32.mrb[6].mxu1 }
 0x193   : > { %2350 = vpow2.f32 %v1950_v27  ;;  %v2150_v57 = vpop.f32.mrb[7].mxu1 }
 0x199   : > { %v2345_v24 = vpop.eup %2344 }
 0x19a   : > { %430 = vrot.lane.b32.xlu0 %v2345_v24, %s2708_s11 }
 0x19b   : > { %v2347_v25 = vpop.eup %2346 }
 0x19c   : > { %v2349_v28 = vpop.eup %2348 }
 0x19d   : > { %v410_v29 = vadd.f32 1.0, %v2349_v28  ;;  %v2351_v30 = vpop.eup %2350 }
 0x19e   : > { %432 = vrot.lane.b32.xlu0 %v2347_v25, %s2708_s11  ;;  %v411_v31 = vadd.f32 1.0, %v2351_v30 }
 0x19f   : > { %2352 = vrcp.f32 %v410_v29  ;;  %v2338_v29 = vld [vmem:[%s2899_s27 + $0x10] sm:$0xff]  }
 0x1a0   : > { %2354 = vrcp.f32 %v411_v31  ;;  %2164 = vmatmul.mubr.msk.bf16.vlgmr.msra.gmra.mrb[8].mxu1 %vm282_vm0, %v2338_v29 }
 0x1a1   : > { %2176 = vmatpush3.bf16.msra.mxu1 %v2940_v0  ;;  %2179 = vmatprep.mubr.msk.bf16.mxu1 %vm2706_vm1, %v2705_v2 }
 0x1a2   : > { %2177 = vmatprep.subr.bf16.mxu1 %v2705_v2 }
 0x1a5   : > { %2178 = vmatpush3.bf16.msra.mxu1 %v2946_v3 }
 0x1a6   : > { %2191 = vmatprep.subr.bf16.mxu1 %v2705_v2 }
 0x1a9   : > { %v2353_v32 = vpop.eup %2352 }
 0x1aa   : > { %v2355_v35 = vpop.eup %2354  ;;  %v426_v39 = vmul.f32 %v2353_v32, %v421_v38 }
 0x1ab   : > { %v427_v43 = vmul.f32 %v2355_v35, %v423_v40 }
 0x20c   : > { %v431_v33 = vpop.permute.xlu0 %430 }
 0x20d   : > { %v436_v34 = vmul.f32 %v2353_v32, %v431_v33 }
 0x20f   : > { %440 = vrot.lane.b32.xlu0 %v436_v34, %s2707_s28 }
 0x210   : > { %v433_v36 = vpop.permute.xlu0 %432 }
 0x211   : > { %v437_v37 = vmul.f32 %v2355_v35, %v433_v36 }
 0x213   : > { %442 = vrot.lane.b32.xlu1 %v437_v37, %s2707_s28 }
 0x273   : > { %v772_v37 = vpop.f32.mrb[8].mxu1 }
 0x274   : > { %v2165_v38 = vpop.f32.mrb[9].mxu1 }
 0x281   : > { %v441_v41 = vpop.permute.xlu0 %440 }
 0x282   : > { %v2995_v42 = vadd.f32 %v441_v41, %v426_v39  ;;  %v775_v39 = vpop.f32.mrb[10].mxu1 }
 0x283   : > { %v2166_v40 = vpop.f32.mrb[11].mxu1 }
 0x284   : > { %2356 = vtanh.f32 %v2995_v42 }
 0x285   : > { %v443_v44 = vpop.permute.xlu1 %442 }
 0x286   : > { %v2998_v45 = vadd.f32 %v443_v44, %v427_v43 }
 0x288   : > { %2358 = vtanh.f32 %v2998_v45 }
 0x28e   : > { %v2357_v47 = vpop.eup %2356 }
 0x28f   : > { %452 = vrot.lane.b32.xlu0 %v2357_v47, %s2708_s11 }
 0x292   : > { %v2359_v48 = vpop.eup %2358 }
 0x293   : > { %454 = vrot.lane.b32.xlu1 %v2359_v48, %s2708_s11 }
 0x301   : > { %v453_v49 = vpop.permute.xlu0 %452 }
 0x302   : > { %v3011_v51 = vmul.f32 %v2353_v32, %v453_v49 }
 0x305   : > { %v455_v50 = vpop.permute.xlu1 %454 }
 0x306   : > { %v3013_v52 = vmul.f32 %v2355_v35, %v455_v50 }
 0x308   : > { %v499_v53 = vpack.c.bf16 %v3013_v52, %v3011_v51 }
 0x30a   : > { %501 = vrot.lane.b32.xlu0 %v499_v53, %s2707_s28 }
 0x37c   : > { %v502_v58 = vpop.permute.xlu0 %501 }
 0x37d   : > { %2140 = vmatmul.mubr.msk.bf16.vlgmr.msra.gmra.mrb[4].mxu0 %vm282_vm0, %v502_v58 }
 0x37e   : > { %2152 = vmatpush3.bf16.msra.mxu0 %v2942_v1  ;;  %2155 = vmatprep.mubr.msk.bf16.mxu0 %vm2706_vm1, %v2705_v2 }
 0x37f   : > { %2153 = vmatprep.subr.bf16.mxu0 %v2705_v2 }
 0x382   : > { %2154 = vmatpush3.bf16.msra.mxu0 %v2958_v4 }
 0x383   : > { %2167 = vmatprep.subr.bf16.mxu0 %v2705_v2 }
 0x450   : > { %v540_v59 = vpop.f32.mrb[4].mxu0 }
 0x451   : > { %v590_v60 = vadd.f32 %v589_v54, %v540_v59  ;;  %v2141_v61 = vpop.f32.mrb[5].mxu0 }
 0x452   : > { %v543_v62 = vpop.f32.mrb[6].mxu0 }
 0x453   : > { %v596_v63 = vadd.f32 %v2987_v13, %v590_v60  ;;  %v593_v5 = vadd.f32 %v592_v56, %v543_v62  ;;  %v2142_v6 = vpop.f32.mrb[7].mxu0 }
 0x455   : > { %2360 = vtanh.f32 %v596_v63  ;;  %v597_v7 = vadd.f32 %v2987_v13, %v593_v5  ;;  %v1960_v10 = vmul.f32 -1.442695, %v596_v63 }
 0x457   : > { %2362 = vtanh.f32 %v597_v7  ;;  %v1961_v11 = vmul.f32 -1.442695, %v597_v7 }
 0x458   : > { %2364 = vpow2.f32 %v1960_v10 }
 0x459   : > { %2366 = vpow2.f32 %v1961_v11 }
 0x45f   : > { %v2361_v8 = vpop.eup %2360 }
 0x460   : > { %616 = vrot.lane.b32.xlu1 %v2361_v8, %s2708_s11 }
 0x461   : > { %v2363_v9 = vpop.eup %2362 }
 0x462   : > { %618 = vrot.lane.b32.xlu0 %v2363_v9, %s2708_s11  ;;  %v2365_v12 = vpop.eup %2364 }
 0x463   : > { %v2367_v14 = vpop.eup %2366  ;;  %v604_v15 = vadd.f32 1.0, %v2365_v12 }
 0x464   : > { %v605_v16 = vadd.f32 1.0, %v2367_v14  ;;  %v2339_v14 = vld [vmem:[%s2899_s27 + $0x18] sm:$0xff]  }
 0x465   : > { %2368 = vrcp.f32 %v604_v15  ;;  %2180 = vmatmul.mubr.msk.bf16.vlgmr.msra.gmra.mrb[12].mxu1 %vm282_vm0, %v2339_v14 }
 0x466   : > { %2370 = vrcp.f32 %v605_v16  ;;  %2192 = vmatpush3.bf16.msra.mxu1 %v2940_v0  ;;  %2195 = vmatprep.mubr.msk.bf16.mxu1 %vm2706_vm1, %v2705_v2 }
 0x467   : > { %2193 = vmatprep.subr.bf16.mxu1 %v2705_v2 }
 0x46a   : > { %2194 = vmatpush3.bf16.msra.mxu1 %v2946_v3 }
 0x46b   : > { %2207 = vmatprep.subr.bf16.mxu1 %v2705_v2 }
 0x46f   : > { %v2369_v17 = vpop.eup %2368 }
 0x470   : > { %v2371_v20 = vpop.eup %2370  ;;  %v612_v23 = vmul.f32 %v2369_v17, %v2995_v42 }
 0x471   : > { %v613_v26 = vmul.f32 %v2371_v20, %v2998_v45 }
 0x4d2   : > { %v617_v18 = vpop.permute.xlu1 %616 }
 0x4d3   : > { %v622_v19 = vmul.f32 %v2369_v17, %v617_v18 }
 0x4d4   : > { %v619_v21 = vpop.permute.xlu0 %618 }
 0x4d5   : > { %626 = vrot.lane.b32.xlu1 %v622_v19, %s2707_s28  ;;  %v623_v22 = vmul.f32 %v2371_v20, %v619_v21 }
 0x4d7   : > { %628 = vrot.lane.b32.xlu0 %v623_v22, %s2707_s28 }
 0x538   : > { %v955_v22 = vpop.f32.mrb[12].mxu1 }
 0x547   : > { %v627_v24 = vpop.permute.xlu1 %626 }
 0x548   : > { %v3032_v25 = vadd.f32 %v627_v24, %v612_v23  ;;  %v2181_v23 = vpop.f32.mrb[13].mxu1 }
 0x549   : > { %v629_v27 = vpop.permute.xlu0 %628  ;;  %v958_v24 = vpop.f32.mrb[14].mxu1 }
 0x54a   : > { %2372 = vtanh.f32 %v3032_v25  ;;  %v3036_v28 = vadd.f32 %v629_v27, %v613_v26 }
 0x54c   : > { %2374 = vtanh.f32 %v3036_v28 }
 0x554   : > { %v2373_v30 = vpop.eup %2372 }
 0x555   : > { %638 = vrot.lane.b32.xlu1 %v2373_v30, %s2708_s11 }
 0x556   : > { %v2375_v31 = vpop.eup %2374 }
 0x557   : > { %640 = vrot.lane.b32.xlu0 %v2375_v31, %s2708_s11 }
 0x5c7   : > { %v639_v32 = vpop.permute.xlu1 %638 }
 0x5c8   : > { %v3049_v34 = vmul.f32 %v2369_v17, %v639_v32 }
 0x5c9   : > { %v641_v33 = vpop.permute.xlu0 %640 }
 0x5ca   : > { %v3051_v35 = vmul.f32 %v2371_v20, %v641_v33 }
 0x5cc   : > { %v682_v36 = vpack.c.bf16 %v3051_v35, %v3049_v34 }
 0x5ce   : > { %684 = vrot.lane.b32.xlu1 %v682_v36, %s2707_s28 }
 0x640   : > { %v685_v41 = vpop.permute.xlu1 %684 }
 0x641   : > { %2156 = vmatmul.mubr.msk.bf16.vlgmr.msra.gmra.mrb[8].mxu0 %vm282_vm0, %v685_v41 }
 0x642   : > { %2168 = vmatpush3.bf16.msra.mxu0 %v2942_v1  ;;  %2171 = vmatprep.mubr.msk.bf16.mxu0 %vm2706_vm1, %v2705_v2 }
 0x643   : > { %2169 = vmatprep.subr.bf16.mxu0 %v2705_v2 }
 0x646   : > { %2170 = vmatpush3.bf16.msra.mxu0 %v2958_v4 }
 0x647   : > { %2183 = vmatprep.subr.bf16.mxu0 %v2705_v2 }
 0x714   : > { %v723_v42 = vpop.f32.mrb[8].mxu0 }
 0x715   : > { %v773_v43 = vadd.f32 %v772_v37, %v723_v42  ;;  %v2157_v44 = vpop.f32.mrb[9].mxu0 }
 0x716   : > { %v726_v45 = vpop.f32.mrb[10].mxu0 }
 0x717   : > { %v779_v46 = vadd.f32 %v2987_v13, %v773_v43  ;;  %v776_v47 = vadd.f32 %v775_v39, %v726_v45  ;;  %v2158_v48 = vpop.f32.mrb[11].mxu0 }
 0x719   : > { %2376 = vtanh.f32 %v779_v46  ;;  %v780_v49 = vadd.f32 %v2987_v13, %v776_v47  ;;  %v1973_v54 = vmul.f32 -1.442695, %v779_v46 }
 0x71b   : > { %2378 = vtanh.f32 %v780_v49  ;;  %v1974_v55 = vmul.f32 -1.442695, %v780_v49 }
 0x71c   : > { %2380 = vpow2.f32 %v1973_v54 }
 0x71d   : > { %2382 = vpow2.f32 %v1974_v55 }
 0x723   : > { %v2377_v50 = vpop.eup %2376 }
 0x724   : > { %799 = vrot.lane.b32.xlu0 %v2377_v50, %s2708_s11 }
 0x725   : > { %v2379_v53 = vpop.eup %2378 }
 0x726   : > { %801 = vrot.lane.b32.xlu1 %v2379_v53, %s2708_s11  ;;  %v2381_v56 = vpop.eup %2380 }
 0x727   : > { %v2383_v57 = vpop.eup %2382  ;;  %v787_v58 = vadd.f32 1.0, %v2381_v56 }
 0x728   : > { %v788_v59 = vadd.f32 1.0, %v2383_v57 }
 0x729   : > { %2384 = vrcp.f32 %v787_v58 }
 0x72a   : > { %2386 = vrcp.f32 %v788_v59  ;;  %v2340_v59 = vld [vmem:[%s2899_s27 + $0x20] sm:$0xff]  }
 0x72b   : > { %2196 = vmatmul.mubr.msk.bf16.vlgmr.msra.gmra.mrb[16].mxu1 %vm282_vm0, %v2340_v59 }
 0x72c   : > { %2208 = vmatpush3.bf16.msra.mxu1 %v2940_v0  ;;  %2211 = vmatprep.mubr.msk.bf16.mxu1 %vm2706_vm1, %v2705_v2 }
 0x72d   : > { %2209 = vmatprep.subr.bf16.mxu1 %v2705_v2 }
 0x730   : > { %2210 = vmatpush3.bf16.msra.mxu1 %v2946_v3 }
 0x731   : > { %2223 = vmatprep.subr.bf16.mxu1 %v2705_v2 }
 0x733   : > { %v2385_v60 = vpop.eup %2384 }
 0x734   : > { %v2387_v63 = vpop.eup %2386  ;;  %v795_v7 = vmul.f32 %v2385_v60, %v3032_v25  ;;  %v2182_v25 = vpop.f32.mrb[15].mxu1 }
 0x735   : > { %v796_v10 = vmul.f32 %v2387_v63, %v3036_v28 }
 0x796   : > { %v800_v61 = vpop.permute.xlu0 %799 }
 0x797   : > { %v805_v62 = vmul.f32 %v2385_v60, %v800_v61 }
 0x798   : > { %v802_v5 = vpop.permute.xlu1 %801 }
 0x799   : > { %809 = vrot.lane.b32.xlu0 %v805_v62, %s2707_s28  ;;  %v806_v6 = vmul.f32 %v2387_v63, %v802_v5 }
 0x79b   : > { %811 = vrot.lane.b32.xlu1 %v806_v6, %s2707_s28 }
 0x80b   : > { %v810_v8 = vpop.permute.xlu0 %809 }
 0x80c   : > { %v3070_v9 = vadd.f32 %v810_v8, %v795_v7  ;;  %v1138_v8 = vpop.f32.mrb[16].mxu1 }
 0x80d   : > { %v812_v11 = vpop.permute.xlu1 %811 }
 0x80e   : > { %2388 = vtanh.f32 %v3070_v9  ;;  %v3074_v12 = vadd.f32 %v812_v11, %v796_v10 }
 0x810   : > { %2390 = vtanh.f32 %v3074_v12 }
 0x818   : > { %v2389_v15 = vpop.eup %2388 }
 0x819   : > { %821 = vrot.lane.b32.xlu0 %v2389_v15, %s2708_s11 }
 0x81a   : > { %v2391_v16 = vpop.eup %2390 }
 0x81b   : > { %823 = vrot.lane.b32.xlu1 %v2391_v16, %s2708_s11 }
 0x88b   : > { %v822_v17 = vpop.permute.xlu0 %821 }
 0x88c   : > { %v3087_v19 = vmul.f32 %v2385_v60, %v822_v17 }
 0x88d   : > { %v824_v18 = vpop.permute.xlu1 %823 }
 0x88e   : > { %v3089_v20 = vmul.f32 %v2387_v63, %v824_v18 }
 0x890   : > { %v865_v21 = vpack.c.bf16 %v3089_v20, %v3087_v19 }
 0x892   : > { %867 = vrot.lane.b32.xlu0 %v865_v21, %s2707_s28 }
 0x904   : > { %v868_v26 = vpop.permute.xlu0 %867 }
 0x905   : > { %2172 = vmatmul.mubr.msk.bf16.vlgmr.msra.gmra.mrb[12].mxu0 %vm282_vm0, %v868_v26 }
 0x906   : > { %2184 = vmatpush3.bf16.msra.mxu0 %v2942_v1  ;;  %2187 = vmatprep.mubr.msk.bf16.mxu0 %vm2706_vm1, %v2705_v2 }
 0x907   : > { %2185 = vmatprep.subr.bf16.mxu0 %v2705_v2 }
 0x90a   : > { %2186 = vmatpush3.bf16.msra.mxu0 %v2958_v4 }
 0x90b   : > { %2199 = vmatprep.subr.bf16.mxu0 %v2705_v2 }
 0x9d8   : > { %v906_v27 = vpop.f32.mrb[12].mxu0 }
 0x9d9   : > { %v956_v28 = vadd.f32 %v955_v22, %v906_v27  ;;  %v2173_v29 = vpop.f32.mrb[13].mxu0 }
 0x9da   : > { %v909_v30 = vpop.f32.mrb[14].mxu0 }
 0x9db   : > { %v962_v31 = vadd.f32 %v2987_v13, %v956_v28  ;;  %v959_v32 = vadd.f32 %v958_v24, %v909_v30  ;;  %v2174_v33 = vpop.f32.mrb[15].mxu0 }
 0x9dd   : > { %2392 = vtanh.f32 %v962_v31  ;;  %v963_v36 = vadd.f32 %v2987_v13, %v959_v32  ;;  %v1986_v39 = vmul.f32 -1.442695, %v962_v31 }
 0x9df   : > { %2394 = vtanh.f32 %v963_v36  ;;  %v1987_v40 = vmul.f32 -1.442695, %v963_v36 }
 0x9e0   : > { %2396 = vpow2.f32 %v1986_v39 }
 0x9e1   : > { %2398 = vpow2.f32 %v1987_v40 }
 0x9e7   : > { %v2393_v37 = vpop.eup %2392 }
 0x9e8   : > { %982 = vrot.lane.b32.xlu1 %v2393_v37, %s2708_s11 }
 0x9e9   : > { %v2395_v38 = vpop.eup %2394 }
 0x9ea   : > { %984 = vrot.lane.b32.xlu0 %v2395_v38, %s2708_s11  ;;  %v2397_v41 = vpop.eup %2396 }
 0x9eb   : > { %v2399_v42 = vpop.eup %2398  ;;  %v970_v43 = vadd.f32 1.0, %v2397_v41 }
 0x9ec   : > { %v971_v44 = vadd.f32 1.0, %v2399_v42 }
 0x9ed   : > { %2400 = vrcp.f32 %v970_v43 }
 0x9ee   : > { %2402 = vrcp.f32 %v971_v44 }
 0x9f7   : > { %v2401_v45 = vpop.eup %2400 }
 0x9f8   : > { %v2403_v48 = vpop.eup %2402  ;;  %v978_v53 = vmul.f32 %v2401_v45, %v3070_v9  ;;  %v2197_v9 = vpop.f32.mrb[17].mxu1 }
 0x9f9   : > { %v979_v56 = vmul.f32 %v2403_v48, %v3074_v12  ;;  %v1141_v10 = vpop.f32.mrb[18].mxu1 }
 0x9fa   : > { %v2198_v11 = vpop.f32.mrb[19].mxu1 }
 0xa5a   : > { %v983_v46 = vpop.permute.xlu1 %982 }
 0xa5b   : > { %v988_v47 = vmul.f32 %v2401_v45, %v983_v46  ;;  %v2341_v46 = vld [vmem:[%s2899_s27 + $0x28] sm:$0xff]  }
 0xa5c   : > { %v985_v49 = vpop.permute.xlu0 %984  ;;  %2212 = vmatmul.mubr.msk.bf16.vlgmr.msra.gmra.mrb[20].mxu1 %vm282_vm0, %v2341_v46 }
 0xa5d   : > { %992 = vrot.lane.b32.xlu1 %v988_v47, %s2707_s28  ;;  %v989_v50 = vmul.f32 %v2403_v48, %v985_v49  ;;  %2224 = vmatpush3.bf16.msra.mxu1 %v2940_v0 }
 0xa5e   : > { %2227 = vmatprep.mubr.msk.bf16.mxu1 %vm2706_vm1, %v2705_v2  ;;  %2225 = vmatprep.subr.bf16.mxu1 %v2705_v2 }
 0xa5f   : > { %994 = vrot.lane.b32.xlu0 %v989_v50, %s2707_s28 }
 0xa61   : > { %2226 = vmatpush3.bf16.msra.mxu1 %v2946_v3 }
 0xa62   : > { %2239 = vmatprep.subr.bf16.mxu1 %v2705_v2 }
 0xacf   : > { %v993_v54 = vpop.permute.xlu1 %992 }
 0xad0   : > { %v3108_v55 = vadd.f32 %v993_v54, %v978_v53 }
 0xad1   : > { %v995_v57 = vpop.permute.xlu0 %994 }
 0xad2   : > { %2404 = vtanh.f32 %v3108_v55  ;;  %v3112_v58 = vadd.f32 %v995_v57, %v979_v56 }
 0xad4   : > { %2406 = vtanh.f32 %v3112_v58 }
 0xadc   : > { %v2405_v60 = vpop.eup %2404 }
 0xadd   : > { %1004 = vrot.lane.b32.xlu1 %v2405_v60, %s2708_s11 }
 0xade   : > { %v2407_v61 = vpop.eup %2406 }
 0xadf   : > { %1006 = vrot.lane.b32.xlu0 %v2407_v61, %s2708_s11 }
 0xb2f   : > { %v1321_v56 = vpop.f32.mrb[20].mxu1 }
 0xb30   : > { %v2213_v57 = vpop.f32.mrb[21].mxu1 }
 0xb4f   : > { %v1005_v62 = vpop.permute.xlu1 %1004 }
 0xb50   : > { %v3125_v5 = vmul.f32 %v2401_v45, %v1005_v62 }
 0xb51   : > { %v1007_v63 = vpop.permute.xlu0 %1006 }
 0xb52   : > { %v3127_v6 = vmul.f32 %v2403_v48, %v1007_v63 }
 0xb54   : > { %v1048_v7 = vpack.c.bf16 %v3127_v6, %v3125_v5 }
 0xb56   : > { %1050 = vrot.lane.b32.xlu1 %v1048_v7, %s2707_s28 }
 0xbc8   : > { %v1051_v12 = vpop.permute.xlu1 %1050 }
 0xbc9   : > { %2188 = vmatmul.mubr.msk.bf16.vlgmr.msra.gmra.mrb[16].mxu0 %vm282_vm0, %v1051_v12 }
 0xbca   : > { %2200 = vmatpush3.bf16.msra.mxu0 %v2942_v1  ;;  %2203 = vmatprep.mubr.msk.bf16.mxu0 %vm2706_vm1, %v2705_v2 }
 0xbcb   : > { %2201 = vmatprep.subr.bf16.mxu0 %v2705_v2 }
 0xbce   : > { %2202 = vmatpush3.bf16.msra.mxu0 %v2958_v4 }
 0xbcf   : > { %2215 = vmatprep.subr.bf16.mxu0 %v2705_v2 }
 0xc9c   : > { %v1089_v14 = vpop.f32.mrb[16].mxu0 }
 0xc9d   : > { %v1139_v15 = vadd.f32 %v1138_v8, %v1089_v14  ;;  %v2189_v16 = vpop.f32.mrb[17].mxu0 }
 0xc9e   : > { %v1092_v17 = vpop.f32.mrb[18].mxu0 }
 0xc9f   : > { %v1145_v18 = vadd.f32 %v2987_v13, %v1139_v15  ;;  %v1142_v21 = vadd.f32 %v1141_v10, %v1092_v17  ;;  %v2190_v22 = vpop.f32.mrb[19].mxu0 }
 0xca1   : > { %2408 = vtanh.f32 %v1145_v18  ;;  %v1146_v23 = vadd.f32 %v2987_v13, %v1142_v21  ;;  %v1999_v26 = vmul.f32 -1.442695, %v1145_v18 }
 0xca3   : > { %2410 = vtanh.f32 %v1146_v23  ;;  %v2000_v27 = vmul.f32 -1.442695, %v1146_v23 }
 0xca4   : > { %2412 = vpow2.f32 %v1999_v26 }
 0xca5   : > { %2414 = vpow2.f32 %v2000_v27 }
 0xcab   : > { %v2409_v24 = vpop.eup %2408 }
 0xcac   : > { %1165 = vrot.lane.b32.xlu0 %v2409_v24, %s2708_s11 }
 0xcad   : > { %v2411_v25 = vpop.eup %2410 }
 0xcae   : > { %1167 = vrot.lane.b32.xlu1 %v2411_v25, %s2708_s11  ;;  %v2413_v28 = vpop.eup %2412 }
 0xcaf   : > { %v2415_v29 = vpop.eup %2414  ;;  %v1153_v30 = vadd.f32 1.0, %v2413_v28 }
 0xcb0   : > { %v1154_v31 = vadd.f32 1.0, %v2415_v29 }
 0xcb1   : > { %2416 = vrcp.f32 %v1153_v30 }
 0xcb2   : > { %2418 = vrcp.f32 %v1154_v31 }
 0xcbb   : > { %v2417_v32 = vpop.eup %2416 }
 0xcbc   : > { %v2419_v37 = vpop.eup %2418  ;;  %v1161_v40 = vmul.f32 %v2417_v32, %v3108_v55 }
 0xcbd   : > { %v1162_v43 = vmul.f32 %v2419_v37, %v3112_v58  ;;  %v1324_v58 = vpop.f32.mrb[22].mxu1 }
 0xcbe   : > { %v2214_v59 = vpop.f32.mrb[23].mxu1 }
 0xd1e   : > { %v1166_v33 = vpop.permute.xlu0 %1165 }
 0xd1f   : > { %v1171_v36 = vmul.f32 %v2417_v32, %v1166_v33 }
 0xd20   : > { %v1168_v38 = vpop.permute.xlu1 %1167 }
 0xd21   : > { %1175 = vrot.lane.b32.xlu0 %v1171_v36, %s2707_s28  ;;  %v1172_v39 = vmul.f32 %v2419_v37, %v1168_v38 }
 0xd23   : > { %1177 = vrot.lane.b32.xlu1 %v1172_v39, %s2707_s28 }
 0xd93   : > { %v1176_v41 = vpop.permute.xlu0 %1175 }
 0xd94   : > { %v3146_v42 = vadd.f32 %v1176_v41, %v1161_v40 }
 0xd95   : > { %v1178_v44 = vpop.permute.xlu1 %1177 }
 0xd96   : > { %2420 = vtanh.f32 %v3146_v42  ;;  %v3150_v45 = vadd.f32 %v1178_v44, %v1162_v43 }
 0xd98   : > { %2422 = vtanh.f32 %v3150_v45 }
 0xda0   : > { %v2421_v47 = vpop.eup %2420 }
 0xda1   : > { %1187 = vrot.lane.b32.xlu0 %v2421_v47, %s2708_s11 }
 0xda2   : > { %v2423_v48 = vpop.eup %2422 }
 0xda3   : > { %1189 = vrot.lane.b32.xlu1 %v2423_v48, %s2708_s11 }
 0xe13   : > { %v1188_v49 = vpop.permute.xlu0 %1187 }
 0xe14   : > { %v3163_v53 = vmul.f32 %v2417_v32, %v1188_v49 }
 0xe15   : > { %v1190_v50 = vpop.permute.xlu1 %1189 }
 0xe16   : > { %v3165_v54 = vmul.f32 %v2419_v37, %v1190_v50  ;;  %v2342_v37 = vld [vmem:[%s2899_s27 + $0x30] sm:$0xff]  }
 0xe17   : > { %2228 = vmatmul.mubr.msk.bf16.vlgmr.msra.gmra.mrb[24].mxu1 %vm282_vm0, %v2342_v37 }
 0xe18   : > { %v1231_v55 = vpack.c.bf16 %v3165_v54, %v3163_v53  ;;  %2240 = vmatpush3.bf16.msra.mxu1 %v2940_v0  ;;  %2243 = vmatprep.mubr.msk.bf16.mxu1 %vm2706_vm1, %v2705_v2 }
 0xe19   : > { %2241 = vmatprep.subr.bf16.mxu1 %v2705_v2 }
 0xe1a   : > { %1233 = vrot.lane.b32.xlu0 %v1231_v55, %s2707_s28 }
 0xe1c   : > { %2242 = vmatpush3.bf16.msra.mxu1 %v2946_v3 }
 0xe8c   : > { %v1234_v60 = vpop.permute.xlu0 %1233 }
 0xe8d   : > { %2204 = vmatmul.mubr.msk.bf16.vlgmr.msra.gmra.mrb[20].mxu0 %vm282_vm0, %v1234_v60 }
 0xe8e   : > { %2216 = vmatpush3.bf16.msra.mxu0 %v2942_v1  ;;  %2219 = vmatprep.mubr.msk.bf16.mxu0 %vm2706_vm1, %v2705_v2 }
 0xe8f   : > { %2217 = vmatprep.subr.bf16.mxu0 %v2705_v2 }
 0xe92   : > { %2218 = vmatpush3.bf16.msra.mxu0 %v2958_v4 }
 0xe93   : > { %2231 = vmatprep.subr.bf16.mxu0 %v2705_v2 }
 0xeea   : > { %v1504_v44 = vpop.f32.mrb[24].mxu1 }
 0xf60   : > { %v1272_v61 = vpop.f32.mrb[20].mxu0 }
 0xf61   : > { %v1322_v62 = vadd.f32 %v1321_v56, %v1272_v61  ;;  %v2205_v63 = vpop.f32.mrb[21].mxu0 }
 0xf62   : > { %v1275_v7 = vpop.f32.mrb[22].mxu0 }
 0xf63   : > { %v1328_v8 = vadd.f32 %v2987_v13, %v1322_v62  ;;  %v1325_v9 = vadd.f32 %v1324_v58, %v1275_v7  ;;  %v2206_v10 = vpop.f32.mrb[23].mxu0 }
 0xf65   : > { %2424 = vtanh.f32 %v1328_v8  ;;  %v1329_v11 = vadd.f32 %v2987_v13, %v1325_v9  ;;  %v2012_v15 = vmul.f32 -1.442695, %v1328_v8 }
 0xf67   : > { %2426 = vtanh.f32 %v1329_v11  ;;  %v2013_v16 = vmul.f32 -1.442695, %v1329_v11 }
 0xf68   : > { %2428 = vpow2.f32 %v2012_v15 }
 0xf69   : > { %2430 = vpow2.f32 %v2013_v16 }
 0xf6f   : > { %v2425_v12 = vpop.eup %2424 }
 0xf70   : > { %1348 = vrot.lane.b32.xlu1 %v2425_v12, %s2708_s11 }
 0xf71   : > { %v2427_v14 = vpop.eup %2426 }
 0xf72   : > { %1350 = vrot.lane.b32.xlu0 %v2427_v14, %s2708_s11  ;;  %v2429_v17 = vpop.eup %2428 }
 0xf73   : > { %v2431_v18 = vpop.eup %2430  ;;  %v1336_v21 = vadd.f32 1.0, %v2429_v17 }
 0xf74   : > { %v1337_v22 = vadd.f32 1.0, %v2431_v18 }
 0xf75   : > { %2432 = vrcp.f32 %v1336_v21 }
 0xf76   : > { %2434 = vrcp.f32 %v1337_v22 }
 0xf7f   : > { %v2433_v23 = vpop.eup %2432 }
 0xf80   : > { %v2435_v26 = vpop.eup %2434  ;;  %v1344_v29 = vmul.f32 %v2433_v23, %v3146_v42 }
 0xf81   : > { %v1345_v32 = vmul.f32 %v2435_v26, %v3150_v45  ;;  %v2229_v45 = vpop.f32.mrb[25].mxu1 }
 0xf82   : > { %v1507_v46 = vpop.f32.mrb[26].mxu1 }
 0xf83   : > { %v2230_v47 = vpop.f32.mrb[27].mxu1 }
 0xf84   : > { %v2709_v47 = vmov 0  }
 0xf85   : > { %2334 = vset.pattern.permute.xlu1 %v2709_v47  ;;  %2335 = vset.pattern.permute.xlu0 %v2709_v47 }
 0xfe2   : > { %v1349_v24 = vpop.permute.xlu1 %1348 }
 0xfe3   : > { %v1354_v25 = vmul.f32 %v2433_v23, %v1349_v24 }
 0xfe4   : > { %v1351_v27 = vpop.permute.xlu0 %1350 }
 0xfe5   : > { %1358 = vrot.lane.b32.xlu1 %v1354_v25, %s2707_s28  ;;  %v1355_v28 = vmul.f32 %v2435_v26, %v1351_v27 }
 0xfe7   : > { %1360 = vrot.lane.b32.xlu0 %v1355_v28, %s2707_s28 }
0x1057   : > { %v1359_v30 = vpop.permute.xlu1 %1358 }
0x1058   : > { %v3184_v31 = vadd.f32 %v1359_v30, %v1344_v29 }
0x1059   : > { %v1361_v33 = vpop.permute.xlu0 %1360 }
0x105a   : > { %2436 = vtanh.f32 %v3184_v31  ;;  %v3188_v36 = vadd.f32 %v1361_v33, %v1345_v32 }
0x105c   : > { %2438 = vtanh.f32 %v3188_v36 }
0x1064   : > { %v2437_v38 = vpop.eup %2436 }
0x1065   : > { %1370 = vrot.lane.b32.xlu1 %v2437_v38, %s2708_s11 }
0x1066   : > { %v2439_v39 = vpop.eup %2438 }
0x1067   : > { %1372 = vrot.lane.b32.xlu0 %v2439_v39, %s2708_s11 }
0x10d7   : > { %v1371_v40 = vpop.permute.xlu1 %1370 }
0x10d8   : > { %v3200_v42 = vmul.f32 %v2433_v23, %v1371_v40  ;;  %v2343_v23 = vld [vmem:[%s2899_s27 + $0x38] sm:$0xff]   ;;  %s464_s27 = scalar_select %p294_p3, 1, 0 }
0x10d9   : > { %v1373_v41 = vpop.permute.xlu0 %1372  ;;  %2244 = vmatmul.mubr.msk.bf16.vlgmr.msra.gmra.mrb[28].mxu1 %vm282_vm0, %v2343_v23 }
0x10da   : > { %v3202_v43 = vmul.f32 %v2435_v26, %v1373_v41 }
0x10dc   : > { %v1414_v0 = vpack.c.bf16 %v3202_v43, %v3200_v42 }
0x10de   : > { %1416 = vrot.lane.b32.xlu1 %v1414_v0, %s2707_s28 }
0x1150   : > { %v1417_v48 = vpop.permute.xlu1 %1416 }
0x1151   : > { %2220 = vmatmul.mubr.msk.bf16.vlgmr.msra.gmra.mrb[24].mxu0 %vm282_vm0, %v1417_v48 }
0x1152   : > { %2232 = vmatpush3.bf16.msra.mxu0 %v2942_v1  ;;  %2235 = vmatprep.mubr.msk.bf16.mxu0 %vm2706_vm1, %v2705_v2 }
0x1153   : > { %2233 = vmatprep.subr.bf16.mxu0 %v2705_v2 }
0x1156   : > { %2234 = vmatpush3.bf16.msra.mxu0 %v2958_v4 }
0x1224   : > { %v1455_v3 = vpop.f32.mrb[24].mxu0 }
0x1225   : > { %v1505_v49 = vadd.f32 %v1504_v44, %v1455_v3  ;;  %v2221_v50 = vpop.f32.mrb[25].mxu0 }
0x1226   : > { %v1458_v55 = vpop.f32.mrb[26].mxu0 }
0x1227   : > { %v1511_v56 = vadd.f32 %v2987_v13, %v1505_v49  ;;  %v1508_v57 = vadd.f32 %v1507_v46, %v1458_v55  ;;  %v2222_v58 = vpop.f32.mrb[27].mxu0 }
0x1228   : > { %v3246_v58 = vld [vmem:[#allocation10] sm:$0xff] }
0x1229   : > { %2440 = vtanh.f32 %v1511_v56  ;;  %v1512_v59 = vadd.f32 %v2987_v13, %v1508_v57  ;;  %v2025_v2 = vmul.f32 -1.442695, %v1511_v56  ;;  %vm1951_vm2 = vcmp.gt.s32.totalorder %v3246_v58, 0 }
0x122a   : > { %vm1962_vm6 = vcmp.gt.s32.totalorder %v3246_v58, 1  ;;  %vm1975_vm9 = vcmp.gt.s32.totalorder %v3246_v58, 2  ;;  %vm1988_vm13 = vcmp.gt.s32.totalorder %v3246_v58, 3 }
0x122b   : > { %2442 = vtanh.f32 %v1512_v59  ;;  %v2026_v4 = vmul.f32 -1.442695, %v1512_v59  ;;  %v465_v59 = vstv %s464_s27 }
0x122c   : > { %2444 = vpow2.f32 %v2025_v2  ;;  %vm3249_vm3 = vcmp.eq.s32.totalorder %v465_v59, 1 }
0x122d   : > { %2446 = vpow2.f32 %v2026_v4  ;;  %vm467_vm4 = vmor %vm3249_vm3, %vm1951_vm2  ;;  %vm2001_vm2 = vcmp.gt.s32.totalorder %v3246_v58, 4 }
0x122e   : > { %vm650_vm8 = vmor %vm3249_vm3, %vm1962_vm6 }
0x122f   : > { %vm833_vm11 = vmor %vm3249_vm3, %vm1975_vm9 }
0x1230   : > { %vm1016_vm15 = vmor %vm3249_vm3, %vm1988_vm13 }
0x1233   : > { %v2441_v1 = vpop.eup %2440 }
0x1234   : > { %1531 = vrot.lane.b32.xlu0 %v2441_v1, %s2708_s11 }
0x1235   : > { %v2443_v60 = vpop.eup %2442 }
0x1236   : > { %1533 = vrot.lane.b32.xlu1 %v2443_v60, %s2708_s11  ;;  %v2445_v61 = vpop.eup %2444  ;;  %v3253_v60 = vld [vmem:[#allocation10 + $0x8] sm:$0xff] }
0x1237   : > { %v2447_v62 = vpop.eup %2446  ;;  %v1519_v63 = vadd.f32 1.0, %v2445_v61  ;;  %vm1952_vm5 = vcmp.gt.s32.totalorder %v3253_v60, 0  ;;  %vm1963_vm10 = vcmp.gt.s32.totalorder %v3253_v60, 1  ;;  %vm1976_vm14 = vcmp.gt.s32.totalorder %v3253_v60, 2 }
0x1238   : > { %v1520_v7 = vadd.f32 1.0, %v2447_v62  ;;  %vm468_vm7 = vmor %vm3249_vm3, %vm1952_vm5 }
0x1239   : > { %2448 = vrcp.f32 %v1519_v63  ;;  %vm651_vm12 = vmor %vm3249_vm3, %vm1963_vm10 }
0x123a   : > { %2450 = vrcp.f32 %v1520_v7  ;;  %vm834_vm1 = vmor %vm3249_vm3, %vm1976_vm14 }
0x123b   : > { %vm1199_vm5 = vmor %vm3249_vm3, %vm2001_vm2 }
0x1243   : > { %v2449_v8 = vpop.eup %2448 }
0x1244   : > { %v2451_v11 = vpop.eup %2450  ;;  %v1527_v15 = vmul.f32 %v2449_v8, %v3184_v31  ;;  %v1687_v31 = vpop.f32.mrb[28].mxu1 }
0x1245   : > { %v1528_v18 = vmul.f32 %v2451_v11, %v3188_v36  ;;  %v2245_v32 = vpop.f32.mrb[29].mxu1 }
0x1246   : > { %v1690_v33 = vpop.f32.mrb[30].mxu1 }
0x1247   : > { %v2246_v36 = vpop.f32.mrb[31].mxu1 }
0x12a6   : > { %v1532_v9 = vpop.permute.xlu0 %1531 }
0x12a7   : > { %v1537_v10 = vmul.f32 %v2449_v8, %v1532_v9  ;;  %v470_v9 = vsel %vm468_vm7, 1, %v2709_v47  ;;  %vm2014_vm7 = vcmp.gt.s32.totalorder %v3246_v58, 5 }
0x12a8   : > { %v1534_v12 = vpop.permute.xlu1 %1533  ;;  %vm1382_vm9 = vmor %vm3249_vm3, %vm2014_vm7 }
0x12a9   : > { %1541 = vrot.lane.b32.xlu0 %v1537_v10, %s2707_s28  ;;  %v1538_v14 = vmul.f32 %v2451_v11, %v1534_v12  ;;  %v652_v10 = vsel %vm650_vm8, 1, %v2709_v47  ;;  %v653_v12 = vsel %vm651_vm12, 1, %v2709_v47  ;;  %vm2002_vm8 = vcmp.gt.s32.totalorder %v3253_v60, 4 }
0x12aa   : > { %vm1200_vm10 = vmor %vm3249_vm3, %vm2002_vm8  ;;  %vm2015_vm12 = vcmp.gt.s32.totalorder %v3253_v60, 5 }
0x12ab   : > { %1543 = vrot.lane.b32.xlu1 %v1538_v14, %s2707_s28  ;;  %v1018_v14 = vsel %vm1016_vm15, 1, %v2709_v47  ;;  %v1202_v23 = vsel %vm1200_vm10, 1, %v2709_v47  ;;  %vm1383_vm14 = vmor %vm3249_vm3, %vm2015_vm12  ;;  %vm2040_vm15 = vcmp.gt.s32.totalorder %v3246_v58, 7 }
0x12ac   : > { %vm1748_vm2 = vmor %vm3249_vm3, %vm2040_vm15 }
0x131b   : > { %v1542_v16 = vpop.permute.xlu0 %1541 }
0x131c   : > { %v3220_v17 = vadd.f32 %v1542_v16, %v1527_v15  ;;  %v836_v15 = vsel %vm834_vm1, 1, %v2709_v47  ;;  %v1201_v16 = vsel %vm1199_vm5, 1, %v2709_v47  ;;  %vm2028_vm1 = vcmp.gt.s32.totalorder %v3253_v60, 6 }
0x131d   : > { %v1544_v21 = vpop.permute.xlu1 %1543  ;;  %vm2041_vm5 = vcmp.gt.s32.totalorder %v3253_v60, 7 }
0x131e   : > { %2452 = vtanh.f32 %v3220_v17  ;;  %v3224_v22 = vadd.f32 %v1544_v21, %v1528_v18  ;;  %v1384_v21 = vsel %vm1382_vm9, 1, %v2709_v47 }
0x1320   : > { %2454 = vtanh.f32 %v3224_v22 }
0x1328   : > { %v2453_v24 = vpop.eup %2452 }
0x1329   : > { %1553 = vrot.lane.b32.xlu0 %v2453_v24, %s2708_s11 }
0x132a   : > { %v2455_v25 = vpop.eup %2454 }
0x132b   : > { %1555 = vrot.lane.b32.xlu1 %v2455_v25, %s2708_s11  ;;  %v1385_v25 = vsel %vm1383_vm14, 1, %v2709_v47 }
0x139b   : > { %v1554_v26 = vpop.permute.xlu0 %1553 }
0x139c   : > { %v3231_v28 = vmul.f32 %v2449_v8, %v1554_v26  ;;  %v469_v8 = vsel %vm467_vm4, 1, %v2709_v47  ;;  %vm1989_vm4 = vcmp.gt.s32.totalorder %v3253_v60, 3  ;;  %v1750_v26 = vsel %vm1748_vm2, 1, %v2709_v47 }
0x139d   : > { %v1556_v27 = vpop.permute.xlu1 %1555  ;;  %vm1017_vm6 = vmor %vm3249_vm3, %vm1989_vm4 }
0x139e   : > { %v3233_v29 = vmul.f32 %v2451_v11, %v1556_v27  ;;  %v835_v11 = vsel %vm833_vm11, 1, %v2709_v47  ;;  %v1019_v18 = vsel %vm1017_vm6, 1, %v2709_v47  ;;  %vm2027_vm11 = vcmp.gt.s32.totalorder %v3246_v58, 6  ;;  %vm1566_vm4 = vmor %vm3249_vm3, %vm2028_vm1 }
0x139f   : > { %vm1565_vm13 = vmor %vm3249_vm3, %vm2027_vm11  ;;  %v1568_v27 = vsel %vm1566_vm4, 1, %v2709_v47 }
0x13a0   : > { %v1597_v30 = vpack.c.bf16 %v3233_v29, %v3231_v28  ;;  %v1567_v24 = vsel %vm1565_vm13, 1, %v2709_v47  ;;  %vm1749_vm6 = vmor %vm3249_vm3, %vm2041_vm5 }
0x13a2   : > { %1599 = vrot.lane.b32.xlu0 %v1597_v30, %s2707_s28  ;;  %v1751_v30 = vsel %vm1749_vm6, 1, %v2709_v47 }
0x1414   : > { %v1600_v37 = vpop.permute.xlu0 %1599 }
0x1415   : > { %2236 = vmatmul.mubr.msk.bf16.vlgmr.msra.gmra.mrb[28].mxu0 %vm282_vm0, %v1600_v37 }
0x14e8   : > { %v1638_v38 = vpop.f32.mrb[28].mxu0 }
0x14e9   : > { %v1688_v39 = vadd.f32 %v1687_v31, %v1638_v38  ;;  %v2237_v40 = vpop.f32.mrb[29].mxu0 }
0x14ea   : > { %v1641_v41 = vpop.f32.mrb[30].mxu0 }
0x14eb   : > { %v1694_v0 = vadd.f32 %v2987_v13, %v1688_v39  ;;  %v1691_v44 = vadd.f32 %v1690_v33, %v1641_v41  ;;  %v2238_v45 = vpop.f32.mrb[31].mxu0 }
0x14ed   : > { %2456 = vtanh.f32 %v1694_v0  ;;  %v1695_v46 = vadd.f32 %v2987_v13, %v1691_v44  ;;  %v2038_v49 = vmul.f32 -1.442695, %v1694_v0 }
0x14ef   : > { %2458 = vtanh.f32 %v1695_v46  ;;  %v2039_v50 = vmul.f32 -1.442695, %v1695_v46 }
0x14f0   : > { %2460 = vpow2.f32 %v2038_v49 }
0x14f1   : > { %2462 = vpow2.f32 %v2039_v50 }
0x14f7   : > { %v2457_v48 = vpop.eup %2456 }
0x14f8   : > { %1714 = vrot.lane.b32.xlu1 %v2457_v48, %s2708_s11 }
0x14f9   : > { %v2459_v3 = vpop.eup %2458 }
0x14fa   : > { %1716 = vrot.lane.b32.xlu0 %v2459_v3, %s2708_s11  ;;  %v2461_v55 = vpop.eup %2460 }
0x14fb   : > { %v2463_v56 = vpop.eup %2462  ;;  %v1702_v13 = vadd.f32 1.0, %v2461_v55 }
0x14fc   : > { %v1703_v57 = vadd.f32 1.0, %v2463_v56 }
0x14fd   : > { %2464 = vrcp.f32 %v1702_v13 }
0x14fe   : > { %2466 = vrcp.f32 %v1703_v57 }
0x1507   : > { %v3255_v2 = vpop.eup %2464 }
0x1508   : > { %v3262_v62 = vpop.eup %2466  ;;  %v1710_v31 = vmul.f32 %v3255_v2, %v3220_v17 }
0x1509   : > { %v1711_v36 = vmul.f32 %v3262_v62, %v3224_v22 }
0x156a   : > { %v1715_v4 = vpop.permute.xlu1 %1714 }
0x156b   : > { %v1720_v61 = vmul.f32 %v3255_v2, %v1715_v4 }
0x156c   : > { %v1717_v63 = vpop.permute.xlu0 %1716 }
0x156d   : > { %1724 = vrot.lane.b32.xlu1 %v1720_v61, %s2707_s28  ;;  %v1721_v7 = vmul.f32 %v3262_v62, %v1717_v63 }
0x156f   : > { %1726 = vrot.lane.b32.xlu0 %v1721_v7, %s2707_s28 }
0x1571   : > { %472 = vperm.xlu1 %2334, %v469_v8  }
0x1573   : > { %475 = vperm.xlu0 %2335, %v470_v9  }
0x1575   : > { %655 = vperm.xlu1 %2334, %v652_v10  }
0x1577   : > { %838 = vperm.xlu0 %2335, %v835_v11  }
0x1579   : > { %658 = vperm.xlu1 %2334, %v653_v12  }
0x157b   : > { %1021 = vperm.xlu0 %2335, %v1018_v14  }
0x157d   : > { %841 = vperm.xlu1 %2334, %v836_v15  }
0x157f   : > { %1204 = vperm.xlu0 %2335, %v1201_v16  }
0x1581   : > { %1024 = vperm.xlu1 %2334, %v1019_v18  }
0x1583   : > { %1387 = vperm.xlu0 %2335, %v1384_v21  }
0x1585   : > { %1207 = vperm.xlu1 %2334, %v1202_v23  }
0x1587   : > { %1570 = vperm.xlu0 %2335, %v1567_v24  }
0x1589   : > { %1390 = vperm.xlu1 %2334, %v1385_v25  }
0x158b   : > { %1753 = vperm.xlu0 %2335, %v1750_v26  }
0x158d   : > { %1573 = vperm.xlu1 %2334, %v1568_v27  }
0x1591   : > { %1756 = vperm.xlu1 %2334, %v1751_v30  }
0x15df   : > { %v1725_v32 = vpop.permute.xlu1 %1724 }
0x15e0   : > { %v3328_v33 = vadd.f32 %v1725_v32, %v1710_v31 }
0x15e1   : > { %v1727_v37 = vpop.permute.xlu0 %1726 }
0x15e2   : > { %2468 = vtanh.f32 %v3328_v33  ;;  %v3333_v38 = vadd.f32 %v1727_v37, %v1711_v36 }
0x15e4   : > { %2470 = vtanh.f32 %v3333_v38 }
0x15ec   : > { %v2469_v39 = vpop.eup %2468 }
0x15ed   : > { %1736 = vrot.lane.b32.xlu0 %v2469_v39, %s2708_s11 }
0x15ee   : > { %v2471_v40 = vpop.eup %2470 }
0x15ef   : > { %1738 = vrot.lane.b32.xlu1 %v2471_v40, %s2708_s11 }
0x15f0   : > { %v473_v17 = vpop.permute.xlu1 %472 }
0x15f1   : > { %vm477_vm3 = vcmp.eq.s32.totalorder %v473_v17, 1 }
0x15f2   : > { %v479_v41 = vsel %vm477_vm3, %v3011_v51, 0.0  ;;  %v476_v44 = vpop.permute.xlu0 %475 }
0x15f3   : > { %v2054_v0 = vpack.c.bf16 %v479_v41, %v479_v41  ;;  %vm478_vm7 = vcmp.eq.s32.totalorder %v476_v44, 1 }
0x15f4   : > { %v656_v22 = vpop.permute.xlu1 %655  ;;  %v480_v45 = vsel %vm478_vm7, %v3013_v52, 0.0  ;;  %vm493_vm7 = vcmask 257024  }
0x15f5   : > { %vm660_vm8 = vcmp.eq.s32.totalorder %v656_v22, 1  ;;  %487 = vrot.lane.b32.xlu0 %v2054_v0, %s2707_s28  ;;  %v2055_v46 = vpack.c.bf16 %v480_v45, %v480_v45 }
0x15f6   : > { %v662_v47 = vsel %vm660_vm8, %v3049_v34, 0.0  ;;  %v839_v3 = vpop.permute.xlu0 %838 }
0x15f7   : > { %v2056_v48 = vpack.c.bf16 %v662_v47, %v662_v47  ;;  %vm843_vm9 = vcmp.eq.s32.totalorder %v839_v3, 1  ;;  %489 = vrot.lane.b32.xlu1 %v2055_v46, %s2707_s28 }
0x15f8   : > { %v659_v49 = vpop.permute.xlu1 %658  ;;  %v845_v51 = vsel %vm843_vm9, %v3087_v19, 0.0 }
0x15f9   : > { %vm661_vm10 = vcmp.eq.s32.totalorder %v659_v49, 1  ;;  %670 = vrot.lane.b32.xlu0 %v2056_v48, %s2707_s28  ;;  %v2058_v52 = vpack.c.bf16 %v845_v51, %v845_v51 }
0x15fa   : > { %v663_v50 = vsel %vm661_vm10, %v3051_v35, 0.0  ;;  %v1022_v56 = vpop.permute.xlu0 %1021 }
0x15fb   : > { %v2057_v55 = vpack.c.bf16 %v663_v50, %v663_v50  ;;  %vm1026_vm11 = vcmp.eq.s32.totalorder %v1022_v56, 1 }
0x15fc   : > { %v842_v13 = vpop.permute.xlu1 %841  ;;  %v1028_v34 = vsel %vm1026_vm11, %v3125_v5, 0.0 }
0x15fd   : > { %vm844_vm12 = vcmp.eq.s32.totalorder %v842_v13, 1  ;;  %853 = vrot.lane.b32.xlu0 %v2058_v52, %s2707_s28  ;;  %672 = vrot.lane.b32.xlu1 %v2057_v55, %s2707_s28  ;;  %v2060_v19 = vpack.c.bf16 %v1028_v34, %v1028_v34 }
0x15fe   : > { %v846_v57 = vsel %vm844_vm12, %v3089_v20, 0.0  ;;  %v1205_v59 = vpop.permute.xlu0 %1204 }
0x15ff   : > { %v2059_v58 = vpack.c.bf16 %v846_v57, %v846_v57  ;;  %vm1209_vm13 = vcmp.eq.s32.totalorder %v1205_v59, 1 }
0x1600   : > { %v1025_v1 = vpop.permute.xlu1 %1024  ;;  %v1211_v35 = vsel %vm1209_vm13, %v3163_v53, 0.0 }
0x1601   : > { %vm1027_vm14 = vcmp.eq.s32.totalorder %v1025_v1, 1  ;;  %1036 = vrot.lane.b32.xlu0 %v2060_v19, %s2707_s28  ;;  %855 = vrot.lane.b32.xlu1 %v2059_v58, %s2707_s28  ;;  %v2062_v60 = vpack.c.bf16 %v1211_v35, %v1211_v35 }
0x1602   : > { %v1029_v5 = vsel %vm1027_vm14, %v3127_v6, 0.0  ;;  %v1388_v61 = vpop.permute.xlu0 %1387 }
0x1603   : > { %v2061_v4 = vpack.c.bf16 %v1029_v5, %v1029_v5  ;;  %vm1392_vm15 = vcmp.eq.s32.totalorder %v1388_v61, 1 }
0x1604   : > { %v1208_v63 = vpop.permute.xlu1 %1207  ;;  %v1394_v20 = vsel %vm1392_vm15, %v3200_v42, 0.0 }
0x1605   : > { %vm1210_vm1 = vcmp.eq.s32.totalorder %v1208_v63, 1  ;;  %1219 = vrot.lane.b32.xlu0 %v2062_v60, %s2707_s28  ;;  %1038 = vrot.lane.b32.xlu1 %v2061_v4, %s2707_s28  ;;  %v2064_v7 = vpack.c.bf16 %v1394_v20, %v1394_v20 }
0x1606   : > { %v1212_v53 = vsel %vm1210_vm1, %v3165_v54, 0.0  ;;  %v1571_v9 = vpop.permute.xlu0 %1570 }
0x1607   : > { %v2063_v8 = vpack.c.bf16 %v1212_v53, %v1212_v53  ;;  %vm1575_vm2 = vcmp.eq.s32.totalorder %v1571_v9, 1 }
0x1608   : > { %v1391_v10 = vpop.permute.xlu1 %1390  ;;  %v1577_v6 = vsel %vm1575_vm2, %v3231_v28, 0.0 }
0x1609   : > { %vm1393_vm4 = vcmp.eq.s32.totalorder %v1391_v10, 1  ;;  %1402 = vrot.lane.b32.xlu0 %v2064_v7, %s2707_s28  ;;  %1221 = vrot.lane.b32.xlu1 %v2063_v8, %s2707_s28  ;;  %v2066_v11 = vpack.c.bf16 %v1577_v6, %v1577_v6 }
0x160a   : > { %v1395_v42 = vsel %vm1393_vm4, %v3202_v43, 0.0  ;;  %v1754_v28 = vpop.permute.xlu0 %1753 }
0x160b   : > { %v2065_v12 = vpack.c.bf16 %v1395_v42, %v1395_v42  ;;  %vm1758_vm6 = vcmp.eq.s32.totalorder %v1754_v28, 1 }
0x160c   : > { %v1574_v14 = vpop.permute.xlu1 %1573 }
0x160d   : > { %vm1576_vm5 = vcmp.eq.s32.totalorder %v1574_v14, 1  ;;  %1585 = vrot.lane.b32.xlu0 %v2066_v11, %s2707_s28  ;;  %1404 = vrot.lane.b32.xlu1 %v2065_v12, %s2707_s28 }
0x160e   : > { %v1578_v54 = vsel %vm1576_vm5, %v3233_v29, 0.0 }
0x160f   : > { %v2067_v15 = vpack.c.bf16 %v1578_v54, %v1578_v54 }
0x1610   : > { %v1757_v16 = vpop.permute.xlu1 %1756 }
0x1611   : > { %1587 = vrot.lane.b32.xlu1 %v2067_v15, %s2707_s28  ;;  %vm1759_vm3 = vcmp.eq.s32.totalorder %v1757_v16, 1 }
0x165f   : > { %v1737_v18 = vpop.permute.xlu0 %1736 }
0x1660   : > { %v1742_v21 = vmul.f32 %v3255_v2, %v1737_v18 }
0x1661   : > { %v1739_v23 = vpop.permute.xlu1 %1738 }
0x1662   : > { %v1760_v43 = vsel %vm1758_vm6, %v1742_v21, 0.0  ;;  %1779 = vrot.lane.b32.xlu0 %v1742_v21, %s2707_s28  ;;  %v1743_v25 = vmul.f32 %v3262_v62, %v1739_v23 }
0x1663   : > { %v2068_v24 = vpack.c.bf16 %v1760_v43, %v1760_v43 }
0x1664   : > { %v1761_v29 = vsel %vm1759_vm3, %v1743_v25, 0.0  ;;  %1781 = vrot.lane.b32.xlu1 %v1743_v25, %s2707_s28 }
0x1665   : > { %v2069_v26 = vpack.c.bf16 %v1761_v29, %v1761_v29 }
0x1666   : > { %1768 = vrot.lane.b32.xlu0 %v2068_v24, %s2707_s28 }
0x1667   : > { %v488_v2 = vpop.permute.xlu0 %487 }
0x1668   : > { %494 = vst.msk [vmem:[%s2909_s30] sm:$0xf] %vm493_vm7, %v488_v2  ;;  %1770 = vrot.lane.b32.xlu1 %v2069_v26, %s2707_s28 }
0x1669   : > { %v490_v27 = vpop.permute.xlu1 %489 }
0x166a   : > { %1789 = vrot.lane.b32.xlu0 %v3328_v33, %s2710_s1  ;;  %495 = vst.msk [vmem:[%s2909_s30 + $0x4] sm:$0xf] %vm493_vm7, %v490_v27 }
0x166b   : > { %v671_v62 = vpop.permute.xlu0 %670 }
0x166c   : > { %1966 = vst.msk [vmem:[%s2909_s30 + $0x8] sm:$0xf] %vm493_vm7, %v671_v62  ;;  %1791 = vrot.lane.b32.xlu1 %v3333_v38, %s2710_s1 }
0x166f   : > { %v854_v30 = vpop.permute.xlu0 %853  ;;  %v673_v31 = vpop.permute.xlu1 %672 }
0x1670   : > { %1979 = vst.msk [vmem:[%s2909_s30 + $0x10] sm:$0xf] %vm493_vm7, %v854_v30  ;;  %1967 = vst.msk [vmem:[%s2909_s30 + $0xc] sm:$0xf] %vm493_vm7, %v673_v31 }
0x1673   : > { %v1037_v32 = vpop.permute.xlu0 %1036  ;;  %v856_v33 = vpop.permute.xlu1 %855 }
0x1674   : > { %1992 = vst.msk [vmem:[%s2909_s30 + $0x18] sm:$0xf] %vm493_vm7, %v1037_v32  ;;  %1980 = vst.msk [vmem:[%s2909_s30 + $0x14] sm:$0xf] %vm493_vm7, %v856_v33 }
0x1677   : > { %v1220_v36 = vpop.permute.xlu0 %1219  ;;  %v1039_v37 = vpop.permute.xlu1 %1038 }
0x1678   : > { %2005 = vst.msk [vmem:[%s2909_s30 + $0x20] sm:$0xf] %vm493_vm7, %v1220_v36  ;;  %1993 = vst.msk [vmem:[%s2909_s30 + $0x1c] sm:$0xf] %vm493_vm7, %v1039_v37 }
0x167b   : > { %v1403_v38 = vpop.permute.xlu0 %1402  ;;  %v1222_v39 = vpop.permute.xlu1 %1221 }
0x167c   : > { %2018 = vst.msk [vmem:[%s2909_s30 + $0x28] sm:$0xf] %vm493_vm7, %v1403_v38  ;;  %2006 = vst.msk [vmem:[%s2909_s30 + $0x24] sm:$0xf] %vm493_vm7, %v1222_v39 }
0x167f   : > { %v1586_v40 = vpop.permute.xlu0 %1585  ;;  %v1405_v17 = vpop.permute.xlu1 %1404 }
0x1680   : > { %2031 = vst.msk [vmem:[%s2909_s30 + $0x30] sm:$0xf] %vm493_vm7, %v1586_v40  ;;  %2019 = vst.msk [vmem:[%s2909_s30 + $0x2c] sm:$0xf] %vm493_vm7, %v1405_v17 }
0x1683   : > { %v1588_v41 = vpop.permute.xlu1 %1587 }
0x1684   : > { %2032 = vst.msk [vmem:[%s2909_s30 + $0x34] sm:$0xf] %vm493_vm7, %v1588_v41 }
0x16d4   : > { %v1780_v0 = vpop.permute.xlu0 %1779 }
0x16d5   : > { %1785 = vst.msk [vmem:[#allocation5] sm:$0xff] %vm282_vm0, %v1780_v0 }
0x16d6   : > { %v1782_v44 = vpop.permute.xlu1 %1781 }
0x16d7   : > { %1786 = vst.msk [vmem:[#allocation5 + $0x8] sm:$0xff] %vm282_vm0, %v1782_v44 }
0x16d8   : > { %v1769_v22 = vpop.permute.xlu0 %1768 }
0x16d9   : > { %2044 = vst.msk [vmem:[%s2909_s30 + $0x38] sm:$0xf] %vm493_vm7, %v1769_v22 }
0x16da   : > { %v1771_v45 = vpop.permute.xlu1 %1770 }
0x16db   : > { %2045 = vst.msk [vmem:[%s2909_s30 + $0x3c] sm:$0xf] %vm493_vm7, %v1771_v45 }
0x16dc   : > { %v1790_v46 = vpop.permute.xlu0 %1789 }
0x16dd   : > { %1795 = vst.msk [vmem:[#allocation6] sm:$0xff] %vm282_vm0, %v1790_v46 }
0x16de   : > { %2615 = shalt.err (!%p2612_p11)
}
0x16df   : > { %s2616_s30 = scalar_lea.hbm %s3411_s8, 1024  ;;  %s2620_s28 = scalar_lea.hbm %s3473_s5, 2048 }
0x16e0   : > { %p2617_p0 = scmp.ne.s32.totalorder %s3411_s8, %s2616_s30  ;;  %p2621_p1 = scmp.lt.u32.totalorder %s3411_s8, %s3473_s5 }
0x16e1   : > { %p2622_p2 = scmp.lt.u32.totalorder %s2620_s28, %s2616_s30  ;;  %p2624_p7 = scmp.lt.u32.totalorder %s2616_s30, %s3411_s8 }
0x16e2   : > { %p2618_p5 = pnand %p2617_p0, %p2839_p10 }
0x16e3   : > { %p2623_p3 = por %p2622_p2, %p2621_p1 }
0x16e4   : > { %p2619_p9 = pneg %p2618_p5 }
0x16e5   : > { %p2625_p13 = por %p2624_p7, %p2623_p3 }
0x16e7   : > { %p2626_p4 = pnand %p2625_p13, %p2619_p9 }
0x16e9   : > { %2629 = shalt.err (!%p2626_p4)
}
0x16ea   : > { %s2712_s16 = smov 4   ;;  %v1792_v47 = vpop.permute.xlu1 %1791 }
0x16eb   : > { %2253 = dma.vmem_to_hbm [thread:$0]  (%p2839_p10), %s3413_s6, 1024, %s3411_s8, %s1798_s21, %s2708_s11, %s2708_s11, %s2712_s16   ;;  %1796 = vst.msk [vmem:[#allocation6 + $0x8] sm:$0xff] %vm282_vm0, %v1792_v47 }
0x16ec PF: > { %s1831_s10 = sand.u32 1, %s2674_s18   ;;  %p3497_p6 = scmp.ne.s32.totalorder %s3483_s29, 0 }
0x16ed   : > { %p3498_p8 = scmp.ge.s32.totalorder %s2694_s23, 2  ;;  %s1832_s14 = scalar_lea.sflag [#allocation9], %s1831_s10 }
0x16ef   : > { %p2264_p12 = pnand %p3498_p8, %p3497_p6 }
0x16f1   : > { %2669 = dma.done.wait (!%p2264_p12), %s1832_s14, 1024  }
0x16f2   : > { %2671 = vsyncadd (!%p2264_p12), %s1832_s14, 4294966272  ;;  %s22_s23 = sadd.s32 1, %s2694_s23   ;;  %s3499_s18 = smov %s2678_s19 }
0x16f3   : > { %p19_p11 = scmp.ge.s32.totalorder %s22_s23, 4   ;;  %s3500_s19 = smov %s2682_s20 }
0x16f4   : > { %s3501_s20 = smov %s2848_s15  ;;  %s3502_s21 = smov %s2690_s22 }
0x16f5   : > { %s3503_s22 = smov %s3505_s9  ;;  %21 = sbr.rel (!%p19_p11) target bundleno = 10 (0xa), region = 114 }
0x16fc   :  { %1837 = vsyncpa [#allocation8], 1 }
0x16fd   :  { %1839 = vsyncpa [#allocation8 + $0x1], 1 }
0x16fe   :  { %1840 = vsyncpa [#allocation11], 1 }
0x16ff   :  { %1841 = vsyncpa [#allocation9], 1 }
0x1700   :  { %1843 = vsyncpa [#allocation9 + $0x1], 1 }

</bundles_post_ra>
